<compile_context>
chip_gen: v7x
topology: tpu7x:2x2x1
jax: 0.10.0
libtpu: 0.0.40
codegen_flags: <defaults>
</compile_context>

<pallas_src>
import jax
import jax.numpy as jnp
from jax.experimental import pallas as pl
from jax.experimental.pallas import tpu as pltpu


# ---------------------------------------------------------------------------
# In-kernel helper: 3x3 conv (input already zero-padded in VMEM) + bias +
# ReLU + 2x2/stride-2 max pool, as one im2col matmul.
#   xp_ref : VMEM ref (N, H+2, W+2, Cin), zero-padded activation, f32
#   w_ref  : VMEM ref (9*Cin, Cout), bf16, rows ordered k = dy*3+dx major,
#            Cin minor (torch (Cout, Cin, kh, kw) permuted to (kh, kw, Cin, Cout))
#   b_ref  : VMEM ref (1, Cout), f32
#   returns (N, H//2, W//2, Cout) f32
# ---------------------------------------------------------------------------
def _conv3x3_relu_pool(xp_ref, w_ref, b_ref):
    n, hp, wp, cin = xp_ref.shape
    h, w = hp - 2, wp - 2
    cout = w_ref.shape[1]

    # im2col: nine shifted windows read straight off the padded VMEM ref,
    # concatenated along channels -> one (N*H*W, 9*Cin) LHS, one MXU matmul.
    cols = [xp_ref[:, dy:dy + h, dx:dx + w, :]
            for dy in range(3) for dx in range(3)]
    patches = jnp.concatenate(cols, axis=-1).reshape(n * h * w, 9 * cin)
    acc = jnp.dot(patches.astype(jnp.bfloat16), w_ref[...],
                  preferred_element_type=jnp.float32)

    acc = jnp.maximum(acc + b_ref[...], 0.0)                     # bias + ReLU (f32)

    # 2x2 / stride-2 max pool.
    y = jnp.max(acc.reshape(n, h, w // 2, 2, cout), axis=3)      # pool along W
    y = jnp.max(y.reshape(n, h // 2, 2, w // 2, cout), axis=2)   # pool along H
    return y                                                     # (n, h//2, w//2, cout)


# ---------------------------------------------------------------------------
# Fused whole-network kernel: conv1/2/3 (+ReLU+pool) + Linear, one invocation
# for the whole batch.  All intermediates live in VMEM.
# ---------------------------------------------------------------------------
def _simple_cnn_kernel(x_ref, w1_ref, b1_ref, w2_ref, b2_ref, w3_ref, b3_ref,
                       wfc_ref, bfc_ref, o_ref,
                       xp1_ref, xp2_ref, xp3_ref):
    n, h0, w0, _ = x_ref.shape
    h1, w1 = h0 // 2, w0 // 2
    h2, w2 = h0 // 4, w0 // 4
    h3, w3 = h0 // 8, w0 // 8

    # --- stage 1: zero-pad the NHWC input into VMEM, conv1 + ReLU + pool1 ---
    xp1_ref[...] = jnp.zeros_like(xp1_ref)
    xp1_ref[:, 1:h0 + 1, 1:w0 + 1, :] = x_ref[...]
    y1 = _conv3x3_relu_pool(xp1_ref, w1_ref, b1_ref)             # (n, h1, w1, 32)

    # --- stage 2 ---
    xp2_ref[...] = jnp.zeros_like(xp2_ref)
    xp2_ref[:, 1:h1 + 1, 1:w1 + 1, :] = y1
    y2 = _conv3x3_relu_pool(xp2_ref, w2_ref, b2_ref)             # (n, h2, w2, 64)

    # --- stage 3 ---
    xp3_ref[...] = jnp.zeros_like(xp3_ref)
    xp3_ref[:, 1:h2 + 1, 1:w2 + 1, :] = y2
    y3 = _conv3x3_relu_pool(xp3_ref, w3_ref, b3_ref)             # (n, h3, w3, 128)

    # --- FC: single matmul over NHWC-flat features ---------------------------
    # Concatenate the h3*w3 spatial positions along the lane dim in (h, w, c)
    # order (matches the pre-permuted FC weight rows), giving one
    # (n, h3*w3*c4) LHS and a single K = h3*w3*c4 MXU matmul.
    feats = jnp.concatenate(
        [y3[:, hh, ww, :] for hh in range(h3) for ww in range(w3)], axis=-1)
    logits = jnp.dot(feats.astype(jnp.bfloat16), wfc_ref[...],
                     preferred_element_type=jnp.float32)
    o_ref[...] = (logits + bfc_ref[...]).astype(o_ref.dtype)


@jax.jit
def simple_cnn_forward(x_nchw, params):
    w1, b1 = params["conv1"]
    w2, b2 = params["conv2"]
    w3, b3 = params["conv3"]
    wfc, bfc = params["fc"]

    n, cin, h, w = x_nchw.shape
    assert h % 8 == 0 and w % 8 == 0, "three 2x2 pools require H, W divisible by 8"
    c2, c3, c4 = w1.shape[1], w2.shape[1], w3.shape[1]
    num_classes = wfc.shape[1]
    assert wfc.shape[0] == (h // 8) * (w // 8) * c4, "FC weight shape mismatch"

    # NCHW -> NHWC once (channels mapped to the 128-lane dim inside the kernel).
    x = jnp.transpose(x_nchw, (0, 2, 3, 1)).astype(jnp.float32)

    def full(shape):
        return pl.BlockSpec(shape, lambda: (0,) * len(shape))

    return pl.pallas_call(
        _simple_cnn_kernel,
        out_shape=jax.ShapeDtypeStruct((n, num_classes), jnp.float32),
        in_specs=[
            full((n, h, w, cin)),
            full(w1.shape), full(b1.shape),
            full(w2.shape), full(b2.shape),
            full(w3.shape), full(b3.shape),
            full(wfc.shape), full(bfc.shape),
        ],
        out_specs=full((n, num_classes)),
        scratch_shapes=[
            pltpu.VMEM((n, h + 2, w + 2, cin), jnp.float32),           # padded input
            pltpu.VMEM((n, h // 2 + 2, w // 2 + 2, c2), jnp.float32),  # padded act 1
            pltpu.VMEM((n, h // 4 + 2, w // 4 + 2, c3), jnp.float32),  # padded act 2
        ],
    )(x, w1, b1, w2, b2, w3, b3, wfc, bfc)


# ---------------------------------------------------------------------------
# Parameter init (deterministic, PyTorch-like U(-1/sqrt(fan_in), 1/sqrt(fan_in))).
#   conv weight: (3*3*Cin, Cout) bf16  == torch (Cout, Cin, kh, kw) permuted
#                to (kh, kw, Cin, Cout) and flattened over (kh, kw, Cin).
#   fc weight  : (fc_in, num_classes) bf16 with rows in NHWC-flat (h, w, c)
#                order  == torch (num_classes, C*H*W) transposed with rows
#                permuted from (c, h, w)-flat to (h, w, c)-flat.
#   biases     : f32.
# ---------------------------------------------------------------------------
def init_params(key, input_channels, num_classes, input_size):
    def conv_p(k, cin, cout):
        kw_, kb_ = jax.random.split(k)
        bound = 1.0 / jnp.sqrt(9.0 * cin)
        wgt = jax.random.uniform(kw_, (9 * cin, cout), jnp.float32, -bound, bound)
        bias = jax.random.uniform(kb_, (1, cout), jnp.float32, -bound, bound)
        return wgt.astype(jnp.bfloat16), bias

    assert input_size % 64 == 0, "input_size must be divisible by 64 (three 2x2 pools)"
    k1, k2, k3, k4 = jax.random.split(key, 4)
    p = {}
    p["conv1"] = conv_p(k1, input_channels, 32)
    p["conv2"] = conv_p(k2, 32, 64)
    p["conv3"] = conv_p(k3, 64, 128)

    fc_in = 128 * input_size // 64
    kw_, kb_ = jax.random.split(k4)
    bound = 1.0 / jnp.sqrt(float(fc_in))
    wfc = jax.random.uniform(kw_, (fc_in, num_classes), jnp.float32, -bound, bound)
    bfc = jax.random.uniform(kb_, (1, num_classes), jnp.float32, -bound, bound)
    p["fc"] = (wfc.astype(jnp.bfloat16), bfc)
    return p


if __name__ == "__main__":
    batch, in_channels, H, W = 2, 4, 16, 16
    num_classes = 10
    input_size = H * W  # matches `fc_input_size = 128 * input_size // 64`

    key = jax.random.PRNGKey(0)
    kx, kp = jax.random.split(key)
    x = jax.random.normal(kx, (batch, in_channels, H, W), jnp.float32)
    params = init_params(kp, in_channels, num_classes, input_size)

    out = simple_cnn_forward(x, params)
    jax.block_until_ready(out)
    assert out.shape == (batch, num_classes), out.shape
    print("KERNEL_OK")
</pallas_src>

<mosaic_0001>
module attributes {stable_mosaic.version = 11 : i64} {
  func.func @_simple_cnn_kernel(%arg0: memref<2x16x16x4xf32, #tpu.memory_space<vmem>>, %arg1: memref<36x32xbf16, #tpu.memory_space<vmem>>, %arg2: memref<1x32xf32, #tpu.memory_space<vmem>>, %arg3: memref<288x64xbf16, #tpu.memory_space<vmem>>, %arg4: memref<1x64xf32, #tpu.memory_space<vmem>>, %arg5: memref<576x128xbf16, #tpu.memory_space<vmem>>, %arg6: memref<1x128xf32, #tpu.memory_space<vmem>>, %arg7: memref<512x10xbf16, #tpu.memory_space<vmem>>, %arg8: memref<1x10xf32, #tpu.memory_space<vmem>>, %arg9: memref<2x10xf32, #tpu.memory_space<vmem>>, %arg10: memref<2x18x18x4xf32, #tpu.memory_space<vmem>>, %arg11: memref<2x10x10x32xf32, #tpu.memory_space<vmem>>, %arg12: memref<2x6x6x64xf32, #tpu.memory_space<vmem>>) attributes {dimension_semantics = [], scalar_prefetch = 0 : i64, scratch_operands = 3 : i64, tpu.core_type = #tpu.core_type<tc>} {
    %cst = arith.constant 0.000000e+00 : f32
    %0 = vector.broadcast %cst : f32 to vector<2x18x18x4xf32>
    %c0 = arith.constant 0 : index
    %c0_0 = arith.constant 0 : index
    %c0_1 = arith.constant 0 : index
    %c0_2 = arith.constant 0 : index
    %1 = vector.load %arg10[%c0, %c0_0, %c0_1, %c0_2] : memref<2x18x18x4xf32, #tpu.memory_space<vmem>>, vector<2x18x18x4xf32>
    tpu.vector_store %arg10[%c0, %c0_0, %c0_1, %c0_2], %0 {strides = array<i32>} : memref<2x18x18x4xf32, #tpu.memory_space<vmem>>, vector<2x18x18x4xf32>,
    %c0_3 = arith.constant 0 : index
    %c0_4 = arith.constant 0 : index
    %c0_5 = arith.constant 0 : index
    %c0_6 = arith.constant 0 : index
    %2 = vector.load %arg0[%c0_3, %c0_4, %c0_5, %c0_6] : memref<2x16x16x4xf32, #tpu.memory_space<vmem>>, vector<2x16x16x4xf32>
    %c0_7 = arith.constant 0 : index
    %c1 = arith.constant 1 : index
    %c1_8 = arith.constant 1 : index
    %c0_9 = arith.constant 0 : index
    %3 = vector.load %arg10[%c0_7, %c1, %c1_8, %c0_9] : memref<2x18x18x4xf32, #tpu.memory_space<vmem>>, vector<2x16x16x4xf32>
    tpu.vector_store %arg10[%c0_7, %c1, %c1_8, %c0_9], %2 {strides = array<i32>} : memref<2x18x18x4xf32, #tpu.memory_space<vmem>>, vector<2x16x16x4xf32>,
    %c0_10 = arith.constant 0 : index
    %c0_11 = arith.constant 0 : index
    %c0_12 = arith.constant 0 : index
    %c0_13 = arith.constant 0 : index
    %4 = vector.load %arg10[%c0_10, %c0_11, %c0_12, %c0_13] : memref<2x18x18x4xf32, #tpu.memory_space<vmem>>, vector<2x16x16x4xf32>
    %c0_14 = arith.constant 0 : index
    %c0_15 = arith.constant 0 : index
    %c1_16 = arith.constant 1 : index
    %c0_17 = arith.constant 0 : index
    %5 = vector.load %arg10[%c0_14, %c0_15, %c1_16, %c0_17] : memref<2x18x18x4xf32, #tpu.memory_space<vmem>>, vector<2x16x16x4xf32>
    %c0_18 = arith.constant 0 : index
    %c0_19 = arith.constant 0 : index
    %c2 = arith.constant 2 : index
    %c0_20 = arith.constant 0 : index
    %6 = vector.load %arg10[%c0_18, %c0_19, %c2, %c0_20] : memref<2x18x18x4xf32, #tpu.memory_space<vmem>>, vector<2x16x16x4xf32>
    %c0_21 = arith.constant 0 : index
    %c1_22 = arith.constant 1 : index
    %c0_23 = arith.constant 0 : index
    %c0_24 = arith.constant 0 : index
    %7 = vector.load %arg10[%c0_21, %c1_22, %c0_23, %c0_24] : memref<2x18x18x4xf32, #tpu.memory_space<vmem>>, vector<2x16x16x4xf32>
    %c0_25 = arith.constant 0 : index
    %c1_26 = arith.constant 1 : index
    %c1_27 = arith.constant 1 : index
    %c0_28 = arith.constant 0 : index
    %8 = vector.load %arg10[%c0_25, %c1_26, %c1_27, %c0_28] : memref<2x18x18x4xf32, #tpu.memory_space<vmem>>, vector<2x16x16x4xf32>
    %c0_29 = arith.constant 0 : index
    %c1_30 = arith.constant 1 : index
    %c2_31 = arith.constant 2 : index
    %c0_32 = arith.constant 0 : index
    %9 = vector.load %arg10[%c0_29, %c1_30, %c2_31, %c0_32] : memref<2x18x18x4xf32, #tpu.memory_space<vmem>>, vector<2x16x16x4xf32>
    %c0_33 = arith.constant 0 : index
    %c2_34 = arith.constant 2 : index
    %c0_35 = arith.constant 0 : index
    %c0_36 = arith.constant 0 : index
    %10 = vector.load %arg10[%c0_33, %c2_34, %c0_35, %c0_36] : memref<2x18x18x4xf32, #tpu.memory_space<vmem>>, vector<2x16x16x4xf32>
    %c0_37 = arith.constant 0 : index
    %c2_38 = arith.constant 2 : index
    %c1_39 = arith.constant 1 : index
    %c0_40 = arith.constant 0 : index
    %11 = vector.load %arg10[%c0_37, %c2_38, %c1_39, %c0_40] : memref<2x18x18x4xf32, #tpu.memory_space<vmem>>, vector<2x16x16x4xf32>
    %c0_41 = arith.constant 0 : index
    %c2_42 = arith.constant 2 : index
    %c2_43 = arith.constant 2 : index
    %c0_44 = arith.constant 0 : index
    %12 = vector.load %arg10[%c0_41, %c2_42, %c2_43, %c0_44] : memref<2x18x18x4xf32, #tpu.memory_space<vmem>>, vector<2x16x16x4xf32>
    %13 = tpu.concatenate %4, %5, %6, %7, %8, %9, %10, %11, %12 in 3 : vector<2x16x16x4xf32>, vector<2x16x16x4xf32>, vector<2x16x16x4xf32>, vector<2x16x16x4xf32>, vector<2x16x16x4xf32>, vector<2x16x16x4xf32>, vector<2x16x16x4xf32>, vector<2x16x16x4xf32>, vector<2x16x16x4xf32> -> vector<2x16x16x36xf32>
    %14 = vector.shape_cast %13 : vector<2x16x16x36xf32> to vector<512x36xf32>
    %15 = arith.truncf %14 : vector<512x36xf32> to vector<512x36xbf16>
    %c0_45 = arith.constant 0 : index
    %c0_46 = arith.constant 0 : index
    %16 = vector.load %arg1[%c0_45, %c0_46] : memref<36x32xbf16, #tpu.memory_space<vmem>>, vector<36x32xbf16>
    %cst_47 = arith.constant dense<0.000000e+00> : vector<512x32xf32>
    %17 = tpu.matmul %15, %16, %cst_47 {dimension_numbers = #tpu.dot_dimension_numbers<[1], [0], [0], [1], [0, 0, 1, 1], [], []>} : vector<512x36xbf16>, vector<36x32xbf16>, vector<512x32xf32> -> vector<512x32xf32>
    %c0_48 = arith.constant 0 : index
    %c0_49 = arith.constant 0 : index
    %18 = vector.load %arg2[%c0_48, %c0_49] : memref<1x32xf32, #tpu.memory_space<vmem>>, vector<1x32xf32>
    %19 = vector.broadcast %18 : vector<1x32xf32> to vector<512x32xf32>
    %20 = arith.addf %17, %19 : vector<512x32xf32>
    %cst_50 = arith.constant 0.000000e+00 : f32
    %21 = vector.broadcast %cst_50 : f32 to vector<512x32xf32>
    %22 = arith.maximumf %20, %21 : vector<512x32xf32>
    %23 = vector.shape_cast %22 : vector<512x32xf32> to vector<2x16x8x2x32xf32>
    %cst_51 = arith.constant dense<0xFF800000> : vector<2x16x8x32xf32>
    %24 = vector.multi_reduction <maximumf>, %23, %cst_51 [3] : vector<2x16x8x2x32xf32> to vector<2x16x8x32xf32>
    %25 = vector.shape_cast %24 : vector<2x16x8x32xf32> to vector<2x8x2x8x32xf32>
    %cst_52 = arith.constant dense<0xFF800000> : vector<2x8x8x32xf32>
    %26 = vector.multi_reduction <maximumf>, %25, %cst_52 [2] : vector<2x8x2x8x32xf32> to vector<2x8x8x32xf32>
    %cst_53 = arith.constant 0.000000e+00 : f32
    %27 = vector.broadcast %cst_53 : f32 to vector<2x10x10x32xf32>
    %c0_54 = arith.constant 0 : index
    %c0_55 = arith.constant 0 : index
    %c0_56 = arith.constant 0 : index
    %c0_57 = arith.constant 0 : index
    %28 = vector.load %arg11[%c0_54, %c0_55, %c0_56, %c0_57] : memref<2x10x10x32xf32, #tpu.memory_space<vmem>>, vector<2x10x10x32xf32>
    tpu.vector_store %arg11[%c0_54, %c0_55, %c0_56, %c0_57], %27 {strides = array<i32>} : memref<2x10x10x32xf32, #tpu.memory_space<vmem>>, vector<2x10x10x32xf32>,
    %c0_58 = arith.constant 0 : index
    %c1_59 = arith.constant 1 : index
    %c1_60 = arith.constant 1 : index
    %c0_61 = arith.constant 0 : index
    %29 = vector.load %arg11[%c0_58, %c1_59, %c1_60, %c0_61] : memref<2x10x10x32xf32, #tpu.memory_space<vmem>>, vector<2x8x8x32xf32>
    tpu.vector_store %arg11[%c0_58, %c1_59, %c1_60, %c0_61], %26 {strides = array<i32>} : memref<2x10x10x32xf32, #tpu.memory_space<vmem>>, vector<2x8x8x32xf32>,
    %c0_62 = arith.constant 0 : index
    %c0_63 = arith.constant 0 : index
    %c0_64 = arith.constant 0 : index
    %c0_65 = arith.constant 0 : index
    %30 = vector.load %arg11[%c0_62, %c0_63, %c0_64, %c0_65] : memref<2x10x10x32xf32, #tpu.memory_space<vmem>>, vector<2x8x8x32xf32>
    %c0_66 = arith.constant 0 : index
    %c0_67 = arith.constant 0 : index
    %c1_68 = arith.constant 1 : index
    %c0_69 = arith.constant 0 : index
    %31 = vector.load %arg11[%c0_66, %c0_67, %c1_68, %c0_69] : memref<2x10x10x32xf32, #tpu.memory_space<vmem>>, vector<2x8x8x32xf32>
    %c0_70 = arith.constant 0 : index
    %c0_71 = arith.constant 0 : index
    %c2_72 = arith.constant 2 : index
    %c0_73 = arith.constant 0 : index
    %32 = vector.load %arg11[%c0_70, %c0_71, %c2_72, %c0_73] : memref<2x10x10x32xf32, #tpu.memory_space<vmem>>, vector<2x8x8x32xf32>
    %c0_74 = arith.constant 0 : index
    %c1_75 = arith.constant 1 : index
    %c0_76 = arith.constant 0 : index
    %c0_77 = arith.constant 0 : index
    %33 = vector.load %arg11[%c0_74, %c1_75, %c0_76, %c0_77] : memref<2x10x10x32xf32, #tpu.memory_space<vmem>>, vector<2x8x8x32xf32>
    %c0_78 = arith.constant 0 : index
    %c1_79 = arith.constant 1 : index
    %c1_80 = arith.constant 1 : index
    %c0_81 = arith.constant 0 : index
    %34 = vector.load %arg11[%c0_78, %c1_79, %c1_80, %c0_81] : memref<2x10x10x32xf32, #tpu.memory_space<vmem>>, vector<2x8x8x32xf32>
    %c0_82 = arith.constant 0 : index
    %c1_83 = arith.constant 1 : index
    %c2_84 = arith.constant 2 : index
    %c0_85 = arith.constant 0 : index
    %35 = vector.load %arg11[%c0_82, %c1_83, %c2_84, %c0_85] : memref<2x10x10x32xf32, #tpu.memory_space<vmem>>, vector<2x8x8x32xf32>
    %c0_86 = arith.constant 0 : index
    %c2_87 = arith.constant 2 : index
    %c0_88 = arith.constant 0 : index
    %c0_89 = arith.constant 0 : index
    %36 = vector.load %arg11[%c0_86, %c2_87, %c0_88, %c0_89] : memref<2x10x10x32xf32, #tpu.memory_space<vmem>>, vector<2x8x8x32xf32>
    %c0_90 = arith.constant 0 : index
    %c2_91 = arith.constant 2 : index
    %c1_92 = arith.constant 1 : index
    %c0_93 = arith.constant 0 : index
    %37 = vector.load %arg11[%c0_90, %c2_91, %c1_92, %c0_93] : memref<2x10x10x32xf32, #tpu.memory_space<vmem>>, vector<2x8x8x32xf32>
    %c0_94 = arith.constant 0 : index
    %c2_95 = arith.constant 2 : index
    %c2_96 = arith.constant 2 : index
    %c0_97 = arith.constant 0 : index
    %38 = vector.load %arg11[%c0_94, %c2_95, %c2_96, %c0_97] : memref<2x10x10x32xf32, #tpu.memory_space<vmem>>, vector<2x8x8x32xf32>
    %39 = tpu.concatenate %30, %31, %32, %33, %34, %35, %36, %37, %38 in 3 : vector<2x8x8x32xf32>, vector<2x8x8x32xf32>, vector<2x8x8x32xf32>, vector<2x8x8x32xf32>, vector<2x8x8x32xf32>, vector<2x8x8x32xf32>, vector<2x8x8x32xf32>, vector<2x8x8x32xf32>, vector<2x8x8x32xf32> -> vector<2x8x8x288xf32>
    %40 = vector.shape_cast %39 : vector<2x8x8x288xf32> to vector<128x288xf32>
    %41 = arith.truncf %40 : vector<128x288xf32> to vector<128x288xbf16>
    %c0_98 = arith.constant 0 : index
    %c0_99 = arith.constant 0 : index
    %42 = vector.load %arg3[%c0_98, %c0_99] : memref<288x64xbf16, #tpu.memory_space<vmem>>, vector<288x64xbf16>
    %cst_100 = arith.constant dense<0.000000e+00> : vector<128x64xf32>
    %43 = tpu.matmul %41, %42, %cst_100 {dimension_numbers = #tpu.dot_dimension_numbers<[1], [0], [0], [1], [0, 0, 1, 1], [], []>} : vector<128x288xbf16>, vector<288x64xbf16>, vector<128x64xf32> -> vector<128x64xf32>
    %c0_101 = arith.constant 0 : index
    %c0_102 = arith.constant 0 : index
    %44 = vector.load %arg4[%c0_101, %c0_102] : memref<1x64xf32, #tpu.memory_space<vmem>>, vector<1x64xf32>
    %45 = vector.broadcast %44 : vector<1x64xf32> to vector<128x64xf32>
    %46 = arith.addf %43, %45 : vector<128x64xf32>
    %cst_103 = arith.constant 0.000000e+00 : f32
    %47 = vector.broadcast %cst_103 : f32 to vector<128x64xf32>
    %48 = arith.maximumf %46, %47 : vector<128x64xf32>
    %49 = vector.shape_cast %48 : vector<128x64xf32> to vector<2x8x4x2x64xf32>
    %cst_104 = arith.constant dense<0xFF800000> : vector<2x8x4x64xf32>
    %50 = vector.multi_reduction <maximumf>, %49, %cst_104 [3] : vector<2x8x4x2x64xf32> to vector<2x8x4x64xf32>
    %51 = vector.shape_cast %50 : vector<2x8x4x64xf32> to vector<2x4x2x4x64xf32>
    %cst_105 = arith.constant dense<0xFF800000> : vector<2x4x4x64xf32>
    %52 = vector.multi_reduction <maximumf>, %51, %cst_105 [2] : vector<2x4x2x4x64xf32> to vector<2x4x4x64xf32>
    %cst_106 = arith.constant 0.000000e+00 : f32
    %53 = vector.broadcast %cst_106 : f32 to vector<2x6x6x64xf32>
    %c0_107 = arith.constant 0 : index
    %c0_108 = arith.constant 0 : index
    %c0_109 = arith.constant 0 : index
    %c0_110 = arith.constant 0 : index
    %54 = vector.load %arg12[%c0_107, %c0_108, %c0_109, %c0_110] : memref<2x6x6x64xf32, #tpu.memory_space<vmem>>, vector<2x6x6x64xf32>
    tpu.vector_store %arg12[%c0_107, %c0_108, %c0_109, %c0_110], %53 {strides = array<i32>} : memref<2x6x6x64xf32, #tpu.memory_space<vmem>>, vector<2x6x6x64xf32>,
    %c0_111 = arith.constant 0 : index
    %c1_112 = arith.constant 1 : index
    %c1_113 = arith.constant 1 : index
    %c0_114 = arith.constant 0 : index
    %55 = vector.load %arg12[%c0_111, %c1_112, %c1_113, %c0_114] : memref<2x6x6x64xf32, #tpu.memory_space<vmem>>, vector<2x4x4x64xf32>
    tpu.vector_store %arg12[%c0_111, %c1_112, %c1_113, %c0_114], %52 {strides = array<i32>} : memref<2x6x6x64xf32, #tpu.memory_space<vmem>>, vector<2x4x4x64xf32>,
    %c0_115 = arith.constant 0 : index
    %c0_116 = arith.constant 0 : index
    %c0_117 = arith.constant 0 : index
    %c0_118 = arith.constant 0 : index
    %56 = vector.load %arg12[%c0_115, %c0_116, %c0_117, %c0_118] : memref<2x6x6x64xf32, #tpu.memory_space<vmem>>, vector<2x4x4x64xf32>
    %c0_119 = arith.constant 0 : index
    %c0_120 = arith.constant 0 : index
    %c1_121 = arith.constant 1 : index
    %c0_122 = arith.constant 0 : index
    %57 = vector.load %arg12[%c0_119, %c0_120, %c1_121, %c0_122] : memref<2x6x6x64xf32, #tpu.memory_space<vmem>>, vector<2x4x4x64xf32>
    %c0_123 = arith.constant 0 : index
    %c0_124 = arith.constant 0 : index
    %c2_125 = arith.constant 2 : index
    %c0_126 = arith.constant 0 : index
    %58 = vector.load %arg12[%c0_123, %c0_124, %c2_125, %c0_126] : memref<2x6x6x64xf32, #tpu.memory_space<vmem>>, vector<2x4x4x64xf32>
    %c0_127 = arith.constant 0 : index
    %c1_128 = arith.constant 1 : index
    %c0_129 = arith.constant 0 : index
    %c0_130 = arith.constant 0 : index
    %59 = vector.load %arg12[%c0_127, %c1_128, %c0_129, %c0_130] : memref<2x6x6x64xf32, #tpu.memory_space<vmem>>, vector<2x4x4x64xf32>
    %c0_131 = arith.constant 0 : index
    %c1_132 = arith.constant 1 : index
    %c1_133 = arith.constant 1 : index
    %c0_134 = arith.constant 0 : index
    %60 = vector.load %arg12[%c0_131, %c1_132, %c1_133, %c0_134] : memref<2x6x6x64xf32, #tpu.memory_space<vmem>>, vector<2x4x4x64xf32>
    %c0_135 = arith.constant 0 : index
    %c1_136 = arith.constant 1 : index
    %c2_137 = arith.constant 2 : index
    %c0_138 = arith.constant 0 : index
    %61 = vector.load %arg12[%c0_135, %c1_136, %c2_137, %c0_138] : memref<2x6x6x64xf32, #tpu.memory_space<vmem>>, vector<2x4x4x64xf32>
    %c0_139 = arith.constant 0 : index
    %c2_140 = arith.constant 2 : index
    %c0_141 = arith.constant 0 : index
    %c0_142 = arith.constant 0 : index
    %62 = vector.load %arg12[%c0_139, %c2_140, %c0_141, %c0_142] : memref<2x6x6x64xf32, #tpu.memory_space<vmem>>, vector<2x4x4x64xf32>
    %c0_143 = arith.constant 0 : index
    %c2_144 = arith.constant 2 : index
    %c1_145 = arith.constant 1 : index
    %c0_146 = arith.constant 0 : index
    %63 = vector.load %arg12[%c0_143, %c2_144, %c1_145, %c0_146] : memref<2x6x6x64xf32, #tpu.memory_space<vmem>>, vector<2x4x4x64xf32>
    %c0_147 = arith.constant 0 : index
    %c2_148 = arith.constant 2 : index
    %c2_149 = arith.constant 2 : index
    %c0_150 = arith.constant 0 : index
    %64 = vector.load %arg12[%c0_147, %c2_148, %c2_149, %c0_150] : memref<2x6x6x64xf32, #tpu.memory_space<vmem>>, vector<2x4x4x64xf32>
    %65 = tpu.concatenate %56, %57, %58, %59, %60, %61, %62, %63, %64 in 3 : vector<2x4x4x64xf32>, vector<2x4x4x64xf32>, vector<2x4x4x64xf32>, vector<2x4x4x64xf32>, vector<2x4x4x64xf32>, vector<2x4x4x64xf32>, vector<2x4x4x64xf32>, vector<2x4x4x64xf32>, vector<2x4x4x64xf32> -> vector<2x4x4x576xf32>
    %66 = vector.shape_cast %65 : vector<2x4x4x576xf32> to vector<32x576xf32>
    %67 = arith.truncf %66 : vector<32x576xf32> to vector<32x576xbf16>
    %c0_151 = arith.constant 0 : index
    %c0_152 = arith.constant 0 : index
    %68 = vector.load %arg5[%c0_151, %c0_152] : memref<576x128xbf16, #tpu.memory_space<vmem>>, vector<576x128xbf16>
    %cst_153 = arith.constant dense<0.000000e+00> : vector<32x128xf32>
    %69 = tpu.matmul %67, %68, %cst_153 {dimension_numbers = #tpu.dot_dimension_numbers<[1], [0], [0], [1], [0, 0, 1, 1], [], []>} : vector<32x576xbf16>, vector<576x128xbf16>, vector<32x128xf32> -> vector<32x128xf32>
    %c0_154 = arith.constant 0 : index
    %c0_155 = arith.constant 0 : index
    %70 = vector.load %arg6[%c0_154, %c0_155] : memref<1x128xf32, #tpu.memory_space<vmem>>, vector<1x128xf32>
    %71 = vector.broadcast %70 : vector<1x128xf32> to vector<32x128xf32>
    %72 = arith.addf %69, %71 : vector<32x128xf32>
    %cst_156 = arith.constant 0.000000e+00 : f32
    %73 = vector.broadcast %cst_156 : f32 to vector<32x128xf32>
    %74 = arith.maximumf %72, %73 : vector<32x128xf32>
    %75 = vector.shape_cast %74 : vector<32x128xf32> to vector<2x4x2x2x128xf32>
    %cst_157 = arith.constant dense<0xFF800000> : vector<2x4x2x128xf32>
    %76 = vector.multi_reduction <maximumf>, %75, %cst_157 [3] : vector<2x4x2x2x128xf32> to vector<2x4x2x128xf32>
    %77 = vector.shape_cast %76 : vector<2x4x2x128xf32> to vector<2x2x2x2x128xf32>
    %cst_158 = arith.constant dense<0xFF800000> : vector<2x2x2x128xf32>
    %78 = vector.multi_reduction <maximumf>, %77, %cst_158 [2] : vector<2x2x2x2x128xf32> to vector<2x2x2x128xf32>
    %79 = vector.extract_strided_slice %78 {offsets = [0, 0, 0, 0], sizes = [2, 1, 1, 128], strides = [1, 1, 1, 1]} : vector<2x2x2x128xf32> to vector<2x1x1x128xf32>
    %80 = vector.shape_cast %79 : vector<2x1x1x128xf32> to vector<2x128xf32>
    %81 = vector.extract_strided_slice %78 {offsets = [0, 0, 1, 0], sizes = [2, 1, 1, 128], strides = [1, 1, 1, 1]} : vector<2x2x2x128xf32> to vector<2x1x1x128xf32>
    %82 = vector.shape_cast %81 : vector<2x1x1x128xf32> to vector<2x128xf32>
    %83 = vector.extract_strided_slice %78 {offsets = [0, 1, 0, 0], sizes = [2, 1, 1, 128], strides = [1, 1, 1, 1]} : vector<2x2x2x128xf32> to vector<2x1x1x128xf32>
    %84 = vector.shape_cast %83 : vector<2x1x1x128xf32> to vector<2x128xf32>
    %85 = vector.extract_strided_slice %78 {offsets = [0, 1, 1, 0], sizes = [2, 1, 1, 128], strides = [1, 1, 1, 1]} : vector<2x2x2x128xf32> to vector<2x1x1x128xf32>
    %86 = vector.shape_cast %85 : vector<2x1x1x128xf32> to vector<2x128xf32>
    %87 = tpu.concatenate %80, %82, %84, %86 in 1 : vector<2x128xf32>, vector<2x128xf32>, vector<2x128xf32>, vector<2x128xf32> -> vector<2x512xf32>
    %88 = arith.truncf %87 : vector<2x512xf32> to vector<2x512xbf16>
    %c0_159 = arith.constant 0 : index
    %c0_160 = arith.constant 0 : index
    %89 = vector.load %arg7[%c0_159, %c0_160] : memref<512x10xbf16, #tpu.memory_space<vmem>>, vector<512x10xbf16>
    %cst_161 = arith.constant dense<0.000000e+00> : vector<2x10xf32>
    %90 = tpu.matmul %88, %89, %cst_161 {dimension_numbers = #tpu.dot_dimension_numbers<[1], [0], [0], [1], [0, 0, 1, 1], [], []>} : vector<2x512xbf16>, vector<512x10xbf16>, vector<2x10xf32> -> vector<2x10xf32>
    %c0_162 = arith.constant 0 : index
    %c0_163 = arith.constant 0 : index
    %91 = vector.load %arg8[%c0_162, %c0_163] : memref<1x10xf32, #tpu.memory_space<vmem>>, vector<1x10xf32>
    %92 = vector.broadcast %91 : vector<1x10xf32> to vector<2x10xf32>
    %93 = arith.addf %90, %92 : vector<2x10xf32>
    %c0_164 = arith.constant 0 : index
    %c0_165 = arith.constant 0 : index
    %94 = vector.load %arg9[%c0_164, %c0_165] : memref<2x10xf32, #tpu.memory_space<vmem>>, vector<2x10xf32>
    tpu.vector_store %arg9[%c0_164, %c0_165], %93 {strides = array<i32>} : memref<2x10xf32, #tpu.memory_space<vmem>>, vector<2x10xf32>,
    return
  }
}

</mosaic_0001>

<bundles_post_ra>
// kernel: simple_cnn_forward.1
= control target key start
LH: loop header
LB: loop body
LE: loop exit
PB: predicated region body
PF: predicated region fallthrough
CT: control target
= control target key end

     0   :  { %vm34_vm0 = vcmask 31744   ;;  %vm37_vm1 = vcmask 25600   ;;  %v13371_v1 = vmov 0.0   ;;  %s13372_s24 = smov 8   ;;  %s13373_s25 = smov 4   ;;  %vm3352_vm2 = vcmask 261120   ;;  %s18840_s0 = inlined_call_operand.vmem [shape: f32[2,16,16,4], index: 0, kind: input, shape index: {}]   ;;  %s18841_s1 = inlined_call_operand.vmem [shape: bf16[36,32], index: 1, kind: input, shape index: {}]   ;;  %s18842_s2 = inlined_call_operand.vmem [shape: f32[1,32], index: 2, kind: input, shape index: {}]   ;;  %s18843_s3 = inlined_call_operand.vmem [shape: bf16[288,64], index: 3, kind: input, shape index: {}]   ;;  %s18844_s4 = inlined_call_operand.vmem [shape: f32[1,64], index: 4, kind: input, shape index: {}]   ;;  %s18845_s5 = inlined_call_operand.vmem [shape: bf16[576,128], index: 5, kind: input, shape index: {}]   ;;  %s18846_s6 = inlined_call_operand.vmem [shape: f32[1,128], index: 6, kind: input, shape index: {}]   ;;  %s18847_s7 = inlined_call_operand.vmem [shape: bf16[512,10], index: 7, kind: input, shape index: {}]   ;;  %s18848_s8 = inlined_call_operand.vmem [shape: f32[1,10], index: 8, kind: input, shape index: {}]   ;;  %s18849_s9 = inlined_call_operand.hbm [shape: f32[2,10], index: 9, kind: output, shape index: {}]  }
   0x1   :  { %v13437_v0 = vld [vmem:[%s18840_s0] sm:$0xff]  ;;  %35 = vst.msk [vmem:[#allocation2] sm:$0xff] %vm34_vm0, %v13371_v1  ;;  %36 = vst.msk [vmem:[#allocation2 + $0x8] sm:$0xff] %vm34_vm0, %v13371_v1  ;;  %v145_v2 = vld [vmem:[%s18840_s0 + $0x8] sm:$0xff]  ;;  %s13374_s26 = smov 12   ;;  %s13375_s27 = smov 16  }
   0x2   :  { %38 = vst.msk [vmem:[#allocation2 + $0x10] sm:$0x3] %vm37_vm1, %v13371_v1  ;;  %41 = vst.msk [vmem:[#allocation2 + $0x28] sm:$0x3] %vm37_vm1, %v13371_v1  ;;  %v146_v3 = vld [vmem:[%s18840_s0 + $0x10] sm:$0xff]  ;;  %v147_v4 = vld [vmem:[%s18840_s0 + $0x18] sm:$0xff] }
   0x3   :  { %39 = vst.msk [vmem:[#allocation2 + $0x18] sm:$0xff] %vm34_vm0, %v13371_v1  ;;  %40 = vst.msk [vmem:[#allocation2 + $0x20] sm:$0xff] %vm34_vm0, %v13371_v1  ;;  %v148_v5 = vld [vmem:[%s18840_s0 + $0x20] sm:$0xff]  ;;  %v149_v6 = vld [vmem:[%s18840_s0 + $0x28] sm:$0xff]  ;;  %s13376_s28 = smov 20   ;;  %s13377_s22 = smov 24  }
   0x4   :  { %42 = vst.msk [vmem:[#allocation2 + $0x30] sm:$0xff] %vm34_vm0, %v13371_v1  ;;  %43 = vst.msk [vmem:[#allocation2 + $0x38] sm:$0xff] %vm34_vm0, %v13371_v1  ;;  %v150_v7 = vld [vmem:[%s18840_s0 + $0x30] sm:$0xff]  ;;  %v151_v8 = vld [vmem:[%s18840_s0 + $0x38] sm:$0xff]  ;;  %vm18850_vm3 = vcmask 1041408   ;;  %s13378_s23 = smov 28  }
   0x5   :  { %44 = vst.msk [vmem:[#allocation2 + $0x40] sm:$0x3] %vm37_vm1, %v13371_v1  ;;  %47 = vst.msk [vmem:[#allocation2 + $0x58] sm:$0x3] %vm37_vm1, %v13371_v1  ;;  %v152_v9 = vld [vmem:[%s18840_s0 + $0x40] sm:$0xff]  ;;  %v153_v10 = vld [vmem:[%s18840_s0 + $0x48] sm:$0xff] }
   0x6   :  { %45 = vst.msk [vmem:[#allocation2 + $0x48] sm:$0xff] %vm34_vm0, %v13371_v1  ;;  %46 = vst.msk [vmem:[#allocation2 + $0x50] sm:$0xff] %vm34_vm0, %v13371_v1  ;;  %v154_v11 = vld [vmem:[%s18840_s0 + $0x50] sm:$0xff]  ;;  %v155_v12 = vld [vmem:[%s18840_s0 + $0x58] sm:$0xff] }
   0x7   :  { %48 = vst.msk [vmem:[#allocation2 + $0x60] sm:$0xff] %vm34_vm0, %v13371_v1  ;;  %49 = vst.msk [vmem:[#allocation2 + $0x68] sm:$0xff] %vm34_vm0, %v13371_v1  ;;  %v156_v13 = vld [vmem:[%s18840_s0 + $0x60] sm:$0xff]  ;;  %v157_v14 = vld [vmem:[%s18840_s0 + $0x68] sm:$0xff] }
   0x8   :  { %50 = vst.msk [vmem:[#allocation2 + $0x70] sm:$0x3] %vm37_vm1, %v13371_v1  ;;  %53 = vst.msk [vmem:[#allocation2 + $0x88] sm:$0x3] %vm37_vm1, %v13371_v1  ;;  %v158_v15 = vld [vmem:[%s18840_s0 + $0x70] sm:$0xff]  ;;  %v159_v16 = vld [vmem:[%s18840_s0 + $0x78] sm:$0xff] }
   0x9   :  { %51 = vst.msk [vmem:[#allocation2 + $0x78] sm:$0xff] %vm34_vm0, %v13371_v1  ;;  %52 = vst.msk [vmem:[#allocation2 + $0x80] sm:$0xff] %vm34_vm0, %v13371_v1  ;;  %v160_v17 = vld [vmem:[%s18840_s0 + $0x80] sm:$0xff]  ;;  %v161_v18 = vld [vmem:[%s18840_s0 + $0x88] sm:$0xff] }
   0xa   :  { %54 = vst.msk [vmem:[#allocation2 + $0x90] sm:$0xff] %vm34_vm0, %v13371_v1  ;;  %55 = vst.msk [vmem:[#allocation2 + $0x98] sm:$0xff] %vm34_vm0, %v13371_v1  ;;  %v401_v19 = vld [vmem:[#allocation2 + $0x2] sm:$0xff]  ;;  %v402_v20 = vld [vmem:[#allocation2 + $0xa] sm:$0xff] }
   0xb   :  { %56 = vst.msk [vmem:[#allocation2 + $0xa0] sm:$0x3] %vm37_vm1, %v13371_v1  ;;  %59 = vst.msk [vmem:[#allocation2 + $0xb8] sm:$0x3] %vm37_vm1, %v13371_v1  ;;  %v337_v21 = vld [vmem:[#allocation2 + $0x1] sm:$0xff]  ;;  %v11720_v22 = vpack.i.bf16 %v402_v20, %v401_v19  ;;  %v338_v23 = vld [vmem:[#allocation2 + $0x9] sm:$0xff] }
   0xc   :  { %57 = vst.msk [vmem:[#allocation2 + $0xa8] sm:$0xff] %vm34_vm0, %v13371_v1  ;;  %58 = vst.msk [vmem:[#allocation2 + $0xb0] sm:$0xff] %vm34_vm0, %v13371_v1  ;;  %v11715_v26 = vpack.i.bf16 %v338_v23, %v337_v21  ;;  %v162_v48 = vld [vmem:[%s18840_s0 + $0x90] sm:$0xff]  ;;  %v163_v49 = vld [vmem:[%s18840_s0 + $0x98] sm:$0xff] }
   0xd   :  { %60 = vst.msk [vmem:[#allocation2 + $0xc0] sm:$0xff] %vm34_vm0, %v13371_v1  ;;  %61 = vst.msk [vmem:[#allocation2 + $0xc8] sm:$0xff] %vm34_vm0, %v13371_v1  ;;  %11721 = vrot.lane.b32.xlu1 %v11720_v22, %s13372_s24  ;;  %v13235_v50 = vld [vmem:[%s18841_s1] sm:$0xff]   ;;  %v13236_v51 = vld [vmem:[%s18841_s1 + $0x8] sm:$0xff]  }
   0xe   :  { %62 = vst.msk [vmem:[#allocation2 + $0xd0] sm:$0x3] %vm37_vm1, %v13371_v1  ;;  %65 = vst.msk [vmem:[#allocation2 + $0xe8] sm:$0x3] %vm37_vm1, %v13371_v1  ;;  %11716 = vrot.lane.b32.xlu0 %v11715_v26, %s13373_s25  ;;  %v164_v52 = vld [vmem:[%s18840_s0 + $0xa0] sm:$0xff]  ;;  %11599 = vmatprep.subr.bf16.mxu0 %v13235_v50  ;;  %v165_v54 = vld [vmem:[%s18840_s0 + $0xa8] sm:$0xff] }
   0xf   :  { %63 = vst.msk [vmem:[#allocation2 + $0xd8] sm:$0xff] %vm34_vm0, %v13371_v1  ;;  %64 = vst.msk [vmem:[#allocation2 + $0xe0] sm:$0xff] %vm34_vm0, %v13371_v1  ;;  %v13237_v53 = vld [vmem:[%s18841_s1 + $0x10] ss:$0 sps:$4 sm:$0x33]   ;;  %11600 = vmatpush3.bf16.msra.mxu0 %v13235_v50  ;;  %s13379_s1 = smov 32  }
  0x10   :  { %66 = vst.msk [vmem:[#allocation2 + $0xf0] sm:$0xff] %vm34_vm0, %v13371_v1  ;;  %67 = vst.msk [vmem:[#allocation2 + $0xf8] sm:$0xff] %vm34_vm0, %v13371_v1  ;;  %11601 = vmatprep.subr.bf16.mxu0 %v13236_v51  ;;  %v3575_v56 = vsel %vm18850_vm3, %v13237_v53, 0  ;;  %v166_v60 = vld [vmem:[%s18840_s0 + $0xb0] sm:$0xff]  ;;  %v167_v63 = vld [vmem:[%s18840_s0 + $0xb8] sm:$0xff] }
  0x11   :  { %68 = vst.msk [vmem:[#allocation2 + $0x100] sm:$0x3] %vm37_vm1, %v13371_v1  ;;  %71 = vst.msk [vmem:[#allocation2 + $0x118] sm:$0x3] %vm37_vm1, %v13371_v1  ;;  %v170_v19 = vld [vmem:[%s18840_s0 + $0xd0] sm:$0xff]  ;;  %v171_v22 = vld [vmem:[%s18840_s0 + $0xd8] sm:$0xff] }
  0x12   :  { %69 = vst.msk [vmem:[#allocation2 + $0x108] sm:$0xff] %vm34_vm0, %v13371_v1  ;;  %70 = vst.msk [vmem:[#allocation2 + $0x110] sm:$0xff] %vm34_vm0, %v13371_v1 }
  0x13   :  { %72 = vst.msk [vmem:[#allocation2 + $0x120] sm:$0xff] %vm34_vm0, %v13371_v1  ;;  %73 = vst.msk [vmem:[#allocation2 + $0x128] sm:$0xff] %vm34_vm0, %v13371_v1  ;;  %11602 = vmatpush3.bf16.msra.mxu0 %v13236_v51 }
  0x14   :  { %74 = vst.msk [vmem:[#allocation2 + $0x130] sm:$0x3] %vm37_vm1, %v13371_v1  ;;  %77 = vst.msk [vmem:[#allocation2 + $0x148] sm:$0x3] %vm37_vm1, %v13371_v1  ;;  %11701 = vmatprep.subr.msk.bf16.mxu0 %vm18850_vm3, %v13237_v53 }
  0x15   :  { %75 = vst.msk [vmem:[#allocation2 + $0x138] sm:$0xff] %vm34_vm0, %v13371_v1  ;;  %76 = vst.msk [vmem:[#allocation2 + $0x140] sm:$0xff] %vm34_vm0, %v13371_v1 }
  0x16   :  { %78 = vst.msk [vmem:[#allocation2 + $0x150] sm:$0xff] %vm34_vm0, %v13371_v1  ;;  %79 = vst.msk [vmem:[#allocation2 + $0x158] sm:$0xff] %vm34_vm0, %v13371_v1 }
  0x17   :  { %80 = vst.msk [vmem:[#allocation2 + $0x160] sm:$0x3] %vm37_vm1, %v13371_v1  ;;  %83 = vst.msk [vmem:[#allocation2 + $0x178] sm:$0x3] %vm37_vm1, %v13371_v1  ;;  %11604 = vmatpush3.bf16.msra.mxu0 %v3575_v56 }
  0x18   :  { %81 = vst.msk [vmem:[#allocation2 + $0x168] sm:$0xff] %vm34_vm0, %v13371_v1  ;;  %82 = vst.msk [vmem:[#allocation2 + $0x170] sm:$0xff] %vm34_vm0, %v13371_v1 }
  0x19   :  { %84 = vst.msk [vmem:[#allocation2 + $0x180] sm:$0xff] %vm34_vm0, %v13371_v1  ;;  %85 = vst.msk [vmem:[#allocation2 + $0x188] sm:$0xff] %vm34_vm0, %v13371_v1 }
  0x1a   :  { %86 = vst.msk [vmem:[#allocation2 + $0x190] sm:$0x3] %vm37_vm1, %v13371_v1  ;;  %89 = vst.msk [vmem:[#allocation2 + $0x1a8] sm:$0x3] %vm37_vm1, %v13371_v1 }
  0x1b   :  { %87 = vst.msk [vmem:[#allocation2 + $0x198] sm:$0xff] %vm34_vm0, %v13371_v1  ;;  %88 = vst.msk [vmem:[#allocation2 + $0x1a0] sm:$0xff] %vm34_vm0, %v13371_v1 }
  0x1c   :  { %90 = vst.msk [vmem:[#allocation2 + $0x1b0] sm:$0xff] %vm34_vm0, %v13371_v1  ;;  %91 = vst.msk [vmem:[#allocation2 + $0x1b8] sm:$0xff] %vm34_vm0, %v13371_v1 }
  0x1d   :  { %92 = vst.msk [vmem:[#allocation2 + $0x1c0] sm:$0x3] %vm37_vm1, %v13371_v1  ;;  %95 = vst.msk [vmem:[#allocation2 + $0x1d8] sm:$0x3] %vm37_vm1, %v13371_v1 }
  0x1e   :  { %93 = vst.msk [vmem:[#allocation2 + $0x1c8] sm:$0xff] %vm34_vm0, %v13371_v1  ;;  %94 = vst.msk [vmem:[#allocation2 + $0x1d0] sm:$0xff] %vm34_vm0, %v13371_v1 }
  0x1f   :  { %96 = vst.msk [vmem:[#allocation2 + $0x1e0] sm:$0xff] %vm34_vm0, %v13371_v1  ;;  %97 = vst.msk [vmem:[#allocation2 + $0x1e8] sm:$0xff] %vm34_vm0, %v13371_v1 }
  0x20   :  { %98 = vst.msk [vmem:[#allocation2 + $0x1f0] sm:$0x3] %vm37_vm1, %v13371_v1  ;;  %101 = vst.msk [vmem:[#allocation2 + $0x208] sm:$0x3] %vm37_vm1, %v13371_v1 }
  0x21   :  { %99 = vst.msk [vmem:[#allocation2 + $0x1f8] sm:$0xff] %vm34_vm0, %v13371_v1  ;;  %100 = vst.msk [vmem:[#allocation2 + $0x200] sm:$0xff] %vm34_vm0, %v13371_v1 }
  0x22   :  { %102 = vst.msk [vmem:[#allocation2 + $0x210] sm:$0xff] %vm34_vm0, %v13371_v1  ;;  %103 = vst.msk [vmem:[#allocation2 + $0x218] sm:$0xff] %vm34_vm0, %v13371_v1 }
  0x23   :  { %104 = vst.msk [vmem:[#allocation2 + $0x220] sm:$0x3] %vm37_vm1, %v13371_v1  ;;  %107 = vst.msk [vmem:[#allocation2 + $0x238] sm:$0x3] %vm37_vm1, %v13371_v1 }
  0x24   :  { %105 = vst.msk [vmem:[#allocation2 + $0x228] sm:$0xff] %vm34_vm0, %v13371_v1  ;;  %106 = vst.msk [vmem:[#allocation2 + $0x230] sm:$0xff] %vm34_vm0, %v13371_v1 }
  0x25   :  { %108 = vst.msk [vmem:[#allocation2 + $0x240] sm:$0xff] %vm34_vm0, %v13371_v1  ;;  %109 = vst.msk [vmem:[#allocation2 + $0x248] sm:$0xff] %vm34_vm0, %v13371_v1 }
  0x26   :  { %110 = vst.msk [vmem:[#allocation2 + $0x250] sm:$0x3] %vm37_vm1, %v13371_v1  ;;  %113 = vst.msk [vmem:[#allocation2 + $0x268] sm:$0x3] %vm37_vm1, %v13371_v1 }
  0x27   :  { %111 = vst.msk [vmem:[#allocation2 + $0x258] sm:$0xff] %vm34_vm0, %v13371_v1  ;;  %112 = vst.msk [vmem:[#allocation2 + $0x260] sm:$0xff] %vm34_vm0, %v13371_v1 }
  0x28   :  { %114 = vst.msk [vmem:[#allocation2 + $0x270] sm:$0xff] %vm34_vm0, %v13371_v1  ;;  %115 = vst.msk [vmem:[#allocation2 + $0x278] sm:$0xff] %vm34_vm0, %v13371_v1 }
  0x29   :  { %116 = vst.msk [vmem:[#allocation2 + $0x280] sm:$0x3] %vm37_vm1, %v13371_v1  ;;  %119 = vst.msk [vmem:[#allocation2 + $0x298] sm:$0x3] %vm37_vm1, %v13371_v1 }
  0x2a   :  { %117 = vst.msk [vmem:[#allocation2 + $0x288] sm:$0xff] %vm34_vm0, %v13371_v1  ;;  %118 = vst.msk [vmem:[#allocation2 + $0x290] sm:$0xff] %vm34_vm0, %v13371_v1 }
  0x2b   :  { %120 = vst.msk [vmem:[#allocation2 + $0x2a0] sm:$0xff] %vm34_vm0, %v13371_v1  ;;  %121 = vst.msk [vmem:[#allocation2 + $0x2a8] sm:$0xff] %vm34_vm0, %v13371_v1 }
  0x2c   :  { %122 = vst.msk [vmem:[#allocation2 + $0x2b0] sm:$0x3] %vm37_vm1, %v13371_v1  ;;  %125 = vst.msk [vmem:[#allocation2 + $0x2c8] sm:$0x3] %vm37_vm1, %v13371_v1 }
  0x2d   :  { %123 = vst.msk [vmem:[#allocation2 + $0x2b8] sm:$0xff] %vm34_vm0, %v13371_v1  ;;  %124 = vst.msk [vmem:[#allocation2 + $0x2c0] sm:$0xff] %vm34_vm0, %v13371_v1 }
  0x2e   :  { %126 = vst.msk [vmem:[#allocation2 + $0x2d0] sm:$0xff] %vm34_vm0, %v13371_v1  ;;  %127 = vst.msk [vmem:[#allocation2 + $0x2d8] sm:$0xff] %vm34_vm0, %v13371_v1 }
  0x2f   :  { %128 = vst.msk [vmem:[#allocation2 + $0x2e0] sm:$0x3] %vm37_vm1, %v13371_v1  ;;  %131 = vst.msk [vmem:[#allocation2 + $0x2f8] sm:$0x3] %vm37_vm1, %v13371_v1 }
  0x30   :  { %129 = vst.msk [vmem:[#allocation2 + $0x2e8] sm:$0xff] %vm34_vm0, %v13371_v1  ;;  %130 = vst.msk [vmem:[#allocation2 + $0x2f0] sm:$0xff] %vm34_vm0, %v13371_v1 }
  0x31   :  { %132 = vst.msk [vmem:[#allocation2 + $0x300] sm:$0xff] %vm34_vm0, %v13371_v1  ;;  %133 = vst.msk [vmem:[#allocation2 + $0x308] sm:$0xff] %vm34_vm0, %v13371_v1 }
  0x32   :  { %134 = vst.msk [vmem:[#allocation2 + $0x310] sm:$0x3] %vm37_vm1, %v13371_v1  ;;  %137 = vst.msk [vmem:[#allocation2 + $0x328] sm:$0x3] %vm37_vm1, %v13371_v1 }
  0x33   :  { %135 = vst.msk [vmem:[#allocation2 + $0x318] sm:$0xff] %vm34_vm0, %v13371_v1  ;;  %136 = vst.msk [vmem:[#allocation2 + $0x320] sm:$0xff] %vm34_vm0, %v13371_v1 }
  0x34   :  { %138 = vst.msk [vmem:[#allocation2 + $0x330] sm:$0xff] %vm34_vm0, %v13371_v1  ;;  %139 = vst.msk [vmem:[#allocation2 + $0x338] sm:$0xff] %vm34_vm0, %v13371_v1 }
  0x35   :  { %140 = vst.msk [vmem:[#allocation2 + $0x340] sm:$0x3] %vm37_vm1, %v13371_v1  ;;  %143 = vst.msk [vmem:[#allocation2 + $0x358] sm:$0x3] %vm37_vm1, %v13371_v1 }
  0x36   :  { %141 = vst.msk [vmem:[#allocation2 + $0x348] sm:$0xff] %vm34_vm0, %v13371_v1  ;;  %142 = vst.msk [vmem:[#allocation2 + $0x350] sm:$0xff] %vm34_vm0, %v13371_v1 }
  0x37   :  { %209 = vst.msk [vmem:[#allocation2 + $0x19] sm:$0xff] %vm34_vm0, %v13437_v0  ;;  %210 = vst.msk [vmem:[#allocation2 + $0x21] sm:$0xff] %vm34_vm0, %v145_v2 }
  0x38   :  { %211 = vst.msk [vmem:[#allocation2 + $0x31] sm:$0xff] %vm34_vm0, %v146_v3  ;;  %212 = vst.msk [vmem:[#allocation2 + $0x39] sm:$0xff] %vm34_vm0, %v147_v4 }
  0x39   :  { %213 = vst.msk [vmem:[#allocation2 + $0x49] sm:$0xff] %vm34_vm0, %v148_v5  ;;  %214 = vst.msk [vmem:[#allocation2 + $0x51] sm:$0xff] %vm34_vm0, %v149_v6 }
  0x3a   :  { %215 = vst.msk [vmem:[#allocation2 + $0x61] sm:$0xff] %vm34_vm0, %v150_v7  ;;  %216 = vst.msk [vmem:[#allocation2 + $0x69] sm:$0xff] %vm34_vm0, %v151_v8  ;;  %v168_v7 = vld [vmem:[%s18840_s0 + $0xc0] sm:$0xff] }
  0x3b   :  { %217 = vst.msk [vmem:[#allocation2 + $0x79] sm:$0xff] %vm34_vm0, %v152_v9  ;;  %218 = vst.msk [vmem:[#allocation2 + $0x81] sm:$0xff] %vm34_vm0, %v153_v10  ;;  %v169_v10 = vld [vmem:[%s18840_s0 + $0xc8] sm:$0xff] }
  0x3c   :  { %219 = vst.msk [vmem:[#allocation2 + $0x91] sm:$0xff] %vm34_vm0, %v154_v11  ;;  %220 = vst.msk [vmem:[#allocation2 + $0x99] sm:$0xff] %vm34_vm0, %v155_v12 }
  0x3d   :  { %221 = vst.msk [vmem:[#allocation2 + $0xa9] sm:$0xff] %vm34_vm0, %v156_v13  ;;  %222 = vst.msk [vmem:[#allocation2 + $0xb1] sm:$0xff] %vm34_vm0, %v157_v14 }
  0x3e   :  { %223 = vst.msk [vmem:[#allocation2 + $0xc1] sm:$0xff] %vm34_vm0, %v158_v15  ;;  %224 = vst.msk [vmem:[#allocation2 + $0xc9] sm:$0xff] %vm34_vm0, %v159_v16  ;;  %v403_v24 = vld [vmem:[#allocation2 + $0x1a] sm:$0xff]  ;;  %v404_v25 = vld [vmem:[#allocation2 + $0x22] sm:$0xff] }
  0x3f   :  { %225 = vst.msk [vmem:[#allocation2 + $0xd9] sm:$0xff] %vm34_vm0, %v160_v17  ;;  %226 = vst.msk [vmem:[#allocation2 + $0xe1] sm:$0xff] %vm34_vm0, %v161_v18  ;;  %v339_v27 = vld [vmem:[#allocation2 + $0x19] sm:$0xff]  ;;  %v340_v28 = vld [vmem:[#allocation2 + $0x21] sm:$0xff]  ;;  %v11730_v29 = vpack.i.bf16 %v404_v25, %v403_v24 }
  0x40   :  { %v11725_v30 = vpack.i.bf16 %v340_v28, %v339_v27  ;;  %v467_v31 = vld [vmem:[#allocation2 + $0x30] sm:$0xff]  ;;  %v468_v32 = vld [vmem:[#allocation2 + $0x38] sm:$0xff]  ;;  %v13729_v34 = vld [vmem:[#allocation2 + $0x20] sm:$0xff]  ;;  %227 = vst.msk [vmem:[#allocation2 + $0xf1] sm:$0xff] %vm34_vm0, %v162_v48 }
  0x41   :  { %v13727_v33 = vld [vmem:[#allocation2 + $0x18] sm:$0xff]  ;;  %11731 = vrot.lane.b32.xlu1 %v11730_v29, %s13372_s24  ;;  %v11740_v35 = vpack.i.bf16 %v468_v32, %v467_v31  ;;  %v660_v43 = vld [vmem:[#allocation2 + $0x48] sm:$0xff]  ;;  %v661_v44 = vld [vmem:[#allocation2 + $0x50] sm:$0xff]  ;;  %228 = vst.msk [vmem:[#allocation2 + $0xf9] sm:$0xff] %vm34_vm0, %v163_v49 }
  0x42   :  { %11726 = vrot.lane.b32.xlu0 %v11725_v30, %s13373_s25  ;;  %v11735_v36 = vpack.i.bf16 %v13729_v34, %v13727_v33  ;;  %v531_v37 = vld [vmem:[#allocation2 + $0x31] sm:$0xff]  ;;  %v532_v38 = vld [vmem:[#allocation2 + $0x39] sm:$0xff]  ;;  %v13746_v45 = vpack.i.bf16 %v661_v44, %v660_v43  ;;  %v724_v46 = vld [vmem:[#allocation2 + $0x49] sm:$0xff]  ;;  %7515 = vst.msk [vmem:[#allocation3] sm:$0xff] %vm3352_vm2, %v13371_v1 }
  0x43   :  { %v13736_v39 = vpack.i.bf16 %v532_v38, %v531_v37  ;;  %v595_v40 = vld [vmem:[#allocation2 + $0x32] sm:$0xff]  ;;  %v596_v41 = vld [vmem:[#allocation2 + $0x3a] sm:$0xff]  ;;  %7517 = vst.msk [vmem:[#allocation3 + $0x10] sm:$0xff] %vm3352_vm2, %v13371_v1  ;;  %7519 = vst.msk [vmem:[#allocation3 + $0x20] sm:$0xff] %vm3352_vm2, %v13371_v1 }
  0x44   :  { %v13741_v42 = vpack.i.bf16 %v596_v41, %v595_v40  ;;  %v725_v47 = vld [vmem:[#allocation2 + $0x51] sm:$0xff]  ;;  %7521 = vst.msk [vmem:[#allocation3 + $0x30] sm:$0xff] %vm3352_vm2, %v13371_v1  ;;  %7523 = vst.msk [vmem:[#allocation3 + $0x40] sm:$0xff] %vm3352_vm2, %v13371_v1  ;;  %v471_v61 = vld [vmem:[#allocation2 + $0x60] sm:$0xff] }
  0x45   :  { %11741 = vrot.lane.b32.xlu1 %v11740_v35, %s13374_s26  ;;  %7525 = vst.msk [vmem:[#allocation3 + $0x50] sm:$0xff] %vm3352_vm2, %v13371_v1  ;;  %7527 = vst.msk [vmem:[#allocation3 + $0x60] sm:$0xff] %vm3352_vm2, %v13371_v1  ;;  %v11780_v55 = vpack.i.bf16 %v725_v47, %v724_v46  ;;  %v788_v57 = vld [vmem:[#allocation2 + $0x4a] sm:$0xff]  ;;  %v789_v58 = vld [vmem:[#allocation2 + $0x52] sm:$0xff] }
  0x46   :  { %11736 = vrot.lane.b32.xlu0 %v11735_v36, %s13374_s26  ;;  %7529 = vst.msk [vmem:[#allocation3 + $0x70] sm:$0xff] %vm3352_vm2, %v13371_v1  ;;  %7531 = vst.msk [vmem:[#allocation3 + $0x80] sm:$0xff] %vm3352_vm2, %v13371_v1  ;;  %v11795_v59 = vpack.i.bf16 %v789_v58, %v788_v57  ;;  %v472_v62 = vld [vmem:[#allocation2 + $0x68] sm:$0xff]  ;;  %v664_v8 = vld [vmem:[#allocation2 + $0x78] sm:$0xff] }
  0x47   :  { %7533 = vst.msk [vmem:[#allocation3 + $0x90] sm:$0xff] %vm3352_vm2, %v13371_v1  ;;  %7535 = vst.msk [vmem:[#allocation3 + $0xa0] sm:$0xff] %vm3352_vm2, %v13371_v1  ;;  %v535_v0 = vld [vmem:[#allocation2 + $0x61] sm:$0xff]  ;;  %v536_v2 = vld [vmem:[#allocation2 + $0x69] sm:$0xff]  ;;  %v11820_v3 = vpack.i.bf16 %v472_v62, %v471_v61 }
  0x48   :  { %7537 = vst.msk [vmem:[#allocation3 + $0xb0] sm:$0xff] %vm3352_vm2, %v13371_v1  ;;  %7539 = vst.msk [vmem:[#allocation3 + $0xc0] sm:$0xff] %vm3352_vm2, %v13371_v1  ;;  %v599_v4 = vld [vmem:[#allocation2 + $0x62] sm:$0xff]  ;;  %v600_v5 = vld [vmem:[#allocation2 + $0x6a] sm:$0xff]  ;;  %v11830_v6 = vpack.i.bf16 %v536_v2, %v535_v0 }
  0x49   :  { %11751 = vrot.lane.b32.xlu1 %v13736_v39, %s13375_s27  ;;  %7541 = vst.msk [vmem:[#allocation3 + $0xd0] sm:$0xff] %vm3352_vm2, %v13371_v1  ;;  %7543 = vst.msk [vmem:[#allocation3 + $0xe0] sm:$0xff] %vm3352_vm2, %v13371_v1  ;;  %v665_v9 = vld [vmem:[#allocation2 + $0x80] sm:$0xff]  ;;  %v11840_v11 = vpack.i.bf16 %v600_v5, %v599_v4  ;;  %v475_v20 = vld [vmem:[#allocation2 + $0x90] sm:$0xff] }
  0x4a   :  { %11746 = vrot.lane.b32.xlu0 %v11725_v30, %s13375_s27  ;;  %7545 = vst.msk [vmem:[#allocation3 + $0xf0] sm:$0xff] %vm3352_vm2, %v13371_v1  ;;  %7547 = vst.msk [vmem:[#allocation3 + $0x100] sm:$0xff] %vm3352_vm2, %v13371_v1  ;;  %v728_v12 = vld [vmem:[#allocation2 + $0x79] sm:$0xff]  ;;  %v729_v13 = vld [vmem:[#allocation2 + $0x81] sm:$0xff]  ;;  %v11850_v14 = vpack.i.bf16 %v665_v9, %v664_v8 }
  0x4b   :  { %7549 = vst.msk [vmem:[#allocation3 + $0x110] sm:$0xff] %vm3352_vm2, %v13371_v1  ;;  %7551 = vst.msk [vmem:[#allocation3 + $0x120] sm:$0xff] %vm3352_vm2, %v13371_v1  ;;  %v11860_v15 = vpack.i.bf16 %v729_v13, %v728_v12  ;;  %v792_v16 = vld [vmem:[#allocation2 + $0x7a] sm:$0xff]  ;;  %v793_v17 = vld [vmem:[#allocation2 + $0x82] sm:$0xff] }
  0x4c   :  { %7553 = vst.msk [vmem:[#allocation3 + $0x130] sm:$0xff] %vm3352_vm2, %v13371_v1  ;;  %v11875_v18 = vpack.i.bf16 %v793_v17, %v792_v16  ;;  %v476_v21 = vld [vmem:[#allocation2 + $0x98] sm:$0xff]  ;;  %v668_v30 = vld [vmem:[#allocation2 + $0xa8] sm:$0xff]  ;;  %v669_v31 = vld [vmem:[#allocation2 + $0xb0] sm:$0xff] }
  0x4d   :  { %11761 = vrot.lane.b32.xlu1 %v13741_v42, %s13376_s28  ;;  %229 = vst.msk [vmem:[#allocation2 + $0x109] sm:$0xff] %vm34_vm0, %v164_v52  ;;  %230 = vst.msk [vmem:[#allocation2 + $0x111] sm:$0xff] %vm34_vm0, %v165_v54  ;;  %v539_v23 = vld [vmem:[#allocation2 + $0x91] sm:$0xff]  ;;  %v540_v24 = vld [vmem:[#allocation2 + $0x99] sm:$0xff]  ;;  %v11900_v25 = vpack.i.bf16 %v476_v21, %v475_v20  ;;  %v11930_v38 = vpack.i.bf16 %v669_v31, %v668_v30 }
  0x4e   :  { %11756 = vrot.lane.b32.xlu0 %v11730_v29, %s13376_s28  ;;  %231 = vst.msk [vmem:[#allocation2 + $0x121] sm:$0xff] %vm34_vm0, %v166_v60  ;;  %232 = vst.msk [vmem:[#allocation2 + $0x129] sm:$0xff] %vm34_vm0, %v167_v63  ;;  %v603_v26 = vld [vmem:[#allocation2 + $0x92] sm:$0xff]  ;;  %v604_v27 = vld [vmem:[#allocation2 + $0x9a] sm:$0xff]  ;;  %v11910_v28 = vpack.i.bf16 %v540_v24, %v539_v23 }
  0x4f   :  { %233 = vst.msk [vmem:[#allocation2 + $0x139] sm:$0xff] %vm34_vm0, %v168_v7  ;;  %234 = vst.msk [vmem:[#allocation2 + $0x141] sm:$0xff] %vm34_vm0, %v169_v10  ;;  %v172_v29 = vld [vmem:[%s18840_s0 + $0xe0] sm:$0xff]  ;;  %v173_v32 = vld [vmem:[%s18840_s0 + $0xe8] sm:$0xff] }
  0x50   :  { %235 = vst.msk [vmem:[#allocation2 + $0x151] sm:$0xff] %vm34_vm0, %v170_v19  ;;  %236 = vst.msk [vmem:[#allocation2 + $0x159] sm:$0xff] %vm34_vm0, %v171_v22  ;;  %v732_v36 = vld [vmem:[#allocation2 + $0xa9] sm:$0xff]  ;;  %v733_v37 = vld [vmem:[#allocation2 + $0xb1] sm:$0xff] }
  0x51   :  { %11771 = vrot.lane.b32.xlu1 %v13746_v45, %s13377_s22  ;;  %237 = vst.msk [vmem:[#allocation2 + $0x169] sm:$0xff] %vm34_vm0, %v172_v29  ;;  %238 = vst.msk [vmem:[#allocation2 + $0x171] sm:$0xff] %vm34_vm0, %v173_v32  ;;  %v796_v40 = vld [vmem:[#allocation2 + $0xaa] sm:$0xff]  ;;  %v797_v41 = vld [vmem:[#allocation2 + $0xb2] sm:$0xff] }
  0x52   :  { %11766 = vrot.lane.b32.xlu0 %v11740_v35, %s13377_s22  ;;  %v11920_v35 = vpack.i.bf16 %v604_v27, %v603_v26 }
  0x55   :  { %11781 = vrot.lane.b32.xlu1 %v11780_v55, %s13378_s23 }
  0x56   :  { %11776 = vrot.lane.b32.xlu0 %v13736_v39, %s13378_s23 }
  0x59   :  { %11791 = vrot.lane.b32.xlu1 %v13736_v39, %s13373_s25  ;;  %v11940_v39 = vpack.i.bf16 %v733_v37, %v732_v36 }
  0x5a   :  { %11786 = vrot.lane.b32.xlu0 %v13741_v42, %s13379_s1 }
  0x5d   :  { %11801 = vrot.lane.b32.xlu1 %v11780_v55, %s13373_s25 }
  0x5e   :  { %11796 = vrot.lane.b32.xlu0 %v11795_v59, %s13379_s1 }
  0x61   :  { %11811 = vrot.lane.b32.xlu1 %v11795_v59, %s13372_s24 }
  0x62   :  { %11806 = vrot.lane.b32.xlu0 %v13741_v42, %s13372_s24  ;;  %v11955_v42 = vpack.i.bf16 %v797_v41, %v796_v40 }
  0x65   :  { %11821 = vrot.lane.b32.xlu1 %v11820_v3, %s13374_s26 }
  0x66   :  { %11816 = vrot.lane.b32.xlu0 %v13746_v45, %s13374_s26 }
  0x69   :  { %11831 = vrot.lane.b32.xlu1 %v11830_v6, %s13375_s27 }
  0x6a   :  { %11826 = vrot.lane.b32.xlu0 %v11780_v55, %s13375_s27 }
  0x6d   :  { %11841 = vrot.lane.b32.xlu1 %v11840_v11, %s13376_s28 }
  0x6e   :  { %11836 = vrot.lane.b32.xlu0 %v11795_v59, %s13376_s28 }
  0x71   :  { %11851 = vrot.lane.b32.xlu1 %v11850_v14, %s13377_s22 }
  0x72   :  { %11846 = vrot.lane.b32.xlu0 %v11820_v3, %s13377_s22 }
  0x75   :  { %11861 = vrot.lane.b32.xlu1 %v11860_v15, %s13378_s23 }
  0x76   :  { %11856 = vrot.lane.b32.xlu0 %v11830_v6, %s13378_s23 }
  0x79   :  { %11871 = vrot.lane.b32.xlu1 %v11830_v6, %s13373_s25 }
  0x7a   :  { %11866 = vrot.lane.b32.xlu0 %v11840_v11, %s13379_s1 }
  0x7d   :  { %11881 = vrot.lane.b32.xlu1 %v11860_v15, %s13373_s25 }
  0x7e   :  { %11876 = vrot.lane.b32.xlu0 %v11875_v18, %s13379_s1 }
  0x81   :  { %11891 = vrot.lane.b32.xlu1 %v11875_v18, %s13372_s24 }
  0x82   :  { %11886 = vrot.lane.b32.xlu0 %v11840_v11, %s13372_s24 }
  0x85   :  { %11901 = vrot.lane.b32.xlu1 %v11900_v25, %s13374_s26 }
  0x86   :  { %11896 = vrot.lane.b32.xlu0 %v11850_v14, %s13374_s26 }
  0x89   :  { %11911 = vrot.lane.b32.xlu1 %v11910_v28, %s13375_s27 }
  0x8a   :  { %11906 = vrot.lane.b32.xlu0 %v11860_v15, %s13375_s27 }
  0x8d   :  { %11921 = vrot.lane.b32.xlu1 %v11920_v35, %s13376_s28 }
  0x8e   :  { %11916 = vrot.lane.b32.xlu0 %v11875_v18, %s13376_s28 }
  0x91   :  { %11931 = vrot.lane.b32.xlu1 %v11930_v38, %s13377_s22 }
  0x92   :  { %11926 = vrot.lane.b32.xlu0 %v11900_v25, %s13377_s22 }
  0x95   :  { %11941 = vrot.lane.b32.xlu1 %v11940_v39, %s13378_s23 }
  0x96   :  { %11936 = vrot.lane.b32.xlu0 %v11910_v28, %s13378_s23 }
  0x99   :  { %11951 = vrot.lane.b32.xlu1 %v11910_v28, %s13373_s25 }
  0x9a   :  { %11946 = vrot.lane.b32.xlu0 %v11920_v35, %s13379_s1 }
  0x9b   :  { %14 = vsyncpa [#allocation6], 0  ;;  %v174_v43 = vld [vmem:[%s18840_s0 + $0xf0] sm:$0xff]  ;;  %v175_v44 = vld [vmem:[%s18840_s0 + $0xf8] sm:$0xff]  ;;  %v13912_v59 = vpop.permute.xlu1 %11721  ;;  %v11717_v60 = vpop.permute.xlu0 %11716  ;;  %vm2962_vm4 = vcmask 64512   ;;  %vm3027_vm5 = vcmask 97280  }
  0x9c   :  { %239 = vst.msk [vmem:[#allocation2 + $0x181] sm:$0xff] %vm34_vm0, %v174_v43  ;;  %240 = vst.msk [vmem:[#allocation2 + $0x189] sm:$0xff] %vm34_vm0, %v175_v44  ;;  %v479_v45 = vld [vmem:[#allocation2 + $0xc0] sm:$0xff]  ;;  %v480_v46 = vld [vmem:[#allocation2 + $0xc8] sm:$0xff]  ;;  %v11719_v14 = vunpack.i.h.bf16 %v11717_v60  ;;  %v11718_v15 = vunpack.i.l.bf16 %v11717_v60  ;;  %vm18855_vm6 = vcmask 130048   ;;  %v11724_v23 = vunpack.i.h.bf16 %v13912_v59  ;;  %s13383_s19 = smov [#allocation5]  }
  0x9d   :  { %11961 = vrot.lane.b32.xlu1 %v11940_v39, %s13373_s25  ;;  %v11980_v47 = vpack.i.bf16 %v480_v46, %v479_v45  ;;  %v543_v48 = vld [vmem:[#allocation2 + $0xc1] sm:$0xff]  ;;  %v544_v49 = vld [vmem:[#allocation2 + $0xc9] sm:$0xff]  ;;  %v672_v54 = vld [vmem:[#allocation2 + $0xd8] sm:$0xff]  ;;  %v11723_v24 = vunpack.i.l.bf16 %v13912_v59  ;;  %vm18853_vm7 = vcmask 162816   ;;  %vm18854_vm8 = vcmask 195584   ;;  %s11225_s20 = sshll.u32 %s13383_s19, 4  ;;  %s11226_s20 = int_to_ptr.vmem [resolvable:$true] %s11225_s20 }
  0x9e   :  { %11956 = vrot.lane.b32.xlu0 %v11955_v42, %s13379_s1  ;;  %v11990_v50 = vpack.i.bf16 %v544_v49, %v543_v48  ;;  %v607_v51 = vld [vmem:[#allocation2 + $0xc2] sm:$0xff]  ;;  %v608_v52 = vld [vmem:[#allocation2 + $0xca] sm:$0xff]  ;;  %v736_v57 = vld [vmem:[#allocation2 + $0xd9] sm:$0xff]  ;;  %vm18852_vm9 = vcmask 228352   ;;  %vm3476_vm10 = vcmask 293888   ;;  %vm5338_vm11 = vcmask 254976   ;;  %p13352_p1 = scmp.lt.s32.totalorder %s11226_s20, %s11226_s20 }
  0x9f   :  { %v12000_v53 = vpack.i.bf16 %v608_v52, %v607_v51  ;;  %v673_v55 = vld [vmem:[#allocation2 + $0xe0] sm:$0xff]  ;;  %v177_v2 = vld [vmem:[%s18840_s0 + $0x108] sm:$0xff]  ;;  %v178_v10 = vld [vmem:[%s18840_s0 + $0x110] sm:$0xff]  ;;  %7516 = vst.msk [vmem:[#allocation3 + $0x8] sm:$0x3] %vm5338_vm11, %v13371_v1  ;;  %vm7683_vm12 = vcmask 1041409  }
  0xa0   :  { %v13909_v56 = vpack.i.bf16 %v673_v55, %v672_v54  ;;  %v737_v58 = vld [vmem:[#allocation2 + $0xe1] sm:$0xff]  ;;  %242 = vst.msk [vmem:[#allocation2 + $0x1d1] sm:$0xff] %vm34_vm0, %v177_v2  ;;  %v179_v11 = vld [vmem:[%s18840_s0 + $0x118] sm:$0xff]  ;;  %243 = vst.msk [vmem:[#allocation2 + $0x1e1] sm:$0xff] %vm34_vm0, %v178_v10  ;;  %vm7685_vm13 = vcmask 1042434   ;;  %vm18851_vm14 = vcmask 1043459  }
  0xa1   :  { %11971 = vrot.lane.b32.xlu1 %v11955_v42, %s13372_s24  ;;  %v13916_v61 = vpack.i.bf16 %v737_v58, %v736_v57  ;;  %v176_v63 = vld [vmem:[%s18840_s0 + $0x100] sm:$0xff]  ;;  %244 = vst.msk [vmem:[#allocation2 + $0x1e9] sm:$0xff] %vm34_vm0, %v179_v11  ;;  %v483_v12 = vld [vmem:[#allocation2 + $0xf0] sm:$0xff]  ;;  %v484_v13 = vld [vmem:[#allocation2 + $0xf8] sm:$0xff]  ;;  %vm7689_vm15 = vcmask 1044484   ;;  %vm18858_vm1 = vcmask 1045509  }
  0xa2   :  { %11966 = vrot.lane.b32.xlu0 %v11920_v35, %s13372_s24  ;;  %241 = vst.msk [vmem:[#allocation2 + $0x1c9] sm:$0xff] %vm34_vm0, %v176_v63  ;;  %v800_v4 = vld [vmem:[#allocation2 + $0xda] sm:$0xff]  ;;  %v801_v5 = vld [vmem:[#allocation2 + $0xe2] sm:$0xff]  ;;  %v13962_v22 = vpack.i.bf16 %v484_v13, %v483_v12  ;;  %v547_v25 = vld [vmem:[#allocation2 + $0xf1] sm:$0xff]  ;;  %vm18857_vm3 = vcmask 1046534   ;;  %s13347_s21 = scalar_lea.vmem %s11226_s20, 32 }
  0xa3   :  { %v13938_v7 = vpack.i.bf16 %v801_v5, %v800_v4  ;;  %v274_v17 = vld [vmem:[#allocation2 + $0x8] sm:$0xff]  ;;  %v273_v18 = vld [vmem:[#allocation2] sm:$0xff]  ;;  %v611_v27 = vld [vmem:[#allocation2 + $0xf2] sm:$0xff]  ;;  %7518 = vst.msk [vmem:[#allocation3 + $0x18] sm:$0x3] %vm5338_vm11, %v13371_v1  ;;  %p13348_p0 = scmp.ne.s32.totalorder %s11226_s20, %s13347_s21  ;;  %p13353_p2 = scmp.lt.s32.totalorder %s13347_s21, %s13347_s21 }
  0xa4   :  { %v548_v26 = vld [vmem:[#allocation2 + $0xf9] sm:$0xff]  ;;  %v2899_v28 = vsel %vm34_vm0, %v274_v17, %v11719_v14  ;;  %v2898_v29 = vsel %vm34_vm0, %v273_v18, %v11718_v15  ;;  %v676_v36 = vld [vmem:[#allocation2 + $0x108] sm:$0xff]  ;;  %v677_v37 = vld [vmem:[#allocation2 + $0x110] sm:$0xff]  ;;  %7520 = vst.msk [vmem:[#allocation3 + $0x28] sm:$0x3] %vm5338_vm11, %v13371_v1 }
  0xa5   :  { %11981 = vrot.lane.b32.xlu1 %v11980_v47, %s13374_s26  ;;  %v612_v35 = vld [vmem:[#allocation2 + $0xfa] sm:$0xff]  ;;  %v13983_v45 = vpack.i.bf16 %v548_v26, %v547_v25  ;;  %v2964_v46 = vsel %vm2962_vm4, %v2899_v28, %v11724_v23  ;;  %v181_v59 = vld [vmem:[%s18840_s0 + $0x128] sm:$0xff]  ;;  %7522 = vst.msk [vmem:[#allocation3 + $0x38] sm:$0x3] %vm5338_vm11, %v13371_v1  ;;  %7524 = vst.msk [vmem:[#allocation3 + $0x48] sm:$0x3] %vm5338_vm11, %v13371_v1  ;;  %p13354_p3 = por %p13353_p2, %p13352_p1 }
  0xa6   :  { %11976 = vrot.lane.b32.xlu0 %v11930_v38, %s13374_s26  ;;  %246 = vst.msk [vmem:[#allocation2 + $0x201] sm:$0xff] %vm34_vm0, %v181_v59 }
  0xa7   :  { %7526 = vst.msk [vmem:[#allocation3 + $0x58] sm:$0x3] %vm5338_vm11, %v13371_v1  ;;  %7528 = vst.msk [vmem:[#allocation3 + $0x68] sm:$0x3] %vm5338_vm11, %v13371_v1  ;;  %p13355_p4 = pnand %p13354_p3, %p13348_p0 }
  0xa8   :  { %7530 = vst.msk [vmem:[#allocation3 + $0x78] sm:$0x3] %vm5338_vm11, %v13371_v1  ;;  %7532 = vst.msk [vmem:[#allocation3 + $0x88] sm:$0x3] %vm5338_vm11, %v13371_v1 }
  0xa9   :  { %11991 = vrot.lane.b32.xlu1 %v11990_v50, %s13375_s27  ;;  %7534 = vst.msk [vmem:[#allocation3 + $0x98] sm:$0x3] %vm5338_vm11, %v13371_v1  ;;  %7536 = vst.msk [vmem:[#allocation3 + $0xa8] sm:$0x3] %vm5338_vm11, %v13371_v1 }
  0xaa   :  { %11986 = vrot.lane.b32.xlu0 %v11940_v39, %s13375_s27  ;;  %7538 = vst.msk [vmem:[#allocation3 + $0xb8] sm:$0x3] %vm5338_vm11, %v13371_v1  ;;  %7540 = vst.msk [vmem:[#allocation3 + $0xc8] sm:$0x3] %vm5338_vm11, %v13371_v1 }
  0xab   :  { %7542 = vst.msk [vmem:[#allocation3 + $0xd8] sm:$0x3] %vm5338_vm11, %v13371_v1  ;;  %7544 = vst.msk [vmem:[#allocation3 + $0xe8] sm:$0x3] %vm5338_vm11, %v13371_v1 }
  0xac   :  { %7546 = vst.msk [vmem:[#allocation3 + $0xf8] sm:$0x3] %vm5338_vm11, %v13371_v1  ;;  %7548 = vst.msk [vmem:[#allocation3 + $0x108] sm:$0x3] %vm5338_vm11, %v13371_v1 }
  0xad   :  { %12001 = vrot.lane.b32.xlu1 %v12000_v53, %s13376_s28  ;;  %7550 = vst.msk [vmem:[#allocation3 + $0x118] sm:$0x3] %vm5338_vm11, %v13371_v1  ;;  %7552 = vst.msk [vmem:[#allocation3 + $0x128] sm:$0x3] %vm5338_vm11, %v13371_v1 }
  0xae   :  { %11996 = vrot.lane.b32.xlu0 %v11955_v42, %s13376_s28  ;;  %7554 = vst.msk [vmem:[#allocation3 + $0x138] sm:$0x3] %vm5338_vm11, %v13371_v1 }
  0xb1   :  { %12011 = vrot.lane.b32.xlu1 %v13909_v56, %s13377_s22 }
  0xb2   :  { %12006 = vrot.lane.b32.xlu0 %v11980_v47, %s13377_s22  ;;  %v13991_v47 = vpack.i.bf16 %v677_v37, %v676_v36 }
  0xb3   :  { %v13919_v62 = vpop.permute.xlu1 %11731 }
  0xb4   :  { %v11727_v0 = vpop.permute.xlu0 %11726  ;;  %v11734_v30 = vunpack.i.h.bf16 %v13919_v62  ;;  %v11733_v31 = vunpack.i.l.bf16 %v13919_v62 }
  0xb5   :  { %12021 = vrot.lane.b32.xlu1 %v13916_v61, %s13378_s23  ;;  %v11729_v19 = vunpack.i.h.bf16 %v11727_v0  ;;  %v11728_v20 = vunpack.i.l.bf16 %v11727_v0 }
  0xb6   :  { %12016 = vrot.lane.b32.xlu0 %v11990_v50, %s13378_s23 }
  0xb7   :  { %v13932_v3 = vpop.permute.xlu1 %11741  ;;  %v2901_v38 = vsel %vm34_vm0, %v13729_v34, %v11729_v19  ;;  %v2900_v39 = vsel %vm34_vm0, %v13727_v33, %v11728_v20  ;;  %v2963_v34 = vsel %vm2962_vm4, %v2898_v29, %v11723_v24  ;;  %v13989_v33 = vpack.i.bf16 %v612_v35, %v611_v27  ;;  %v740_v20 = vld [vmem:[#allocation2 + $0x109] sm:$0xff] }
  0xb8   :  { %v13934_v6 = vpop.permute.xlu0 %11736  ;;  %v11744_v40 = vunpack.i.h.bf16 %v13932_v3  ;;  %v11743_v41 = vunpack.i.l.bf16 %v13932_v3  ;;  %v2965_v48 = vsel %vm2962_vm4, %v2900_v39, %v11733_v31  ;;  %v2966_v49 = vsel %vm2962_vm4, %v2901_v38, %v11734_v30 }
  0xb9   :  { %12031 = vrot.lane.b32.xlu1 %v11990_v50, %s13373_s25  ;;  %v11739_v43 = vunpack.i.h.bf16 %v13934_v6  ;;  %v11738_v44 = vunpack.i.l.bf16 %v13934_v6 }
  0xba   :  { %12026 = vrot.lane.b32.xlu0 %v12000_v53, %s13379_s1  ;;  %v3030_v54 = vsel %vm3027_vm5, %v2965_v48, %v11743_v41  ;;  %v3031_v55 = vsel %vm3027_vm5, %v2966_v49, %v11744_v40 }
  0xbb   :  { %v13940_v8 = vpop.permute.xlu1 %11751  ;;  %v3028_v60 = vsel %vm3027_vm5, %v2963_v34, %v11738_v44  ;;  %v3029_v62 = vsel %vm3027_vm5, %v2964_v46, %v11739_v43 }
  0xbc   :  { %v13942_v9 = vpop.permute.xlu0 %11746  ;;  %v11754_v2 = vunpack.i.h.bf16 %v13940_v8  ;;  %v11753_v3 = vunpack.i.l.bf16 %v13940_v8 }
  0xbd   :  { %12041 = vrot.lane.b32.xlu1 %v13916_v61, %s13373_s25  ;;  %v11749_v50 = vunpack.i.h.bf16 %v13942_v9  ;;  %v11748_v51 = vunpack.i.l.bf16 %v13942_v9 }
  0xbe   :  { %12036 = vrot.lane.b32.xlu0 %v13938_v7, %s13379_s1  ;;  %v3095_v27 = vsel %vm18855_vm6, %v3030_v54, %v11753_v3  ;;  %v3096_v28 = vsel %vm18855_vm6, %v3031_v55, %v11754_v2  ;;  %v182_v55 = vld [vmem:[%s18840_s0 + $0x130] sm:$0xff] }
  0xbf   :  { %v13956_v16 = vpop.permute.xlu1 %11761  ;;  %v3093_v6 = vsel %vm18855_vm6, %v3028_v60, %v11748_v51  ;;  %v3094_v9 = vsel %vm18855_vm6, %v3029_v62, %v11749_v50  ;;  %v804_v50 = vld [vmem:[#allocation2 + $0x10a] sm:$0xff]  ;;  %v805_v51 = vld [vmem:[#allocation2 + $0x112] sm:$0xff]  ;;  %247 = vst.msk [vmem:[#allocation2 + $0x211] sm:$0xff] %vm34_vm0, %v182_v55  ;;  %v551_v62 = vld [vmem:[#allocation2 + $0x121] sm:$0xff] }
  0xc0   :  { %v13958_v21 = vpop.permute.xlu0 %11756  ;;  %v11764_v10 = vunpack.i.h.bf16 %v13956_v16  ;;  %v11763_v11 = vunpack.i.l.bf16 %v13956_v16 }
  0xc1   :  { %12051 = vrot.lane.b32.xlu1 %v13938_v7, %s13372_s24  ;;  %v11758_v57 = vunpack.i.l.bf16 %v13958_v21 }
  0xc2   :  { %12046 = vrot.lane.b32.xlu0 %v12000_v53, %s13372_s24  ;;  %v180_v53 = vld [vmem:[%s18840_s0 + $0x120] sm:$0xff]  ;;  %v3161_v35 = vsel %vm18853_vm7, %v3096_v28, %v11764_v10 }
  0xc3   :  { %v13971_v32 = vpop.permute.xlu1 %11771  ;;  %245 = vst.msk [vmem:[#allocation2 + $0x1f9] sm:$0xff] %vm34_vm0, %v180_v53  ;;  %v3158_v13 = vsel %vm18853_vm7, %v3093_v6, %v11758_v57  ;;  %v14073_v53 = vpack.i.bf16 %v805_v51, %v804_v50  ;;  %v183_v57 = vld [vmem:[%s18840_s0 + $0x138] sm:$0xff] }
  0xc4   :  { %v11767_v42 = vpop.permute.xlu0 %11766  ;;  %v11774_v8 = vunpack.i.h.bf16 %v13971_v32  ;;  %v11773_v15 = vunpack.i.l.bf16 %v13971_v32  ;;  %v3160_v32 = vsel %vm18853_vm7, %v3095_v27, %v11763_v11  ;;  %248 = vst.msk [vmem:[#allocation2 + $0x219] sm:$0xff] %vm34_vm0, %v183_v57  ;;  %v680_v6 = vld [vmem:[#allocation2 + $0x138] sm:$0xff] }
  0xc5   :  { %12061 = vrot.lane.b32.xlu1 %v13962_v22, %s13374_s26  ;;  %v11769_v63 = vunpack.i.h.bf16 %v11767_v42  ;;  %v11768_v0 = vunpack.i.l.bf16 %v11767_v42  ;;  %v13330_v27 = vld [vmem:[#allocation2 + $0x38] sm:$0xff] }
  0xc6   :  { %12056 = vrot.lane.b32.xlu0 %v13909_v56, %s13374_s26  ;;  %v11759_v56 = vunpack.i.h.bf16 %v13958_v21  ;;  %v741_v21 = vld [vmem:[#allocation2 + $0x111] sm:$0xff]  ;;  %v3225_v38 = vsel %vm18854_vm8, %v3160_v32, %v11773_v15  ;;  %v3226_v39 = vsel %vm18854_vm8, %v3161_v35, %v11774_v8 }
  0xc7   :  { %v11782_v52 = vpop.permute.xlu1 %11781  ;;  %v3223_v19 = vsel %vm18854_vm8, %v3158_v13, %v11768_v0  ;;  %v14043_v37 = vpack.i.bf16 %v741_v21, %v740_v20  ;;  %v615_v0 = vld [vmem:[#allocation2 + $0x122] sm:$0xff]  ;;  %v13328_v21 = vld [vmem:[#allocation2 + $0x50] sm:$0xff] }
  0xc8   :  { %v11777_v58 = vpop.permute.xlu0 %11776  ;;  %v3159_v14 = vsel %vm18853_vm7, %v3094_v9, %v11759_v56  ;;  %v11784_v23 = vunpack.i.h.bf16 %v11782_v52  ;;  %v11783_v24 = vunpack.i.l.bf16 %v11782_v52  ;;  %v681_v9 = vld [vmem:[#allocation2 + $0x140] sm:$0xff] }
  0xc9   :  { %12071 = vrot.lane.b32.xlu1 %v13983_v45, %s13375_s27  ;;  %v11779_v4 = vunpack.i.h.bf16 %v11777_v58  ;;  %v11778_v5 = vunpack.i.l.bf16 %v11777_v58  ;;  %v3224_v16 = vsel %vm18854_vm8, %v3159_v14, %v11769_v63  ;;  %v488_v58 = vld [vmem:[#allocation2 + $0x128] sm:$0xff]  ;;  %v14117_v20 = vpack.i.bf16 %v681_v9, %v680_v6 }
  0xca   :  { %12066 = vrot.lane.b32.xlu0 %v13916_v61, %s13375_s27  ;;  %v3290_v42 = vsel %vm18852_vm9, %v3225_v38, %v11783_v24  ;;  %v3291_v43 = vsel %vm18852_vm9, %v3226_v39, %v11784_v23  ;;  %v552_v63 = vld [vmem:[#allocation2 + $0x129] sm:$0xff]  ;;  %v745_v9 = vld [vmem:[#allocation2 + $0x141] sm:$0xff] }
  0xcb   :  { %v14021_v12 = vpop.permute.xlu1 %11791  ;;  %v3288_v25 = vsel %vm18852_vm9, %v3223_v19, %v11778_v5  ;;  %v3289_v26 = vsel %vm18852_vm9, %v3224_v16, %v11779_v4  ;;  %v616_v5 = vld [vmem:[#allocation2 + $0x12a] sm:$0xff] }
  0xcc   :  { %v11787_v17 = vpop.permute.xlu0 %11786  ;;  %v11794_v10 = vunpack.i.h.bf16 %v14021_v12  ;;  %v11793_v11 = vunpack.i.l.bf16 %v14021_v12  ;;  %v14115_v16 = vpack.i.bf16 %v616_v5, %v615_v0  ;;  %v13329_v23 = vld [vmem:[#allocation2 + $0x48] sm:$0xff] }
  0xcd   :  { %v11789_v61 = vunpack.i.h.bf16 %v11787_v17  ;;  %v11788_v18 = vunpack.i.l.bf16 %v11787_v17  ;;  %12081 = vrot.lane.b32.xlu1 %v13989_v33, %s13376_s28 }
  0xce   :  { %12076 = vrot.lane.b32.xlu0 %v13938_v7, %s13376_s28  ;;  %v2903_v28 = vsel %vm34_vm0, %v13330_v27, %v11794_v10 }
  0xcf   :  { %v14037_v29 = vpop.permute.xlu1 %11801  ;;  %v3353_v30 = vsel %vm3352_vm2, %v3288_v25, %v11788_v18  ;;  %v3354_v31 = vsel %vm3352_vm2, %v3289_v26, %v11789_v61  ;;  %v14111_v61 = vpack.i.bf16 %v552_v63, %v551_v62 }
  0xd0   :  { %v11797_v36 = vpop.permute.xlu0 %11796  ;;  %v3417_v7 = vpack.c.bf16 %v3354_v31, %v3353_v30  ;;  %v11804_v2 = vunpack.i.h.bf16 %v14037_v29  ;;  %v11803_v3 = vunpack.i.l.bf16 %v14037_v29  ;;  %v13331_v29 = vld [vmem:[#allocation2 + $0x30] sm:$0xff] }
  0xd1   :  { %v11799_v40 = vunpack.i.h.bf16 %v11797_v36  ;;  %v11798_v41 = vunpack.i.l.bf16 %v11797_v36  ;;  %12091 = vrot.lane.b32.xlu1 %v13991_v47, %s13377_s22  ;;  %v2902_v30 = vsel %vm34_vm0, %v13331_v29, %v11793_v11 }
  0xd2   :  { %12086 = vrot.lane.b32.xlu0 %v13962_v22, %s13377_s22  ;;  %11605 = vmatprep.mubr.msk.bf16.mxu0 %vm3476_vm10, %v3417_v7  ;;  %v2904_v24 = vsel %vm34_vm0, %v13329_v23, %v11803_v3 }
  0xd3   :  { %v3355_v44 = vsel %vm3352_vm2, %v3290_v42, %v11798_v41  ;;  %v3356_v34 = vsel %vm3352_vm2, %v3291_v43, %v11799_v40  ;;  %v14056_v46 = vpop.permute.xlu1 %11811  ;;  %v184_v40 = vld [vmem:[%s18840_s0 + $0x140] sm:$0xff] }
  0xd4   :  { %v14058_v48 = vpop.permute.xlu0 %11806  ;;  %v3418_v49 = vpack.c.bf16 %v3356_v34, %v3355_v44  ;;  %v11814_v13 = vunpack.i.h.bf16 %v14056_v46  ;;  %v11813_v14 = vunpack.i.l.bf16 %v14056_v46  ;;  %v185_v34 = vld [vmem:[%s18840_s0 + $0x148] sm:$0xff]  ;;  %249 = vst.msk [vmem:[#allocation2 + $0x229] sm:$0xff] %vm34_vm0, %v184_v40 }
  0xd5   :  { %12101 = vrot.lane.b32.xlu1 %v14043_v37, %s13378_s23  ;;  %v11809_v8 = vunpack.i.h.bf16 %v14058_v48  ;;  %v11808_v15 = vunpack.i.l.bf16 %v14058_v48  ;;  %250 = vst.msk [vmem:[#allocation2 + $0x231] sm:$0xff] %vm34_vm0, %v185_v34 }
  0xd6   :  { %12096 = vrot.lane.b32.xlu0 %v13983_v45, %s13378_s23  ;;  %11606 = vmatmul.mubr.msk.bf16.vlgmr.msra.gmra.mrb[0].mxu0 %vm3476_vm10, %v3418_v49  ;;  %v2969_v31 = vsel %vm2962_vm4, %v2904_v24, %v11813_v14 }
  0xd7   :  { %v14065_v22 = vpop.permute.xlu1 %11821  ;;  %v2968_v35 = vsel %vm2962_vm4, %v2903_v28, %v11809_v8  ;;  %v2967_v36 = vsel %vm2962_vm4, %v2902_v30, %v11808_v15 }
  0xd8   :  { %v14067_v52 = vpop.permute.xlu0 %11816  ;;  %v11824_v18 = vunpack.i.h.bf16 %v14065_v22  ;;  %v11823_v19 = vunpack.i.l.bf16 %v14065_v22 }
  0xd9   :  { %12111 = vrot.lane.b32.xlu1 %v13983_v45, %s13373_s25  ;;  %v487_v45 = vld [vmem:[#allocation2 + $0x120] sm:$0xff]  ;;  %v11819_v25 = vunpack.i.h.bf16 %v14067_v52  ;;  %v11818_v26 = vunpack.i.l.bf16 %v14067_v52 }
  0xda   :  { %12106 = vrot.lane.b32.xlu0 %v13989_v33, %s13379_s1  ;;  %v14099_v4 = vpack.i.bf16 %v488_v58, %v487_v45  ;;  %v3034_v41 = vsel %vm3027_vm5, %v2969_v31, %v11823_v19 }
  0xdb   :  { %v14075_v54 = vpop.permute.xlu1 %11831  ;;  %v3032_v46 = vsel %vm3027_vm5, %v2967_v36, %v11818_v26  ;;  %v3033_v48 = vsel %vm3027_vm5, %v2968_v35, %v11819_v25 }
  0xdc   :  { %v14080_v56 = vpop.permute.xlu0 %11826  ;;  %v11834_v50 = vunpack.i.h.bf16 %v14075_v54  ;;  %v11833_v51 = vunpack.i.l.bf16 %v14075_v54 }
  0xdd   :  { %12121 = vrot.lane.b32.xlu1 %v14043_v37, %s13373_s25  ;;  %v11829_v7 = vunpack.i.h.bf16 %v14080_v56  ;;  %v11828_v38 = vunpack.i.l.bf16 %v14080_v56 }
  0xde   :  { %12116 = vrot.lane.b32.xlu0 %v14073_v53, %s13379_s1  ;;  %v3099_v8 = vsel %vm18855_vm6, %v3034_v41, %v11833_v51 }
  0xdf   :  { %v14091_v59 = vpop.permute.xlu1 %11841  ;;  %v3097_v56 = vsel %vm18855_vm6, %v3032_v46, %v11828_v38  ;;  %v3098_v57 = vsel %vm18855_vm6, %v3033_v48, %v11829_v7  ;;  %v808_v7 = vld [vmem:[#allocation2 + $0x13a] sm:$0xff]  ;;  %v809_v38 = vld [vmem:[#allocation2 + $0x142] sm:$0xff]  ;;  %v555_v48 = vld [vmem:[#allocation2 + $0x151] sm:$0xff] }
  0xe0   :  { %v14093_v60 = vpop.permute.xlu0 %11836  ;;  %v11844_v45 = vunpack.i.h.bf16 %v14091_v59  ;;  %v11843_v58 = vunpack.i.l.bf16 %v14091_v59  ;;  %v744_v59 = vld [vmem:[#allocation2 + $0x139] sm:$0xff]  ;;  %v14211_v40 = vpack.i.bf16 %v809_v38, %v808_v7 }
  0xe1   :  { %12131 = vrot.lane.b32.xlu1 %v14073_v53, %s13372_s24  ;;  %v11839_v43 = vunpack.i.h.bf16 %v14093_v60  ;;  %v14181_v24 = vpack.i.bf16 %v745_v9, %v744_v59  ;;  %v13332_v9 = vld [vmem:[#allocation2 + $0x80] sm:$0xff] }
  0xe2   :  { %12126 = vrot.lane.b32.xlu0 %v13989_v33, %s13372_s24  ;;  %v2905_v33 = vsel %vm34_vm0, %v13328_v21, %v11804_v2 }
  0xe3   :  { %v14109_v17 = vpop.permute.xlu1 %11851  ;;  %v2970_v32 = vsel %vm2962_vm4, %v2905_v33, %v11814_v13  ;;  %v3163_v63 = vsel %vm18853_vm7, %v3098_v57, %v11839_v43  ;;  %v685_v57 = vld [vmem:[#allocation2 + $0x170] sm:$0xff] }
  0xe4   :  { %v11847_v12 = vpop.permute.xlu0 %11846  ;;  %v3035_v42 = vsel %vm3027_vm5, %v2970_v32, %v11824_v18  ;;  %v11854_v54 = vunpack.i.h.bf16 %v14109_v17  ;;  %v11853_v0 = vunpack.i.l.bf16 %v14109_v17 }
  0xe5   :  { %12141 = vrot.lane.b32.xlu1 %v14099_v4, %s13374_s26  ;;  %v11849_v49 = vunpack.i.h.bf16 %v11847_v12  ;;  %v11848_v22 = vunpack.i.l.bf16 %v11847_v12  ;;  %v3100_v15 = vsel %vm18855_vm6, %v3035_v42, %v11834_v50  ;;  %v3164_v12 = vsel %vm18853_vm7, %v3099_v8, %v11843_v58  ;;  %v186_v42 = vld [vmem:[%s18840_s0 + $0x150] sm:$0xff]  ;;  %v13334_v8 = vld [vmem:[#allocation2 + $0x68] sm:$0xff] }
  0xe6   :  { %12136 = vrot.lane.b32.xlu0 %v13991_v47, %s13374_s26  ;;  %v11838_v47 = vunpack.i.l.bf16 %v14093_v60  ;;  %v3165_v21 = vsel %vm18853_vm7, %v3100_v15, %v11844_v45  ;;  %251 = vst.msk [vmem:[#allocation2 + $0x241] sm:$0xff] %vm34_vm0, %v186_v42 }
  0xe7   :  { %v11862_v39 = vpop.permute.xlu1 %11861  ;;  %v3228_v3 = vsel %vm18854_vm8, %v3163_v63, %v11849_v49  ;;  %v3230_v25 = vsel %vm18854_vm8, %v3165_v21, %v11854_v54  ;;  %v556_v49 = vld [vmem:[#allocation2 + $0x159] sm:$0xff] }
  0xe8   :  { %v11857_v44 = vpop.permute.xlu0 %11856  ;;  %v3162_v62 = vsel %vm18853_vm7, %v3097_v56, %v11838_v47  ;;  %v11864_v10 = vunpack.i.h.bf16 %v11862_v39  ;;  %v11863_v11 = vunpack.i.l.bf16 %v11862_v39  ;;  %v187_v47 = vld [vmem:[%s18840_s0 + $0x158] sm:$0xff]  ;;  %v684_v56 = vld [vmem:[#allocation2 + $0x168] sm:$0xff] }
  0xe9   :  { %12151 = vrot.lane.b32.xlu1 %v14111_v61, %s13375_s27  ;;  %v11859_v52 = vunpack.i.h.bf16 %v11857_v44  ;;  %v11858_v55 = vunpack.i.l.bf16 %v11857_v44  ;;  %252 = vst.msk [vmem:[#allocation2 + $0x249] sm:$0xff] %vm34_vm0, %v187_v47  ;;  %v492_v44 = vld [vmem:[#allocation2 + $0x158] sm:$0xff]  ;;  %v14255_v59 = vpack.i.bf16 %v685_v57, %v684_v56 }
  0xea   :  { %12146 = vrot.lane.b32.xlu0 %v14043_v37, %s13375_s27  ;;  %v3227_v37 = vsel %vm18854_vm8, %v3162_v62, %v11848_v22  ;;  %v3295_v29 = vsel %vm18852_vm9, %v3230_v25, %v11864_v10  ;;  %v619_v22 = vld [vmem:[#allocation2 + $0x152] sm:$0xff] }
  0xeb   :  { %v14159_v60 = vpop.permute.xlu1 %11871  ;;  %v3292_v13 = vsel %vm18852_vm9, %v3227_v37, %v11858_v55  ;;  %v3293_v14 = vsel %vm18852_vm9, %v3228_v3, %v11859_v52  ;;  %v620_v55 = vld [vmem:[#allocation2 + $0x15a] sm:$0xff]  ;;  %v14249_v37 = vpack.i.bf16 %v556_v49, %v555_v48  ;;  %v749_v57 = vld [vmem:[#allocation2 + $0x171] sm:$0xff] }
  0xec   :  { %v11867_v2 = vpop.permute.xlu0 %11866  ;;  %v11874_v45 = vunpack.i.h.bf16 %v14159_v60  ;;  %v11873_v58 = vunpack.i.l.bf16 %v14159_v60  ;;  %v13333_v10 = vld [vmem:[#allocation2 + $0x78] sm:$0xff] }
  0xed   :  { %v11869_v5 = vunpack.i.h.bf16 %v11867_v2  ;;  %v11868_v6 = vunpack.i.l.bf16 %v11867_v2  ;;  %12161 = vrot.lane.b32.xlu1 %v14115_v16, %s13376_s28 }
  0xee   :  { %12156 = vrot.lane.b32.xlu0 %v14073_v53, %s13376_s28  ;;  %v3229_v53 = vsel %vm18854_vm8, %v3164_v12, %v11853_v0  ;;  %v2907_v15 = vsel %vm34_vm0, %v13334_v8, %v11874_v45 }
  0xef   :  { %v3357_v17 = vsel %vm3352_vm2, %v3292_v13, %v11868_v6  ;;  %v3358_v18 = vsel %vm3352_vm2, %v3293_v14, %v11869_v5  ;;  %v14177_v19 = vpop.permute.xlu1 %11881  ;;  %v3294_v28 = vsel %vm18852_vm9, %v3229_v53, %v11863_v11  ;;  %v14253_v6 = vpack.i.bf16 %v620_v55, %v619_v22 }
  0xf0   :  { %v11877_v33 = vpop.permute.xlu0 %11876  ;;  %v3419_v23 = vpack.c.bf16 %v3358_v18, %v3357_v17  ;;  %v11884_v50 = vunpack.i.h.bf16 %v14177_v19  ;;  %v11883_v51 = vunpack.i.l.bf16 %v14177_v19  ;;  %v13335_v17 = vld [vmem:[#allocation2 + $0x60] sm:$0xff] }
  0xf1   :  { %v11879_v26 = vunpack.i.h.bf16 %v11877_v33  ;;  %v11878_v27 = vunpack.i.l.bf16 %v11877_v33  ;;  %12171 = vrot.lane.b32.xlu1 %v14117_v20, %s13377_s22  ;;  %v2906_v18 = vsel %vm34_vm0, %v13335_v17, %v11873_v58 }
  0xf2   :  { %12166 = vrot.lane.b32.xlu0 %v14099_v4, %s13377_s22  ;;  %11609 = vmatprep.mubr.msk.bf16.mxu0 %vm3476_vm10, %v3419_v23  ;;  %v2908_v11 = vsel %vm34_vm0, %v13333_v10, %v11883_v51 }
  0xf3   :  { %v3360_v30 = vsel %vm3352_vm2, %v3295_v29, %v11879_v26  ;;  %v3359_v31 = vsel %vm3352_vm2, %v3294_v28, %v11878_v27  ;;  %v14194_v32 = vpop.permute.xlu1 %11891  ;;  %v188_v26 = vld [vmem:[%s18840_s0 + $0x160] sm:$0xff] }
  0xf4   :  { %v14196_v35 = vpop.permute.xlu0 %11886  ;;  %v3420_v36 = vpack.c.bf16 %v3360_v30, %v3359_v31  ;;  %v11894_v62 = vunpack.i.h.bf16 %v14194_v32  ;;  %v11893_v63 = vunpack.i.l.bf16 %v14194_v32  ;;  %v189_v31 = vld [vmem:[%s18840_s0 + $0x168] sm:$0xff]  ;;  %253 = vst.msk [vmem:[#allocation2 + $0x259] sm:$0xff] %vm34_vm0, %v188_v26 }
  0xf5   :  { %12181 = vrot.lane.b32.xlu1 %v14181_v24, %s13378_s23  ;;  %v11889_v54 = vunpack.i.h.bf16 %v14196_v35  ;;  %v11888_v0 = vunpack.i.l.bf16 %v14196_v35  ;;  %254 = vst.msk [vmem:[#allocation2 + $0x261] sm:$0xff] %vm34_vm0, %v189_v31 }
  0xf6   :  { %12176 = vrot.lane.b32.xlu0 %v14111_v61, %s13378_s23  ;;  %11610 = vmatmul.mubr.msk.bf16.gmra.mrb[4].mxu0 %vm3476_vm10, %v3420_v36  ;;  %v2973_v19 = vsel %vm2962_vm4, %v2908_v11, %v11893_v63 }
  0xf7   :  { %v14203_v4 = vpop.permute.xlu1 %11901  ;;  %v2972_v21 = vsel %vm2962_vm4, %v2907_v15, %v11889_v54  ;;  %v2971_v33 = vsel %vm2962_vm4, %v2906_v18, %v11888_v0 }
  0xf8   :  { %v14205_v39 = vpop.permute.xlu0 %11896  ;;  %v11904_v3 = vunpack.i.h.bf16 %v14203_v4  ;;  %v11903_v5 = vunpack.i.l.bf16 %v14203_v4 }
  0xf9   :  { %12191 = vrot.lane.b32.xlu1 %v14111_v61, %s13373_s25  ;;  %v491_v61 = vld [vmem:[#allocation2 + $0x150] sm:$0xff]  ;;  %v11899_v13 = vunpack.i.h.bf16 %v14205_v39  ;;  %v11898_v14 = vunpack.i.l.bf16 %v14205_v39 }
  0xfa   :  { %12186 = vrot.lane.b32.xlu0 %v14115_v16, %s13379_s1  ;;  %v14237_v52 = vpack.i.bf16 %v492_v44, %v491_v61  ;;  %v3038_v27 = vsel %vm3027_vm5, %v2973_v19, %v11903_v5 }
  0xfb   :  { %v14213_v41 = vpop.permute.xlu1 %11911  ;;  %v3036_v32 = vsel %vm3027_vm5, %v2971_v33, %v11898_v14  ;;  %v3037_v35 = vsel %vm3027_vm5, %v2972_v21, %v11899_v13 }
  0xfc   :  { %v14218_v43 = vpop.permute.xlu0 %11906  ;;  %v11914_v7 = vunpack.i.h.bf16 %v14213_v41  ;;  %v11913_v38 = vunpack.i.l.bf16 %v14213_v41 }
  0xfd   :  { %12201 = vrot.lane.b32.xlu1 %v14181_v24, %s13373_s25  ;;  %v11909_v23 = vunpack.i.h.bf16 %v14218_v43  ;;  %v11908_v53 = vunpack.i.l.bf16 %v14218_v43 }
  0xfe   :  { %12196 = vrot.lane.b32.xlu0 %v14211_v40, %s13379_s1  ;;  %v3103_v54 = vsel %vm18855_vm6, %v3038_v27, %v11913_v38  ;;  %v624_v38 = vld [vmem:[#allocation2 + $0x18a] sm:$0xff] }
  0xff   :  { %v14229_v34 = vpop.permute.xlu1 %11921  ;;  %v3101_v43 = vsel %vm18855_vm6, %v3036_v32, %v11908_v53  ;;  %v3102_v47 = vsel %vm18855_vm6, %v3037_v35, %v11909_v23  ;;  %v812_v23 = vld [vmem:[#allocation2 + $0x16a] sm:$0xff]  ;;  %v813_v53 = vld [vmem:[#allocation2 + $0x172] sm:$0xff]  ;;  %v559_v32 = vld [vmem:[#allocation2 + $0x181] sm:$0xff] }
 0x100   :  { %v14231_v46 = vpop.permute.xlu0 %11916  ;;  %v11924_v61 = vunpack.i.h.bf16 %v14229_v34  ;;  %v11923_v44 = vunpack.i.l.bf16 %v14229_v34  ;;  %v748_v34 = vld [vmem:[#allocation2 + $0x169] sm:$0xff]  ;;  %v14349_v26 = vpack.i.bf16 %v813_v53, %v812_v23 }
 0x101   :  { %12211 = vrot.lane.b32.xlu1 %v14211_v40, %s13372_s24  ;;  %v11919_v29 = vunpack.i.h.bf16 %v14231_v46  ;;  %v14319_v11 = vpack.i.bf16 %v749_v57, %v748_v34 }
 0x102   :  { %12206 = vrot.lane.b32.xlu0 %v14115_v16, %s13372_s24  ;;  %v2909_v16 = vsel %vm34_vm0, %v13332_v9, %v11884_v50 }
 0x103   :  { %v14247_v2 = vpop.permute.xlu1 %11931  ;;  %v2974_v12 = vsel %vm2962_vm4, %v2909_v16, %v11894_v62  ;;  %v3167_v49 = vsel %vm18853_vm7, %v3102_v47, %v11919_v29 }
 0x104   :  { %v11927_v60 = vpop.permute.xlu0 %11926  ;;  %v3039_v28 = vsel %vm3027_vm5, %v2974_v12, %v11904_v3  ;;  %v11934_v41 = vunpack.i.h.bf16 %v14247_v2  ;;  %v11933_v22 = vunpack.i.l.bf16 %v14247_v2 }
 0x105   :  { %12221 = vrot.lane.b32.xlu1 %v14237_v52, %s13374_s26  ;;  %v11929_v36 = vunpack.i.h.bf16 %v11927_v60  ;;  %v11928_v4 = vunpack.i.l.bf16 %v11927_v60  ;;  %v3104_v0 = vsel %vm18855_vm6, %v3039_v28, %v11914_v7  ;;  %v3168_v60 = vsel %vm18853_vm7, %v3103_v54, %v11923_v44  ;;  %v190_v28 = vld [vmem:[%s18840_s0 + $0x170] sm:$0xff]  ;;  %v623_v7 = vld [vmem:[#allocation2 + $0x182] sm:$0xff] }
 0x106   :  { %12216 = vrot.lane.b32.xlu0 %v14117_v20, %s13374_s26  ;;  %v11918_v20 = vunpack.i.l.bf16 %v14231_v46  ;;  %v3169_v9 = vsel %vm18853_vm7, %v3104_v0, %v11924_v61  ;;  %255 = vst.msk [vmem:[#allocation2 + $0x271] sm:$0xff] %vm34_vm0, %v190_v28  ;;  %v14378_v61 = vld [vmem:[#allocation2 + $0x198] sm:$0xff]  ;;  %v14380_v44 = vld [vmem:[#allocation2 + $0x1a0] sm:$0xff]  ;;  %v14393_v57 = vpack.i.bf16 %v624_v38, %v623_v7 }
 0x107   :  { %v11942_v25 = vpop.permute.xlu1 %11941  ;;  %v3232_v51 = vsel %vm18854_vm8, %v3167_v49, %v11929_v36  ;;  %v3234_v13 = vsel %vm18854_vm8, %v3169_v9, %v11934_v41  ;;  %v287_v49 = vld [vmem:[#allocation2 + $0xa8] sm:$0xff]  ;;  %v288_v41 = vld [vmem:[#allocation2 + $0xb0] sm:$0xff] }
 0x108   :  { %v11937_v30 = vpop.permute.xlu0 %11936  ;;  %v3166_v48 = vsel %vm18853_vm7, %v3101_v43, %v11918_v20  ;;  %v11944_v45 = vunpack.i.h.bf16 %v11942_v25  ;;  %v11943_v58 = vunpack.i.l.bf16 %v11942_v25  ;;  %v191_v20 = vld [vmem:[%s18840_s0 + $0x178] sm:$0xff] }
 0x109   :  { %12231 = vrot.lane.b32.xlu1 %v14249_v37, %s13375_s27  ;;  %v11939_v39 = vunpack.i.h.bf16 %v11937_v30  ;;  %v11938_v42 = vunpack.i.l.bf16 %v11937_v30  ;;  %256 = vst.msk [vmem:[#allocation2 + $0x279] sm:$0xff] %vm34_vm0, %v191_v20  ;;  %v496_v30 = vld [vmem:[#allocation2 + $0x188] sm:$0xff] }
 0x10a   :  { %12226 = vrot.lane.b32.xlu0 %v14181_v24, %s13375_s27  ;;  %v3231_v24 = vsel %vm18854_vm8, %v3166_v48, %v11928_v4  ;;  %v3299_v17 = vsel %vm18852_vm9, %v3234_v13, %v11944_v45  ;;  %v560_v4 = vld [vmem:[#allocation2 + $0x189] sm:$0xff] }
 0x10b   :  { %v14297_v46 = vpop.permute.xlu1 %11951  ;;  %v3296_v62 = vsel %vm18852_vm9, %v3231_v24, %v11938_v42  ;;  %v3297_v63 = vsel %vm18852_vm9, %v3232_v51, %v11939_v39  ;;  %v286_v39 = vld [vmem:[#allocation2 + $0x98] sm:$0xff]  ;;  %v285_v24 = vld [vmem:[#allocation2 + $0x90] sm:$0xff]  ;;  %v14391_v34 = vpack.i.bf16 %v560_v4, %v559_v32 }
 0x10c   :  { %v11947_v50 = vpop.permute.xlu0 %11946  ;;  %v11954_v35 = vunpack.i.h.bf16 %v14297_v46  ;;  %v11953_v48 = vunpack.i.l.bf16 %v14297_v46 }
 0x10d   :  { %v11949_v55 = vunpack.i.h.bf16 %v11947_v50  ;;  %v11948_v56 = vunpack.i.l.bf16 %v11947_v50  ;;  %12241 = vrot.lane.b32.xlu1 %v14253_v6, %s13376_s28 }
 0x10e   :  { %12236 = vrot.lane.b32.xlu0 %v14211_v40, %s13376_s28  ;;  %v3233_v40 = vsel %vm18854_vm8, %v3168_v60, %v11933_v22  ;;  %v2911_v46 = vsel %vm34_vm0, %v286_v39, %v11954_v35 }
 0x10f   :  { %v3361_v2 = vsel %vm3352_vm2, %v3296_v62, %v11948_v56  ;;  %v3362_v3 = vsel %vm3352_vm2, %v3297_v63, %v11949_v55  ;;  %v14315_v5 = vpop.permute.xlu1 %11961  ;;  %v3298_v15 = vsel %vm18852_vm9, %v3233_v40, %v11943_v58 }
 0x110   :  { %v11957_v16 = vpop.permute.xlu0 %11956  ;;  %v3421_v10 = vpack.c.bf16 %v3362_v3, %v3361_v2  ;;  %v11964_v42 = vunpack.i.h.bf16 %v14315_v5  ;;  %v11963_v43 = vunpack.i.l.bf16 %v14315_v5  ;;  %v2910_v3 = vsel %vm34_vm0, %v285_v24, %v11953_v48 }
 0x111   :  { %v11959_v14 = vunpack.i.h.bf16 %v11957_v16  ;;  %v11958_v8 = vunpack.i.l.bf16 %v11957_v16  ;;  %12251 = vrot.lane.b32.xlu1 %v14255_v59, %s13377_s22 }
 0x112   :  { %12246 = vrot.lane.b32.xlu0 %v14237_v52, %s13377_s22  ;;  %11613 = vmatprep.mubr.msk.bf16.mxu0 %vm3476_vm10, %v3421_v10  ;;  %v2913_v63 = vsel %vm34_vm0, %v288_v41, %v11964_v42  ;;  %v2912_v54 = vsel %vm34_vm0, %v287_v49, %v11963_v43  ;;  %v753_v42 = vld [vmem:[#allocation2 + $0x1a1] sm:$0xff] }
 0x113   :  { %v3364_v18 = vsel %vm3352_vm2, %v3299_v17, %v11959_v14  ;;  %v3363_v19 = vsel %vm3352_vm2, %v3298_v15, %v11958_v8  ;;  %v14332_v12 = vpop.permute.xlu1 %11971 }
 0x114   :  { %v14334_v21 = vpop.permute.xlu0 %11966  ;;  %v3422_v33 = vpack.c.bf16 %v3364_v18, %v3363_v19  ;;  %v11974_v22 = vunpack.i.h.bf16 %v14332_v12  ;;  %v11973_v50 = vunpack.i.l.bf16 %v14332_v12 }
 0x115   :  { %12261 = vrot.lane.b32.xlu1 %v14319_v11, %s13378_s23  ;;  %v11969_v51 = vunpack.i.h.bf16 %v14334_v21  ;;  %v11968_v55 = vunpack.i.l.bf16 %v14334_v21 }
 0x116   :  { %12256 = vrot.lane.b32.xlu0 %v14249_v37, %s13378_s23  ;;  %11614 = vmatmul.mubr.msk.bf16.gmra.mrb[8].mxu0 %vm3476_vm10, %v3422_v33  ;;  %v2977_v5 = vsel %vm2962_vm4, %v2912_v54, %v11973_v50  ;;  %v2978_v60 = vsel %vm2962_vm4, %v2913_v63, %v11974_v22 }
 0x117   :  { %v14341_v52 = vpop.permute.xlu1 %11981  ;;  %v2976_v16 = vsel %vm2962_vm4, %v2911_v46, %v11969_v51  ;;  %v2975_v10 = vsel %vm2962_vm4, %v2910_v3, %v11968_v55  ;;  %v369_v3 = vld [vmem:[#allocation2 + $0x1b1] sm:$0xff] }
 0x118   :  { %v14343_v25 = vpop.permute.xlu0 %11976  ;;  %v11984_v45 = vunpack.i.h.bf16 %v14341_v52  ;;  %v11983_v58 = vunpack.i.l.bf16 %v14341_v52 }
 0x119   :  { %12271 = vrot.lane.b32.xlu1 %v14249_v37, %s13373_s25  ;;  %v495_v37 = vld [vmem:[#allocation2 + $0x180] sm:$0xff]  ;;  %v11979_v0 = vunpack.i.h.bf16 %v14343_v25  ;;  %v11978_v2 = vunpack.i.l.bf16 %v14343_v25 }
 0x11a   :  { %12266 = vrot.lane.b32.xlu0 %v14253_v6, %s13379_s1  ;;  %v14376_v47 = vpack.i.bf16 %v496_v30, %v495_v37  ;;  %v3042_v8 = vsel %vm3027_vm5, %v2977_v5, %v11983_v58  ;;  %v3043_v15 = vsel %vm3027_vm5, %v2978_v60, %v11984_v45  ;;  %v370_v5 = vld [vmem:[#allocation2 + $0x1b9] sm:$0xff] }
 0x11b   :  { %v14351_v27 = vpop.permute.xlu1 %11991  ;;  %v3041_v12 = vsel %vm3027_vm5, %v2976_v16, %v11979_v0 }
 0x11c   :  { %v14356_v29 = vpop.permute.xlu0 %11986  ;;  %v11993_v9 = vunpack.i.l.bf16 %v14351_v27  ;;  %v11994_v52 = vunpack.i.h.bf16 %v14351_v27 }
 0x11d   :  { %12281 = vrot.lane.b32.xlu1 %v14319_v11, %s13373_s25  ;;  %v11989_v40 = vunpack.i.h.bf16 %v14356_v29  ;;  %v11988_v13 = vunpack.i.l.bf16 %v14356_v29 }
 0x11e   :  { %12276 = vrot.lane.b32.xlu0 %v14349_v26, %s13379_s1  ;;  %v3107_v23 = vsel %vm18855_vm6, %v3042_v8, %v11993_v9  ;;  %v3108_v22 = vsel %vm18855_vm6, %v3043_v15, %v11994_v52  ;;  %v497_v52 = vld [vmem:[#allocation2 + $0x1c8] sm:$0xff] }
 0x11f   :  { %v14367_v31 = vpop.permute.xlu1 %12001  ;;  %v3106_v29 = vsel %vm18855_vm6, %v3041_v12, %v11989_v40  ;;  %v434_v12 = vld [vmem:[#allocation2 + $0x1ba] sm:$0xff] }
 0x120   :  { %v14370_v36 = vpop.permute.xlu0 %11996  ;;  %v12004_v20 = vunpack.i.h.bf16 %v14367_v31  ;;  %v12003_v37 = vunpack.i.l.bf16 %v14367_v31  ;;  %v752_v31 = vld [vmem:[#allocation2 + $0x199] sm:$0xff] }
 0x121   :  { %12291 = vrot.lane.b32.xlu1 %v14349_v26, %s13372_s24  ;;  %v11999_v17 = vunpack.i.h.bf16 %v14370_v36  ;;  %v11998_v18 = vunpack.i.l.bf16 %v14370_v36  ;;  %v12340_v58 = vpack.i.bf16 %v753_v42, %v752_v31  ;;  %v291_v42 = vld [vmem:[#allocation2 + $0xd8] sm:$0xff] }
 0x122   :  { %12286 = vrot.lane.b32.xlu0 %v14253_v6, %s13372_s24  ;;  %v12330_v6 = vpack.i.bf16 %v14380_v44, %v14378_v61  ;;  %v3172_v55 = vsel %vm18853_vm7, %v3107_v23, %v12003_v37  ;;  %v12350_v44 = vpack.i.bf16 %v370_v5, %v369_v3  ;;  %v564_v37 = vld [vmem:[#allocation2 + $0x1e9] sm:$0xff] }
 0x123   :  { %v14389_v56 = vpop.permute.xlu1 %12011  ;;  %v3171_v27 = vsel %vm18853_vm7, %v3106_v29, %v11999_v17 }
 0x124   :  { %v12007_v62 = vpop.permute.xlu0 %12006  ;;  %v12014_v35 = vunpack.i.h.bf16 %v14389_v56  ;;  %v12013_v36 = vunpack.i.l.bf16 %v14389_v56  ;;  %v3173_v56 = vsel %vm18853_vm7, %v3108_v22, %v12004_v20  ;;  %v563_v20 = vld [vmem:[#allocation2 + $0x1e1] sm:$0xff] }
 0x125   :  { %12301 = vrot.lane.b32.xlu1 %v14376_v47, %s13374_s26  ;;  %v12009_v21 = vunpack.i.h.bf16 %v12007_v62  ;;  %v12008_v33 = vunpack.i.l.bf16 %v12007_v62  ;;  %v290_v22 = vld [vmem:[#allocation2 + $0xc8] sm:$0xff] }
 0x126   :  { %12296 = vrot.lane.b32.xlu0 %v14255_v59, %s13374_s26  ;;  %v3040_v59 = vsel %vm3027_vm5, %v2975_v10, %v11978_v2  ;;  %v3238_v62 = vsel %vm18854_vm8, %v3173_v56, %v12014_v35 }
 0x127   :  { %v14416_v14 = vpop.permute.xlu1 %12021  ;;  %v3105_v28 = vsel %vm18855_vm6, %v3040_v59, %v11988_v13  ;;  %v3236_v7 = vsel %vm18854_vm8, %v3171_v27, %v12009_v21  ;;  %v816_v13 = vld [vmem:[#allocation2 + $0x19a] sm:$0xff]  ;;  %v433_v59 = vld [vmem:[#allocation2 + $0x1b2] sm:$0xff] }
 0x128   :  { %v12017_v19 = vpop.permute.xlu0 %12016  ;;  %v3170_v32 = vsel %vm18853_vm7, %v3105_v28, %v11998_v18  ;;  %v12024_v43 = vunpack.i.h.bf16 %v14416_v14  ;;  %v12023_v48 = vunpack.i.l.bf16 %v14416_v14  ;;  %v817_v14 = vld [vmem:[#allocation2 + $0x1a2] sm:$0xff]  ;;  %v435_v18 = vld [vmem:[#allocation2 + $0x1ca] sm:$0xff]  ;;  %v12365_v23 = vpack.i.bf16 %v434_v12, %v433_v59 }
 0x129   :  { %12311 = vrot.lane.b32.xlu1 %v14391_v34, %s13375_s27  ;;  %v12019_v53 = vunpack.i.h.bf16 %v12017_v19  ;;  %v12018_v25 = vunpack.i.l.bf16 %v12017_v19  ;;  %v12355_v17 = vpack.i.bf16 %v817_v14, %v816_v13 }
 0x12a   :  { %12306 = vrot.lane.b32.xlu0 %v14319_v11, %s13375_s27  ;;  %v3235_v11 = vsel %vm18854_vm8, %v3170_v32, %v12008_v33  ;;  %v3303_v2 = vsel %vm18852_vm9, %v3238_v62, %v12024_v43  ;;  %v627_v32 = vld [vmem:[#allocation2 + $0x1e2] sm:$0xff] }
 0x12b   :  { %v14434_v30 = vpop.permute.xlu1 %12031  ;;  %v3300_v49 = vsel %vm18852_vm9, %v3235_v11, %v12018_v25  ;;  %v3301_v41 = vsel %vm18852_vm9, %v3236_v7, %v12019_v53  ;;  %v499_v53 = vld [vmem:[#allocation2 + $0x1e0] sm:$0xff]  ;;  %v498_v25 = vld [vmem:[#allocation2 + $0x1d0] sm:$0xff]  ;;  %v692_v7 = vld [vmem:[#allocation2 + $0x1f8] sm:$0xff] }
 0x12c   :  { %v12027_v4 = vpop.permute.xlu0 %12026  ;;  %v628_v11 = vld [vmem:[#allocation2 + $0x1ea] sm:$0xff]  ;;  %v12033_v31 = vunpack.i.l.bf16 %v14434_v30  ;;  %v292_v43 = vld [vmem:[#allocation2 + $0xe0] sm:$0xff] }
 0x12d   :  { %v12029_v38 = vunpack.i.h.bf16 %v12027_v4  ;;  %v12028_v39 = vunpack.i.l.bf16 %v12027_v4  ;;  %12321 = vrot.lane.b32.xlu1 %v14393_v57, %s13376_s28  ;;  %v12375_v4 = vpack.i.bf16 %v498_v25, %v497_v52  ;;  %v192_v52 = vld [vmem:[%s18840_s0 + $0x180] sm:$0xff] }
 0x12e   :  { %12316 = vrot.lane.b32.xlu0 %v14349_v26, %s13376_s28  ;;  %v3237_v26 = vsel %vm18854_vm8, %v3172_v55, %v12013_v36  ;;  %v14555_v55 = vpack.i.bf16 %v564_v37, %v563_v20  ;;  %257 = vst.msk [vmem:[#allocation2 + $0x289] sm:$0xff] %vm34_vm0, %v192_v52  ;;  %v696_v52 = vld [vmem:[#allocation2 + $0x228] sm:$0xff] }
 0x12f   :  { %v3365_v50 = vsel %vm3352_vm2, %v3300_v49, %v12028_v39  ;;  %v3366_v24 = vsel %vm3352_vm2, %v3301_v41, %v12029_v38  ;;  %v14453_v51 = vpop.permute.xlu1 %12041  ;;  %v3302_v0 = vsel %vm18852_vm9, %v3237_v26, %v12023_v48  ;;  %v693_v38 = vld [vmem:[#allocation2 + $0x200] sm:$0xff]  ;;  %v12034_v39 = vunpack.i.h.bf16 %v14434_v30 }
 0x130   :  { %v12037_v46 = vpop.permute.xlu0 %12036  ;;  %v3423_v45 = vpack.c.bf16 %v3366_v24, %v3365_v50  ;;  %v12044_v27 = vunpack.i.h.bf16 %v14453_v51  ;;  %v12043_v35 = vunpack.i.l.bf16 %v14453_v51  ;;  %v289_v41 = vld [vmem:[#allocation2 + $0xc0] sm:$0xff] }
 0x131   :  { %v12039_v63 = vunpack.i.h.bf16 %v12037_v46  ;;  %v12038_v54 = vunpack.i.l.bf16 %v12037_v46  ;;  %12331 = vrot.lane.b32.xlu1 %v12330_v6, %s13377_s22  ;;  %v372_v6 = vld [vmem:[#allocation2 + $0x1d1] sm:$0xff] }
 0x132   :  { %12326 = vrot.lane.b32.xlu0 %v14376_v47, %s13377_s22  ;;  %11617 = vmatprep.mubr.msk.bf16.mxu0 %vm3476_vm10, %v3423_v45  ;;  %v371_v47 = vld [vmem:[#allocation2 + $0x1c9] sm:$0xff]  ;;  %v14559_v45 = vpack.i.bf16 %v628_v11, %v627_v32  ;;  %v2917_v26 = vsel %vm34_vm0, %v292_v43, %v12044_v27  ;;  %v2916_v62 = vsel %vm34_vm0, %v291_v42, %v12043_v35 }
 0x133   :  { %v3368_v60 = vsel %vm3352_vm2, %v3303_v2, %v12039_v63  ;;  %v3367_v9 = vsel %vm3352_vm2, %v3302_v0, %v12038_v54  ;;  %v14510_v16 = vpop.permute.xlu1 %12051  ;;  %v14523_v15 = vpack.i.bf16 %v372_v6, %v371_v47  ;;  %v2915_v0 = vsel %vm34_vm0, %v290_v22, %v12034_v39 }
 0x134   :  { %v14512_v10 = vpop.permute.xlu0 %12046  ;;  %v3424_v61 = vpack.c.bf16 %v3368_v60, %v3367_v9  ;;  %v12054_v48 = vunpack.i.h.bf16 %v14510_v16  ;;  %v12053_v49 = vunpack.i.l.bf16 %v14510_v16  ;;  %v2914_v2 = vsel %vm34_vm0, %v289_v41, %v12033_v31 }
 0x135   :  { %12341 = vrot.lane.b32.xlu1 %v12340_v58, %s13378_s23  ;;  %v12049_v50 = vunpack.i.h.bf16 %v14512_v10  ;;  %v12048_v24 = vunpack.i.l.bf16 %v14512_v10  ;;  %v14561_v58 = vpack.i.bf16 %v693_v38, %v692_v7  ;;  %v756_v7 = vld [vmem:[#allocation2 + $0x1f9] sm:$0xff]  ;;  %v757_v38 = vld [vmem:[#allocation2 + $0x201] sm:$0xff] }
 0x136   :  { %12336 = vrot.lane.b32.xlu0 %v14391_v34, %s13378_s23  ;;  %11618 = vmatmul.mubr.msk.bf16.gmra.mrb[12].mxu0 %vm3476_vm10, %v3424_v61  ;;  %v436_v34 = vld [vmem:[#allocation2 + $0x1d2] sm:$0xff]  ;;  %v2981_v3 = vsel %vm2962_vm4, %v2916_v62, %v12053_v49  ;;  %v2982_v5 = vsel %vm2962_vm4, %v2917_v26, %v12054_v48 }
 0x137   :  { %v14518_v40 = vpop.permute.xlu1 %12061  ;;  %v14533_v33 = vpack.i.bf16 %v436_v34, %v435_v18  ;;  %v2980_v60 = vsel %vm2962_vm4, %v2915_v0, %v12049_v50  ;;  %v2979_v9 = vsel %vm2962_vm4, %v2914_v2, %v12048_v24 }
 0x138   :  { %v14520_v8 = vpop.permute.xlu0 %12056  ;;  %v12064_v30 = vunpack.i.h.bf16 %v14518_v40  ;;  %v12063_v56 = vunpack.i.l.bf16 %v14518_v40 }
 0x139   :  { %12351 = vrot.lane.b32.xlu1 %v12350_v44, %s13373_s25  ;;  %v12059_v63 = vunpack.i.h.bf16 %v14520_v8  ;;  %v12058_v54 = vunpack.i.l.bf16 %v14520_v8 }
 0x13a   :  { %12346 = vrot.lane.b32.xlu0 %v14393_v57, %s13379_s1  ;;  %v500_v57 = vld [vmem:[#allocation2 + $0x1e8] sm:$0xff]  ;;  %v3046_v44 = vsel %vm3027_vm5, %v2981_v3, %v12063_v56  ;;  %v3047_v47 = vsel %vm3027_vm5, %v2982_v5, %v12064_v30 }
 0x13b   :  { %v14527_v19 = vpop.permute.xlu1 %12071  ;;  %v14544_v36 = vpack.i.bf16 %v500_v57, %v499_v53  ;;  %v3044_v14 = vsel %vm3027_vm5, %v2979_v9, %v12058_v54  ;;  %v3045_v8 = vsel %vm3027_vm5, %v2980_v60, %v12059_v63 }
 0x13c   :  { %v14529_v21 = vpop.permute.xlu0 %12066  ;;  %v12074_v34 = vunpack.i.h.bf16 %v14527_v19  ;;  %v12073_v59 = vunpack.i.l.bf16 %v14527_v19 }
 0x13d   :  { %12361 = vrot.lane.b32.xlu1 %v14523_v15, %s13373_s25  ;;  %v12069_v16 = vunpack.i.h.bf16 %v14529_v21  ;;  %v12068_v10 = vunpack.i.l.bf16 %v14529_v21 }
 0x13e   :  { %12356 = vrot.lane.b32.xlu0 %v12355_v17, %s13379_s1  ;;  %v3111_v48 = vsel %vm18855_vm6, %v3046_v44, %v12073_v59  ;;  %v3112_v49 = vsel %vm18855_vm6, %v3047_v47, %v12074_v34 }
 0x13f   :  { %v14536_v28 = vpop.permute.xlu1 %12081  ;;  %v3109_v53 = vsel %vm18855_vm6, %v3044_v14, %v12068_v10  ;;  %v3110_v57 = vsel %vm18855_vm6, %v3045_v8, %v12069_v16  ;;  %v820_v16 = vld [vmem:[#allocation2 + $0x1fa] sm:$0xff]  ;;  %v821_v10 = vld [vmem:[#allocation2 + $0x202] sm:$0xff]  ;;  %v567_v8 = vld [vmem:[#allocation2 + $0x211] sm:$0xff] }
 0x140   :  { %v14538_v29 = vpop.permute.xlu0 %12076  ;;  %v12084_v25 = vunpack.i.h.bf16 %v14536_v28  ;;  %v12083_v19 = vunpack.i.l.bf16 %v14536_v28  ;;  %v14654_v44 = vpack.i.bf16 %v821_v10, %v820_v16 }
 0x141   :  { %12371 = vrot.lane.b32.xlu1 %v14533_v33, %s13372_s24  ;;  %v12079_v6 = vunpack.i.h.bf16 %v14538_v29  ;;  %v12078_v40 = vunpack.i.l.bf16 %v14538_v29 }
 0x142   :  { %12366 = vrot.lane.b32.xlu0 %v12365_v23, %s13372_s24  ;;  %v193_v23 = vld [vmem:[%s18840_s0 + $0x188] sm:$0xff]  ;;  %v3176_v24 = vsel %vm18853_vm7, %v3111_v48, %v12083_v19  ;;  %v296_v19 = vld [vmem:[#allocation2 + $0x110] sm:$0xff] }
 0x143   :  { %v14553_v51 = vpop.permute.xlu1 %12091  ;;  %258 = vst.msk [vmem:[#allocation2 + $0x291] sm:$0xff] %vm34_vm0, %v193_v23  ;;  %v3175_v20 = vsel %vm18853_vm7, %v3110_v57, %v12079_v6  ;;  %v697_v23 = vld [vmem:[#allocation2 + $0x230] sm:$0xff] }
 0x144   :  { %v12087_v46 = vpop.permute.xlu0 %12086  ;;  %v12094_v37 = vunpack.i.h.bf16 %v14553_v51  ;;  %v12093_v32 = vunpack.i.l.bf16 %v14553_v51  ;;  %v3177_v51 = vsel %vm18853_vm7, %v3112_v49, %v12084_v25  ;;  %v295_v25 = vld [vmem:[#allocation2 + $0x108] sm:$0xff] }
 0x145   :  { %12381 = vrot.lane.b32.xlu1 %v14544_v36, %s13374_s26  ;;  %v12089_v17 = vunpack.i.h.bf16 %v12087_v46  ;;  %v12088_v18 = vunpack.i.l.bf16 %v12087_v46  ;;  %v14624_v46 = vpack.i.bf16 %v757_v38, %v756_v7 }
 0x146   :  { %12376 = vrot.lane.b32.xlu0 %v12375_v4, %s13374_s26  ;;  %v3242_v26 = vsel %vm18854_vm8, %v3177_v51, %v12094_v37  ;;  %v194_v37 = vld [vmem:[%s18840_s0 + $0x190] sm:$0xff] }
 0x147   :  { %v12102_v61 = vpop.permute.xlu1 %12101  ;;  %v3240_v4 = vsel %vm18854_vm8, %v3175_v20, %v12089_v17  ;;  %v568_v17 = vld [vmem:[#allocation2 + $0x219] sm:$0xff]  ;;  %259 = vst.msk [vmem:[#allocation2 + $0x2a1] sm:$0xff] %vm34_vm0, %v194_v37 }
 0x148   :  { %v12097_v13 = vpop.permute.xlu0 %12096  ;;  %v12104_v39 = vunpack.i.h.bf16 %v12102_v61  ;;  %v12103_v31 = vunpack.i.l.bf16 %v12102_v61 }
 0x149   :  { %12391 = vrot.lane.b32.xlu1 %v14555_v55, %s13375_s27  ;;  %v12099_v12 = vunpack.i.h.bf16 %v12097_v13  ;;  %v12098_v21 = vunpack.i.l.bf16 %v12097_v13  ;;  %v504_v13 = vld [vmem:[#allocation2 + $0x218] sm:$0xff] }
 0x14a   :  { %12386 = vrot.lane.b32.xlu0 %v14523_v15, %s13375_s27  ;;  %v3174_v15 = vsel %vm18853_vm7, %v3109_v53, %v12078_v40  ;;  %v3307_v0 = vsel %vm18852_vm9, %v3242_v26, %v12104_v39  ;;  %v503_v40 = vld [vmem:[#allocation2 + $0x210] sm:$0xff] }
 0x14b   :  { %v14600_v29 = vpop.permute.xlu1 %12111  ;;  %v3239_v35 = vsel %vm18854_vm8, %v3174_v15, %v12088_v18  ;;  %v3305_v43 = vsel %vm18852_vm9, %v3240_v4, %v12099_v12  ;;  %v631_v18 = vld [vmem:[#allocation2 + $0x212] sm:$0xff]  ;;  %v14672_v12 = vpack.i.bf16 %v504_v13, %v503_v40 }
 0x14c   :  { %v12107_v27 = vpop.permute.xlu0 %12106  ;;  %v3304_v42 = vsel %vm18852_vm9, %v3239_v35, %v12098_v21  ;;  %v632_v21 = vld [vmem:[#allocation2 + $0x21a] sm:$0xff]  ;;  %v12114_v53 = vunpack.i.h.bf16 %v14600_v29  ;;  %v12113_v57 = vunpack.i.l.bf16 %v14600_v29 }
 0x14d   :  { %v12109_v28 = vunpack.i.h.bf16 %v12107_v27  ;;  %v12108_v11 = vunpack.i.l.bf16 %v12107_v27  ;;  %12401 = vrot.lane.b32.xlu1 %v14559_v45, %s13376_s28  ;;  %v294_v27 = vld [vmem:[#allocation2 + $0xf8] sm:$0xff]  ;;  %v14695_v39 = vpack.i.bf16 %v632_v21, %v631_v18 }
 0x14e   :  { %12396 = vrot.lane.b32.xlu0 %v14533_v33, %s13376_s28  ;;  %v3241_v33 = vsel %vm18854_vm8, %v3176_v24, %v12093_v32  ;;  %v293_v32 = vld [vmem:[#allocation2 + $0xf0] sm:$0xff] }
 0x14f   :  { %v3369_v41 = vsel %vm3352_vm2, %v3304_v42, %v12108_v11  ;;  %v3370_v22 = vsel %vm3352_vm2, %v3305_v43, %v12109_v28  ;;  %v14620_v50 = vpop.permute.xlu1 %12121  ;;  %v3306_v54 = vsel %vm18852_vm9, %v3241_v33, %v12103_v31  ;;  %v14687_v28 = vpack.i.bf16 %v568_v17, %v567_v8  ;;  %v195_v11 = vld [vmem:[%s18840_s0 + $0x198] sm:$0xff] }
 0x150   :  { %v12117_v30 = vpop.permute.xlu0 %12116  ;;  %v3425_v56 = vpack.c.bf16 %v3370_v22, %v3369_v41  ;;  %v12124_v34 = vunpack.i.h.bf16 %v14620_v50  ;;  %v12123_v59 = vunpack.i.l.bf16 %v14620_v50  ;;  %v14697_v31 = vpack.i.bf16 %v697_v23, %v696_v52  ;;  %260 = vst.msk [vmem:[#allocation2 + $0x2a9] sm:$0xff] %vm34_vm0, %v195_v11  ;;  %v761_v23 = vld [vmem:[#allocation2 + $0x231] sm:$0xff] }
 0x151   :  { %v12119_v62 = vunpack.i.h.bf16 %v12117_v30  ;;  %v12118_v63 = vunpack.i.l.bf16 %v12117_v30  ;;  %12411 = vrot.lane.b32.xlu1 %v14561_v58, %s13377_s22  ;;  %v2919_v41 = vsel %vm34_vm0, %v294_v27, %v12114_v53  ;;  %v2918_v22 = vsel %vm34_vm0, %v293_v32, %v12113_v57 }
 0x152   :  { %12406 = vrot.lane.b32.xlu0 %v14544_v36, %s13377_s22  ;;  %11621 = vmatprep.mubr.msk.bf16.mxu0 %vm3476_vm10, %v3425_v56  ;;  %v2921_v42 = vsel %vm34_vm0, %v296_v19, %v12124_v34  ;;  %v2920_v43 = vsel %vm34_vm0, %v295_v25, %v12123_v59 }
 0x153   :  { %v3372_v2 = vsel %vm3352_vm2, %v3307_v0, %v12119_v62  ;;  %v3371_v3 = vsel %vm3352_vm2, %v3306_v54, %v12118_v63  ;;  %v14637_v5 = vpop.permute.xlu1 %12131 }
 0x154   :  { %v14639_v60 = vpop.permute.xlu0 %12126  ;;  %v3426_v9 = vpack.c.bf16 %v3372_v2, %v3371_v3  ;;  %v12134_v15 = vunpack.i.h.bf16 %v14637_v5  ;;  %v12133_v20 = vunpack.i.l.bf16 %v14637_v5 }
 0x155   :  { %12421 = vrot.lane.b32.xlu1 %v14624_v46, %s13378_s23  ;;  %v12129_v35 = vunpack.i.h.bf16 %v14639_v60  ;;  %v12128_v4 = vunpack.i.l.bf16 %v14639_v60 }
 0x156   :  { %12416 = vrot.lane.b32.xlu0 %v14555_v55, %s13378_s23  ;;  %11622 = vmatmul.mubr.msk.bf16.gmra.mrb[16].mxu0 %vm3476_vm10, %v3426_v9  ;;  %v2985_v50 = vsel %vm2962_vm4, %v2920_v43, %v12133_v20  ;;  %v2986_v24 = vsel %vm2962_vm4, %v2921_v42, %v12134_v15 }
 0x157   :  { %v14646_v36 = vpop.permute.xlu1 %12141  ;;  %v2984_v51 = vsel %vm2962_vm4, %v2919_v41, %v12129_v35  ;;  %v2983_v30 = vsel %vm2962_vm4, %v2918_v22, %v12128_v4 }
 0x158   :  { %v14648_v61 = vpop.permute.xlu0 %12136  ;;  %v12143_v7 = vunpack.i.l.bf16 %v14646_v36 }
 0x159   :  { %12431 = vrot.lane.b32.xlu1 %v14555_v55, %s13373_s25  ;;  %v12139_v48 = vunpack.i.h.bf16 %v14648_v61  ;;  %v12138_v49 = vunpack.i.l.bf16 %v14648_v61 }
 0x15a   :  { %12426 = vrot.lane.b32.xlu0 %v14559_v45, %s13379_s1  ;;  %v3050_v62 = vsel %vm3027_vm5, %v2985_v50, %v12143_v7 }
 0x15b   :  { %v14656_v47 = vpop.permute.xlu1 %12151  ;;  %v3049_v3 = vsel %vm3027_vm5, %v2984_v51, %v12139_v48  ;;  %v824_v51 = vld [vmem:[#allocation2 + $0x22a] sm:$0xff] }
 0x15c   :  { %v14658_v6 = vpop.permute.xlu0 %12146  ;;  %v12154_v9 = vunpack.i.h.bf16 %v14656_v47 }
 0x15d   :  { %12441 = vrot.lane.b32.xlu1 %v14624_v46, %s13373_s25  ;;  %v12149_v56 = vunpack.i.h.bf16 %v14658_v6  ;;  %v12148_v33 = vunpack.i.l.bf16 %v14658_v6 }
 0x15e   :  { %12436 = vrot.lane.b32.xlu0 %v14654_v44, %s13379_s1 }
 0x15f   :  { %v14664_v14 = vpop.permute.xlu1 %12161  ;;  %v3114_v6 = vsel %vm18855_vm6, %v3049_v3, %v12149_v56  ;;  %v635_v3 = vld [vmem:[#allocation2 + $0x242] sm:$0xff] }
 0x160   :  { %v14666_v55 = vpop.permute.xlu0 %12156  ;;  %v12164_v40 = vunpack.i.h.bf16 %v14664_v14  ;;  %v12163_v13 = vunpack.i.l.bf16 %v14664_v14  ;;  %v760_v14 = vld [vmem:[#allocation2 + $0x229] sm:$0xff] }
 0x161   :  { %12451 = vrot.lane.b32.xlu1 %v14654_v44, %s13372_s24  ;;  %v12159_v54 = vunpack.i.h.bf16 %v14666_v55  ;;  %v12158_v0 = vunpack.i.l.bf16 %v14666_v55 }
 0x162   :  { %12446 = vrot.lane.b32.xlu0 %v14559_v45, %s13372_s24  ;;  %v12144_v45 = vunpack.i.h.bf16 %v14646_v36  ;;  %v12153_v36 = vunpack.i.l.bf16 %v14656_v47 }
 0x163   :  { %v14685_v29 = vpop.permute.xlu1 %12171  ;;  %v3179_v17 = vsel %vm18853_vm7, %v3114_v6, %v12159_v54  ;;  %v508_v54 = vld [vmem:[#allocation2 + $0x248] sm:$0xff] }
 0x164   :  { %v12167_v38 = vpop.permute.xlu0 %12166  ;;  %v3051_v63 = vsel %vm3027_vm5, %v2986_v24, %v12144_v45  ;;  %v12174_v47 = vunpack.i.h.bf16 %v14685_v29  ;;  %v12173_v18 = vunpack.i.l.bf16 %v14685_v29  ;;  %v3115_v15 = vsel %vm18855_vm6, %v3050_v62, %v12153_v36 }
 0x165   :  { %12461 = vrot.lane.b32.xlu1 %v14672_v12, %s13374_s26  ;;  %v12169_v5 = vunpack.i.h.bf16 %v12167_v38  ;;  %v12168_v60 = vunpack.i.l.bf16 %v12167_v38  ;;  %v3116_v20 = vsel %vm18855_vm6, %v3051_v63, %v12154_v9  ;;  %v3180_v35 = vsel %vm18853_vm7, %v3115_v15, %v12163_v13  ;;  %v507_v63 = vld [vmem:[#allocation2 + $0x240] sm:$0xff] }
 0x166   :  { %12456 = vrot.lane.b32.xlu0 %v14561_v58, %s13374_s26  ;;  %v3048_v58 = vsel %vm3027_vm5, %v2983_v30, %v12138_v49  ;;  %v3181_v4 = vsel %vm18853_vm7, %v3116_v20, %v12164_v40  ;;  %v14754_v45 = vpack.i.bf16 %v761_v23, %v760_v14  ;;  %v825_v30 = vld [vmem:[#allocation2 + $0x232] sm:$0xff]  ;;  %v300_v13 = vld [vmem:[#allocation2 + $0x140] sm:$0xff] }
 0x167   :  { %v12182_v26 = vpop.permute.xlu1 %12181  ;;  %v3113_v61 = vsel %vm18855_vm6, %v3048_v58, %v12148_v33  ;;  %v3244_v59 = vsel %vm18854_vm8, %v3179_v17, %v12169_v5  ;;  %v3246_v7 = vsel %vm18854_vm8, %v3181_v4, %v12174_v47  ;;  %v14784_v33 = vpack.i.bf16 %v825_v30, %v824_v51  ;;  %v572_v58 = vld [vmem:[#allocation2 + $0x249] sm:$0xff]  ;;  %v196_v47 = vld [vmem:[%s18840_s0 + $0x1a0] sm:$0xff] }
 0x168   :  { %v12177_v2 = vpop.permute.xlu0 %12176  ;;  %v3178_v8 = vsel %vm18853_vm7, %v3113_v61, %v12158_v0  ;;  %v12184_v53 = vunpack.i.h.bf16 %v12182_v26  ;;  %v12183_v57 = vunpack.i.l.bf16 %v12182_v26  ;;  %v636_v5 = vld [vmem:[#allocation2 + $0x24a] sm:$0xff]  ;;  %v701_v61 = vld [vmem:[#allocation2 + $0x260] sm:$0xff]  ;;  %261 = vst.msk [vmem:[#allocation2 + $0x2b9] sm:$0xff] %vm34_vm0, %v196_v47 }
 0x169   :  { %12471 = vrot.lane.b32.xlu1 %v14687_v28, %s13375_s27  ;;  %v12179_v16 = vunpack.i.h.bf16 %v12177_v2  ;;  %v12178_v10 = vunpack.i.l.bf16 %v12177_v2  ;;  %v14822_v14 = vpack.i.bf16 %v636_v5, %v635_v3 }
 0x16a   :  { %12466 = vrot.lane.b32.xlu0 %v14624_v46, %s13375_s27  ;;  %v3243_v46 = vsel %vm18854_vm8, %v3178_v8, %v12168_v60  ;;  %v3311_v48 = vsel %vm18852_vm9, %v3246_v7, %v12184_v53  ;;  %v299_v60 = vld [vmem:[#allocation2 + $0x138] sm:$0xff] }
 0x16b   :  { %v14732_v55 = vpop.permute.xlu1 %12191  ;;  %v3308_v25 = vsel %vm18852_vm9, %v3243_v46, %v12178_v10  ;;  %v3309_v19 = vsel %vm18852_vm9, %v3244_v59, %v12179_v16  ;;  %v14802_v16 = vpack.i.bf16 %v508_v54, %v507_v63  ;;  %v700_v10 = vld [vmem:[#allocation2 + $0x258] sm:$0xff]  ;;  %v298_v46 = vld [vmem:[#allocation2 + $0x128] sm:$0xff] }
 0x16c   :  { %v12187_v34 = vpop.permute.xlu0 %12186  ;;  %v12194_v6 = vunpack.i.h.bf16 %v14732_v55  ;;  %v12193_v40 = vunpack.i.l.bf16 %v14732_v55 }
 0x16d   :  { %v12189_v21 = vunpack.i.h.bf16 %v12187_v34  ;;  %v12188_v52 = vunpack.i.l.bf16 %v12187_v34  ;;  %12481 = vrot.lane.b32.xlu1 %v14695_v39, %s13376_s28  ;;  %v297_v34 = vld [vmem:[#allocation2 + $0x120] sm:$0xff] }
 0x16e   :  { %12476 = vrot.lane.b32.xlu0 %v14654_v44, %s13376_s28  ;;  %v3245_v44 = vsel %vm18854_vm8, %v3180_v35, %v12173_v18  ;;  %v197_v18 = vld [vmem:[%s18840_s0 + $0x1a8] sm:$0xff] }
 0x16f   :  { %v3373_v37 = vsel %vm3352_vm2, %v3308_v25, %v12188_v52  ;;  %v3374_v32 = vsel %vm3352_vm2, %v3309_v19, %v12189_v21  ;;  %v14750_v27 = vpop.permute.xlu1 %12201  ;;  %v3310_v43 = vsel %vm18852_vm9, %v3245_v44, %v12183_v57  ;;  %262 = vst.msk [vmem:[#allocation2 + $0x2c1] sm:$0xff] %vm34_vm0, %v197_v18  ;;  %v14828_v57 = vpack.i.bf16 %v701_v61, %v700_v10  ;;  %v765_v10 = vld [vmem:[#allocation2 + $0x261] sm:$0xff] }
 0x170   :  { %v12197_v29 = vpop.permute.xlu0 %12196  ;;  %v3427_v11 = vpack.c.bf16 %v3374_v32, %v3373_v37  ;;  %v12204_v9 = vunpack.i.h.bf16 %v14750_v27  ;;  %v12203_v36 = vunpack.i.l.bf16 %v14750_v27  ;;  %v2923_v37 = vsel %vm34_vm0, %v298_v46, %v12194_v6 }
 0x171   :  { %v12199_v38 = vunpack.i.h.bf16 %v12197_v29  ;;  %v12198_v42 = vunpack.i.l.bf16 %v12197_v29  ;;  %12491 = vrot.lane.b32.xlu1 %v14697_v31, %s13377_s22  ;;  %v2922_v32 = vsel %vm34_vm0, %v297_v34, %v12193_v40 }
 0x172   :  { %12486 = vrot.lane.b32.xlu0 %v14672_v12, %s13377_s22  ;;  %11625 = vmatprep.mubr.msk.bf16.mxu0 %vm3476_vm10, %v3427_v11  ;;  %v2925_v25 = vsel %vm34_vm0, %v300_v13, %v12204_v9  ;;  %v2924_v19 = vsel %vm34_vm0, %v299_v60, %v12203_v36 }
 0x173   :  { %v3376_v49 = vsel %vm3352_vm2, %v3311_v48, %v12199_v38  ;;  %v3375_v41 = vsel %vm3352_vm2, %v3310_v43, %v12198_v42  ;;  %v14767_v22 = vpop.permute.xlu1 %12211 }
 0x174   :  { %v14769_v50 = vpop.permute.xlu0 %12206  ;;  %v3428_v24 = vpack.c.bf16 %v3376_v49, %v3375_v41  ;;  %v12214_v8 = vunpack.i.h.bf16 %v14767_v22  ;;  %v12213_v17 = vunpack.i.l.bf16 %v14767_v22 }
 0x175   :  { %12501 = vrot.lane.b32.xlu1 %v14754_v45, %s13378_s23  ;;  %v12209_v55 = vunpack.i.h.bf16 %v14769_v50  ;;  %v12208_v59 = vunpack.i.l.bf16 %v14769_v50 }
 0x176   :  { %12496 = vrot.lane.b32.xlu0 %v14687_v28, %s13378_s23  ;;  %11626 = vmatmul.mubr.msk.bf16.gmra.mrb[20].mxu0 %vm3476_vm10, %v3428_v24  ;;  %v2989_v27 = vsel %vm2962_vm4, %v2924_v19, %v12213_v17  ;;  %v2990_v35 = vsel %vm2962_vm4, %v2925_v25, %v12214_v8 }
 0x177   :  { %v14776_v12 = vpop.permute.xlu1 %12221  ;;  %v2988_v4 = vsel %vm2962_vm4, %v2923_v37, %v12209_v55  ;;  %v2987_v29 = vsel %vm2962_vm4, %v2922_v32, %v12208_v59  ;;  %v3998_v32 = vlaneseq }
 0x178   :  { %v14778_v56 = vpop.permute.xlu0 %12216  ;;  %v12223_v23 = vunpack.i.l.bf16 %v14776_v12 }
 0x179   :  { %12511 = vrot.lane.b32.xlu1 %v14687_v28, %s13373_s25  ;;  %v571_v28 = vld [vmem:[#allocation2 + $0x241] sm:$0xff]  ;;  %v12219_v15 = vunpack.i.h.bf16 %v14778_v56  ;;  %v12218_v20 = vunpack.i.l.bf16 %v14778_v56 }
 0x17a   :  { %12506 = vrot.lane.b32.xlu0 %v14695_v39, %s13379_s1  ;;  %v14820_v52 = vpack.i.bf16 %v572_v58, %v571_v28  ;;  %v3054_v38 = vsel %vm3027_vm5, %v2989_v27, %v12223_v23 }
 0x17b   :  { %v14786_v26 = vpop.permute.xlu1 %12231  ;;  %v3053_v41 = vsel %vm3027_vm5, %v2988_v4, %v12219_v15 }
 0x17c   :  { %v14788_v62 = vpop.permute.xlu0 %12226  ;;  %v12234_v24 = vunpack.i.h.bf16 %v14786_v26 }
 0x17d   :  { %12521 = vrot.lane.b32.xlu1 %v14754_v45, %s13373_s25  ;;  %v12229_v11 = vunpack.i.h.bf16 %v14788_v62  ;;  %v12228_v44 = vunpack.i.l.bf16 %v14788_v62 }
 0x17e   :  { %12516 = vrot.lane.b32.xlu0 %v14784_v33, %s13379_s1 }
 0x17f   :  { %v14794_v0 = vpop.permute.xlu1 %12241  ;;  %v3118_v62 = vsel %vm18855_vm6, %v3053_v41, %v12229_v11  ;;  %v640_v41 = vld [vmem:[#allocation2 + $0x27a] sm:$0xff] }
 0x180   :  { %v14796_v2 = vpop.permute.xlu0 %12236  ;;  %v12244_v63 = vunpack.i.h.bf16 %v14794_v0  ;;  %v12243_v54 = vunpack.i.l.bf16 %v14794_v0  ;;  %v764_v0 = vld [vmem:[#allocation2 + $0x259] sm:$0xff] }
 0x181   :  { %12531 = vrot.lane.b32.xlu1 %v14784_v33, %s13372_s24  ;;  %v12239_v43 = vunpack.i.h.bf16 %v14796_v2  ;;  %v12238_v48 = vunpack.i.l.bf16 %v14796_v2 }
 0x182   :  { %12526 = vrot.lane.b32.xlu0 %v14695_v39, %s13372_s24  ;;  %v12224_v39 = vunpack.i.h.bf16 %v14776_v12  ;;  %v12233_v12 = vunpack.i.l.bf16 %v14786_v26 }
 0x183   :  { %v14818_v21 = vpop.permute.xlu1 %12251  ;;  %v3183_v58 = vsel %vm18853_vm7, %v3118_v62, %v12239_v43  ;;  %v576_v43 = vld [vmem:[#allocation2 + $0x279] sm:$0xff] }
 0x184   :  { %v12247_v53 = vpop.permute.xlu0 %12246  ;;  %v3055_v42 = vsel %vm3027_vm5, %v2990_v35, %v12224_v39  ;;  %v12254_v26 = vunpack.i.h.bf16 %v14818_v21  ;;  %v12253_v3 = vunpack.i.l.bf16 %v14818_v21  ;;  %v3119_v8 = vsel %vm18855_vm6, %v3054_v38, %v12233_v12  ;;  %v511_v38 = vld [vmem:[#allocation2 + $0x270] sm:$0xff] }
 0x185   :  { %12541 = vrot.lane.b32.xlu1 %v14802_v16, %s13374_s26  ;;  %v12249_v22 = vunpack.i.h.bf16 %v12247_v53  ;;  %v12248_v50 = vunpack.i.l.bf16 %v12247_v53  ;;  %v3120_v17 = vsel %vm18855_vm6, %v3055_v42, %v12234_v24  ;;  %v3184_v46 = vsel %vm18853_vm7, %v3119_v8, %v12243_v54  ;;  %v512_v42 = vld [vmem:[#allocation2 + $0x278] sm:$0xff]  ;;  %v768_v12 = vld [vmem:[#allocation2 + $0x289] sm:$0xff] }
 0x186   :  { %12536 = vrot.lane.b32.xlu0 %v14697_v31, %s13374_s26  ;;  %v3052_v31 = vsel %vm3027_vm5, %v2987_v29, %v12218_v20  ;;  %v3185_v55 = vsel %vm18853_vm7, %v3120_v17, %v12244_v63  ;;  %v14884_v39 = vpack.i.bf16 %v765_v10, %v764_v0  ;;  %v13380_v20 = vmov 1983009808   ;;  %v833_v62 = vld [vmem:[#allocation2 + $0x292] sm:$0xff]  ;;  %v515_v63 = vld [vmem:[#allocation2 + $0x2a0] sm:$0xff]  ;;  %v516_v54 = vld [vmem:[#allocation2 + $0x2a8] sm:$0xff] }
 0x187   :  { %v12262_v7 = vpop.permute.xlu1 %12261  ;;  %v3117_v56 = vsel %vm18855_vm6, %v3052_v31, %v12228_v44  ;;  %v3248_v60 = vsel %vm18854_vm8, %v3183_v58, %v12249_v22  ;;  %v3250_v23 = vsel %vm18854_vm8, %v3185_v55, %v12254_v26  ;;  %v3996_v37 = vunpack.c.l.s4 %v13380_v20  ;;  %v828_v44 = vld [vmem:[#allocation2 + $0x25a] sm:$0xff]  ;;  %v704_v22 = vld [vmem:[#allocation2 + $0x288] sm:$0xff] }
 0x188   :  { %v12257_v49 = vpop.permute.xlu0 %12256  ;;  %v3182_v2 = vsel %vm18853_vm7, %v3117_v56, %v12238_v48  ;;  %v12264_v61 = vunpack.i.h.bf16 %v12262_v7  ;;  %v12263_v6 = vunpack.i.l.bf16 %v12262_v7  ;;  %v829_v7 = vld [vmem:[#allocation2 + $0x262] sm:$0xff]  ;;  %v639_v48 = vld [vmem:[#allocation2 + $0x272] sm:$0xff]  ;;  %v3999_v31 = vshrl.u32 %v3998_v32, 7 }
 0x189   :  { %12551 = vrot.lane.b32.xlu1 %v14820_v52, %s13375_s27  ;;  %v12259_v51 = vunpack.i.h.bf16 %v12257_v49  ;;  %v12258_v30 = vunpack.i.l.bf16 %v12257_v49  ;;  %v3997_v49 = vunpack.c.0.s8 %v3996_v37  ;;  %v14912_v58 = vpack.i.bf16 %v829_v7, %v828_v44  ;;  %v643_v10 = vld [vmem:[#allocation2 + $0x2a2] sm:$0xff] }
 0x18a   :  { %12546 = vrot.lane.b32.xlu0 %v14754_v45, %s13375_s27  ;;  %v3247_v45 = vsel %vm18854_vm8, %v3182_v2, %v12248_v50  ;;  %v3315_v15 = vsel %vm18852_vm9, %v3250_v23, %v12264_v61  ;;  %v705_v50 = vld [vmem:[#allocation2 + $0x290] sm:$0xff]  ;;  %v302_v2 = vld [vmem:[#allocation2 + $0x158] sm:$0xff]  ;;  %v14914_v26 = vpack.i.bf16 %v512_v42, %v511_v38  ;;  %v709_v55 = vld [vmem:[#allocation2 + $0x2c0] sm:$0xff] }
 0x18b   :  { %v14862_v28 = vpop.permute.xlu1 %12271  ;;  %v3312_v40 = vsel %vm18852_vm9, %v3247_v45, %v12258_v30  ;;  %v3313_v13 = vsel %vm18852_vm9, %v3248_v60, %v12259_v51  ;;  %v769_v51 = vld [vmem:[#allocation2 + $0x291] sm:$0xff] }
 0x18c   :  { %v12267_v5 = vpop.permute.xlu0 %12266  ;;  %v832_v30 = vld [vmem:[#allocation2 + $0x28a] sm:$0xff] }
 0x18d   :  { %v12269_v9 = vunpack.i.h.bf16 %v12267_v5  ;;  %v12268_v36 = vunpack.i.l.bf16 %v12267_v5  ;;  %12561 = vrot.lane.b32.xlu1 %v14822_v14, %s13376_s28  ;;  %v580_v5 = vld [vmem:[#allocation2 + $0x2a9] sm:$0xff] }
 0x18e   :  { %12556 = vrot.lane.b32.xlu0 %v14784_v33, %s13376_s28  ;;  %v3249_v33 = vsel %vm18854_vm8, %v3184_v46, %v12253_v3  ;;  %v579_v3 = vld [vmem:[#allocation2 + $0x2a1] sm:$0xff]  ;;  %v198_v45 = vld [vmem:[%s18840_s0 + $0x1b0] sm:$0xff]  ;;  %v708_v46 = vld [vmem:[#allocation2 + $0x2b8] sm:$0xff] }
 0x18f   :  { %v3377_v47 = vsel %vm3352_vm2, %v3312_v40, %v12268_v36  ;;  %v3378_v18 = vsel %vm3352_vm2, %v3313_v13, %v12269_v9  ;;  %v14880_v34 = vpop.permute.xlu1 %12281  ;;  %v3314_v19 = vsel %vm18852_vm9, %v3249_v33, %v12263_v6  ;;  %v301_v60 = vld [vmem:[#allocation2 + $0x150] sm:$0xff]  ;;  %v12274_v9 = vunpack.i.h.bf16 %v14862_v28  ;;  %v199_v6 = vld [vmem:[%s18840_s0 + $0x1b8] sm:$0xff]  ;;  %263 = vst.msk [vmem:[#allocation2 + $0x2d1] sm:$0xff] %vm34_vm0, %v198_v45  ;;  %v303_v13 = vld [vmem:[#allocation2 + $0x168] sm:$0xff] }
 0x190   :  { %v12277_v59 = vpop.permute.xlu0 %12276  ;;  %v3429_v21 = vpack.c.bf16 %v3378_v18, %v3377_v47  ;;  %v14922_v36 = vsub.s32 %v3997_v49, %v3999_v31  ;;  %v644_v61 = vld [vmem:[#allocation2 + $0x2aa] sm:$0xff]  ;;  %v12273_v40 = vunpack.i.l.bf16 %v14862_v28  ;;  %v12284_v8 = vunpack.i.h.bf16 %v14880_v34  ;;  %264 = vst.msk [vmem:[#allocation2 + $0x2d9] sm:$0xff] %vm34_vm0, %v199_v6 }
 0x191   :  { %v12279_v53 = vunpack.i.h.bf16 %v12277_v59  ;;  %v12278_v25 = vunpack.i.l.bf16 %v12277_v59  ;;  %12571 = vrot.lane.b32.xlu1 %v14828_v57, %s13377_s22  ;;  %v12283_v17 = vunpack.i.l.bf16 %v14880_v34  ;;  %v14935_v18 = vpack.i.bf16 %v705_v50, %v704_v22  ;;  %v304_v59 = vld [vmem:[#allocation2 + $0x170] sm:$0xff] }
 0x192   :  { %12566 = vrot.lane.b32.xlu0 %v14802_v16, %s13377_s22  ;;  %11629 = vmatprep.mubr.msk.bf16.mxu0 %vm3476_vm10, %v3429_v21  ;;  %v575_v16 = vld [vmem:[#allocation2 + $0x271] sm:$0xff]  ;;  %v14942_v28 = vpack.i.bf16 %v833_v62, %v832_v30  ;;  %v14949_v20 = vpack.i.bf16 %v580_v5, %v579_v3  ;;  %v14951_v37 = vpack.i.bf16 %v644_v61, %v643_v10 }
 0x193   :  { %v3380_v27 = vsel %vm3352_vm2, %v3315_v15, %v12279_v53  ;;  %v3379_v35 = vsel %vm3352_vm2, %v3314_v19, %v12278_v25  ;;  %v14897_v4 = vpop.permute.xlu1 %12291  ;;  %v14924_v0 = vpack.i.bf16 %v576_v43, %v575_v16  ;;  %v14940_v53 = vpack.i.bf16 %v769_v51, %v768_v12  ;;  %v772_v25 = vld [vmem:[#allocation2 + $0x2b9] sm:$0xff]  ;;  %v773_v19 = vld [vmem:[#allocation2 + $0x2c1] sm:$0xff] }
 0x194   :  { %v14899_v29 = vpop.permute.xlu0 %12286  ;;  %v3430_v11 = vpack.c.bf16 %v3380_v27, %v3379_v35  ;;  %v12294_v21 = vunpack.i.h.bf16 %v14897_v4  ;;  %v12293_v33 = vunpack.i.l.bf16 %v14897_v4  ;;  %v14947_v15 = vpack.i.bf16 %v516_v54, %v515_v63  ;;  %v836_v12 = vld [vmem:[#allocation2 + $0x2ba] sm:$0xff]  ;;  %v837_v51 = vld [vmem:[#allocation2 + $0x2c2] sm:$0xff] }
 0x195   :  { %12581 = vrot.lane.b32.xlu1 %v14884_v39, %s13378_s23  ;;  %v12289_v34 = vunpack.i.h.bf16 %v14899_v29  ;;  %v2927_v32 = vsel %vm34_vm0, %v302_v2, %v12274_v9  ;;  %v12288_v27 = vunpack.i.l.bf16 %v14899_v29  ;;  %v14958_v4 = vpack.i.bf16 %v709_v55, %v708_v46 }
 0x196   :  { %12576 = vrot.lane.b32.xlu0 %v14820_v52, %s13378_s23  ;;  %11630 = vmatmul.mubr.msk.bf16.gmra.mrb[24].mxu0 %vm3476_vm10, %v3430_v11  ;;  %v2926_v11 = vsel %vm34_vm0, %v301_v60, %v12273_v40  ;;  %v2929_v44 = vsel %vm34_vm0, %v304_v59, %v12284_v8  ;;  %v2928_v7 = vsel %vm34_vm0, %v303_v13, %v12283_v17  ;;  %v519_v8 = vld [vmem:[#allocation2 + $0x2d0] sm:$0xff] }
 0x197   :  { %v14906_v24 = vpop.permute.xlu1 %12301  ;;  %v14963_v42 = vpack.i.bf16 %v773_v19, %v772_v25  ;;  %v2993_v16 = vsel %vm2962_vm4, %v2928_v7, %v12293_v33  ;;  %v2994_v29 = vsel %vm2962_vm4, %v2929_v44, %v12294_v21  ;;  %v2992_v31 = vsel %vm2962_vm4, %v2927_v32, %v12289_v34  ;;  %v520_v17 = vld [vmem:[#allocation2 + $0x2d8] sm:$0xff] }
 0x198   :  { %v14908_v56 = vpop.permute.xlu0 %12296  ;;  %v12303_v35 = vunpack.i.l.bf16 %v14906_v24  ;;  %v12304_v43 = vunpack.i.h.bf16 %v14906_v24  ;;  %v2991_v30 = vsel %vm2962_vm4, %v2926_v11, %v12288_v27  ;;  %v14979_v61 = vpack.i.bf16 %v837_v51, %v836_v12  ;;  %v583_v21 = vld [vmem:[#allocation2 + $0x2d1] sm:$0xff]  ;;  %v584_v33 = vld [vmem:[#allocation2 + $0x2d9] sm:$0xff] }
 0x199   :  { %12591 = vrot.lane.b32.xlu1 %v14820_v52, %s13373_s25  ;;  %v14926_v52 = vpack.i.bf16 %v640_v41, %v639_v48  ;;  %v12298_v48 = vunpack.i.l.bf16 %v14908_v56  ;;  %v12299_v41 = vunpack.i.h.bf16 %v14908_v56  ;;  %v14997_v27 = vld [vmem:[%s18842_s2] ss:$0 sm:$0xff]  ;;  %v15000_v7 = vpack.i.bf16 %v520_v17, %v519_v8 }
 0x19a   :  { %12586 = vrot.lane.b32.xlu0 %v14822_v14, %s13379_s1  ;;  %v3058_v62 = vsel %vm3027_vm5, %v2993_v16, %v12303_v35  ;;  %v3059_v45 = vsel %vm3027_vm5, %v2994_v29, %v12304_v43 }
 0x19b   :  { %v12312_v47 = vpop.permute.xlu1 %12311  ;;  %v3056_v60 = vsel %vm3027_vm5, %v2991_v30, %v12298_v48  ;;  %v3057_v6 = vsel %vm3027_vm5, %v2992_v31, %v12299_v41  ;;  %v15005_v48 = vpack.i.bf16 %v584_v33, %v583_v21 }
 0x19c   :  { %v12307_v23 = vpop.permute.xlu0 %12306  ;;  %v12314_v22 = vunpack.i.h.bf16 %v12312_v47  ;;  %v12313_v50 = vunpack.i.l.bf16 %v12312_v47 }
 0x19d   :  { %12601 = vrot.lane.b32.xlu1 %v14884_v39, %s13373_s25  ;;  %v12309_v63 = vunpack.i.h.bf16 %v12307_v23  ;;  %v12308_v24 = vunpack.i.l.bf16 %v12307_v23 }
 0x19e   :  { %12596 = vrot.lane.b32.xlu0 %v14912_v58, %s13379_s1  ;;  %v3123_v40 = vsel %vm18855_vm6, %v3058_v62, %v12313_v50  ;;  %v3124_v13 = vsel %vm18855_vm6, %v3059_v45, %v12314_v22 }
 0x19f   :  { %v12322_v38 = vpop.permute.xlu1 %12321  ;;  %v3121_v47 = vsel %vm18855_vm6, %v3056_v60, %v12308_v24  ;;  %v3122_v46 = vsel %vm18855_vm6, %v3057_v6, %v12309_v63  ;;  %v306_v24 = vld [vmem:[#allocation2 + $0x1b8] sm:$0xff] }
 0x1a0   :  { %v12317_v49 = vpop.permute.xlu0 %12316  ;;  %v12324_v54 = vunpack.i.h.bf16 %v12322_v38  ;;  %v12323_v2 = vunpack.i.l.bf16 %v12322_v38 }
 0x1a1   :  { %12611 = vrot.lane.b32.xlu1 %v14912_v58, %s13372_s24  ;;  %v12319_v3 = vunpack.i.h.bf16 %v12317_v49  ;;  %v12318_v56 = vunpack.i.l.bf16 %v12317_v49 }
 0x1a2   :  { %12606 = vrot.lane.b32.xlu0 %v14822_v14, %s13372_s24  ;;  %v3188_v23 = vsel %vm18853_vm7, %v3123_v40, %v12323_v2  ;;  %v3189_v25 = vsel %vm18853_vm7, %v3124_v13, %v12324_v54 }
 0x1a3   :  { %v12332_v5 = vpop.permute.xlu1 %12331  ;;  %v3186_v19 = vsel %vm18853_vm7, %v3121_v47, %v12318_v56  ;;  %v3187_v34 = vsel %vm18853_vm7, %v3122_v46, %v12319_v3  ;;  %v305_v56 = vld [vmem:[#allocation2 + $0x1b0] sm:$0xff] }
 0x1a4   :  { %v12333_v9 = vunpack.i.l.bf16 %v12332_v5  ;;  %v12327_v10 = vpop.permute.xlu0 %12326  ;;  %v12334_v14 = vunpack.i.h.bf16 %v12332_v5 }
 0x1a5   :  { %12621 = vrot.lane.b32.xlu1 %v14914_v26, %s13374_s26  ;;  %v12329_v55 = vunpack.i.h.bf16 %v12327_v10  ;;  %v12328_v59 = vunpack.i.l.bf16 %v12327_v10 }
 0x1a6   :  { %12616 = vrot.lane.b32.xlu0 %v14828_v57, %s13374_s26  ;;  %v3253_v35 = vsel %vm18854_vm8, %v3188_v23, %v12333_v9  ;;  %v3254_v38 = vsel %vm18854_vm8, %v3189_v25, %v12334_v14 }
 0x1a7   :  { %v12342_v32 = vpop.permute.xlu1 %12341  ;;  %v3251_v49 = vsel %vm18854_vm8, %v3186_v19, %v12328_v59  ;;  %v3252_v31 = vsel %vm18854_vm8, %v3187_v34, %v12329_v55 }
 0x1a8   :  { %v12344_v11 = vunpack.i.h.bf16 %v12342_v32  ;;  %v12343_v57 = vunpack.i.l.bf16 %v12342_v32  ;;  %v12337_v44 = vpop.permute.xlu0 %12336 }
 0x1a9   :  { %v12339_v16 = vunpack.i.h.bf16 %v12337_v44  ;;  %v12338_v29 = vunpack.i.l.bf16 %v12337_v44  ;;  %v11607_v43 = vpop.f32.mrb[0].mxu0  ;;  %12631 = vrot.lane.b32.xlu1 %v14924_v0, %s13375_s27 }
 0x1aa   :  { %v15010_v41 = vsel %vm18852_vm9, %v3253_v35, %v12343_v57  ;;  %v3620_v22 = vadd.f32 %v11607_v43, %v14997_v27  ;;  %12626 = vrot.lane.b32.xlu0 %v14884_v39, %s13375_s27  ;;  %v3611_v50 = vpop.f32.mrb[1].mxu0  ;;  %v15016_v12 = vsel %vm18852_vm9, %v3254_v38, %v12344_v11 }
 0x1ab   :  { %v3316_v51 = vsel %vm18852_vm9, %v3251_v49, %v12338_v29  ;;  %v15020_v30 = vsel %vm18852_vm9, %v3252_v31, %v12339_v16  ;;  %v3612_v62 = vadd.f32 %v14997_v27, %v3611_v50  ;;  %v11608_v63 = vpop.f32.mrb[2].mxu0  ;;  %v12352_v54 = vpop.permute.xlu1 %12351 }
 0x1ac   :  { %v3868_v2 = vmax.f32 %v3620_v22, 0.0  ;;  %v3623_v3 = vadd.f32 %v11608_v63, %v14997_v27  ;;  %v12354_v5 = vunpack.i.h.bf16 %v12352_v54  ;;  %v12353_v39 = vunpack.i.l.bf16 %v12352_v54  ;;  %v15024_v45 = vpop.permute.xlu0 %12346  ;;  %v3614_v60 = vpop.f32.mrb[3].mxu0 }
 0x1ad   :  { %v3866_v9 = vmax.f32 %v3612_v62, 0.0  ;;  %v12349_v10 = vunpack.i.h.bf16 %v15024_v45  ;;  %v12348_v6 = vunpack.i.l.bf16 %v15024_v45  ;;  %v15029_v40 = vadd.f32 %v14997_v27, %v3614_v60  ;;  %12641 = vrot.lane.b32.xlu1 %v14926_v52, %s13376_s28 }
 0x1ae   :  { %v4028_v13 = vcombine.high %v3868_v2, %v3868_v2  ;;  %v4035_v14 = vrot.slane %v3868_v2, %v14922_v36  ;;  %v15034_v8 = vmax.f32 %v3623_v3, 0.0  ;;  %v15037_v17 = vsel %vm34_vm0, %v306_v24, %v12354_v5  ;;  %12636 = vrot.lane.b32.xlu0 %v14912_v58, %s13376_s28 }
 0x1af   :  { %v3994_v47 = vcombine.high %v3866_v9, %v3866_v9  ;;  %v4001_v46 = vrot.slane %v3866_v9, %v14922_v36  ;;  %v15043_v55 = vsel %vm34_vm0, %v305_v56, %v12353_v39  ;;  %v15046_v59 = vsel %vm3352_vm2, %v3316_v51, %v12348_v6 }
 0x1b0   :  { %v4042_v21 = vrot.slane %v4028_v13, %v14922_v36  ;;  %v4043_v33 = vcombine.high %v4035_v14, %v4035_v14  ;;  %v5395_v23 = vsel %vm5338_vm11, %v4035_v14, -inf  ;;  %v4045_v25 = vcombine.high %v15034_v8, %v15034_v8 }
 0x1b1   :  { %v5396_v19 = vrot.slane %v5395_v23, 4  ;;  %v4008_v58 = vrot.slane %v3994_v47, %v14922_v36  ;;  %v4009_v34 = vcombine.high %v4001_v46, %v4001_v46  ;;  %v5339_v32 = vsel %vm5338_vm11, %v4001_v46, -inf  ;;  %12651 = vrot.lane.b32.xlu1 %v14935_v18, %s13377_s22 }
 0x1b2   :  { %v4044_v35 = vcombine.high %v4042_v21, %v4042_v21  ;;  %v5402_v11 = vsel %vm5338_vm11, %v4043_v33, -inf  ;;  %v5409_v57 = vsel %vm5338_vm11, %v4042_v21, -inf  ;;  %v5340_v44 = vrot.slane %v5339_v32, 4  ;;  %12646 = vrot.lane.b32.xlu0 %v14914_v26, %s13377_s22 }
 0x1b3   :  { %v5397_v38 = vmax.f32 %v5395_v23, %v5396_v19  ;;  %v5403_v16 = vrot.slane %v5402_v11, 4  ;;  %v5410_v29 = vrot.slane %v5409_v57, 4  ;;  %v4010_v43 = vcombine.high %v4008_v58, %v4008_v58 }
 0x1b4   :  { %v5416_v49 = vsel %vm5338_vm11, %v4044_v35, -inf  ;;  %v5341_v31 = vmax.f32 %v5339_v32, %v5340_v44  ;;  %v5346_v22 = vsel %vm5338_vm11, %v4009_v34, -inf  ;;  %v5353_v50 = vsel %vm5338_vm11, %v4008_v58, -inf  ;;  %v15072_v44 = vpop.permute.xlu1 %12361 }
 0x1b5   :  { %v5398_v51 = vrot.slane %v5397_v38, 2  ;;  %v5404_v62 = vmax.f32 %v5402_v11, %v5403_v16  ;;  %v5411_v63 = vmax.f32 %v5409_v57, %v5410_v29  ;;  %v5417_v24 = vrot.slane %v5416_v49, 4  ;;  %12661 = vrot.lane.b32.xlu1 %v14940_v53, %s13378_s23 }
 0x1b6   :  { %v5342_v54 = vrot.slane %v5341_v31, 2  ;;  %v5347_v26 = vrot.slane %v5346_v22, 4  ;;  %v5354_v2 = vrot.slane %v5353_v50, 4  ;;  %v5360_v3 = vsel %vm5338_vm11, %v4010_v43, -inf  ;;  %12656 = vrot.lane.b32.xlu0 %v14924_v0, %s13378_s23 }
 0x1b7   :  { %v5399_v56 = vmax.f32 %v5397_v38, %v5398_v51  ;;  %v5405_v5 = vrot.slane %v5404_v62, 2  ;;  %v5412_v39 = vrot.slane %v5411_v63, 2  ;;  %v5418_v60 = vmax.f32 %v5416_v49, %v5417_v24  ;;  %v15074_v38 = vpop.permute.xlu0 %12356 }
 0x1b8   :  { %v5343_v9 = vmax.f32 %v5341_v31, %v5342_v54  ;;  %v5348_v6 = vmax.f32 %v5346_v22, %v5347_v26  ;;  %v5355_v13 = vmax.f32 %v5353_v50, %v5354_v2  ;;  %v5361_v14 = vrot.slane %v5360_v3, 4 }
 0x1b9   :  { %v5400_v47 = vrot.slane %v5399_v56, 1  ;;  %v5406_v46 = vmax.f32 %v5404_v62, %v5405_v5  ;;  %v5413_v21 = vmax.f32 %v5411_v63, %v5412_v39  ;;  %v5419_v33 = vrot.slane %v5418_v60, 2  ;;  %12671 = vrot.lane.b32.xlu1 %v14924_v0, %s13373_s25 }
 0x1ba   :  { %v5344_v23 = vrot.slane %v5343_v9, 1  ;;  %v5349_v19 = vrot.slane %v5348_v6, 2  ;;  %v5356_v58 = vrot.slane %v5355_v13, 2  ;;  %v5362_v34 = vmax.f32 %v5360_v3, %v5361_v14  ;;  %12666 = vrot.lane.b32.xlu0 %v14926_v52, %s13379_s1 }
 0x1bb   :  { %v5401_v32 = vmax.f32 %v5399_v56, %v5400_v47  ;;  %v5407_v35 = vrot.slane %v5406_v46, 1  ;;  %v5414_v11 = vrot.slane %v5413_v21, 1  ;;  %v5420_v57 = vmax.f32 %v5418_v60, %v5419_v33  ;;  %v15106_v33 = vpop.permute.xlu0 %12366 }
 0x1bc   :  { %v5345_v16 = vmax.f32 %v5343_v9, %v5344_v23  ;;  %v5350_v29 = vmax.f32 %v5348_v6, %v5349_v19  ;;  %v5357_v0 = vmax.f32 %v5355_v13, %v5356_v58  ;;  %v5363_v43 = vrot.slane %v5362_v34, 2  ;;  %v200_v9 = vld [vmem:[%s18840_s0 + $0x1c0] sm:$0xff]  ;;  %v201_v6 = vld [vmem:[%s18840_s0 + $0x1c8] sm:$0xff] }
 0x1bd   :  { %v5408_v49 = vmax.f32 %v5406_v46, %v5407_v35  ;;  %v5415_v31 = vmax.f32 %v5413_v21, %v5414_v11  ;;  %v5421_v22 = vrot.slane %v5420_v57, 1  ;;  %v7132_v50 = vsel %vm3352_vm2, %v5401_v32, -inf  ;;  %12681 = vrot.lane.b32.xlu1 %v14940_v53, %s13373_s25  ;;  %v15104_v21 = vpop.permute.xlu1 %12371  ;;  %265 = vst.msk [vmem:[#allocation2 + $0x2e9] sm:$0xff] %vm34_vm0, %v200_v9  ;;  %266 = vst.msk [vmem:[#allocation2 + $0x2f1] sm:$0xff] %vm34_vm0, %v201_v6 }
 0x1be   :  { %v5351_v51 = vrot.slane %v5350_v29, 1  ;;  %v5358_v62 = vrot.slane %v5357_v0, 1  ;;  %v5364_v63 = vmax.f32 %v5362_v34, %v5363_v43  ;;  %v7131_v24 = vsel %vm3352_vm2, %v5345_v16, -inf  ;;  %12676 = vrot.lane.b32.xlu0 %v14942_v28, %s13379_s1 }
 0x1bf   :  { %v5422_v54 = vmax.f32 %v5420_v57, %v5421_v22  ;;  %v7135_v26 = vsel %vm3352_vm2, %v5408_v49, -inf  ;;  %v7138_v2 = vsel %vm3352_vm2, %v5415_v31, -inf  ;;  %v7133_v3 = vmax.f32 %v7131_v24, %v7132_v50 }
 0x1c0   :  { %v5352_v56 = vmax.f32 %v5350_v29, %v5351_v51  ;;  %v5359_v5 = vmax.f32 %v5357_v0, %v5358_v62  ;;  %v5365_v39 = vrot.slane %v5364_v63, 1  ;;  %v4052_v60 = vrot.slane %v15034_v8, %v14922_v36 }
 0x1c1   :  { %v7141_v13 = vsel %vm3352_vm2, %v5422_v54, -inf  ;;  %v4059_v14 = vrot.slane %v4045_v25, %v14922_v36  ;;  %v15101_v47 = vsel %vm3352_vm2, %v15020_v30, %v12349_v10  ;;  %v3867_v46 = vmax.f32 %v15029_v40, 0.0  ;;  %12691 = vrot.lane.b32.xlu1 %v14942_v28, %s13372_s24  ;;  %v15128_v62 = vpop.permute.xlu1 %12381 }
 0x1c2   :  { %v5366_v8 = vmax.f32 %v5364_v63, %v5365_v39  ;;  %v7134_v45 = vsel %vm3352_vm2, %v5352_v56, -inf  ;;  %v7137_v25 = vsel %vm3352_vm2, %v5359_v5, -inf  ;;  %v4060_v30 = vcombine.high %v4052_v60, %v4052_v60  ;;  %12686 = vrot.lane.b32.xlu0 %v14926_v52, %s13372_s24  ;;  %v15130_v63 = vpop.permute.xlu0 %12376 }
 0x1c3   :  { %v7136_v10 = vmax.f32 %v7134_v45, %v7135_v26  ;;  %v7139_v40 = vmax.f32 %v7137_v25, %v7138_v2  ;;  %v4061_v23 = vcombine.high %v4059_v14, %v4059_v14  ;;  %v5423_v19 = vsel %vm5338_vm11, %v4052_v60, -inf }
 0x1c4   :  { %v7140_v58 = vsel %vm3352_vm2, %v5366_v8, -inf  ;;  %v5424_v34 = vrot.slane %v5423_v19, 4  ;;  %v5430_v32 = vsel %vm5338_vm11, %v4060_v30, -inf  ;;  %v5437_v35 = vsel %vm5338_vm11, %v4059_v14, -inf }
 0x1c5   :  { %v7142_v11 = vmax.f32 %v7140_v58, %v7141_v13  ;;  %v7684_v57 = vsel %vm7683_vm12, %v7136_v10, %v7133_v3  ;;  %v5431_v16 = vrot.slane %v5430_v32, 4  ;;  %v5438_v29 = vrot.slane %v5437_v35, 4  ;;  %12701 = vrot.lane.b32.xlu1 %v14947_v15, %s13374_s26 }
 0x1c6   :  { %v7686_v52 = vsel %vm7685_vm13, %v7139_v40, %v7684_v57  ;;  %v5425_v0 = vmax.f32 %v5423_v19, %v5424_v34  ;;  %v5444_v43 = vsel %vm5338_vm11, %v4061_v23, -inf  ;;  %v4011_v49 = vcombine.high %v3867_v46, %v3867_v46  ;;  %12696 = vrot.lane.b32.xlu0 %v14935_v18, %s13374_s26  ;;  %v15155_v57 = vpop.permute.xlu0 %12386 }
 0x1c7   :  { %v5432_v31 = vmax.f32 %v5430_v32, %v5431_v16  ;;  %v5439_v22 = vmax.f32 %v5437_v35, %v5438_v29  ;;  %v5445_v50 = vrot.slane %v5444_v43, 4  ;;  %v4018_v51 = vrot.slane %v3867_v46, %v14922_v36 }
 0x1c8   :  { %v5426_v24 = vrot.slane %v5425_v0, 2  ;;  %v4025_v54 = vrot.slane %v4011_v49, %v14922_v36  ;;  %v15134_v26 = vsel %vm18851_vm14, %v7142_v11, %v7686_v52  ;;  %v12364_v2 = vunpack.i.h.bf16 %v15072_v44  ;;  %v15153_v11 = vpop.permute.xlu1 %12391 }
 0x1c9   :  { %v5433_v3 = vrot.slane %v5432_v31, 2  ;;  %v5440_v56 = vrot.slane %v5439_v22, 2  ;;  %v5446_v18 = vmax.f32 %v5444_v43, %v5445_v50  ;;  %v4026_v5 = vcombine.high %v4018_v51, %v4018_v51  ;;  %v15137_v39 = vpop.f32.mrb[4].mxu0  ;;  %12711 = vrot.lane.b32.xlu1 %v14949_v20, %s13375_s27  ;;  %v308_v50 = vld [vmem:[#allocation2 + $0x1d0] sm:$0xff] }
 0x1ca   :  { %v5427_v60 = vmax.f32 %v5425_v0, %v5426_v24  ;;  %v4027_v9 = vcombine.high %v4025_v54, %v4025_v54  ;;  %v5367_v6 = vsel %vm5338_vm11, %v4018_v51, -inf  ;;  %v5381_v13 = vsel %vm5338_vm11, %v4025_v54, -inf  ;;  %12706 = vrot.lane.b32.xlu0 %v14940_v53, %s13375_s27  ;;  %v15145_v14 = vpop.f32.mrb[5].mxu0 }
 0x1cb   :  { %v5434_v46 = vmax.f32 %v5432_v31, %v5433_v3  ;;  %v5441_v8 = vmax.f32 %v5439_v22, %v5440_v56  ;;  %v5447_v45 = vrot.slane %v5446_v18, 2  ;;  %v5368_v25 = vrot.slane %v5367_v6, 4  ;;  %v15147_v30 = vpop.f32.mrb[6].mxu0 }
 0x1cc   :  { %v5428_v10 = vrot.slane %v5427_v60, 1  ;;  %v5374_v40 = vsel %vm5338_vm11, %v4026_v5, -inf  ;;  %v5382_v23 = vrot.slane %v5381_v13, 4  ;;  %v5388_v19 = vsel %vm5338_vm11, %v4027_v9, -inf  ;;  %v15151_v58 = vpop.f32.mrb[7].mxu0 }
 0x1cd   :  { %v5435_v34 = vrot.slane %v5434_v46, 1  ;;  %v5442_v32 = vrot.slane %v5441_v8, 1  ;;  %v5448_v35 = vmax.f32 %v5446_v18, %v5447_v45  ;;  %v5369_v53 = vmax.f32 %v5367_v6, %v5368_v25  ;;  %12721 = vrot.lane.b32.xlu1 %v14951_v37, %s13376_s28 }
 0x1ce   :  { %v5429_v16 = vmax.f32 %v5427_v60, %v5428_v10  ;;  %v5375_v29 = vrot.slane %v5374_v40, 4  ;;  %v5383_v52 = vmax.f32 %v5381_v13, %v5382_v23  ;;  %v5389_v0 = vrot.slane %v5388_v19, 4  ;;  %12716 = vrot.lane.b32.xlu0 %v14942_v28, %s13376_s28  ;;  %v307_v13 = vld [vmem:[#allocation2 + $0x1c8] sm:$0xff]  ;;  %v15180_v23 = vpop.permute.xlu0 %12396 }
 0x1cf   :  { %v5436_v43 = vmax.f32 %v5434_v46, %v5435_v34  ;;  %v5443_v49 = vmax.f32 %v5441_v8, %v5442_v32  ;;  %v5449_v31 = vrot.slane %v5448_v35, 1  ;;  %v5370_v22 = vrot.slane %v5369_v53, 2 }
 0x1d0   :  { %v7144_v51 = vsel %vm3352_vm2, %v5429_v16, -inf  ;;  %v5376_v24 = vmax.f32 %v5374_v40, %v5375_v29  ;;  %v5384_v54 = vrot.slane %v5383_v52, 2  ;;  %v5390_v3 = vmax.f32 %v5388_v19, %v5389_v0  ;;  %v15178_v40 = vpop.permute.xlu1 %12401 }
 0x1d1   :  { %v5450_v56 = vmax.f32 %v5448_v35, %v5449_v31  ;;  %v15163_v18 = vsel %vm3352_vm2, %v5436_v43, -inf  ;;  %v15166_v5 = vsel %vm3352_vm2, %v5443_v49, -inf  ;;  %v5371_v60 = vmax.f32 %v5369_v53, %v5370_v22  ;;  %12731 = vrot.lane.b32.xlu1 %v14958_v4, %s13377_s22 }
 0x1d2   :  { %v5377_v28 = vrot.slane %v5376_v24, 2  ;;  %v5385_v9 = vmax.f32 %v5383_v52, %v5384_v54  ;;  %v5391_v6 = vrot.slane %v5390_v3, 2  ;;  %v2933_v46 = vsel %vm34_vm0, %v308_v50, %v12364_v2  ;;  %12726 = vrot.lane.b32.xlu0 %v14947_v15, %s13377_s22 }
 0x1d3   :  { %v15174_v8 = vsel %vm3352_vm2, %v5450_v56, -inf  ;;  %v5372_v45 = vrot.slane %v5371_v60, 1  ;;  %v12363_v25 = vunpack.i.l.bf16 %v15072_v44  ;;  %v12359_v10 = vunpack.i.h.bf16 %v15074_v38  ;;  %v15208_v56 = vpop.permute.xlu0 %12406 }
 0x1d4   :  { %v5378_v19 = vmax.f32 %v5376_v24, %v5377_v28  ;;  %v5386_v34 = vrot.slane %v5385_v9, 1  ;;  %v5392_v32 = vmax.f32 %v5390_v3, %v5391_v6  ;;  %vm18856_vm14 = vcmask 1047559   ;;  %v12412_v3 = vpop.permute.xlu1 %12411 }
 0x1d5   :  { %v12358_v2 = vunpack.i.l.bf16 %v15074_v38  ;;  %v5373_v15 = vmax.f32 %v5371_v60, %v5372_v45  ;;  %v2932_v35 = vsel %vm34_vm0, %v307_v13, %v12363_v25  ;;  %v3384_v53 = vsel %vm3352_vm2, %v15016_v12, %v12359_v10  ;;  %12741 = vrot.lane.b32.xlu1 %v14963_v42, %s13378_s23 }
 0x1d6   :  { %v3431_v44 = vpack.c.bf16 %v15101_v47, %v15046_v59  ;;  %v5379_v16 = vrot.slane %v5378_v19, 1  ;;  %v5387_v29 = vmax.f32 %v5385_v9, %v5386_v34  ;;  %v5393_v52 = vrot.slane %v5392_v32, 1  ;;  %12736 = vrot.lane.b32.xlu0 %v14949_v20, %s13378_s23 }
 0x1d7   :  { %v3383_v0 = vsel %vm3352_vm2, %v15010_v41, %v12358_v2  ;;  %v7143_v38 = vsel %vm3352_vm2, %v5373_v15, -inf  ;;  %v12374_v12 = vunpack.i.h.bf16 %v15104_v21  ;;  %v12373_v59 = vunpack.i.l.bf16 %v15104_v21  ;;  %v202_v41 = vld [vmem:[%s18840_s0 + $0x1d0] sm:$0xff] }
 0x1d8   :  { %11633 = vmatprep.mubr.msk.bf16.mxu0 %vm3476_vm10, %v3431_v44  ;;  %v12369_v47 = vunpack.i.h.bf16 %v15106_v33  ;;  %v5380_v43 = vmax.f32 %v5378_v19, %v5379_v16  ;;  %v5394_v49 = vmax.f32 %v5392_v32, %v5393_v52  ;;  %v7145_v31 = vmax.f32 %v7143_v38, %v7144_v51  ;;  %v203_v51 = vld [vmem:[%s18840_s0 + $0x1d8] sm:$0xff]  ;;  %267 = vst.msk [vmem:[#allocation2 + $0x301] sm:$0xff] %vm34_vm0, %v202_v41  ;;  %v12422_v15 = vpop.permute.xlu1 %12421 }
 0x1d9   :  { %v7149_v22 = vsel %vm3352_vm2, %v5387_v29, -inf  ;;  %v2997_v24 = vsel %vm2962_vm4, %v2932_v35, %v12373_v59  ;;  %v2998_v54 = vsel %vm2962_vm4, %v2933_v46, %v12374_v12  ;;  %12751 = vrot.lane.b32.xlu1 %v14949_v20, %s13373_s25  ;;  %268 = vst.msk [vmem:[#allocation2 + $0x309] sm:$0xff] %vm34_vm0, %v203_v51  ;;  %v3432_v6 = vpack.c.bf16 %v3384_v53, %v3383_v0  ;;  %v12417_v35 = vpop.permute.xlu0 %12416 }
 0x1da   :  { %v7151_v50 = vmax.f32 %v7149_v22, %v15166_v5  ;;  %v2996_v21 = vsel %vm2962_vm4, %v15037_v17, %v12369_v47  ;;  %v7146_v5 = vsel %vm3352_vm2, %v5380_v43, -inf  ;;  %v7152_v60 = vsel %vm3352_vm2, %v5394_v49, -inf  ;;  %12746 = vrot.lane.b32.xlu0 %v14951_v37, %s13379_s1 }
 0x1db   :  { %v7690_v28 = vsel %vm7689_vm15, %v7145_v31, %v15134_v26  ;;  %v12368_v17 = vunpack.i.l.bf16 %v15106_v33  ;;  %v7148_v20 = vmax.f32 %v7146_v5, %v15163_v18  ;;  %v7154_v9 = vmax.f32 %v7152_v60, %v15174_v8  ;;  %11634 = vmatmul.mubr.msk.bf16.gmra.mrb[28].mxu0 %vm3476_vm10, %v3432_v6  ;;  %v309_v6 = vld [vmem:[#allocation2 + $0x1e0] sm:$0xff] }
 0x1dc   :  { %v12384_v13 = vunpack.i.h.bf16 %v15128_v62  ;;  %v12383_v45 = vunpack.i.l.bf16 %v15128_v62  ;;  %v12379_v26 = vunpack.i.h.bf16 %v15130_v63  ;;  %v12378_v33 = vunpack.i.l.bf16 %v15130_v63  ;;  %v12432_v51 = vpop.permute.xlu1 %12431 }
 0x1dd   :  { %v2995_v46 = vsel %vm2962_vm4, %v15043_v55, %v12368_v17  ;;  %v7692_v25 = vsel %vm18858_vm1, %v7148_v20, %v7690_v28  ;;  %v12394_v8 = vunpack.i.h.bf16 %v15153_v11  ;;  %v12393_v10 = vunpack.i.l.bf16 %v15153_v11  ;;  %12761 = vrot.lane.b32.xlu1 %v14963_v42, %s13373_s25  ;;  %v15274_v5 = vpop.permute.xlu0 %12426 }
 0x1de   :  { %v3063_v18 = vsel %vm3027_vm5, %v2998_v54, %v12384_v13  ;;  %v7694_v55 = vsel %vm18857_vm3, %v7151_v50, %v7692_v25  ;;  %v3062_v62 = vsel %vm3027_vm5, %v2997_v24, %v12383_v45  ;;  %v3060_v19 = vsel %vm3027_vm5, %v2995_v46, %v12378_v33  ;;  %12756 = vrot.lane.b32.xlu0 %v14979_v61, %s13379_s1  ;;  %v310_v13 = vld [vmem:[#allocation2 + $0x1e8] sm:$0xff] }
 0x1df   :  { %v3061_v63 = vsel %vm3027_vm5, %v2996_v21, %v12379_v26  ;;  %v7696_v34 = vsel %vm18856_vm14, %v7154_v9, %v7694_v55  ;;  %v3127_v32 = vsel %vm18855_vm6, %v3062_v62, %v12393_v10  ;;  %v3128_v11 = vsel %vm18855_vm6, %v3063_v18, %v12394_v8 }
 0x1e0   :  { %v12389_v2 = vunpack.i.h.bf16 %v15155_v57  ;;  %7819 = vst.msk [vmem:[#allocation3 + $0x11] sm:$0xff] %vm3352_vm2, %v7696_v34  ;;  %v12388_v53 = vunpack.i.l.bf16 %v15155_v57  ;;  %v12404_v44 = vunpack.i.h.bf16 %v15178_v40  ;;  %v12403_v16 = vunpack.i.l.bf16 %v15178_v40 }
 0x1e1   :  { %v12399_v29 = vunpack.i.h.bf16 %v15180_v23  ;;  %v12398_v0 = vunpack.i.l.bf16 %v15180_v23  ;;  %v12414_v38 = vunpack.i.h.bf16 %v12412_v3  ;;  %v12413_v12 = vunpack.i.l.bf16 %v12412_v3  ;;  %12771 = vrot.lane.b32.xlu1 %v14979_v61, %s13372_s24 }
 0x1e2   :  { %v3126_v52 = vsel %vm18855_vm6, %v3061_v63, %v12389_v2  ;;  %v3125_v59 = vsel %vm18855_vm6, %v3060_v19, %v12388_v53  ;;  %v3192_v47 = vsel %vm18853_vm7, %v3127_v32, %v12403_v16  ;;  %v3193_v57 = vsel %vm18853_vm7, %v3128_v11, %v12404_v44  ;;  %12766 = vrot.lane.b32.xlu0 %v14951_v37, %s13372_s24 }
 0x1e3   :  { %v3191_v43 = vsel %vm18853_vm7, %v3126_v52, %v12399_v29  ;;  %v3190_v40 = vsel %vm18853_vm7, %v3125_v59, %v12398_v0  ;;  %v3257_v23 = vsel %vm18854_vm8, %v3192_v47, %v12413_v12  ;;  %v3258_v49 = vsel %vm18854_vm8, %v3193_v57, %v12414_v38 }
 0x1e4   :  { %v12409_v31 = vunpack.i.h.bf16 %v15208_v56  ;;  %v12408_v22 = vunpack.i.l.bf16 %v15208_v56  ;;  %v12424_v41 = vunpack.i.h.bf16 %v12422_v15  ;;  %v12423_v50 = vunpack.i.l.bf16 %v12422_v15 }
 0x1e5   :  { %v12419_v24 = vunpack.i.h.bf16 %v12417_v35  ;;  %v12418_v21 = vunpack.i.l.bf16 %v12417_v35  ;;  %v3636_v3 = vadd.f32 %v15137_v39, %v14997_v27  ;;  %v3628_v37 = vadd.f32 %v14997_v27, %v15145_v14  ;;  %12781 = vrot.lane.b32.xlu1 %v15000_v7, %s13374_s26 }
 0x1e6   :  { %v3256_v54 = vsel %vm18854_vm8, %v3191_v43, %v12409_v31  ;;  %v3255_v56 = vsel %vm18854_vm8, %v3190_v40, %v12408_v22  ;;  %v15280_v60 = vsel %vm18852_vm9, %v3257_v23, %v12423_v50  ;;  %v15283_v28 = vsel %vm18852_vm9, %v3258_v49, %v12424_v41  ;;  %12776 = vrot.lane.b32.xlu0 %v14958_v4, %s13374_s26 }
 0x1e7   :  { %v15286_v17 = vsel %vm18852_vm9, %v3256_v54, %v12419_v24  ;;  %v3320_v39 = vsel %vm18852_vm9, %v3255_v56, %v12418_v21  ;;  %v3872_v14 = vmax.f32 %v3636_v3, 0.0  ;;  %v3870_v20 = vmax.f32 %v3628_v37, 0.0 }
 0x1e8   :  { %v3639_v9 = vadd.f32 %v15147_v30, %v14997_v27  ;;  %v12434_v46 = vunpack.i.h.bf16 %v12432_v51  ;;  %v12433_v45 = vunpack.i.l.bf16 %v12432_v51  ;;  %v12429_v26 = vunpack.i.h.bf16 %v15274_v5 }
 0x1e9   :  { %v12428_v33 = vunpack.i.l.bf16 %v15274_v5  ;;  %v4096_v25 = vcombine.high %v3872_v14, %v3872_v14  ;;  %v4103_v18 = vrot.slane %v3872_v14, %v14922_v36  ;;  %v4062_v8 = vcombine.high %v3870_v20, %v3870_v20  ;;  %v15297_v10 = vpop.f32.mrb[8].mxu0  ;;  %12791 = vrot.lane.b32.xlu1 %v15005_v48, %s13375_s27 }
 0x1ea   :  { %v4069_v4 = vrot.slane %v3870_v20, %v14922_v36  ;;  %v15301_v30 = vmax.f32 %v3639_v9, 0.0  ;;  %v15304_v55 = vsel %vm34_vm0, %v310_v13, %v12434_v46  ;;  %v15307_v62 = vsel %vm34_vm0, %v309_v6, %v12433_v45  ;;  %12786 = vrot.lane.b32.xlu0 %v14963_v42, %s13375_s27  ;;  %v15314_v63 = vpop.f32.mrb[9].mxu0 }
 0x1eb   :  { %v15310_v19 = vsel %vm3352_vm2, %v3320_v39, %v12428_v33  ;;  %v4110_v34 = vrot.slane %v4096_v25, %v14922_v36  ;;  %v4111_v32 = vcombine.high %v4103_v18, %v4103_v18  ;;  %v5507_v11 = vsel %vm5338_vm11, %v4103_v18, -inf  ;;  %v15319_v15 = vpop.f32.mrb[10].mxu0 }
 0x1ec   :  { %v4076_v2 = vrot.slane %v4062_v8, %v14922_v36  ;;  %v5508_v35 = vrot.slane %v5507_v11, 4  ;;  %v4077_v53 = vcombine.high %v4069_v4, %v4069_v4  ;;  %v5451_v44 = vsel %vm5338_vm11, %v4069_v4, -inf  ;;  %v15324_v29 = vpop.f32.mrb[11].mxu0  ;;  %v15336_v4 = vpop.permute.xlu1 %12441 }
 0x1ed   :  { %v4113_v16 = vcombine.high %v15301_v30, %v15301_v30  ;;  %v4112_v42 = vcombine.high %v4110_v34, %v4110_v34  ;;  %v5514_v52 = vsel %vm5338_vm11, %v4111_v32, -inf  ;;  %v5521_v0 = vsel %vm5338_vm11, %v4110_v34, -inf }
 0x1ee   :  { %v4078_v38 = vcombine.high %v4076_v2, %v4076_v2  ;;  %v5509_v12 = vmax.f32 %v5507_v11, %v5508_v35  ;;  %v5515_v59 = vrot.slane %v5514_v52, 4  ;;  %v5522_v47 = vrot.slane %v5521_v0, 4  ;;  %12796 = vrot.lane.b32.xlu0 %v14979_v61, %s13376_s28  ;;  %v15338_v35 = vpop.permute.xlu0 %12436 }
 0x1ef   :  { %v5452_v57 = vrot.slane %v5451_v44, 4  ;;  %v5528_v43 = vsel %vm5338_vm11, %v4112_v42, -inf  ;;  %v5458_v40 = vsel %vm5338_vm11, %v4077_v53, -inf  ;;  %v5465_v23 = vsel %vm5338_vm11, %v4076_v2, -inf }
 0x1f0   :  { %v5472_v49 = vsel %vm5338_vm11, %v4078_v38, -inf  ;;  %v5510_v31 = vrot.slane %v5509_v12, 2  ;;  %v5516_v22 = vmax.f32 %v5514_v52, %v5515_v59  ;;  %v5523_v41 = vmax.f32 %v5521_v0, %v5522_v47 }
 0x1f1   :  { %v5529_v50 = vrot.slane %v5528_v43, 4  ;;  %v5453_v24 = vmax.f32 %v5451_v44, %v5452_v57  ;;  %v5459_v54 = vrot.slane %v5458_v40, 4  ;;  %v5466_v21 = vrot.slane %v5465_v23, 4 }
 0x1f2   :  { %v5473_v3 = vrot.slane %v5472_v49, 4  ;;  %v5511_v37 = vmax.f32 %v5509_v12, %v5510_v31  ;;  %v5517_v51 = vrot.slane %v5516_v22, 2  ;;  %v5524_v56 = vrot.slane %v5523_v41, 2  ;;  %12806 = vrot.lane.b32.xlu0 %v15000_v7, %s13377_s22 }
 0x1f3   :  { %v5530_v61 = vmax.f32 %v5528_v43, %v5529_v50  ;;  %v5454_v39 = vrot.slane %v5453_v24, 2  ;;  %v5460_v14 = vmax.f32 %v5458_v40, %v5459_v54  ;;  %v5467_v20 = vmax.f32 %v5465_v23, %v5466_v21  ;;  %v204_v40 = vld [vmem:[%s18840_s0 + $0x1e0] sm:$0xff] }
 0x1f4   :  { %v5474_v9 = vmax.f32 %v5472_v49, %v5473_v3  ;;  %v5512_v6 = vrot.slane %v5511_v37, 1  ;;  %v5518_v13 = vmax.f32 %v5516_v22, %v5517_v51  ;;  %v5525_v46 = vmax.f32 %v5523_v41, %v5524_v56  ;;  %v205_v41 = vld [vmem:[%s18840_s0 + $0x1e8] sm:$0xff]  ;;  %269 = vst.msk [vmem:[#allocation2 + $0x319] sm:$0xff] %vm34_vm0, %v204_v40  ;;  %v15355_v3 = vpop.permute.xlu1 %12451 }
 0x1f5   :  { %v5531_v45 = vrot.slane %v5530_v61, 2  ;;  %v5455_v33 = vmax.f32 %v5453_v24, %v5454_v39  ;;  %v5461_v25 = vrot.slane %v5460_v14, 2  ;;  %v5468_v18 = vrot.slane %v5467_v20, 2  ;;  %270 = vst.msk [vmem:[#allocation2 + $0x321] sm:$0xff] %vm34_vm0, %v205_v41  ;;  %v15363_v39 = vpop.permute.xlu0 %12446 }
 0x1f6   :  { %v5475_v8 = vrot.slane %v5474_v9, 2  ;;  %v5513_v34 = vmax.f32 %v5511_v37, %v5512_v6  ;;  %v5519_v32 = vrot.slane %v5518_v13, 1  ;;  %v5526_v11 = vrot.slane %v5525_v46, 1  ;;  %12816 = vrot.lane.b32.xlu0 %v15005_v48, %s13378_s23 }
 0x1f7   :  { %v5532_v2 = vmax.f32 %v5530_v61, %v5531_v45  ;;  %v5456_v7 = vrot.slane %v5455_v33, 1  ;;  %v5462_v53 = vmax.f32 %v5460_v14, %v5461_v25  ;;  %v5469_v44 = vmax.f32 %v5467_v20, %v5468_v18 }
 0x1f8   :  { %v5476_v42 = vmax.f32 %v5474_v9, %v5475_v8  ;;  %v5520_v52 = vmax.f32 %v5518_v13, %v5519_v32  ;;  %v5527_v0 = vmax.f32 %v5525_v46, %v5526_v11  ;;  %v7156_v12 = vsel %vm3352_vm2, %v5513_v34, -inf }
 0x1f9   :  { %v5533_v38 = vrot.slane %v5532_v2, 1  ;;  %v5457_v59 = vmax.f32 %v5455_v33, %v5456_v7  ;;  %v5463_v47 = vrot.slane %v5462_v53, 1  ;;  %v5470_v57 = vrot.slane %v5469_v44, 1 }
 0x1fa   :  { %v5477_v43 = vrot.slane %v5476_v42, 1  ;;  %v7159_v49 = vsel %vm3352_vm2, %v5520_v52, -inf  ;;  %v7162_v31 = vsel %vm3352_vm2, %v5527_v0, -inf  ;;  %v4120_v22 = vrot.slane %v15301_v30, %v14922_v36  ;;  %v15382_v52 = vpop.permute.xlu1 %12461 }
 0x1fb   :  { %v5534_v23 = vmax.f32 %v5532_v2, %v5533_v38  ;;  %v5464_v50 = vmax.f32 %v5462_v53, %v5463_v47  ;;  %v5471_v24 = vmax.f32 %v5469_v44, %v5470_v57  ;;  %v7155_v21 = vsel %vm3352_vm2, %v5457_v59, -inf  ;;  %v15388_v38 = vpop.permute.xlu0 %12456  ;;  %v311_v57 = vld [vmem:[#allocation2 + $0x1f8] sm:$0xff] }
 0x1fc   :  { %v5478_v54 = vmax.f32 %v5476_v42, %v5477_v43  ;;  %v7157_v51 = vmax.f32 %v7155_v21, %v7156_v12  ;;  %v4127_v56 = vrot.slane %v4113_v16, %v14922_v36  ;;  %v4128_v61 = vcombine.high %v4120_v22, %v4120_v22  ;;  %v312_v42 = vld [vmem:[#allocation2 + $0x200] sm:$0xff] }
 0x1fd   :  { %v7165_v37 = vsel %vm3352_vm2, %v5534_v23, -inf  ;;  %v7158_v14 = vsel %vm3352_vm2, %v5464_v50, -inf  ;;  %v7161_v20 = vsel %vm3352_vm2, %v5471_v24, -inf  ;;  %v5535_v6 = vsel %vm5338_vm11, %v4120_v22, -inf }
 0x1fe   :  { %v7164_v9 = vsel %vm3352_vm2, %v5478_v54, -inf  ;;  %v7160_v13 = vmax.f32 %v7158_v14, %v7159_v49  ;;  %v7163_v46 = vmax.f32 %v7161_v20, %v7162_v31  ;;  %v4129_v33 = vcombine.high %v4127_v56, %v4127_v56 }
 0x1ff   :  { %v7166_v45 = vmax.f32 %v7164_v9, %v7165_v37  ;;  %v5536_v25 = vrot.slane %v5535_v6, 4  ;;  %v5542_v18 = vsel %vm5338_vm11, %v4128_v61, -inf  ;;  %v5549_v30 = vsel %vm5338_vm11, %v4127_v56, -inf  ;;  %v15400_v61 = vpop.permute.xlu1 %12471 }
 0x200   :  { %v15375_v16 = vsel %vm3352_vm2, %v15286_v17, %v12429_v26  ;;  %v7697_v8 = vsel %vm7683_vm12, %v7160_v13, %v7157_v51  ;;  %v5543_v34 = vrot.slane %v5542_v18, 4  ;;  %v5550_v32 = vrot.slane %v5549_v30, 4  ;;  %v15404_v13 = vpop.permute.xlu0 %12466 }
 0x201   :  { %v5556_v11 = vsel %vm5338_vm11, %v4129_v33, -inf  ;;  %v7698_v2 = vsel %vm7685_vm13, %v7163_v46, %v7697_v8  ;;  %v5537_v7 = vmax.f32 %v5535_v6, %v5536_v25  ;;  %v3631_v44 = vadd.f32 %v14997_v27, %v15151_v58 }
 0x202   :  { %v5557_v53 = vrot.slane %v5556_v11, 4  ;;  %v5544_v5 = vmax.f32 %v5542_v18, %v5543_v34  ;;  %v5551_v0 = vmax.f32 %v5549_v30, %v5550_v32  ;;  %vm18859_vm9 = vcmask 1043459  }
 0x203   :  { %v15385_v17 = vsel %vm18859_vm9, %v7166_v45, %v7698_v2  ;;  %v12444_v26 = vunpack.i.h.bf16 %v15336_v4  ;;  %v5538_v12 = vrot.slane %v5537_v7, 2  ;;  %v3871_v47 = vmax.f32 %v3631_v44, 0.0 }
 0x204   :  { %v5558_v59 = vmax.f32 %v5556_v11, %v5557_v53  ;;  %v12443_v43 = vunpack.i.l.bf16 %v15336_v4  ;;  %v5545_v40 = vrot.slane %v5544_v5, 2  ;;  %v5552_v27 = vrot.slane %v5551_v0, 2 }
 0x205   :  { %v2937_v58 = vsel %vm34_vm0, %v312_v42, %v12444_v26  ;;  %v12439_v23 = vunpack.i.h.bf16 %v15338_v35  ;;  %v5539_v49 = vmax.f32 %v5537_v7, %v5538_v12  ;;  %v4079_v22 = vcombine.high %v3871_v47, %v3871_v47 }
 0x206   :  { %v5559_v31 = vrot.slane %v5558_v59, 2  ;;  %v4086_v41 = vrot.slane %v3871_v47, %v14922_v36  ;;  %v5546_v50 = vmax.f32 %v5544_v5, %v5545_v40  ;;  %v5553_v24 = vmax.f32 %v5551_v0, %v5552_v27 }
 0x207   :  { %v2936_v54 = vsel %vm34_vm0, %v311_v57, %v12443_v43  ;;  %v15397_v21 = vsel %vm3352_vm2, %v15283_v28, %v12439_v23  ;;  %v5540_v4 = vrot.slane %v5539_v49, 1  ;;  %v4093_v51 = vrot.slane %v4079_v22, %v14922_v36  ;;  %v15429_v43 = vpop.permute.xlu1 %12481 }
 0x208   :  { %v5560_v37 = vmax.f32 %v5558_v59, %v5559_v31  ;;  %v4094_v56 = vcombine.high %v4086_v41, %v4086_v41  ;;  %v5547_v14 = vrot.slane %v5546_v50, 1  ;;  %v5554_v20 = vrot.slane %v5553_v24, 1  ;;  %v15436_v31 = vpop.permute.xlu0 %12476 }
 0x209   :  { %v5479_v9 = vsel %vm5338_vm11, %v4086_v41, -inf  ;;  %v12438_v6 = vunpack.i.l.bf16 %v15338_v35  ;;  %v5541_v46 = vmax.f32 %v5539_v49, %v5540_v4  ;;  %v4095_v33 = vcombine.high %v4093_v51, %v4093_v51  ;;  %v15406_v25 = vpop.f32.mrb[12].mxu0 }
 0x20a   :  { %v5561_v45 = vrot.slane %v5560_v37, 1  ;;  %v5480_v28 = vrot.slane %v5479_v9, 4  ;;  %v5548_v18 = vmax.f32 %v5546_v50, %v5547_v14  ;;  %v5555_v30 = vmax.f32 %v5553_v24, %v5554_v20  ;;  %v15410_v32 = vpop.f32.mrb[13].mxu0 }
 0x20b   :  { %v5486_v8 = vsel %vm5338_vm11, %v4094_v56, -inf  ;;  %v5493_v34 = vsel %vm5338_vm11, %v4093_v51, -inf  ;;  %v15413_v2 = vsel %vm3352_vm2, %v5541_v46, -inf  ;;  %v15415_v53 = vpop.f32.mrb[14].mxu0  ;;  %v5500_v0 = vsel %vm5338_vm11, %v4095_v33, -inf }
 0x20c   :  { %v5562_v11 = vmax.f32 %v5560_v37, %v5561_v45  ;;  %v5481_v35 = vmax.f32 %v5479_v9, %v5480_v28  ;;  %v5487_v7 = vrot.slane %v5486_v8, 4  ;;  %v15418_v44 = vsel %vm3352_vm2, %v5548_v18, -inf  ;;  %v15424_v26 = vpop.f32.mrb[15].mxu0  ;;  %v12492_v28 = vpop.permute.xlu1 %12491 }
 0x20d   :  { %v15421_v42 = vsel %vm3352_vm2, %v5555_v30, -inf  ;;  %v5494_v5 = vrot.slane %v5493_v34, 4  ;;  %v5501_v57 = vrot.slane %v5500_v0, 4  ;;  %v3387_v27 = vsel %vm3352_vm2, %v15280_v60, %v12438_v6  ;;  %v12487_v30 = vpop.permute.xlu0 %12486 }
 0x20e   :  { %v15427_v12 = vsel %vm3352_vm2, %v5562_v11, -inf  ;;  %v5482_v59 = vrot.slane %v5481_v35, 2  ;;  %v5488_v47 = vmax.f32 %v5486_v8, %v5487_v7  ;;  %v3433_v23 = vpack.c.bf16 %v15375_v16, %v15310_v19 }
 0x20f   :  { %v5495_v40 = vmax.f32 %v5493_v34, %v5494_v5  ;;  %v12454_v49 = vunpack.i.h.bf16 %v15355_v3  ;;  %v5502_v50 = vmax.f32 %v5500_v0, %v5501_v57  ;;  %v12453_v24 = vunpack.i.l.bf16 %v15355_v3 }
 0x210   :  { %v5483_v22 = vmax.f32 %v5481_v35, %v5482_v59  ;;  %v5489_v41 = vrot.slane %v5488_v47, 2  ;;  %11637 = vmatprep.mubr.msk.bf16.mxu0 %vm3476_vm10, %v3433_v23  ;;  %v12449_v51 = vunpack.i.h.bf16 %v15363_v39  ;;  %v12448_v60 = vunpack.i.l.bf16 %v15363_v39 }
 0x211   :  { %v5496_v4 = vrot.slane %v5495_v40, 2  ;;  %v3002_v37 = vsel %vm2962_vm4, %v2937_v58, %v12454_v49  ;;  %v5503_v16 = vrot.slane %v5502_v50, 2  ;;  %v3001_v14 = vsel %vm2962_vm4, %v2936_v54, %v12453_v24  ;;  %v206_v58 = vld [vmem:[%s18840_s0 + $0x1f0] sm:$0xff]  ;;  %v207_v54 = vld [vmem:[%s18840_s0 + $0x1f8] sm:$0xff]  ;;  %v12502_v24 = vpop.permute.xlu1 %12501 }
 0x212   :  { %v5484_v56 = vrot.slane %v5483_v22, 1  ;;  %v5490_v19 = vmax.f32 %v5488_v47, %v5489_v41  ;;  %v3000_v9 = vsel %vm2962_vm4, %v15304_v55, %v12449_v51  ;;  %v2999_v3 = vsel %vm2962_vm4, %v15307_v62, %v12448_v60  ;;  %271 = vst.msk [vmem:[#allocation2 + $0x331] sm:$0xff] %vm34_vm0, %v206_v58  ;;  %272 = vst.msk [vmem:[#allocation2 + $0x339] sm:$0xff] %vm34_vm0, %v207_v54 }
 0x213   :  { %v5497_v20 = vmax.f32 %v5495_v40, %v5496_v4  ;;  %v3434_v6 = vpack.c.bf16 %v15397_v21, %v3387_v27  ;;  %v5504_v45 = vmax.f32 %v5502_v50, %v5503_v16  ;;  %v12464_v33 = vunpack.i.h.bf16 %v15382_v52 }
 0x214   :  { %v5485_v46 = vmax.f32 %v5483_v22, %v5484_v56  ;;  %v5491_v39 = vrot.slane %v5490_v19, 1  ;;  %v12463_v62 = vunpack.i.l.bf16 %v15382_v52  ;;  %v12459_v21 = vunpack.i.h.bf16 %v15388_v38 }
 0x215   :  { %v5498_v55 = vrot.slane %v5497_v20, 1  ;;  %11638 = vmatmul.mubr.msk.bf16.gmra.mrb[32].mxu0 %vm3476_vm10, %v3434_v6  ;;  %v12458_v18 = vunpack.i.l.bf16 %v15388_v38  ;;  %v5505_v34 = vrot.slane %v5504_v45, 1  ;;  %v3067_v35 = vsel %vm3027_vm5, %v3002_v37, %v12464_v33  ;;  %v12512_v54 = vpop.permute.xlu1 %12511 }
 0x216   :  { %v5492_v8 = vmax.f32 %v5490_v19, %v5491_v39  ;;  %v7167_v11 = vsel %vm3352_vm2, %v5485_v46, -inf  ;;  %v3066_v0 = vsel %vm3027_vm5, %v3001_v14, %v12463_v62  ;;  %v3065_v38 = vsel %vm3027_vm5, %v3000_v9, %v12459_v21 }
 0x217   :  { %v5499_v7 = vmax.f32 %v5497_v20, %v5498_v55  ;;  %v7169_v5 = vmax.f32 %v7167_v11, %v15413_v2  ;;  %v3064_v52 = vsel %vm3027_vm5, %v2999_v3, %v12458_v18  ;;  %v5506_v59 = vmax.f32 %v5504_v45, %v5505_v34  ;;  %v15511_v34 = vld [vmem:[%s18842_s2] ss:$0 sm:$0xff] }
 0x218   :  { %v7170_v47 = vsel %vm3352_vm2, %v5492_v8, -inf  ;;  %v12474_v57 = vunpack.i.h.bf16 %v15400_v61  ;;  %v12473_v2 = vunpack.i.l.bf16 %v15400_v61  ;;  %v12469_v50 = vunpack.i.h.bf16 %v15404_v13 }
 0x219   :  { %v7172_v40 = vmax.f32 %v7170_v47, %v15418_v44  ;;  %v7173_v27 = vsel %vm3352_vm2, %v5499_v7, -inf  ;;  %v7700_v23 = vsel %vm7689_vm15, %v7169_v5, %v15385_v17  ;;  %v7176_v22 = vsel %vm3352_vm2, %v5506_v59, -inf  ;;  %v12497_v17 = vpop.permute.xlu0 %12496  ;;  %v314_v7 = vld [vmem:[#allocation2 + $0x218] sm:$0xff] }
 0x21a   :  { %v7175_v49 = vmax.f32 %v7173_v27, %v15421_v42  ;;  %v3132_v41 = vsel %vm18855_vm6, %v3067_v35, %v12474_v57  ;;  %v7178_v4 = vmax.f32 %v7176_v22, %v15427_v12  ;;  %v3131_v37 = vsel %vm18855_vm6, %v3066_v0, %v12473_v2  ;;  %v313_v57 = vld [vmem:[#allocation2 + $0x210] sm:$0xff] }
 0x21b   :  { %v7701_v44 = vsel %vm18858_vm1, %v7172_v40, %v7700_v23  ;;  %v12468_v51 = vunpack.i.l.bf16 %v15404_v13  ;;  %v3130_v42 = vsel %vm18855_vm6, %v3065_v38, %v12469_v50  ;;  %v12484_v60 = vunpack.i.h.bf16 %v15429_v43 }
 0x21c   :  { %v7702_v61 = vsel %vm18857_vm3, %v7175_v49, %v7701_v44  ;;  %v12483_v56 = vunpack.i.l.bf16 %v15429_v43  ;;  %v12479_v12 = vunpack.i.h.bf16 %v15436_v31  ;;  %v12478_v14 = vunpack.i.l.bf16 %v15436_v31 }
 0x21d   :  { %v7703_v19 = vsel %vm18856_vm14, %v7178_v4, %v7702_v61  ;;  %v3129_v16 = vsel %vm18855_vm6, %v3064_v52, %v12468_v51  ;;  %v3197_v20 = vsel %vm18853_vm7, %v3132_v41, %v12484_v60  ;;  %v12494_v9 = vunpack.i.h.bf16 %v12492_v28 }
 0x21e   :  { %7820 = vst.msk [vmem:[#allocation3 + $0x21] sm:$0xff] %vm3352_vm2, %v7703_v19  ;;  %v3196_v13 = vsel %vm18853_vm7, %v3131_v37, %v12483_v56  ;;  %v12493_v3 = vunpack.i.l.bf16 %v12492_v28  ;;  %v3194_v6 = vsel %vm18853_vm7, %v3129_v16, %v12478_v14  ;;  %v3195_v43 = vsel %vm18853_vm7, %v3130_v42, %v12479_v12  ;;  %v15500_v28 = vpop.permute.xlu0 %12506 }
 0x21f   :  { %v12489_v58 = vunpack.i.h.bf16 %v12487_v30  ;;  %v12488_v46 = vunpack.i.l.bf16 %v12487_v30  ;;  %v3262_v45 = vsel %vm18854_vm8, %v3197_v20, %v12494_v9  ;;  %v12504_v33 = vunpack.i.h.bf16 %v12502_v24 }
 0x220   :  { %v3261_v39 = vsel %vm18854_vm8, %v3196_v13, %v12493_v3  ;;  %v12503_v31 = vunpack.i.l.bf16 %v12502_v24  ;;  %v12499_v21 = vunpack.i.h.bf16 %v12497_v17  ;;  %v12498_v18 = vunpack.i.l.bf16 %v12497_v17 }
 0x221   :  { %v3259_v55 = vsel %vm18854_vm8, %v3194_v6, %v12488_v46  ;;  %v3260_v62 = vsel %vm18854_vm8, %v3195_v43, %v12489_v58  ;;  %vm18860_vm9 = vcmask 228352   ;;  %v3652_v11 = vadd.f32 %v15511_v34, %v15297_v10 }
 0x222   :  { %v15503_v8 = vsel %vm18860_vm9, %v3261_v39, %v12503_v31  ;;  %vm18861_vm7 = vmmov %vm18860_vm9  ;;  %v3644_v35 = vadd.f32 %v15511_v34, %v15314_v63  ;;  %v3655_v52 = vadd.f32 %v15511_v34, %v15319_v15  ;;  %v12514_v59 = vunpack.i.h.bf16 %v12512_v54 }
 0x223   :  { %v15506_v30 = vsel %vm18861_vm7, %v3262_v45, %v12504_v33  ;;  %vm18862_vm8 = vmmov %vm18861_vm7  ;;  %v3876_v47 = vmax.f32 %v3652_v11, 0.0  ;;  %v12513_v40 = vunpack.i.l.bf16 %v12512_v54  ;;  %v12509_v27 = vunpack.i.h.bf16 %v15500_v28 }
 0x224   :  { %v3324_v5 = vsel %vm18862_vm8, %v3259_v55, %v12498_v18  ;;  %vm18863_vm6 = vmmov %vm18861_vm7  ;;  %v3874_v38 = vmax.f32 %v3644_v35, 0.0  ;;  %v3877_v10 = vmax.f32 %v3655_v52, 0.0  ;;  %v15525_v23 = vsel %vm34_vm0, %v314_v7, %v12514_v59 }
 0x225   :  { %v15519_v0 = vsel %vm18863_vm6, %v3260_v62, %v12499_v21  ;;  %v12508_v63 = vunpack.i.l.bf16 %v15500_v28  ;;  %v15530_v2 = vadd.f32 %v15511_v34, %v15324_v29  ;;  %v4164_v49 = vcombine.high %v3876_v47, %v3876_v47 }
 0x226   :  { %v4171_v15 = vrot.slane %v3876_v47, %v14922_v36  ;;  %v4130_v22 = vcombine.high %v3874_v38, %v3874_v38  ;;  %v4137_v41 = vrot.slane %v3874_v38, %v14922_v36  ;;  %v4181_v50 = vcombine.high %v3877_v10, %v3877_v10 }
 0x227   :  { %v15535_v24 = vrot.slane %v3877_v10, %v14922_v36  ;;  %v15538_v4 = vsel %vm34_vm0, %v313_v57, %v12513_v40  ;;  %v15541_v44 = vsel %vm3352_vm2, %v3324_v5, %v12508_v63  ;;  %v4178_v37 = vrot.slane %v4164_v49, %v14922_v36 }
 0x228   :  { %v4179_v29 = vcombine.high %v4171_v15, %v4171_v15  ;;  %v5619_v51 = vsel %vm5338_vm11, %v4171_v15, -inf  ;;  %v4144_v17 = vrot.slane %v4130_v22, %v14922_v36  ;;  %v4145_v42 = vcombine.high %v4137_v41, %v4137_v41 }
 0x229   :  { %v5620_v61 = vrot.slane %v5619_v51, 4  ;;  %v5563_v60 = vsel %vm5338_vm11, %v4137_v41, -inf  ;;  %v15548_v56 = vrot.slane %v4181_v50, %v14922_v36  ;;  %v4180_v19 = vcombine.high %v4178_v37, %v4178_v37  ;;  %v15552_v13 = vpop.f32.mrb[16].mxu0 }
 0x22a   :  { %v5626_v16 = vsel %vm5338_vm11, %v4179_v29, -inf  ;;  %v5633_v12 = vsel %vm5338_vm11, %v4178_v37, -inf  ;;  %v4146_v14 = vcombine.high %v4144_v17, %v4144_v17  ;;  %v5564_v6 = vrot.slane %v5563_v60, 4  ;;  %v15554_v43 = vpop.f32.mrb[17].mxu0 }
 0x22b   :  { %v5621_v20 = vmax.f32 %v5619_v51, %v5620_v61  ;;  %v5627_v9 = vrot.slane %v5626_v16, 4  ;;  %v5634_v3 = vrot.slane %v5633_v12, 4  ;;  %v5640_v58 = vsel %vm5338_vm11, %v4180_v19, -inf  ;;  %v15560_v33 = vpop.f32.mrb[18].mxu0 }
 0x22c   :  { %v5570_v46 = vsel %vm5338_vm11, %v4145_v42, -inf  ;;  %v5577_v39 = vsel %vm5338_vm11, %v4144_v17, -inf  ;;  %v5584_v45 = vsel %vm5338_vm11, %v4146_v14, -inf  ;;  %v5641_v62 = vrot.slane %v5640_v58, 4  ;;  %v15562_v42 = vpop.permute.xlu1 %12521  ;;  %v15564_v14 = vpop.permute.xlu0 %12516 }
 0x22d   :  { %v5622_v31 = vrot.slane %v5621_v20, 2  ;;  %v5628_v54 = vmax.f32 %v5626_v16, %v5627_v9  ;;  %v5635_v55 = vmax.f32 %v5633_v12, %v5634_v3  ;;  %v5565_v21 = vmax.f32 %v5563_v60, %v5564_v6 }
 0x22e   :  { %v5571_v18 = vrot.slane %v5570_v46, 4  ;;  %v5578_v11 = vrot.slane %v5577_v39, 4  ;;  %v5585_v35 = vrot.slane %v5584_v45, 4  ;;  %v5642_v59 = vmax.f32 %v5640_v58, %v5641_v62 }
 0x22f   :  { %v5623_v7 = vmax.f32 %v5621_v20, %v5622_v31  ;;  %v5629_v5 = vrot.slane %v5628_v54, 2  ;;  %v5636_v52 = vrot.slane %v5635_v55, 2  ;;  %v5566_v47 = vrot.slane %v5565_v21, 2  ;;  %v15566_v20 = vpop.f32.mrb[19].mxu0 }
 0x230   :  { %v5572_v38 = vmax.f32 %v5570_v46, %v5571_v18  ;;  %v5579_v57 = vmax.f32 %v5577_v39, %v5578_v11  ;;  %v5586_v40 = vmax.f32 %v5584_v45, %v5585_v35  ;;  %v5643_v15 = vrot.slane %v5642_v59, 2 }
 0x231   :  { %v5624_v10 = vrot.slane %v5623_v7, 1  ;;  %v5630_v63 = vmax.f32 %v5628_v54, %v5629_v5  ;;  %v5637_v49 = vmax.f32 %v5635_v55, %v5636_v52  ;;  %v5567_v22 = vmax.f32 %v5565_v21, %v5566_v47 }
 0x232   :  { %v5573_v41 = vrot.slane %v5572_v38, 2  ;;  %v5580_v50 = vrot.slane %v5579_v57, 2  ;;  %v5587_v37 = vrot.slane %v5586_v40, 2  ;;  %v5644_v61 = vmax.f32 %v5642_v59, %v5643_v15 }
 0x233   :  { %v5625_v29 = vmax.f32 %v5623_v7, %v5624_v10  ;;  %v5631_v51 = vrot.slane %v5630_v63, 1  ;;  %v5638_v17 = vrot.slane %v5637_v49, 1  ;;  %v5568_v60 = vrot.slane %v5567_v22, 1 }
 0x234   :  { %v5574_v19 = vmax.f32 %v5572_v38, %v5573_v41  ;;  %v5581_v16 = vmax.f32 %v5579_v57, %v5580_v50  ;;  %v5588_v12 = vmax.f32 %v5586_v40, %v5587_v37  ;;  %v5645_v6 = vrot.slane %v5644_v61, 1  ;;  %v15579_v38 = vpop.permute.xlu1 %12531 }
 0x235   :  { %v5632_v9 = vmax.f32 %v5630_v63, %v5631_v51  ;;  %v5639_v3 = vmax.f32 %v5637_v49, %v5638_v17  ;;  %v7180_v58 = vsel %vm3352_vm2, %v5625_v29, -inf  ;;  %v5569_v46 = vmax.f32 %v5567_v22, %v5568_v60  ;;  %v15584_v49 = vpop.permute.xlu0 %12526  ;;  %v647_v17 = vld [vmem:[#allocation2 + $0x2d2] sm:$0xff] }
 0x236   :  { %v5575_v39 = vrot.slane %v5574_v19, 1  ;;  %v5582_v45 = vrot.slane %v5581_v16, 1  ;;  %v5589_v31 = vrot.slane %v5588_v12, 1  ;;  %v5646_v54 = vmax.f32 %v5644_v61, %v5645_v6  ;;  %v648_v61 = vld [vmem:[#allocation2 + $0x2da] sm:$0xff] }
 0x237   :  { %v7183_v55 = vsel %vm3352_vm2, %v5632_v9, -inf  ;;  %v7186_v62 = vsel %vm3352_vm2, %v5639_v3, -inf  ;;  %v4196_v21 = vcombine.high %v15535_v24, %v15535_v24  ;;  %v7179_v7 = vsel %vm3352_vm2, %v5569_v46, -inf }
 0x238   :  { %v5576_v18 = vmax.f32 %v5574_v19, %v5575_v39  ;;  %v5583_v11 = vmax.f32 %v5581_v16, %v5582_v45  ;;  %v5590_v35 = vmax.f32 %v5588_v12, %v5589_v31  ;;  %v7189_v5 = vsel %vm3352_vm2, %v5646_v54, -inf  ;;  %v15604_v31 = vpop.permute.xlu1 %12541 }
 0x239   :  { %v7181_v52 = vmax.f32 %v7179_v7, %v7180_v58  ;;  %v4197_v59 = vcombine.high %v15548_v56, %v15548_v56  ;;  %v5647_v47 = vsel %vm5338_vm11, %v15535_v24, -inf  ;;  %v5654_v50 = vsel %vm5338_vm11, %v4196_v21, -inf }
 0x23a   :  { %v7182_v57 = vsel %vm3352_vm2, %v5576_v18, -inf  ;;  %v7185_v40 = vsel %vm3352_vm2, %v5583_v11, -inf  ;;  %v7188_v10 = vsel %vm3352_vm2, %v5590_v35, -inf  ;;  %v5648_v63 = vrot.slane %v5647_v47, 4 }
 0x23b   :  { %v7184_v15 = vmax.f32 %v7182_v57, %v7183_v55  ;;  %v7187_v22 = vmax.f32 %v7185_v40, %v7186_v62  ;;  %v7190_v41 = vmax.f32 %v7188_v10, %v7189_v5  ;;  %v5655_v29 = vrot.slane %v5654_v50, 4  ;;  %v15607_v62 = vpop.permute.xlu0 %12536 }
 0x23c   :  { %v5649_v37 = vmax.f32 %v5647_v47, %v5648_v63  ;;  %v5661_v24 = vsel %vm5338_vm11, %v15548_v56, -inf  ;;  %v5668_v51 = vsel %vm5338_vm11, %v4197_v59, -inf  ;;  %v15595_v12 = vsel %vm3352_vm2, %v15519_v0, %v12509_v27  ;;  %v316_v27 = vld [vmem:[#allocation2 + $0x230] sm:$0xff] }
 0x23d   :  { %v7704_v60 = vsel %vm7683_vm12, %v7184_v15, %v7181_v52  ;;  %v5662_v19 = vrot.slane %v5661_v24, 4  ;;  %v5669_v16 = vrot.slane %v5668_v51, 4  ;;  %v5656_v6 = vmax.f32 %v5654_v50, %v5655_v29  ;;  %v15620_v29 = vpop.permute.xlu1 %12551 }
 0x23e   :  { %v7705_v9 = vsel %vm7685_vm13, %v7187_v22, %v7704_v60  ;;  %v5650_v3 = vrot.slane %v5649_v37, 2  ;;  %v3875_v56 = vmax.f32 %v15530_v2, 0.0  ;;  %vm18864_vm6 = vcmask 1043459   ;;  %v315_v60 = vld [vmem:[#allocation2 + $0x228] sm:$0xff] }
 0x23f   :  { %v5663_v58 = vmax.f32 %v5661_v24, %v5662_v19  ;;  %v5670_v46 = vmax.f32 %v5668_v51, %v5669_v16  ;;  %v15600_v39 = vsel %vm18864_vm6, %v7190_v41, %v7705_v9  ;;  %v15602_v45 = vpack.i.bf16 %v648_v61, %v647_v17  ;;  %v15625_v19 = vpop.permute.xlu0 %12546 }
 0x240   :  { %v5651_v28 = vmax.f32 %v5649_v37, %v5650_v3  ;;  %v5657_v54 = vrot.slane %v5656_v6, 2  ;;  %v4147_v55 = vcombine.high %v3875_v56, %v3875_v56  ;;  %v4154_v0 = vrot.slane %v3875_v56, %v14922_v36 }
 0x241   :  { %v5664_v21 = vrot.slane %v5663_v58, 2  ;;  %v5671_v18 = vrot.slane %v5670_v46, 2  ;;  %12801 = vrot.lane.b32.xlu1 %v15602_v45, %s13376_s28  ;;  %v12524_v2 = vunpack.i.h.bf16 %v15562_v42  ;;  %v12523_v11 = vunpack.i.l.bf16 %v15562_v42  ;;  %12826 = vrot.lane.b32.xlu0 %v15602_v45, %s13379_s1 }
 0x242   :  { %v5652_v35 = vrot.slane %v5651_v28, 1  ;;  %v5658_v7 = vmax.f32 %v5656_v6, %v5657_v54  ;;  %v4161_v5 = vrot.slane %v4147_v55, %v14922_v36  ;;  %v4162_v52 = vcombine.high %v4154_v0, %v4154_v0  ;;  %v712_v54 = vld [vmem:[#allocation2 + $0x2e8] sm:$0xff]  ;;  %v713_v55 = vld [vmem:[#allocation2 + $0x2f0] sm:$0xff] }
 0x243   :  { %v5665_v59 = vmax.f32 %v5663_v58, %v5664_v21  ;;  %v5672_v47 = vmax.f32 %v5670_v46, %v5671_v18  ;;  %v5591_v57 = vsel %vm5338_vm11, %v4154_v0, -inf  ;;  %v2941_v40 = vsel %vm34_vm0, %v316_v27, %v12524_v2 }
 0x244   :  { %v5653_v10 = vmax.f32 %v5651_v28, %v5652_v35  ;;  %v5659_v63 = vrot.slane %v5658_v7, 1  ;;  %v4163_v15 = vcombine.high %v4161_v5, %v4161_v5  ;;  %v5592_v22 = vrot.slane %v5591_v57, 4 }
 0x245   :  { %v5666_v41 = vrot.slane %v5665_v59, 1  ;;  %v5673_v42 = vrot.slane %v5672_v47, 1  ;;  %v5598_v50 = vsel %vm5338_vm11, %v4162_v52, -inf  ;;  %v5605_v37 = vsel %vm5338_vm11, %v4161_v5, -inf }
 0x246   :  { %v5660_v24 = vmax.f32 %v5658_v7, %v5659_v63  ;;  %v15623_v51 = vsel %vm3352_vm2, %v5653_v10, -inf  ;;  %v5593_v17 = vmax.f32 %v5591_v57, %v5592_v22  ;;  %v5599_v61 = vrot.slane %v5598_v50, 4  ;;  %v15644_v10 = vpop.permute.xlu1 %12561 }
 0x247   :  { %v5667_v16 = vmax.f32 %v5665_v59, %v5666_v41  ;;  %v5674_v9 = vmax.f32 %v5672_v47, %v5673_v42  ;;  %v5606_v3 = vrot.slane %v5605_v37, 4  ;;  %v5612_v6 = vsel %vm5338_vm11, %v4163_v15, -inf  ;;  %v15648_v41 = vpop.permute.xlu0 %12556 }
 0x248   :  { %v15629_v56 = vsel %vm3352_vm2, %v5660_v24, -inf  ;;  %v5594_v58 = vrot.slane %v5593_v17, 2  ;;  %v5600_v46 = vmax.f32 %v5598_v50, %v5599_v61  ;;  %v5613_v28 = vrot.slane %v5612_v6, 4  ;;  %v777_v61 = vld [vmem:[#allocation2 + $0x2f1] sm:$0xff] }
 0x249   :  { %v15632_v0 = vsel %vm3352_vm2, %v5667_v16, -inf  ;;  %v15635_v27 = vsel %vm3352_vm2, %v5674_v9, -inf  ;;  %v5607_v21 = vmax.f32 %v5605_v37, %v5606_v3  ;;  %v2940_v18 = vsel %vm34_vm0, %v315_v60, %v12523_v11 }
 0x24a   :  { %v5595_v2 = vmax.f32 %v5593_v17, %v5594_v58  ;;  %v5601_v35 = vrot.slane %v5600_v46, 2  ;;  %v5614_v7 = vmax.f32 %v5612_v6, %v5613_v28  ;;  %v12519_v5 = vunpack.i.h.bf16 %v15564_v14  ;;  %v776_v17 = vld [vmem:[#allocation2 + $0x2e9] sm:$0xff] }
 0x24b   :  { %v5608_v52 = vrot.slane %v5607_v21, 2  ;;  %v12518_v59 = vunpack.i.l.bf16 %v15564_v14  ;;  %v15640_v47 = vpack.i.bf16 %v713_v55, %v712_v54  ;;  %v3435_v57 = vpack.c.bf16 %v15595_v12, %v15541_v44 }
 0x24c   :  { %v5596_v63 = vrot.slane %v5595_v2, 1  ;;  %v5602_v15 = vmax.f32 %v5600_v46, %v5601_v35  ;;  %v5615_v22 = vrot.slane %v5614_v7, 2  ;;  %v3392_v11 = vsel %vm3352_vm2, %v15506_v30, %v12519_v5  ;;  %v12567_v35 = vpop.permute.xlu0 %12566 }
 0x24d   :  { %v5609_v42 = vmax.f32 %v5607_v21, %v5608_v52  ;;  %v3391_v50 = vsel %vm3352_vm2, %v15503_v8, %v12518_v59  ;;  %12811 = vrot.lane.b32.xlu1 %v15640_v47, %s13377_s22  ;;  %11641 = vmatprep.mubr.msk.bf16.mxu0 %vm3476_vm10, %v3435_v57  ;;  %v12534_v44 = vunpack.i.h.bf16 %v15579_v38  ;;  %v12533_v14 = vunpack.i.l.bf16 %v15579_v38  ;;  %v12572_v21 = vpop.permute.xlu1 %12571 }
 0x24e   :  { %v5597_v12 = vmax.f32 %v5595_v2, %v5596_v63  ;;  %v5603_v37 = vrot.slane %v5602_v15, 1  ;;  %v5616_v24 = vmax.f32 %v5614_v7, %v5615_v22  ;;  %v12529_v30 = vunpack.i.h.bf16 %v15584_v49  ;;  %v840_v22 = vld [vmem:[#allocation2 + $0x2ea] sm:$0xff] }
 0x24f   :  { %v5610_v60 = vrot.slane %v5609_v42, 1  ;;  %v3005_v16 = vsel %vm2962_vm4, %v2940_v18, %v12533_v14  ;;  %v3006_v8 = vsel %vm2962_vm4, %v2941_v40, %v12534_v44  ;;  %v12528_v9 = vunpack.i.l.bf16 %v15584_v49 }
 0x250   :  { %v5604_v3 = vmax.f32 %v5602_v15, %v5603_v37  ;;  %v5617_v6 = vrot.slane %v5616_v24, 1  ;;  %v7191_v58 = vsel %vm3352_vm2, %v5597_v12, -inf  ;;  %v3004_v38 = vsel %vm2962_vm4, %v15525_v23, %v12529_v30 }
 0x251   :  { %v5611_v46 = vmax.f32 %v5609_v42, %v5610_v60  ;;  %v7193_v28 = vmax.f32 %v7191_v58, %v15623_v51  ;;  %v3003_v54 = vsel %vm2962_vm4, %v15538_v4, %v12528_v9  ;;  %v15667_v55 = vpack.i.bf16 %v777_v61, %v776_v17  ;;  %v12582_v12 = vpop.permute.xlu1 %12581  ;;  %v12577_v17 = vpop.permute.xlu0 %12576 }
 0x252   :  { %v5618_v18 = vmax.f32 %v5616_v24, %v5617_v6  ;;  %v7194_v40 = vsel %vm3352_vm2, %v5604_v3, -inf  ;;  %v3436_v49 = vpack.c.bf16 %v3392_v11, %v3391_v50  ;;  %v12544_v2 = vunpack.i.h.bf16 %v15604_v31 }
 0x253   :  { %v7196_v7 = vmax.f32 %v7194_v40, %v15629_v56  ;;  %v7197_v23 = vsel %vm3352_vm2, %v5611_v46, -inf  ;;  %v7707_v51 = vsel %vm7689_vm15, %v7193_v28, %v15600_v39  ;;  %12821 = vrot.lane.b32.xlu1 %v15667_v55, %s13378_s23  ;;  %v12543_v4 = vunpack.i.l.bf16 %v15604_v31  ;;  %v841_v31 = vld [vmem:[#allocation2 + $0x2f2] sm:$0xff] }
 0x254   :  { %v7199_v5 = vmax.f32 %v7197_v23, %v15632_v0  ;;  %v7200_v52 = vsel %vm3352_vm2, %v5618_v18, -inf  ;;  %11642 = vmatmul.mubr.msk.bf16.gmra.mrb[36].mxu0 %vm3476_vm10, %v3436_v49  ;;  %v3071_v59 = vsel %vm3027_vm5, %v3006_v8, %v12544_v2  ;;  %v12539_v56 = vunpack.i.h.bf16 %v15607_v62  ;;  %v524_v8 = vld [vmem:[#allocation2 + $0x308] sm:$0xff] }
 0x255   :  { %v7202_v57 = vmax.f32 %v7200_v52, %v15635_v27  ;;  %v7708_v63 = vsel %vm18858_vm1, %v7196_v7, %v7707_v51  ;;  %v3070_v39 = vsel %vm3027_vm5, %v3005_v16, %v12543_v4  ;;  %v12538_v15 = vunpack.i.l.bf16 %v15607_v62  ;;  %v523_v16 = vld [vmem:[#allocation2 + $0x300] sm:$0xff]  ;;  %v588_v18 = vld [vmem:[#allocation2 + $0x309] sm:$0xff] }
 0x256   :  { %v7709_v0 = vsel %vm18857_vm3, %v7199_v5, %v7708_v63  ;;  %v3069_v11 = vsel %vm3027_vm5, %v3004_v38, %v12539_v56  ;;  %v12554_v42 = vunpack.i.h.bf16 %v15620_v29  ;;  %v12553_v50 = vunpack.i.l.bf16 %v15620_v29  ;;  %v12592_v5 = vpop.permute.xlu1 %12591 }
 0x257   :  { %v7710_v44 = vsel %vm18856_vm14, %v7202_v57, %v7709_v0  ;;  %v3068_v27 = vsel %vm3027_vm5, %v3003_v54, %v12538_v15  ;;  %12831 = vrot.lane.b32.xlu1 %v15005_v48, %s13373_s25  ;;  %v12549_v14 = vunpack.i.h.bf16 %v15625_v19  ;;  %v12548_v62 = vunpack.i.l.bf16 %v15625_v19  ;;  %v587_v54 = vld [vmem:[#allocation2 + $0x301] sm:$0xff]  ;;  %v15730_v57 = vpop.permute.xlu0 %12586 }
 0x258   :  { %7821 = vst.msk [vmem:[#allocation3 + $0x31] sm:$0xff] %vm3352_vm2, %v7710_v44  ;;  %vm18865_vm7 = vcmask 130048   ;;  %v15700_v30 = vpack.i.bf16 %v841_v31, %v840_v22  ;;  %v12564_v29 = vunpack.i.h.bf16 %v15644_v10  ;;  %v12563_v60 = vunpack.i.l.bf16 %v15644_v10  ;;  %v317_v44 = vld [vmem:[#allocation2 + $0x240] sm:$0xff] }
 0x259   :  { %v3135_v37 = vsel %vm18865_vm7, %v3070_v39, %v12553_v50  ;;  %vm18866_vm8 = vmmov %vm18865_vm7  ;;  %v12559_v19 = vunpack.i.h.bf16 %v15648_v41  ;;  %v12558_v3 = vunpack.i.l.bf16 %v15648_v41  ;;  %v12574_v6 = vunpack.i.h.bf16 %v12572_v21 }
 0x25a   :  { %v3136_v24 = vsel %vm18866_vm8, %v3071_v59, %v12554_v42  ;;  %vm18867_vm9 = vmmov %vm18865_vm7  ;;  %12836 = vrot.lane.b32.xlu0 %v15700_v30, %s13379_s1  ;;  %v12573_v58 = vunpack.i.l.bf16 %v12572_v21  ;;  %v12569_v46 = vunpack.i.h.bf16 %v12567_v35  ;;  %v12568_v28 = vunpack.i.l.bf16 %v12567_v35  ;;  %v15720_v21 = vpop.f32.mrb[20].mxu0 }
 0x25b   :  { %v3133_v61 = vsel %vm18867_vm9, %v3068_v27, %v12548_v62  ;;  %vm18868_vm6 = vmmov %vm18865_vm7  ;;  %vm18869_vm7 = vcmask 162816   ;;  %12841 = vrot.lane.b32.xlu1 %v15667_v55, %s13373_s25  ;;  %vm18873_vm14 = vcmask 195584   ;;  %v15718_v41 = vpack.i.bf16 %v524_v8, %v523_v16 }
 0x25c   :  { %v3134_v48 = vsel %vm18868_vm6, %v3069_v11, %v12549_v14  ;;  %v3201_v9 = vsel %vm18869_vm7, %v3136_v24, %v12564_v29  ;;  %vm18870_vm8 = vmmov %vm18869_vm7  ;;  %v12584_v51 = vunpack.i.h.bf16 %v12582_v12  ;;  %v12583_v4 = vunpack.i.l.bf16 %v12582_v12 }
 0x25d   :  { %v3200_v38 = vsel %vm18870_vm8, %v3135_v37, %v12563_v60  ;;  %vm18871_vm9 = vmmov %vm18869_vm7  ;;  %v12579_v35 = vunpack.i.h.bf16 %v12577_v17  ;;  %v12578_v52 = vunpack.i.l.bf16 %v12577_v17  ;;  %v3668_v59 = vadd.f32 %v15511_v34, %v15406_v25  ;;  %v318_v25 = vld [vmem:[#allocation2 + $0x248] sm:$0xff] }
 0x25e   :  { %v3199_v10 = vsel %vm18871_vm9, %v3134_v48, %v12559_v19  ;;  %vm18872_vm6 = vmmov %vm18869_vm7  ;;  %v3265_v49 = vsel %vm18873_vm14, %v3200_v38, %v12573_v58  ;;  %12846 = vrot.lane.b32.xlu0 %v15602_v45, %s13372_s24  ;;  %v15728_v56 = vpack.i.bf16 %v588_v18, %v587_v54  ;;  %v3660_v45 = vadd.f32 %v15511_v34, %v15410_v32 }
 0x25f   :  { %v3198_v40 = vsel %vm18872_vm6, %v3133_v61, %v12558_v3  ;;  %vm18874_vm7 = vmmov %vm18873_vm14  ;;  %12851 = vrot.lane.b32.xlu1 %v15700_v30, %s13372_s24  ;;  %v3671_v15 = vadd.f32 %v15511_v34, %v15415_v53  ;;  %v3880_v0 = vmax.f32 %v3668_v59, 0.0  ;;  %v12594_v11 = vunpack.i.h.bf16 %v12592_v5 }
 0x260   :  { %v3266_v2 = vsel %vm18874_vm7, %v3201_v9, %v12574_v6  ;;  %vm18875_vm3 = vmmov %vm18874_vm7  ;;  %v3878_v42 = vmax.f32 %v3660_v45, 0.0  ;;  %v12593_v27 = vunpack.i.l.bf16 %v12592_v5  ;;  %v12589_v14 = vunpack.i.h.bf16 %v15730_v57 }
 0x261   :  { %v3263_v7 = vsel %vm18875_vm3, %v3198_v40, %v12568_v28  ;;  %vm18876_vm1 = vmmov %vm18875_vm3  ;;  %vm18877_vm3 = vcmask 228352   ;;  %v15750_v50 = vmax.f32 %v3671_v15, 0.0  ;;  %v4232_v32 = vcombine.high %v3880_v0, %v3880_v0 }
 0x262   :  { %v3264_v23 = vsel %vm18876_vm1, %v3199_v10, %v12569_v46  ;;  %v15735_v63 = vsel %vm18877_vm3, %v3265_v49, %v12583_v4  ;;  %vm18878_vm14 = vmmov %vm18877_vm3  ;;  %12856 = vrot.lane.b32.xlu0 %v15640_v47, %s13374_s26  ;;  %v4239_v53 = vrot.slane %v3880_v0, %v14922_v36  ;;  %v15757_v62 = vsel %vm34_vm0, %v318_v25, %v12594_v11 }
 0x263   :  { %v15738_v39 = vsel %vm18878_vm14, %v3266_v2, %v12584_v51  ;;  %vm18879_vm1 = vmmov %vm18877_vm3  ;;  %v12588_v12 = vunpack.i.l.bf16 %v15730_v57  ;;  %12861 = vrot.lane.b32.xlu1 %v15718_v41, %s13374_s26  ;;  %v4198_v37 = vcombine.high %v3878_v42, %v3878_v42  ;;  %v4205_v24 = vrot.slane %v3878_v42, %v14922_v36 }
 0x264   :  { %v15745_v22 = vsel %vm18879_vm1, %v3263_v7, %v12578_v52  ;;  %vm18880_vm8 = vmmov %vm18879_vm1  ;;  %v4249_v29 = vcombine.high %v15750_v50, %v15750_v50  ;;  %v15767_v47 = vrot.slane %v15750_v50, %v14922_v36  ;;  %v4246_v17 = vrot.slane %v4232_v32, %v14922_v36 }
 0x265   :  { %v15748_v31 = vsel %vm18880_vm8, %v3264_v23, %v12579_v35  ;;  %v4247_v61 = vcombine.high %v4239_v53, %v4239_v53  ;;  %v5731_v48 = vsel %vm5338_vm11, %v4239_v53, -inf  ;;  %v15772_v60 = vsel %vm34_vm0, %v317_v44, %v12593_v27 }
 0x266   :  { %v5732_v19 = vrot.slane %v5731_v48, 4  ;;  %v4212_v16 = vrot.slane %v4198_v37, %v14922_v36  ;;  %v4213_v8 = vcombine.high %v4205_v24, %v4205_v24  ;;  %v5675_v9 = vsel %vm5338_vm11, %v4205_v24, -inf  ;;  %12866 = vrot.lane.b32.xlu0 %v15667_v55, %s13375_s27 }
 0x267   :  { %v4248_v3 = vcombine.high %v4246_v17, %v4246_v17  ;;  %v5738_v6 = vsel %vm5338_vm11, %v4247_v61, -inf  ;;  %v5745_v58 = vsel %vm5338_vm11, %v4246_v17, -inf  ;;  %v5676_v38 = vrot.slane %v5675_v9, 4  ;;  %12871 = vrot.lane.b32.xlu1 %v15728_v56, %s13375_s27 }
 0x268   :  { %v5733_v10 = vmax.f32 %v5731_v48, %v5732_v19  ;;  %v5739_v46 = vrot.slane %v5738_v6, 4  ;;  %v5746_v28 = vrot.slane %v5745_v58, 4  ;;  %v4214_v54 = vcombine.high %v4212_v16, %v4212_v16 }
 0x269   :  { %v5752_v18 = vsel %vm5338_vm11, %v4248_v3, -inf  ;;  %v5677_v40 = vmax.f32 %v5675_v9, %v5676_v38  ;;  %v5682_v49 = vsel %vm5338_vm11, %v4213_v8, -inf  ;;  %v5689_v2 = vsel %vm5338_vm11, %v4212_v16, -inf  ;;  %v15790_v38 = vpop.permute.xlu1 %12601 }
 0x26a   :  { %v5734_v7 = vrot.slane %v5733_v10, 2  ;;  %v5740_v23 = vmax.f32 %v5738_v6, %v5739_v46  ;;  %v5747_v51 = vmax.f32 %v5745_v58, %v5746_v28  ;;  %v5753_v4 = vrot.slane %v5752_v18, 4  ;;  %12876 = vrot.lane.b32.xlu0 %v15700_v30, %s13376_s28 }
 0x26b   :  { %v5678_v55 = vrot.slane %v5677_v40, 2  ;;  %v5683_v5 = vrot.slane %v5682_v49, 4  ;;  %v5690_v35 = vrot.slane %v5689_v2, 4  ;;  %v5696_v52 = vsel %vm5338_vm11, %v4214_v54, -inf }
 0x26c   :  { %v5735_v59 = vmax.f32 %v5733_v10, %v5734_v7  ;;  %v5741_v45 = vrot.slane %v5740_v23, 2  ;;  %v5748_v15 = vrot.slane %v5747_v51, 2  ;;  %v5754_v25 = vmax.f32 %v5752_v18, %v5753_v4  ;;  %v15792_v10 = vpop.f32.mrb[21].mxu0 }
 0x26d   :  { %v5679_v0 = vmax.f32 %v5677_v40, %v5678_v55  ;;  %v5684_v11 = vmax.f32 %v5682_v49, %v5683_v5  ;;  %v5691_v42 = vmax.f32 %v5689_v2, %v5690_v35  ;;  %v5697_v44 = vrot.slane %v5696_v52, 4  ;;  %v15795_v40 = vpop.permute.xlu0 %12596 }
 0x26e   :  { %v5736_v27 = vrot.slane %v5735_v59, 1  ;;  %v5742_v32 = vmax.f32 %v5740_v23, %v5741_v45  ;;  %v5749_v53 = vmax.f32 %v5747_v51, %v5748_v15  ;;  %v5755_v37 = vrot.slane %v5754_v25, 2  ;;  %12886 = vrot.lane.b32.xlu0 %v15718_v41, %s13377_s22 }
 0x26f   :  { %v5680_v24 = vrot.slane %v5679_v0, 1  ;;  %v5685_v17 = vrot.slane %v5684_v11, 2  ;;  %v5692_v61 = vrot.slane %v5691_v42, 2  ;;  %v5698_v48 = vmax.f32 %v5696_v52, %v5697_v44 }
 0x270   :  { %v5737_v30 = vmax.f32 %v5735_v59, %v5736_v27  ;;  %v5743_v19 = vrot.slane %v5742_v32, 1  ;;  %v5750_v16 = vrot.slane %v5749_v53, 1  ;;  %v5756_v8 = vmax.f32 %v5754_v25, %v5755_v37  ;;  %v15821_v27 = vpop.permute.xlu1 %12611 }
 0x271   :  { %v5681_v9 = vmax.f32 %v5679_v0, %v5680_v24  ;;  %v5686_v3 = vmax.f32 %v5684_v11, %v5685_v17  ;;  %v5693_v6 = vmax.f32 %v5691_v42, %v5692_v61  ;;  %v5699_v58 = vrot.slane %v5698_v48, 2  ;;  %v15817_v11 = vpop.f32.mrb[22].mxu0  ;;  %v15824_v24 = vpop.permute.xlu0 %12606 }
 0x272   :  { %v5744_v46 = vmax.f32 %v5742_v32, %v5743_v19  ;;  %v5751_v28 = vmax.f32 %v5749_v53, %v5750_v16  ;;  %v5757_v54 = vrot.slane %v5756_v8, 1  ;;  %v7204_v18 = vsel %vm3352_vm2, %v5737_v30, -inf  ;;  %12896 = vrot.lane.b32.xlu0 %v15728_v56, %s13378_s23 }
 0x273   :  { %v5687_v41 = vrot.slane %v5686_v3, 1  ;;  %v5694_v49 = vrot.slane %v5693_v6, 1  ;;  %v5700_v2 = vmax.f32 %v5698_v48, %v5699_v58  ;;  %v7203_v7 = vsel %vm3352_vm2, %v5681_v9, -inf  ;;  %v652_v9 = vld [vmem:[#allocation2 + $0x30a] sm:$0xff] }
 0x274   :  { %v5758_v23 = vmax.f32 %v5756_v8, %v5757_v54  ;;  %v7207_v51 = vsel %vm3352_vm2, %v5744_v46, -inf  ;;  %v7210_v4 = vsel %vm3352_vm2, %v5751_v28, -inf  ;;  %v7205_v55 = vmax.f32 %v7203_v7, %v7204_v18  ;;  %v651_v8 = vld [vmem:[#allocation2 + $0x302] sm:$0xff]  ;;  %v15845_v57 = vpop.permute.xlu1 %12621 }
 0x275   :  { %v5688_v5 = vmax.f32 %v5686_v3, %v5687_v41  ;;  %v5695_v35 = vmax.f32 %v5693_v6, %v5694_v49  ;;  %v5701_v52 = vrot.slane %v5700_v2, 1  ;;  %v4263_v59 = vrot.slane %v4249_v29, %v14922_v36  ;;  %v320_v49 = vld [vmem:[#allocation2 + $0x260] sm:$0xff] }
 0x276   :  { %v7213_v45 = vsel %vm3352_vm2, %v5758_v23, -inf  ;;  %v4264_v15 = vcombine.high %v15767_v47, %v15767_v47  ;;  %v5759_v25 = vsel %vm5338_vm11, %v15767_v47, -inf  ;;  %v15815_v0 = vsel %vm3352_vm2, %v15745_v22, %v12588_v12 }
 0x277   :  { %v5702_v42 = vmax.f32 %v5700_v2, %v5701_v52  ;;  %v7206_v50 = vsel %vm3352_vm2, %v5688_v5, -inf  ;;  %v7209_v29 = vsel %vm3352_vm2, %v5695_v35, -inf  ;;  %v4265_v44 = vcombine.high %v4263_v59, %v4263_v59  ;;  %v15848_v35 = vpop.permute.xlu0 %12616 }
 0x278   :  { %v7208_v32 = vmax.f32 %v7206_v50, %v7207_v51  ;;  %v7211_v53 = vmax.f32 %v7209_v29, %v7210_v4  ;;  %v5760_v37 = vrot.slane %v5759_v25, 4  ;;  %v5766_v47 = vsel %vm5338_vm11, %v4264_v15, -inf }
 0x279   :  { %v7212_v22 = vsel %vm3352_vm2, %v5702_v42, -inf  ;;  %v5767_v12 = vrot.slane %v5766_v47, 4  ;;  %v5773_v17 = vsel %vm5338_vm11, %v4263_v59, -inf  ;;  %v5780_v61 = vsel %vm5338_vm11, %v4265_v44, -inf }
 0x27a   :  { %v7214_v48 = vmax.f32 %v7212_v22, %v7213_v45  ;;  %v7711_v30 = vsel %vm7683_vm12, %v7208_v32, %v7205_v55  ;;  %v5761_v19 = vmax.f32 %v5759_v25, %v5760_v37  ;;  %v5774_v16 = vrot.slane %v5773_v17, 4  ;;  %v319_v55 = vld [vmem:[#allocation2 + $0x258] sm:$0xff]  ;;  %v15863_v22 = vpop.f32.mrb[23].mxu0 }
 0x27b   :  { %v7712_v3 = vsel %vm7685_vm13, %v7211_v53, %v7711_v30  ;;  %v5768_v6 = vmax.f32 %v5766_v47, %v5767_v12  ;;  %v5781_v58 = vrot.slane %v5780_v61, 4  ;;  %v15835_v46 = vsel %vm3352_vm2, %v15748_v31, %v12589_v14  ;;  %v15867_v30 = vpop.permute.xlu1 %12631 }
 0x27c   :  { %v5762_v28 = vrot.slane %v5761_v19, 2  ;;  %v5775_v54 = vmax.f32 %v5773_v17, %v5774_v16  ;;  %v3663_v18 = vadd.f32 %v15511_v34, %v15424_v26  ;;  %vm18881_vm9 = vcmask 1043459  }
 0x27d   :  { %v15840_v41 = vsel %vm18881_vm9, %v7214_v48, %v7712_v3  ;;  %v5769_v2 = vrot.slane %v5768_v6, 2  ;;  %v5782_v7 = vmax.f32 %v5780_v61, %v5781_v58  ;;  %v15842_v23 = vpack.i.bf16 %v652_v9, %v651_v8  ;;  %v716_v9 = vld [vmem:[#allocation2 + $0x318] sm:$0xff]  ;;  %v717_v3 = vld [vmem:[#allocation2 + $0x320] sm:$0xff] }
 0x27e   :  { %v12604_v51 = vunpack.i.h.bf16 %v15790_v38  ;;  %v5763_v4 = vmax.f32 %v5761_v19, %v5762_v28  ;;  %v5776_v31 = vrot.slane %v5775_v54, 2  ;;  %v3879_v14 = vmax.f32 %v3663_v18, 0.0 }
 0x27f   :  { %v12603_v5 = vunpack.i.l.bf16 %v15790_v38  ;;  %v5770_v26 = vmax.f32 %v5768_v6, %v5769_v2  ;;  %v5783_v34 = vrot.slane %v5782_v7, 2  ;;  %12881 = vrot.lane.b32.xlu1 %v15842_v23, %s13376_s28  ;;  %v12599_v59 = vunpack.i.h.bf16 %v15795_v40  ;;  %12906 = vrot.lane.b32.xlu0 %v15842_v23, %s13379_s1  ;;  %v15872_v6 = vpop.permute.xlu0 %12626 }
 0x280   :  { %v2945_v52 = vsel %vm34_vm0, %v320_v49, %v12604_v51  ;;  %v5764_v45 = vrot.slane %v5763_v4, 1  ;;  %v5777_v15 = vmax.f32 %v5775_v54, %v5776_v31  ;;  %v4215_v25 = vcombine.high %v3879_v14, %v3879_v14 }
 0x281   :  { %v4222_v42 = vrot.slane %v3879_v14, %v14922_v36  ;;  %v5771_v38 = vrot.slane %v5770_v26, 1  ;;  %v5784_v50 = vmax.f32 %v5782_v7, %v5783_v34  ;;  %v2944_v29 = vsel %vm34_vm0, %v319_v55, %v12603_v5 }
 0x282   :  { %v15860_v44 = vsel %vm3352_vm2, %v15738_v39, %v12599_v59  ;;  %v5765_v32 = vmax.f32 %v5763_v4, %v5764_v45  ;;  %v5778_v53 = vrot.slane %v5777_v15, 1  ;;  %v4229_v37 = vrot.slane %v4215_v25, %v14922_v36 }
 0x283   :  { %v4230_v47 = vcombine.high %v4222_v42, %v4222_v42  ;;  %v5772_v12 = vmax.f32 %v5770_v26, %v5771_v38  ;;  %v5785_v17 = vrot.slane %v5784_v50, 1  ;;  %v5703_v61 = vsel %vm5338_vm11, %v4222_v42, -inf  ;;  %v15897_v42 = vpop.permute.xlu1 %12641 }
 0x284   :  { %v12598_v48 = vunpack.i.l.bf16 %v15795_v40  ;;  %v5779_v19 = vmax.f32 %v5777_v15, %v5778_v53  ;;  %v15870_v16 = vsel %vm3352_vm2, %v5765_v32, -inf  ;;  %v4231_v39 = vcombine.high %v4229_v37, %v4229_v37  ;;  %v780_v53 = vld [vmem:[#allocation2 + $0x319] sm:$0xff] }
 0x285   :  { %v5704_v8 = vrot.slane %v5703_v61, 4  ;;  %v5786_v58 = vmax.f32 %v5784_v50, %v5785_v17  ;;  %v15875_v28 = vsel %vm3352_vm2, %v5772_v12, -inf  ;;  %v5710_v54 = vsel %vm5338_vm11, %v4230_v47, -inf  ;;  %v15899_v47 = vpop.permute.xlu0 %12636 }
 0x286   :  { %v5717_v40 = vsel %vm5338_vm11, %v4229_v37, -inf  ;;  %v15880_v18 = vsel %vm3352_vm2, %v5779_v19, -inf  ;;  %v5711_v2 = vrot.slane %v5710_v54, 4  ;;  %v5724_v4 = vsel %vm5338_vm11, %v4231_v39, -inf  ;;  %v781_v37 = vld [vmem:[#allocation2 + $0x321] sm:$0xff] }
 0x287   :  { %v5705_v49 = vmax.f32 %v5703_v61, %v5704_v8  ;;  %v5718_v7 = vrot.slane %v5717_v40, 4  ;;  %v15883_v51 = vsel %vm3352_vm2, %v5786_v58, -inf  ;;  %v3395_v31 = vsel %vm3352_vm2, %v15735_v63, %v12598_v48 }
 0x288   :  { %v15888_v14 = vpack.i.bf16 %v717_v3, %v716_v9  ;;  %v5712_v5 = vmax.f32 %v5710_v54, %v5711_v2  ;;  %v5725_v34 = vrot.slane %v5724_v4, 4  ;;  %v3437_v59 = vpack.c.bf16 %v15835_v46, %v15815_v0 }
 0x289   :  { %v5706_v55 = vrot.slane %v5705_v49, 2  ;;  %v5719_v26 = vmax.f32 %v5717_v40, %v5718_v7  ;;  %v12614_v45 = vunpack.i.h.bf16 %v15821_v27  ;;  %v12613_v15 = vunpack.i.l.bf16 %v15821_v27 }
 0x28a   :  { %12891 = vrot.lane.b32.xlu1 %v15888_v14, %s13377_s22  ;;  %v12609_v25 = vunpack.i.h.bf16 %v15824_v24  ;;  %v5713_v38 = vrot.slane %v5712_v5, 2  ;;  %v5726_v32 = vmax.f32 %v5724_v4, %v5725_v34  ;;  %11645 = vmatprep.mubr.msk.bf16.mxu0 %vm3476_vm10, %v3437_v59  ;;  %v12608_v12 = vunpack.i.l.bf16 %v15824_v24 }
 0x28b   :  { %v5707_v63 = vmax.f32 %v5705_v49, %v5706_v55  ;;  %v5720_v50 = vrot.slane %v5719_v26, 2  ;;  %v3009_v0 = vsel %vm2962_vm4, %v2944_v29, %v12613_v15  ;;  %v3010_v46 = vsel %vm2962_vm4, %v2945_v52, %v12614_v45  ;;  %v844_v15 = vld [vmem:[#allocation2 + $0x31a] sm:$0xff] }
 0x28c   :  { %v3008_v27 = vsel %vm2962_vm4, %v15757_v62, %v12609_v25  ;;  %v5714_v61 = vmax.f32 %v5712_v5, %v5713_v38  ;;  %v5727_v19 = vrot.slane %v5726_v32, 2  ;;  %v3007_v39 = vsel %vm2962_vm4, %v15772_v60, %v12608_v12  ;;  %v845_v25 = vld [vmem:[#allocation2 + $0x322] sm:$0xff] }
 0x28d   :  { %v5708_v17 = vrot.slane %v5707_v63, 1  ;;  %v5721_v48 = vmax.f32 %v5719_v26, %v5720_v50  ;;  %v15909_v8 = vpack.i.bf16 %v781_v37, %v780_v53  ;;  %v3438_v9 = vpack.c.bf16 %v15860_v44, %v3395_v31  ;;  %v12652_v44 = vpop.permute.xlu1 %12651  ;;  %v12647_v31 = vpop.permute.xlu0 %12646 }
 0x28e   :  { %v12624_v29 = vunpack.i.h.bf16 %v15845_v57  ;;  %v5715_v52 = vrot.slane %v5714_v61, 1  ;;  %v5728_v54 = vmax.f32 %v5726_v32, %v5727_v19  ;;  %v12623_v62 = vunpack.i.l.bf16 %v15845_v57 }
 0x28f   :  { %v5709_v3 = vmax.f32 %v5707_v63, %v5708_v17  ;;  %v5722_v58 = vrot.slane %v5721_v48, 1  ;;  %12901 = vrot.lane.b32.xlu1 %v15909_v8, %s13378_s23  ;;  %11646 = vmatmul.mubr.msk.bf16.gmra.mrb[40].mxu0 %vm3476_vm10, %v3438_v9  ;;  %v12619_v60 = vunpack.i.h.bf16 %v15848_v35  ;;  %v12618_v40 = vunpack.i.l.bf16 %v15848_v35  ;;  %v528_v9 = vld [vmem:[#allocation2 + $0x338] sm:$0xff] }
 0x290   :  { %v3075_v24 = vsel %vm3027_vm5, %v3010_v46, %v12624_v29  ;;  %v5716_v49 = vmax.f32 %v5714_v61, %v5715_v52  ;;  %v5729_v7 = vrot.slane %v5728_v54, 1  ;;  %v3074_v5 = vsel %vm3027_vm5, %v3009_v0, %v12623_v62 }
 0x291   :  { %v5723_v2 = vmax.f32 %v5721_v48, %v5722_v58  ;;  %v7215_v4 = vsel %vm3352_vm2, %v5709_v3, -inf  ;;  %v3072_v26 = vsel %vm3027_vm5, %v3007_v39, %v12618_v40  ;;  %v3073_v57 = vsel %vm3027_vm5, %v3008_v27, %v12619_v60  ;;  %v12662_v27 = vpop.permute.xlu1 %12661  ;;  %v12657_v61 = vpop.permute.xlu0 %12656  ;;  %v527_v39 = vld [vmem:[#allocation2 + $0x330] sm:$0xff] }
 0x292   :  { %v7217_v55 = vmax.f32 %v7215_v4, %v15870_v16  ;;  %v5730_v34 = vmax.f32 %v5728_v54, %v5729_v7  ;;  %v7218_v59 = vsel %vm3352_vm2, %v5716_v49, -inf  ;;  %v12634_v45 = vunpack.i.h.bf16 %v15867_v30  ;;  %v15958_v54 = vpop.f32.mrb[24].mxu0  ;;  %v591_v40 = vld [vmem:[#allocation2 + $0x331] sm:$0xff] }
 0x293   :  { %v7221_v35 = vsel %vm3352_vm2, %v5723_v2, -inf  ;;  %v7220_v63 = vmax.f32 %v7218_v59, %v15875_v28  ;;  %12911 = vrot.lane.b32.xlu1 %v15728_v56, %s13373_s25  ;;  %v12633_v50 = vunpack.i.l.bf16 %v15867_v30  ;;  %vm18882_vm6 = vcmask 130048  }
 0x294   :  { %v7223_v38 = vmax.f32 %v7221_v35, %v15880_v18  ;;  %v7714_v16 = vsel %vm7689_vm15, %v7217_v55, %v15840_v41  ;;  %v7224_v32 = vsel %vm3352_vm2, %v5730_v34, -inf  ;;  %v3140_v53 = vsel %vm18882_vm6, %v3075_v24, %v12634_v45  ;;  %vm18884_vm3 = vmmov %vm18882_vm6  ;;  %v15976_v34 = vld [vmem:[%s18842_s2] ss:$0 sm:$0xff] }
 0x295   :  { %v12629_v37 = vunpack.i.h.bf16 %v15872_v6  ;;  %v12628_v0 = vunpack.i.l.bf16 %v15872_v6  ;;  %v7226_v28 = vmax.f32 %v7224_v32, %v15883_v51  ;;  %vm18883_vm7 = vcmask 1045509   ;;  %vm18886_vm1 = vmmov %vm18884_vm3  ;;  %v15984_v45 = vpop.permute.xlu0 %12666  ;;  %v322_v32 = vld [vmem:[#allocation2 + $0x278] sm:$0xff] }
 0x296   :  { %v7715_v18 = vsel %vm18883_vm7, %v7220_v63, %v7714_v16  ;;  %v3139_v46 = vsel %vm18884_vm3, %v3074_v5, %v12633_v50  ;;  %v15942_v41 = vpack.i.bf16 %v845_v25, %v844_v15  ;;  %vm18885_vm14 = vcmask 1046534   ;;  %vm18887_vm8 = vmmov %vm18886_vm1 }
 0x297   :  { %v7716_v56 = vsel %vm18885_vm14, %v7223_v38, %v7715_v18  ;;  %v3137_v30 = vsel %vm18886_vm1, %v3072_v26, %v12628_v0  ;;  %v3138_v12 = vsel %vm18887_vm8, %v3073_v57, %v12629_v37  ;;  %v12644_v17 = vunpack.i.h.bf16 %v15897_v42  ;;  %12921 = vrot.lane.b32.xlu1 %v15909_v8, %s13373_s25  ;;  %v12672_v26 = vpop.permute.xlu1 %12671 }
 0x298   :  { %vm18888_vm9 = vcmask 1047559   ;;  %12916 = vrot.lane.b32.xlu0 %v15942_v41, %s13379_s1  ;;  %v12643_v51 = vunpack.i.l.bf16 %v15897_v42  ;;  %v12639_v48 = vunpack.i.h.bf16 %v15899_v47  ;;  %v12638_v19 = vunpack.i.l.bf16 %v15899_v47  ;;  %v592_v47 = vld [vmem:[#allocation2 + $0x339] sm:$0xff] }
 0x299   :  { %v7717_v6 = vsel %vm18888_vm9, %v7226_v28, %v7716_v56  ;;  %vm18889_vm6 = vcmask 162816   ;;  %v12654_v3 = vunpack.i.h.bf16 %v12652_v44  ;;  %v12653_v52 = vunpack.i.l.bf16 %v12652_v44 }
 0x29a   :  { %7822 = vst.msk [vmem:[#allocation3 + $0x41] sm:$0xff] %vm3352_vm2, %v7717_v6  ;;  %v3205_v29 = vsel %vm18889_vm6, %v3140_v53, %v12644_v17  ;;  %v12649_v58 = vunpack.i.h.bf16 %v12647_v31  ;;  %vm18890_vm7 = vmmov %vm18889_vm6  ;;  %v12648_v60 = vunpack.i.l.bf16 %v12647_v31  ;;  %vm18893_vm1 = vcmask 195584  }
 0x29b   :  { %v3204_v62 = vsel %vm18890_vm7, %v3139_v46, %v12643_v51  ;;  %vm18891_vm3 = vmmov %vm18889_vm6  ;;  %v15966_v4 = vpack.i.bf16 %v528_v9, %v527_v39  ;;  %12931 = vrot.lane.b32.xlu1 %v15942_v41, %s13372_s24  ;;  %v12664_v55 = vunpack.i.h.bf16 %v12662_v27  ;;  %v12663_v31 = vunpack.i.l.bf16 %v12662_v27 }
 0x29c   :  { %v3202_v24 = vsel %vm18891_vm3, %v3137_v30, %v12638_v19  ;;  %vm18892_vm14 = vmmov %vm18891_vm3  ;;  %v3269_v49 = vsel %vm18893_vm1, %v3204_v62, %v12653_v52  ;;  %12926 = vrot.lane.b32.xlu0 %v15842_v23, %s13372_s24  ;;  %v12659_v5 = vunpack.i.h.bf16 %v12657_v61  ;;  %v12658_v57 = vunpack.i.l.bf16 %v12657_v61  ;;  %s13381_s24 = smov 64  }
 0x29d   :  { %v3203_v42 = vsel %vm18892_vm14, %v3138_v12, %v12639_v48  ;;  %vm18894_vm8 = vmmov %vm18893_vm1  ;;  %v3684_v59 = vadd.f32 %v15976_v34, %v15552_v13  ;;  %v15980_v35 = vpack.i.bf16 %v592_v47, %v591_v40  ;;  %v3676_v23 = vadd.f32 %v15976_v34, %v15554_v43  ;;  %v321_v43 = vld [vmem:[#allocation2 + $0x270] sm:$0xff] }
 0x29e   :  { %v3270_v2 = vsel %vm18894_vm8, %v3205_v29, %v12654_v3  ;;  %vm18895_vm9 = vmmov %vm18893_vm1  ;;  %vm18897_vm7 = vcmask 228352   ;;  %v3687_v38 = vadd.f32 %v15976_v34, %v15560_v33  ;;  %v12674_v53 = vunpack.i.h.bf16 %v12672_v26 }
 0x29f   :  { %v3268_v7 = vsel %vm18895_vm9, %v3203_v42, %v12649_v58  ;;  %vm18896_vm6 = vmmov %vm18893_vm1  ;;  %v15987_v15 = vsel %vm18897_vm7, %v3269_v49, %v12663_v31  ;;  %v3884_v16 = vmax.f32 %v3684_v59, 0.0  ;;  %v3882_v50 = vmax.f32 %v3676_v23, 0.0  ;;  %12941 = vrot.lane.b32.xlu1 %v15966_v4, %s13374_s26 }
 0x2a0   :  { %v3267_v44 = vsel %vm18896_vm6, %v3202_v24, %v12648_v60  ;;  %vm18898_vm3 = vmmov %vm18897_vm7  ;;  %12936 = vrot.lane.b32.xlu0 %v15888_v14, %s13374_s26  ;;  %v3885_v37 = vmax.f32 %v3687_v38, 0.0  ;;  %v12673_v0 = vunpack.i.l.bf16 %v12672_v26  ;;  %v12669_v28 = vunpack.i.h.bf16 %v15984_v45  ;;  %s13382_s26 = smov 96  }
 0x2a1   :  { %v15990_v25 = vsel %vm18898_vm3, %v3270_v2, %v12664_v55  ;;  %vm18899_vm14 = vmmov %vm18898_vm3  ;;  %v12668_v33 = vunpack.i.l.bf16 %v15984_v45  ;;  %v4300_v18 = vcombine.high %v3884_v16, %v3884_v16  ;;  %v4307_v46 = vrot.slane %v3884_v16, %v14922_v36 }
 0x2a2   :  { %v15993_v63 = vsel %vm18899_vm14, %v3268_v7, %v12659_v5  ;;  %vm18900_vm1 = vmmov %vm18898_vm3  ;;  %v4266_v27 = vcombine.high %v3882_v50, %v3882_v50  ;;  %v4273_v56 = vrot.slane %v3882_v50, %v14922_v36  ;;  %v4317_v30 = vcombine.high %v3885_v37, %v3885_v37 }
 0x2a3   :  { %v15998_v13 = vsel %vm18900_vm1, %v3267_v44, %v12658_v57  ;;  %v16009_v12 = vrot.slane %v3885_v37, %v14922_v36  ;;  %v16012_v17 = vsel %vm34_vm0, %v322_v32, %v12674_v53  ;;  %v16015_v14 = vsel %vm34_vm0, %v321_v43, %v12673_v0  ;;  %12951 = vrot.lane.b32.xlu1 %v15980_v35, %s13375_s27 }
 0x2a4   :  { %v4314_v61 = vrot.slane %v4300_v18, %v14922_v36  ;;  %v4315_v6 = vcombine.high %v4307_v46, %v4307_v46  ;;  %v5843_v51 = vsel %vm5338_vm11, %v4307_v46, -inf  ;;  %v4280_v48 = vrot.slane %v4266_v27, %v14922_v36  ;;  %12946 = vrot.lane.b32.xlu0 %v15909_v8, %s13375_s27 }
 0x2a5   :  { %v5844_v19 = vrot.slane %v5843_v51, 4  ;;  %v4281_v39 = vcombine.high %v4273_v56, %v4273_v56  ;;  %v5787_v9 = vsel %vm5338_vm11, %v4273_v56, -inf  ;;  %v16026_v29 = vrot.slane %v4317_v30, %v14922_v36 }
 0x2a6   :  { %v4316_v3 = vcombine.high %v4314_v61, %v4314_v61  ;;  %v5850_v52 = vsel %vm5338_vm11, %v4315_v6, -inf  ;;  %v5857_v58 = vsel %vm5338_vm11, %v4314_v61, -inf  ;;  %v4282_v62 = vcombine.high %v4280_v48, %v4280_v48 }
 0x2a7   :  { %v5845_v24 = vmax.f32 %v5843_v51, %v5844_v19  ;;  %v5851_v42 = vrot.slane %v5850_v52, 4  ;;  %v5858_v60 = vrot.slane %v5857_v58, 4  ;;  %v5788_v40 = vrot.slane %v5787_v9, 4 }
 0x2a8   :  { %v5864_v47 = vsel %vm5338_vm11, %v4316_v3, -inf  ;;  %v5794_v8 = vsel %vm5338_vm11, %v4281_v39, -inf  ;;  %v5801_v49 = vsel %vm5338_vm11, %v4280_v48, -inf  ;;  %v5808_v2 = vsel %vm5338_vm11, %v4282_v62, -inf  ;;  %12956 = vrot.lane.b32.xlu0 %v15942_v41, %s13376_s28 }
 0x2a9   :  { %v5846_v7 = vrot.slane %v5845_v24, 2  ;;  %v5852_v44 = vmax.f32 %v5850_v52, %v5851_v42  ;;  %v5859_v55 = vmax.f32 %v5857_v58, %v5858_v60  ;;  %v5865_v31 = vrot.slane %v5864_v47, 4  ;;  %v16038_v58 = vpop.f32.mrb[25].mxu0 }
 0x2aa   :  { %v5789_v5 = vmax.f32 %v5787_v9, %v5788_v40  ;;  %v5795_v26 = vrot.slane %v5794_v8, 4  ;;  %v5802_v57 = vrot.slane %v5801_v49, 4  ;;  %v5809_v59 = vrot.slane %v5808_v2, 4 }
 0x2ab   :  { %v5847_v23 = vmax.f32 %v5845_v24, %v5846_v7  ;;  %v5853_v38 = vrot.slane %v5852_v44, 2  ;;  %v5860_v16 = vrot.slane %v5859_v55, 2  ;;  %v5866_v50 = vmax.f32 %v5864_v47, %v5865_v31 }
 0x2ac   :  { %v5790_v43 = vrot.slane %v5789_v5, 2  ;;  %v5796_v32 = vmax.f32 %v5794_v8, %v5795_v26  ;;  %v5803_v53 = vmax.f32 %v5801_v49, %v5802_v57  ;;  %v5810_v37 = vmax.f32 %v5808_v2, %v5809_v59  ;;  %12966 = vrot.lane.b32.xlu0 %v15966_v4, %s13377_s22  ;;  %v16041_v4 = vpop.permute.xlu1 %12681  ;;  %v16045_v2 = vpop.permute.xlu0 %12676 }
 0x2ad   :  { %v5848_v0 = vrot.slane %v5847_v23, 1  ;;  %v5854_v18 = vmax.f32 %v5852_v44, %v5853_v38  ;;  %v5861_v46 = vmax.f32 %v5859_v55, %v5860_v16  ;;  %v5867_v27 = vrot.slane %v5866_v50, 2 }
 0x2ae   :  { %v5791_v41 = vmax.f32 %v5789_v5, %v5790_v43  ;;  %v5797_v56 = vrot.slane %v5796_v32, 2  ;;  %v5804_v30 = vrot.slane %v5803_v53, 2  ;;  %v5811_v61 = vrot.slane %v5810_v37, 2 }
 0x2af   :  { %v5849_v6 = vmax.f32 %v5847_v23, %v5848_v0  ;;  %v5855_v51 = vrot.slane %v5854_v18, 1  ;;  %v5862_v48 = vrot.slane %v5861_v46, 1  ;;  %v5868_v19 = vmax.f32 %v5866_v50, %v5867_v27  ;;  %v16057_v50 = vpop.f32.mrb[26].mxu0 }
 0x2b0   :  { %v5792_v39 = vrot.slane %v5791_v41, 1  ;;  %v5798_v9 = vmax.f32 %v5796_v32, %v5797_v56  ;;  %v5805_v3 = vmax.f32 %v5803_v53, %v5804_v30  ;;  %v5812_v52 = vmax.f32 %v5810_v37, %v5811_v61  ;;  %12976 = vrot.lane.b32.xlu0 %v15980_v35, %s13378_s23 }
 0x2b1   :  { %v5856_v62 = vmax.f32 %v5854_v18, %v5855_v51  ;;  %v5863_v24 = vmax.f32 %v5861_v46, %v5862_v48  ;;  %v5869_v42 = vrot.slane %v5868_v19, 1  ;;  %v7228_v60 = vsel %vm3352_vm2, %v5849_v6, -inf  ;;  %v16068_v6 = vpop.permute.xlu0 %12686 }
 0x2b2   :  { %v5793_v40 = vmax.f32 %v5791_v41, %v5792_v39  ;;  %v5799_v47 = vrot.slane %v5798_v9, 1  ;;  %v5806_v8 = vrot.slane %v5805_v3, 1  ;;  %v5813_v49 = vrot.slane %v5812_v52, 1  ;;  %v16063_v41 = vpop.permute.xlu1 %12691 }
 0x2b3   :  { %v5870_v7 = vmax.f32 %v5868_v19, %v5869_v42  ;;  %v7231_v44 = vsel %vm3352_vm2, %v5856_v62, -inf  ;;  %v7234_v55 = vsel %vm3352_vm2, %v5863_v24, -inf  ;;  %v4332_v31 = vcombine.high %v16009_v12, %v16009_v12 }
 0x2b4   :  { %v5800_v5 = vmax.f32 %v5798_v9, %v5799_v47  ;;  %v5807_v26 = vmax.f32 %v5805_v3, %v5806_v8  ;;  %v5814_v57 = vmax.f32 %v5812_v52, %v5813_v49  ;;  %v7227_v59 = vsel %vm3352_vm2, %v5793_v40, -inf  ;;  %v655_v9 = vld [vmem:[#allocation2 + $0x332] sm:$0xff]  ;;  %v656_v3 = vld [vmem:[#allocation2 + $0x33a] sm:$0xff] }
 0x2b5   :  { %v7237_v35 = vsel %vm3352_vm2, %v5870_v7, -inf  ;;  %v7229_v23 = vmax.f32 %v7227_v59, %v7228_v60  ;;  %v4333_v38 = vcombine.high %v16026_v29, %v16026_v29  ;;  %v5871_v16 = vsel %vm5338_vm11, %v16009_v12, -inf  ;;  %v16096_v59 = vpop.permute.xlu0 %12696 }
 0x2b6   :  { %v7230_v43 = vsel %vm3352_vm2, %v5800_v5, -inf  ;;  %v7233_v32 = vsel %vm3352_vm2, %v5807_v26, -inf  ;;  %v7236_v53 = vsel %vm3352_vm2, %v5814_v57, -inf  ;;  %v5872_v37 = vrot.slane %v5871_v16, 4 }
 0x2b7   :  { %v7232_v0 = vmax.f32 %v7230_v43, %v7231_v44  ;;  %v7235_v18 = vmax.f32 %v7233_v32, %v7234_v55  ;;  %v7238_v46 = vmax.f32 %v7236_v53, %v7237_v35  ;;  %v5878_v27 = vsel %vm5338_vm11, %v4332_v31, -inf  ;;  %v323_v31 = vld [vmem:[#allocation2 + $0x288] sm:$0xff] }
 0x2b8   :  { %v5873_v56 = vmax.f32 %v5871_v16, %v5872_v37  ;;  %v5879_v30 = vrot.slane %v5878_v27, 4  ;;  %v5885_v12 = vsel %vm5338_vm11, %v16026_v29, -inf  ;;  %v5892_v61 = vsel %vm5338_vm11, %v4333_v38, -inf  ;;  %v16105_v37 = vpop.f32.mrb[27].mxu0 }
 0x2b9   :  { %v7718_v51 = vsel %vm7683_vm12, %v7232_v0, %v7229_v23  ;;  %v5886_v48 = vrot.slane %v5885_v12, 4  ;;  %v5893_v19 = vrot.slane %v5892_v61, 4  ;;  %v16075_v39 = vsel %vm3352_vm2, %v15998_v13, %v12668_v33  ;;  %v324_v33 = vld [vmem:[#allocation2 + $0x290] sm:$0xff] }
 0x2ba   :  { %v7719_v52 = vsel %vm7685_vm13, %v7235_v18, %v7718_v51  ;;  %v5874_v62 = vrot.slane %v5873_v56, 2  ;;  %v5880_v29 = vmax.f32 %v5878_v27, %v5879_v30  ;;  %v16082_v24 = vsel %vm3352_vm2, %v15993_v63, %v12669_v28  ;;  %v16091_v28 = vpop.permute.xlu1 %12701 }
 0x2bb   :  { %v5887_v42 = vmax.f32 %v5885_v12, %v5886_v48  ;;  %v5894_v60 = vmax.f32 %v5892_v61, %v5893_v19  ;;  %v3679_v40 = vadd.f32 %v15976_v34, %v15566_v20  ;;  %vm18901_vm8 = vcmask 1043459  }
 0x2bc   :  { %v16087_v13 = vsel %vm18901_vm8, %v7238_v46, %v7719_v52  ;;  %v5875_v47 = vmax.f32 %v5873_v56, %v5874_v62  ;;  %v5881_v8 = vrot.slane %v5880_v29, 2  ;;  %v12960_v49 = vpack.i.bf16 %v656_v3, %v655_v9  ;;  %v720_v9 = vld [vmem:[#allocation2 + $0x348] sm:$0xff]  ;;  %v721_v3 = vld [vmem:[#allocation2 + $0x350] sm:$0xff] }
 0x2bd   :  { %v12684_v7 = vunpack.i.h.bf16 %v16041_v4  ;;  %v5888_v44 = vrot.slane %v5887_v42, 2  ;;  %v5895_v45 = vrot.slane %v5894_v60, 2  ;;  %v3883_v55 = vmax.f32 %v3679_v40, 0.0  ;;  %v16122_v40 = vpop.permute.xlu0 %12706 }
 0x2be   :  { %v12683_v63 = vunpack.i.l.bf16 %v16041_v4  ;;  %v5876_v5 = vrot.slane %v5875_v47, 1  ;;  %v5882_v26 = vmax.f32 %v5880_v29, %v5881_v8  ;;  %12961 = vrot.lane.b32.xlu1 %v12960_v49, %s13376_s28  ;;  %v12679_v57 = vunpack.i.h.bf16 %v16045_v2  ;;  %12986 = vrot.lane.b32.xlu0 %v12960_v49, %s13379_s1  ;;  %v16113_v52 = vpop.permute.xlu1 %12711 }
 0x2bf   :  { %v2949_v20 = vsel %vm34_vm0, %v324_v33, %v12684_v7  ;;  %v5889_v35 = vmax.f32 %v5887_v42, %v5888_v44  ;;  %v5896_v23 = vmax.f32 %v5894_v60, %v5895_v45  ;;  %v4283_v38 = vcombine.high %v3883_v55, %v3883_v55 }
 0x2c0   :  { %v4290_v16 = vrot.slane %v3883_v55, %v14922_v36  ;;  %v5877_v4 = vmax.f32 %v5875_v47, %v5876_v5  ;;  %v5883_v43 = vrot.slane %v5882_v26, 1  ;;  %v2948_v32 = vsel %vm34_vm0, %v323_v31, %v12683_v63 }
 0x2c1   :  { %v16103_v53 = vsel %vm3352_vm2, %v15990_v25, %v12679_v57  ;;  %v5890_v0 = vrot.slane %v5889_v35, 1  ;;  %v5897_v18 = vrot.slane %v5896_v23, 1  ;;  %v4297_v46 = vrot.slane %v4283_v38, %v14922_v36  ;;  %v785_v38 = vld [vmem:[#allocation2 + $0x351] sm:$0xff] }
 0x2c2   :  { %v4298_v27 = vcombine.high %v4290_v16, %v4290_v16  ;;  %v5884_v56 = vmax.f32 %v5882_v26, %v5883_v43  ;;  %v16109_v30 = vsel %vm3352_vm2, %v5877_v4, -inf  ;;  %v5815_v12 = vsel %vm5338_vm11, %v4290_v16, -inf  ;;  %v16140_v43 = vpop.permute.xlu1 %12721 }
 0x2c3   :  { %v12678_v61 = vunpack.i.l.bf16 %v16045_v2  ;;  %v5891_v51 = vmax.f32 %v5889_v35, %v5890_v0  ;;  %v5898_v48 = vmax.f32 %v5896_v23, %v5897_v18  ;;  %v4299_v19 = vcombine.high %v4297_v46, %v4297_v46  ;;  %v784_v23 = vld [vmem:[#allocation2 + $0x349] sm:$0xff] }
 0x2c4   :  { %v5816_v25 = vrot.slane %v5815_v12, 4  ;;  %v16116_v62 = vsel %vm3352_vm2, %v5884_v56, -inf  ;;  %v5822_v29 = vsel %vm5338_vm11, %v4298_v27, -inf  ;;  %v5829_v42 = vsel %vm5338_vm11, %v4297_v46, -inf  ;;  %v16147_v27 = vpop.permute.xlu0 %12716 }
 0x2c5   :  { %v3399_v60 = vsel %vm3352_vm2, %v15987_v15, %v12678_v61  ;;  %v16125_v2 = vsel %vm3352_vm2, %v5891_v51, -inf  ;;  %v16128_v33 = vsel %vm3352_vm2, %v5898_v48, -inf  ;;  %v5823_v8 = vrot.slane %v5822_v29, 4 }
 0x2c6   :  { %v5817_v47 = vmax.f32 %v5815_v12, %v5816_v25  ;;  %v5830_v49 = vrot.slane %v5829_v42, 4  ;;  %v5836_v7 = vsel %vm5338_vm11, %v4299_v19, -inf  ;;  %v12970_v44 = vpack.i.bf16 %v721_v3, %v720_v9  ;;  %v849_v3 = vld [vmem:[#allocation2 + $0x352] sm:$0xff] }
 0x2c7   :  { %v3439_v45 = vpack.c.bf16 %v16082_v24, %v16075_v39  ;;  %v5824_v31 = vmax.f32 %v5822_v29, %v5823_v8  ;;  %v5837_v15 = vrot.slane %v5836_v7, 4  ;;  %v12694_v63 = vunpack.i.h.bf16 %v16063_v41 }
 0x2c8   :  { %v5818_v55 = vrot.slane %v5817_v47, 2  ;;  %v5831_v5 = vmax.f32 %v5829_v42, %v5830_v49  ;;  %12971 = vrot.lane.b32.xlu1 %v12970_v44, %s13377_s22  ;;  %v12693_v26 = vunpack.i.l.bf16 %v16063_v41  ;;  %v12689_v57 = vunpack.i.h.bf16 %v16068_v6 }
 0x2c9   :  { %11649 = vmatprep.mubr.msk.bf16.mxu0 %vm3476_vm10, %v3439_v45  ;;  %v12688_v35 = vunpack.i.l.bf16 %v16068_v6  ;;  %v5825_v39 = vrot.slane %v5824_v31, 2  ;;  %v5838_v24 = vmax.f32 %v5836_v7, %v5837_v15  ;;  %v3014_v4 = vsel %vm2962_vm4, %v2949_v20, %v12694_v63  ;;  %v12732_v7 = vpop.permute.xlu1 %12731  ;;  %v16162_v15 = vpop.permute.xlu0 %12726 }
 0x2ca   :  { %v5819_v16 = vmax.f32 %v5817_v47, %v5818_v55  ;;  %v5832_v0 = vrot.slane %v5831_v5, 2  ;;  %v3013_v18 = vsel %vm2962_vm4, %v2948_v32, %v12693_v26  ;;  %v3012_v46 = vsel %vm2962_vm4, %v16012_v17, %v12689_v57 }
 0x2cb   :  { %v3011_v41 = vsel %vm2962_vm4, %v16015_v14, %v12688_v35  ;;  %v5826_v56 = vmax.f32 %v5824_v31, %v5825_v39  ;;  %v5839_v12 = vrot.slane %v5838_v24, 2  ;;  %v12980_v61 = vpack.i.bf16 %v785_v38, %v784_v23  ;;  %v848_v14 = vld [vmem:[#allocation2 + $0x34a] sm:$0xff]  ;;  %v16173_v38 = vld [vmem:[#allocation3 + $0x22] sm:$0xff] }
 0x2cc   :  { %v5820_v6 = vrot.slane %v5819_v16, 1  ;;  %v5833_v51 = vmax.f32 %v5831_v5, %v5832_v0  ;;  %v3440_v20 = vpack.c.bf16 %v16103_v53, %v3399_v60  ;;  %v12704_v48 = vunpack.i.h.bf16 %v16091_v28  ;;  %v7852_v39 = vld [vmem:[#allocation3 + $0x11] sm:$0xff] }
 0x2cd   :  { %v12703_v19 = vunpack.i.l.bf16 %v16091_v28  ;;  %v5827_v25 = vrot.slane %v5826_v56, 1  ;;  %v5840_v9 = vmax.f32 %v5838_v24, %v5839_v12  ;;  %12981 = vrot.lane.b32.xlu1 %v12980_v61, %s13378_s23  ;;  %v12699_v17 = vunpack.i.h.bf16 %v16096_v59 }
 0x2ce   :  { %v5821_v32 = vmax.f32 %v5819_v16, %v5820_v6  ;;  %v5834_v29 = vrot.slane %v5833_v51, 1  ;;  %11650 = vmatmul.mubr.msk.bf16.gmra.mrb[44].mxu0 %vm3476_vm10, %v3440_v20  ;;  %v3079_v53 = vsel %vm3027_vm5, %v3014_v4, %v12704_v48  ;;  %v12698_v60 = vunpack.i.l.bf16 %v16096_v59  ;;  %v7851_v16 = vld [vmem:[#allocation3 + $0x1] sm:$0xff]  ;;  %v16183_v6 = vld [vmem:[#allocation3 + $0x30] sm:$0xff]  ;;  %v12742_v20 = vpop.permute.xlu1 %12741 }
 0x2cf   :  { %v3078_v42 = vsel %vm3027_vm5, %v3013_v18, %v12703_v19  ;;  %v5828_v47 = vmax.f32 %v5826_v56, %v5827_v25  ;;  %v5841_v28 = vrot.slane %v5840_v9, 1  ;;  %v3077_v49 = vsel %vm3027_vm5, %v3012_v46, %v12699_v17  ;;  %v7867_v56 = vld [vmem:[#allocation3 + $0x2] sm:$0xff]  ;;  %v7949_v25 = vld [vmem:[#allocation3 + $0x31] sm:$0xff]  ;;  %v16192_v17 = vpop.f32.mrb[28].mxu0 }
 0x2d0   :  { %v7239_v8 = vsel %vm3352_vm2, %v5821_v32, -inf  ;;  %v5835_v44 = vmax.f32 %v5833_v51, %v5834_v29  ;;  %v3076_v55 = vsel %vm3027_vm5, %v3011_v41, %v12698_v60  ;;  %v12990_v31 = vpack.i.bf16 %v849_v3, %v848_v14  ;;  %v7915_v41 = vld [vmem:[#allocation3 + $0x12] sm:$0xff]  ;;  %v7932_v32 = vld [vmem:[#allocation3 + $0x20] sm:$0xff] }
 0x2d1   :  { %v7241_v45 = vmax.f32 %v7239_v8, %v16109_v30  ;;  %v5842_v63 = vmax.f32 %v5840_v9, %v5841_v28  ;;  %v7242_v5 = vsel %vm3352_vm2, %v5828_v47, -inf  ;;  %v12714_v59 = vunpack.i.h.bf16 %v16113_v52  ;;  %v12737_v9 = vpop.permute.xlu0 %12736  ;;  %v7948_v28 = vld [vmem:[#allocation3 + $0x21] sm:$0xff] }
 0x2d2   :  { %v12713_v26 = vunpack.i.l.bf16 %v16113_v52  ;;  %v7244_v57 = vmax.f32 %v7242_v5, %v16116_v62  ;;  %v7245_v35 = vsel %vm3352_vm2, %v5835_v44, -inf  ;;  %12991 = vrot.lane.b32.xlu1 %v12990_v31, %s13379_s1  ;;  %v12709_v30 = vunpack.i.h.bf16 %v16122_v40 }
 0x2d3   :  { %v7721_v23 = vsel %vm7689_vm15, %v7241_v45, %v16087_v13  ;;  %v7247_v24 = vmax.f32 %v7245_v35, %v16125_v2  ;;  %v7248_v4 = vsel %vm3352_vm2, %v5842_v63, -inf  ;;  %vm18902_vm9 = vcmask 130048   ;;  %v12752_v35 = vpop.permute.xlu1 %12751 }
 0x2d4   :  { %v3143_v52 = vsel %vm18902_vm9, %v3078_v42, %v12713_v26  ;;  %vm18903_vm6 = vmmov %vm18902_vm9  ;;  %v7250_v0 = vmax.f32 %v7248_v4, %v16128_v33  ;;  %vm18904_vm7 = vcmask 1045509   ;;  %v12708_v18 = vunpack.i.l.bf16 %v16122_v40 }
 0x2d5   :  { %v3144_v62 = vsel %vm18903_vm6, %v3079_v53, %v12714_v59  ;;  %v7722_v13 = vsel %vm18904_vm7, %v7244_v57, %v7721_v23  ;;  %vm18905_vm3 = vmmov %vm18903_vm6  ;;  %vm18906_vm14 = vcmask 1046534   ;;  %v12995_v12 = vpack.i.bf16 %v16173_v38, %v7915_v41  ;;  %v16207_v59 = vld [vmem:[#allocation3 + $0x42] sm:$0xff]  ;;  %v16222_v4 = vpop.permute.xlu0 %12746 }
 0x2d6   :  { %v3142_v46 = vsel %vm18905_vm3, %v3077_v49, %v12709_v30  ;;  %v7723_v2 = vsel %vm18906_vm14, %v7247_v24, %v7722_v13  ;;  %v13000_v61 = vpack.i.bf16 %v7852_v39, %v7851_v16  ;;  %v12724_v51 = vunpack.i.h.bf16 %v16140_v43  ;;  %vm18908_vm8 = vmmov %vm18905_vm3  ;;  %v16220_v24 = vld [vmem:[#allocation3 + $0x32] sm:$0xff] }
 0x2d7   :  { %vm18907_vm1 = vcmask 1047559   ;;  %v3141_v48 = vsel %vm18908_vm8, %v3076_v55, %v12708_v18  ;;  %v12723_v40 = vunpack.i.l.bf16 %v16140_v43  ;;  %v12719_v19 = vunpack.i.h.bf16 %v16147_v27  ;;  %12996 = vrot.lane.b32.xlu0 %v12995_v12, %s13379_s1  ;;  %v7883_v55 = vld [vmem:[#allocation3 + $0x10] sm:$0xff] }
 0x2d8   :  { %v7724_v33 = vsel %vm18907_vm1, %v7250_v0, %v7723_v2  ;;  %13001 = vrot.lane.b32.xlu1 %v13000_v61, %s13379_s1  ;;  %vm18909_vm9 = vcmask 162816   ;;  %v12718_v3 = vunpack.i.l.bf16 %v16147_v27  ;;  %v13005_v29 = vpack.i.bf16 %v16183_v6, %v7932_v32 }
 0x2d9   :  { %7823 = vst.msk [vmem:[#allocation3 + $0x51] sm:$0xff] %vm3352_vm2, %v7724_v33  ;;  %v3209_v14 = vsel %vm18909_vm9, %v3144_v62, %v12724_v51  ;;  %v13010_v43 = vpack.i.bf16 %v7915_v41, %v7867_v56  ;;  %vm18910_vm6 = vmmov %vm18909_vm9  ;;  %v12734_v60 = vunpack.i.h.bf16 %v12732_v7  ;;  %v12733_v47 = vunpack.i.l.bf16 %v12732_v7  ;;  %v326_v41 = vld [vmem:[#allocation2 + $0x2a8] sm:$0xff] }
 0x2da   :  { %v3208_v42 = vsel %vm18910_vm6, %v3143_v52, %v12723_v40  ;;  %vm18911_vm7 = vmmov %vm18910_vm6  ;;  %v12729_v49 = vunpack.i.h.bf16 %v16162_v15  ;;  %v12728_v44 = vunpack.i.l.bf16 %v16162_v15  ;;  %v13015_v45 = vpack.i.bf16 %v7949_v25, %v7948_v28 }
 0x2db   :  { %v3207_v53 = vsel %vm18911_vm7, %v3142_v46, %v12719_v19  ;;  %vm18912_vm3 = vmmov %vm18910_vm6  ;;  %vm18913_vm14 = vcmask 195584   ;;  %v13020_v63 = vpack.i.bf16 %v7932_v32, %v7883_v55  ;;  %v12744_v5 = vunpack.i.h.bf16 %v12742_v20  ;;  %13006 = vrot.lane.b32.xlu0 %v13005_v29, %s13381_s24  ;;  %v325_v46 = vld [vmem:[#allocation2 + $0x2a0] sm:$0xff] }
 0x2dc   :  { %v3206_v8 = vsel %vm18912_vm3, %v3141_v48, %v12718_v3  ;;  %v3273_v27 = vsel %vm18913_vm14, %v3208_v42, %v12733_v47  ;;  %vm18914_vm1 = vmmov %vm18913_vm14  ;;  %13011 = vrot.lane.b32.xlu1 %v13010_v43, %s13381_s24  ;;  %v12743_v15 = vunpack.i.l.bf16 %v12742_v20  ;;  %v12739_v57 = vunpack.i.h.bf16 %v12737_v9 }
 0x2dd   :  { %v3274_v31 = vsel %vm18914_vm1, %v3209_v14, %v12734_v60  ;;  %vm18915_vm8 = vmmov %vm18914_vm1  ;;  %vm18917_vm6 = vcmask 228352   ;;  %v12738_v30 = vunpack.i.l.bf16 %v12737_v9  ;;  %v3700_v16 = vadd.f32 %v15976_v34, %v15720_v21 }
 0x2de   :  { %v3271_v7 = vsel %vm18915_vm8, %v3206_v8, %v12728_v44  ;;  %vm18916_vm9 = vmmov %vm18914_vm1  ;;  %v16214_v23 = vsel %vm18917_vm6, %v3274_v31, %v12744_v5  ;;  %v3692_v39 = vadd.f32 %v15976_v34, %v15792_v10  ;;  %v13025_v0 = vpack.i.bf16 %v16207_v59, %v16220_v24 }
 0x2df   :  { %v3272_v26 = vsel %vm18916_vm9, %v3207_v53, %v12729_v49  ;;  %vm18918_vm7 = vmmov %vm18917_vm6  ;;  %v3703_v13 = vadd.f32 %v15976_v34, %v15817_v11  ;;  %v3888_v10 = vmax.f32 %v3700_v16, 0.0  ;;  %v12754_v56 = vunpack.i.h.bf16 %v12752_v35  ;;  %13016 = vrot.lane.b32.xlu0 %v13015_v45, %s13382_s26 }
 0x2e0   :  { %v16225_v52 = vsel %vm18918_vm7, %v3273_v27, %v12743_v15  ;;  %vm18919_vm3 = vmmov %vm18917_vm6  ;;  %v3886_v18 = vmax.f32 %v3692_v39, 0.0  ;;  %13021 = vrot.lane.b32.xlu1 %v13020_v63, %s13382_s26  ;;  %v12753_v12 = vunpack.i.l.bf16 %v12752_v35  ;;  %v12749_v61 = vunpack.i.h.bf16 %v16222_v4 }
 0x2e1   :  { %v16228_v62 = vsel %vm18919_vm3, %v3272_v26, %v12739_v57  ;;  %vm18920_vm14 = vmmov %vm18919_vm3  ;;  %v3889_v2 = vmax.f32 %v3703_v13, 0.0  ;;  %v12748_v51 = vunpack.i.l.bf16 %v16222_v4  ;;  %v4368_v11 = vcombine.high %v3888_v10, %v3888_v10 }
 0x2e2   :  { %v16235_v21 = vsel %vm18920_vm14, %v3271_v7, %v12738_v30  ;;  %v4375_v20 = vrot.slane %v3888_v10, %v14922_v36  ;;  %v4334_v33 = vcombine.high %v3886_v18, %v3886_v18  ;;  %v4341_v48 = vrot.slane %v3886_v18, %v14922_v36 }
 0x2e3   :  { %v4385_v40 = vcombine.high %v3889_v2, %v3889_v2  ;;  %v16244_v19 = vrot.slane %v3889_v2, %v14922_v36  ;;  %v16247_v32 = vsel %vm34_vm0, %v326_v41, %v12754_v56  ;;  %v16250_v25 = vsel %vm34_vm0, %v325_v46, %v12753_v12  ;;  %13026 = vrot.lane.b32.xlu0 %v13025_v0, %s13379_s1 }
 0x2e4   :  { %v4382_v9 = vrot.slane %v4368_v11, %v14922_v36  ;;  %v4383_v14 = vcombine.high %v4375_v20, %v4375_v20  ;;  %v5955_v3 = vsel %vm5338_vm11, %v4375_v20, -inf  ;;  %v4348_v29 = vrot.slane %v4334_v33, %v14922_v36  ;;  %13031 = vrot.lane.b32.xlu1 %v13015_v45, %s13379_s1 }
 0x2e5   :  { %v5956_v43 = vrot.slane %v5955_v3, 4  ;;  %v4349_v42 = vcombine.high %v4341_v48, %v4341_v48  ;;  %v5899_v53 = vsel %vm5338_vm11, %v4341_v48, -inf  ;;  %v16259_v60 = vrot.slane %v4385_v40, %v14922_v36 }
 0x2e6   :  { %v4384_v47 = vcombine.high %v4382_v9, %v4382_v9  ;;  %v5962_v28 = vsel %vm5338_vm11, %v4383_v14, -inf  ;;  %v5969_v8 = vsel %vm5338_vm11, %v4382_v9, -inf  ;;  %v4350_v49 = vcombine.high %v4348_v29, %v4348_v29 }
 0x2e7   :  { %v5957_v44 = vmax.f32 %v5955_v3, %v5956_v43  ;;  %v5963_v55 = vrot.slane %v5962_v28, 4  ;;  %v5970_v27 = vrot.slane %v5969_v8, 4  ;;  %v5900_v31 = vrot.slane %v5899_v53, 4 }
 0x2e8   :  { %v5976_v63 = vsel %vm5338_vm11, %v4384_v47, -inf  ;;  %v5906_v5 = vsel %vm5338_vm11, %v4349_v42, -inf  ;;  %v5913_v7 = vsel %vm5338_vm11, %v4348_v29, -inf  ;;  %v5920_v45 = vsel %vm5338_vm11, %v4350_v49, -inf  ;;  %v16267_v29 = vpop.f32.mrb[29].mxu0 }
 0x2e9   :  { %v5958_v26 = vrot.slane %v5957_v44, 2  ;;  %v5964_v15 = vmax.f32 %v5962_v28, %v5963_v55  ;;  %v5971_v57 = vmax.f32 %v5969_v8, %v5970_v27  ;;  %v5977_v35 = vrot.slane %v5976_v63, 4  ;;  %v16269_v28 = vpop.permute.xlu1 %12761  ;;  %v16271_v27 = vpop.permute.xlu0 %12756 }
 0x2ea   :  { %v5901_v30 = vmax.f32 %v5899_v53, %v5900_v31  ;;  %v5907_v16 = vrot.slane %v5906_v5, 4  ;;  %v5914_v39 = vrot.slane %v5913_v7, 4  ;;  %v5921_v0 = vrot.slane %v5920_v45, 4 }
 0x2eb   :  { %v5959_v13 = vmax.f32 %v5957_v44, %v5958_v26  ;;  %v5965_v10 = vrot.slane %v5964_v15, 2  ;;  %v5972_v18 = vrot.slane %v5971_v57, 2  ;;  %v5978_v46 = vmax.f32 %v5976_v63, %v5977_v35 }
 0x2ec   :  { %v5902_v41 = vrot.slane %v5901_v30, 2  ;;  %v5908_v56 = vmax.f32 %v5906_v5, %v5907_v16  ;;  %v5915_v2 = vmax.f32 %v5913_v7, %v5914_v39  ;;  %v5922_v12 = vmax.f32 %v5920_v45, %v5921_v0  ;;  %v16278_v0 = vpop.f32.mrb[30].mxu0 }
 0x2ed   :  { %v5960_v11 = vrot.slane %v5959_v13, 1  ;;  %v5966_v20 = vmax.f32 %v5964_v15, %v5965_v10  ;;  %v5973_v33 = vmax.f32 %v5971_v57, %v5972_v18  ;;  %v5979_v48 = vrot.slane %v5978_v46, 2 }
 0x2ee   :  { %v5903_v40 = vmax.f32 %v5901_v30, %v5902_v41  ;;  %v5909_v9 = vrot.slane %v5908_v56, 2  ;;  %v5916_v14 = vrot.slane %v5915_v2, 2  ;;  %v5923_v3 = vrot.slane %v5922_v12, 2 }
 0x2ef   :  { %v5961_v43 = vmax.f32 %v5959_v13, %v5960_v11  ;;  %v5967_v42 = vrot.slane %v5966_v20, 1  ;;  %v5974_v53 = vrot.slane %v5973_v33, 1  ;;  %v5980_v47 = vmax.f32 %v5978_v46, %v5979_v48  ;;  %v16286_v11 = vpop.permute.xlu1 %12771 }
 0x2f0   :  { %v5904_v8 = vrot.slane %v5903_v40, 1  ;;  %v5910_v49 = vmax.f32 %v5908_v56, %v5909_v9  ;;  %v5917_v44 = vmax.f32 %v5915_v2, %v5916_v14  ;;  %v5924_v55 = vmax.f32 %v5922_v12, %v5923_v3  ;;  %v16291_v9 = vpop.permute.xlu0 %12766 }
 0x2f1   :  { %v5968_v31 = vmax.f32 %v5966_v20, %v5967_v42  ;;  %v5975_v63 = vmax.f32 %v5973_v33, %v5974_v53  ;;  %v5981_v5 = vrot.slane %v5980_v47, 1  ;;  %v7252_v7 = vsel %vm3352_vm2, %v5961_v43, -inf }
 0x2f2   :  { %v5905_v45 = vmax.f32 %v5903_v40, %v5904_v8  ;;  %v5911_v26 = vrot.slane %v5910_v49, 1  ;;  %v5918_v15 = vrot.slane %v5917_v44, 1  ;;  %v5925_v57 = vrot.slane %v5924_v55, 1 }
 0x2f3   :  { %v5982_v35 = vmax.f32 %v5980_v47, %v5981_v5  ;;  %v7255_v30 = vsel %vm3352_vm2, %v5968_v31, -inf  ;;  %v7258_v16 = vsel %vm3352_vm2, %v5975_v63, -inf  ;;  %v4400_v39 = vcombine.high %v16244_v19, %v16244_v19 }
 0x2f4   :  { %v5912_v13 = vmax.f32 %v5910_v49, %v5911_v26  ;;  %v5919_v10 = vmax.f32 %v5917_v44, %v5918_v15  ;;  %v5926_v18 = vmax.f32 %v5924_v55, %v5925_v57  ;;  %v7251_v46 = vsel %vm3352_vm2, %v5905_v45, -inf }
 0x2f5   :  { %v7261_v41 = vsel %vm3352_vm2, %v5982_v35, -inf  ;;  %v7253_v56 = vmax.f32 %v7251_v46, %v7252_v7  ;;  %v4401_v2 = vcombine.high %v16259_v60, %v16259_v60  ;;  %v5983_v12 = vsel %vm5338_vm11, %v16244_v19, -inf }
 0x2f6   :  { %v7254_v20 = vsel %vm3352_vm2, %v5912_v13, -inf  ;;  %v7257_v33 = vsel %vm3352_vm2, %v5919_v10, -inf  ;;  %v7260_v48 = vsel %vm3352_vm2, %v5926_v18, -inf  ;;  %v5984_v40 = vrot.slane %v5983_v12, 4  ;;  %v327_v10 = vld [vmem:[#allocation2 + $0x2b8] sm:$0xff] }
 0x2f7   :  { %v7256_v14 = vmax.f32 %v7254_v20, %v7255_v30  ;;  %v7259_v3 = vmax.f32 %v7257_v33, %v7258_v16  ;;  %v7262_v43 = vmax.f32 %v7260_v48, %v7261_v41  ;;  %v5990_v42 = vsel %vm5338_vm11, %v4400_v39, -inf }
 0x2f8   :  { %v5985_v53 = vmax.f32 %v5983_v12, %v5984_v40  ;;  %v5991_v47 = vrot.slane %v5990_v42, 4  ;;  %v5997_v19 = vsel %vm5338_vm11, %v16259_v60, -inf  ;;  %v6004_v8 = vsel %vm5338_vm11, %v4401_v2, -inf }
 0x2f9   :  { %v7725_v49 = vsel %vm7683_vm12, %v7256_v14, %v7253_v56  ;;  %v5998_v44 = vrot.slane %v5997_v19, 4  ;;  %v6005_v55 = vrot.slane %v6004_v8, 4  ;;  %v16302_v31 = vsel %vm3352_vm2, %v16235_v21, %v12748_v51  ;;  %v328_v21 = vld [vmem:[#allocation2 + $0x2c0] sm:$0xff]  ;;  %v16316_v51 = vpop.permute.xlu1 %12781  ;;  %v16327_v56 = vpop.f32.mrb[31].mxu0 }
 0x2fa   :  { %v7726_v63 = vsel %vm7685_vm13, %v7259_v3, %v7725_v49  ;;  %v5986_v5 = vrot.slane %v5985_v53, 2  ;;  %v5992_v7 = vmax.f32 %v5990_v42, %v5991_v47  ;;  %v16309_v60 = vsel %vm3352_vm2, %v16228_v62, %v12749_v61  ;;  %v16321_v62 = vpop.permute.xlu0 %12776 }
 0x2fb   :  { %v5999_v45 = vmax.f32 %v5997_v19, %v5998_v44  ;;  %v6006_v26 = vmax.f32 %v6004_v8, %v6005_v55  ;;  %v3695_v15 = vadd.f32 %v15976_v34, %v15863_v22  ;;  %vm18921_vm1 = vcmask 1043459  }
 0x2fc   :  { %v16314_v57 = vsel %vm18921_vm1, %v7262_v43, %v7726_v63  ;;  %v5987_v35 = vmax.f32 %v5985_v53, %v5986_v5  ;;  %v5993_v30 = vrot.slane %v5992_v7, 2  ;;  %v13040_v4 = vpack.i.bf16 %v16220_v24, %v16173_v38  ;;  %v7886_v5 = vld [vmem:[#allocation3 + $0x40] sm:$0xff] }
 0x2fd   :  { %v12764_v16 = vunpack.i.h.bf16 %v16269_v28  ;;  %v6000_v61 = vrot.slane %v5999_v45, 2  ;;  %v6007_v39 = vrot.slane %v6006_v26, 2  ;;  %v3887_v13 = vmax.f32 %v3695_v15, 0.0  ;;  %v16336_v42 = vpop.permute.xlu1 %12791 }
 0x2fe   :  { %v12763_v22 = vunpack.i.l.bf16 %v16269_v28  ;;  %v5988_v34 = vrot.slane %v5987_v35, 1  ;;  %v5994_v18 = vmax.f32 %v5992_v7, %v5993_v30  ;;  %13041 = vrot.lane.b32.xlu1 %v13040_v4, %s13381_s24  ;;  %v12759_v41 = vunpack.i.h.bf16 %v16271_v27  ;;  %v16343_v49 = vpop.permute.xlu0 %12786 }
 0x2ff   :  { %v2953_v46 = vsel %vm34_vm0, %v328_v21, %v12764_v16  ;;  %v6001_v38 = vmax.f32 %v5999_v45, %v6000_v61  ;;  %v6008_v24 = vmax.f32 %v6006_v26, %v6007_v39  ;;  %v4351_v2 = vcombine.high %v3887_v13, %v3887_v13 }
 0x300   :  { %v4358_v12 = vrot.slane %v3887_v13, %v14922_v36  ;;  %v5989_v20 = vmax.f32 %v5987_v35, %v5988_v34  ;;  %v5995_v33 = vrot.slane %v5994_v18, 1  ;;  %v2952_v48 = vsel %vm34_vm0, %v327_v10, %v12763_v22 }
 0x301   :  { %v16333_v28 = vsel %vm3352_vm2, %v16214_v23, %v12759_v41  ;;  %v6002_v40 = vrot.slane %v6001_v38, 1  ;;  %v6009_v14 = vrot.slane %v6008_v24, 1  ;;  %v4365_v3 = vrot.slane %v4351_v2, %v14922_v36  ;;  %v16363_v34 = vpop.permute.xlu1 %12801 }
 0x302   :  { %v4366_v43 = vcombine.high %v4358_v12, %v4358_v12  ;;  %v5996_v53 = vmax.f32 %v5994_v18, %v5995_v33  ;;  %v16339_v47 = vsel %vm3352_vm2, %v5989_v20, -inf  ;;  %v5927_v19 = vsel %vm5338_vm11, %v4358_v12, -inf  ;;  %v7856_v33 = vld [vmem:[#allocation3 + $0x51] sm:$0xff] }
 0x303   :  { %v12758_v8 = vunpack.i.l.bf16 %v16271_v27  ;;  %v6003_v44 = vmax.f32 %v6001_v38, %v6002_v40  ;;  %v6010_v23 = vmax.f32 %v6008_v24, %v6009_v14  ;;  %v4367_v55 = vcombine.high %v4365_v3, %v4365_v3 }
 0x304   :  { %v5928_v63 = vrot.slane %v5927_v19, 4  ;;  %v16346_v7 = vsel %vm3352_vm2, %v5996_v53, -inf  ;;  %v5934_v45 = vsel %vm5338_vm11, %v4366_v43, -inf  ;;  %v5941_v26 = vsel %vm5338_vm11, %v4365_v3, -inf }
 0x305   :  { %v3403_v15 = vsel %vm3352_vm2, %v16225_v52, %v12758_v8  ;;  %v16353_v21 = vsel %vm3352_vm2, %v6003_v44, -inf  ;;  %v16356_v27 = vsel %vm3352_vm2, %v6010_v23, -inf  ;;  %v5935_v30 = vrot.slane %v5934_v45, 4  ;;  %v7855_v8 = vld [vmem:[#allocation3 + $0x41] sm:$0xff] }
 0x306   :  { %v5929_v35 = vmax.f32 %v5927_v19, %v5928_v63  ;;  %v5942_v4 = vrot.slane %v5941_v26, 4  ;;  %v5948_v16 = vsel %vm5338_vm11, %v4367_v55, -inf  ;;  %v3441_v61 = vpack.c.bf16 %v16309_v60, %v16302_v31  ;;  %v16370_v60 = vld [vmem:[#allocation3 + $0x50] sm:$0xff] }
 0x307   :  { %v13050_v39 = vpack.i.bf16 %v7886_v5, %v16183_v6  ;;  %v5936_v10 = vmax.f32 %v5934_v45, %v5935_v30  ;;  %v5949_v22 = vrot.slane %v5948_v16, 4  ;;  %v12774_v52 = vunpack.i.h.bf16 %v16286_v11  ;;  %v16372_v6 = vpop.permute.xlu0 %12796 }
 0x308   :  { %v5930_v13 = vrot.slane %v5929_v35, 2  ;;  %v5943_v18 = vmax.f32 %v5941_v26, %v5942_v4  ;;  %11653 = vmatprep.mubr.msk.bf16.mxu0 %vm3476_vm10, %v3441_v61  ;;  %v12773_v41 = vunpack.i.l.bf16 %v16286_v11  ;;  %v12769_v38 = vunpack.i.h.bf16 %v16291_v9  ;;  %v13239_v4 = vld [vmem:[%s18843_s3] sm:$0xff]  }
 0x309   :  { %13051 = vrot.lane.b32.xlu1 %v13050_v39, %s13382_s26  ;;  %v12768_v31 = vunpack.i.l.bf16 %v16291_v9  ;;  %v5937_v2 = vrot.slane %v5936_v10, 2  ;;  %v5950_v12 = vmax.f32 %v5948_v16, %v5949_v22  ;;  %v3018_v20 = vsel %vm2962_vm4, %v2953_v46, %v12774_v52 }
 0x30a   :  { %v5931_v24 = vmax.f32 %v5929_v35, %v5930_v13  ;;  %v5944_v40 = vrot.slane %v5943_v18, 2  ;;  %v3017_v14 = vsel %vm2962_vm4, %v2952_v48, %v12773_v41  ;;  %v3016_v11 = vsel %vm2962_vm4, %v16247_v32, %v12769_v38  ;;  %v16392_v35 = vld [vmem:[#allocation3 + $0x52] sm:$0xff] }
 0x30b   :  { %v3015_v3 = vsel %vm2962_vm4, %v16250_v25, %v12768_v31  ;;  %v5938_v43 = vmax.f32 %v5936_v10, %v5937_v2  ;;  %v5951_v53 = vrot.slane %v5950_v12, 2  ;;  %v13035_v19 = vpack.i.bf16 %v16370_v60, %v7886_v5  ;;  %v16385_v25 = vpop.permute.xlu1 %12811  ;;  %v16394_v30 = vpop.permute.xlu0 %12806 }
 0x30c   :  { %v5932_v9 = vrot.slane %v5931_v24, 1  ;;  %v5945_v44 = vmax.f32 %v5943_v18, %v5944_v40  ;;  %v3442_v23 = vpack.c.bf16 %v16333_v28, %v3403_v15  ;;  %v13060_v46 = vpack.i.bf16 %v7856_v33, %v7855_v8  ;;  %v13240_v18 = vld [vmem:[%s18843_s3 + $0x48] sm:$0xff]  }
 0x30d   :  { %v12784_v55 = vunpack.i.h.bf16 %v16316_v51  ;;  %v5939_v48 = vrot.slane %v5938_v43, 1  ;;  %v5952_v45 = vmax.f32 %v5950_v12, %v5951_v53  ;;  %13036 = vrot.lane.b32.xlu0 %v13035_v19, %s13381_s24  ;;  %v12783_v32 = vunpack.i.l.bf16 %v16316_v51  ;;  %v13238_v51 = vld [vmem:[%s18843_s3 + $0x40] sm:$0xff]   ;;  %v16435_v19 = vpop.f32.mrb[32].mxu0 }
 0x30e   :  { %v5933_v63 = vmax.f32 %v5931_v24, %v5932_v9  ;;  %v5946_v26 = vrot.slane %v5945_v44, 1  ;;  %11654 = vmatmul.mubr.msk.bf16.gmra.mrb[48].mxu0 %vm3476_vm10, %v3442_v23  ;;  %13061 = vrot.lane.b32.xlu1 %v13060_v46, %s13379_s1  ;;  %v12779_v28 = vunpack.i.h.bf16 %v16321_v62  ;;  %v12778_v15 = vunpack.i.l.bf16 %v16321_v62 }
 0x30f   :  { %v3083_v5 = vsel %vm3027_vm5, %v3018_v20, %v12784_v55  ;;  %v5940_v16 = vmax.f32 %v5938_v43, %v5939_v48  ;;  %v5953_v61 = vrot.slane %v5952_v45, 1  ;;  %v3082_v13 = vsel %vm3027_vm5, %v3017_v14, %v12783_v32  ;;  %11419 = vmatprep.subr.bf16.mxu1 %v13238_v51  ;;  %v12817_v53 = vpop.permute.xlu0 %12816 }
 0x310   :  { %v7263_v39 = vsel %vm3352_vm2, %v5933_v63, -inf  ;;  %v5947_v10 = vmax.f32 %v5945_v44, %v5946_v26  ;;  %v3080_v22 = vsel %vm3027_vm5, %v3015_v3, %v12778_v15  ;;  %v3081_v52 = vsel %vm3027_vm5, %v3016_v11, %v12779_v28  ;;  %11420 = vmatpush3.bf16.msra.mxu1 %v13239_v4  ;;  %v12822_v3 = vpop.permute.xlu1 %12821 }
 0x311   :  { %v7265_v62 = vmax.f32 %v7263_v39, %v16339_v47  ;;  %v5954_v41 = vmax.f32 %v5952_v45, %v5953_v61  ;;  %v7266_v38 = vsel %vm3352_vm2, %v5940_v16, -inf  ;;  %13046 = vrot.lane.b32.xlu0 %v13060_v46, %s13382_s26  ;;  %v13070_v31 = vpack.i.bf16 %v16392_v35, %v16207_v59  ;;  %v13241_v47 = vld [vmem:[%s18843_s3 + $0x8] sm:$0xff]   ;;  %11421 = vmatprep.subr.bf16.mxu1 %v13240_v18  ;;  %v13242_v59 = vld [vmem:[%s18843_s3 + $0x50] sm:$0xff]  }
 0x312   :  { %v12794_v24 = vunpack.i.h.bf16 %v16336_v42  ;;  %v7268_v2 = vmax.f32 %v7266_v38, %v16346_v7  ;;  %v7269_v12 = vsel %vm3352_vm2, %v5947_v10, -inf  ;;  %v12793_v33 = vunpack.i.l.bf16 %v16336_v42  ;;  %v330_v38 = vld [vmem:[#allocation2 + $0x2d8] sm:$0xff] }
 0x313   :  { %v7728_v20 = vsel %vm7689_vm15, %v7265_v62, %v16314_v57  ;;  %v7271_v40 = vmax.f32 %v7269_v12, %v16353_v21  ;;  %v7272_v14 = vsel %vm3352_vm2, %v5954_v41, -inf  ;;  %13071 = vrot.lane.b32.xlu1 %v13070_v31, %s13381_s24  ;;  %vm18922_vm8 = vcmask 130048   ;;  %v16461_v62 = vpop.permute.xlu0 %12826 }
 0x314   :  { %v3148_v7 = vsel %vm18922_vm8, %v3083_v5, %v12794_v24  ;;  %v12789_v11 = vunpack.i.h.bf16 %v16343_v49  ;;  %v7274_v57 = vmax.f32 %v7272_v14, %v16356_v27  ;;  %vm18923_vm9 = vcmask 1045509   ;;  %vm18924_vm6 = vmmov %vm18922_vm8  ;;  %11422 = vmatpush3.bf16.msra.mxu1 %v13241_v47  ;;  %v13243_v27 = vld [vmem:[%s18843_s3 + $0x10] sm:$0xff]   ;;  %v12832_v61 = vpop.permute.xlu1 %12831 }
 0x315   :  { %v7729_v42 = vsel %vm18923_vm9, %v7268_v2, %v7728_v20  ;;  %v3147_v9 = vsel %vm18924_vm6, %v3082_v13, %v12793_v33  ;;  %v12788_v43 = vunpack.i.l.bf16 %v16343_v49  ;;  %vm18925_vm7 = vcmask 1046534   ;;  %vm18926_vm3 = vmmov %vm18924_vm6  ;;  %11423 = vmatprep.subr.bf16.mxu1 %v13242_v59  ;;  %v329_v33 = vld [vmem:[#allocation2 + $0x2d0] sm:$0xff] }
 0x316   :  { %v7730_v21 = vsel %vm18925_vm7, %v7271_v40, %v7729_v42  ;;  %v3146_v8 = vsel %vm18926_vm3, %v3081_v52, %v12789_v11  ;;  %v12804_v44 = vunpack.i.h.bf16 %v16363_v34  ;;  %v12803_v23 = vunpack.i.l.bf16 %v16363_v34  ;;  %vm18928_vm1 = vmmov %vm18926_vm3  ;;  %v16472_v52 = vld [vmem:[%s18842_s2] ss:$0 sm:$0xff] }
 0x317   :  { %vm18927_vm14 = vcmask 1047559   ;;  %v3145_v49 = vsel %vm18928_vm1, %v3080_v22, %v12788_v43  ;;  %v12799_v55 = vunpack.i.h.bf16 %v16372_v6  ;;  %v12798_v63 = vunpack.i.l.bf16 %v16372_v6 }
 0x318   :  { %v7731_v46 = vsel %vm18927_vm14, %v7274_v57, %v7730_v21  ;;  %vm18929_vm8 = vcmask 162816   ;;  %v12814_v45 = vunpack.i.h.bf16 %v16385_v25  ;;  %v12813_v32 = vunpack.i.l.bf16 %v16385_v25  ;;  %11424 = vmatpush3.bf16.msra.mxu1 %v13243_v27 }
 0x319   :  { %7824 = vst.msk [vmem:[#allocation3 + $0x61] sm:$0xff] %vm3352_vm2, %v7731_v46  ;;  %v3212_v48 = vsel %vm18929_vm8, %v3147_v9, %v12803_v23  ;;  %vm18930_vm9 = vmmov %vm18929_vm8  ;;  %v12809_v28 = vunpack.i.h.bf16 %v16394_v30  ;;  %v12808_v15 = vunpack.i.l.bf16 %v16394_v30  ;;  %vm18933_vm3 = vcmask 195584  }
 0x31a   :  { %v3213_v34 = vsel %vm18930_vm9, %v3148_v7, %v12804_v44  ;;  %vm18931_vm6 = vmmov %vm18929_vm8  ;;  %v3277_v6 = vsel %vm18933_vm3, %v3212_v48, %v12813_v32  ;;  %v12824_v4 = vunpack.i.h.bf16 %v12822_v3  ;;  %v12823_v16 = vunpack.i.l.bf16 %v12822_v3 }
 0x31b   :  { %v3210_v26 = vsel %vm18931_vm6, %v3145_v49, %v12798_v63  ;;  %vm18932_vm7 = vmmov %vm18931_vm6  ;;  %v12819_v13 = vunpack.i.h.bf16 %v12817_v53  ;;  %v12818_v10 = vunpack.i.l.bf16 %v12817_v53  ;;  %vm18937_vm9 = vcmask 228352  }
 0x31c   :  { %v3211_v5 = vsel %vm18932_vm7, %v3146_v8, %v12799_v55  ;;  %vm18934_vm14 = vmmov %vm18933_vm3  ;;  %v16464_v22 = vsel %vm18937_vm9, %v3277_v6, %v12823_v16  ;;  %v3716_v18 = vadd.f32 %v16472_v52, %v15958_v54  ;;  %v3708_v41 = vadd.f32 %v16472_v52, %v16038_v58 }
 0x31d   :  { %v3278_v51 = vsel %vm18934_vm14, %v3213_v34, %v12814_v45  ;;  %vm18935_vm1 = vmmov %vm18933_vm3  ;;  %v3719_v47 = vadd.f32 %v16472_v52, %v16057_v50  ;;  %v12834_v2 = vunpack.i.h.bf16 %v12832_v61  ;;  %v12833_v59 = vunpack.i.l.bf16 %v12832_v61 }
 0x31e   :  { %v3275_v39 = vsel %vm18935_vm1, %v3210_v26, %v12808_v15  ;;  %vm18936_vm8 = vmmov %vm18935_vm1  ;;  %v3892_v12 = vmax.f32 %v3716_v18, 0.0  ;;  %v3890_v20 = vmax.f32 %v3708_v41, 0.0  ;;  %v12829_v40 = vunpack.i.h.bf16 %v16461_v62 }
 0x31f   :  { %v3276_v25 = vsel %vm18936_vm8, %v3211_v5, %v12809_v28  ;;  %vm18938_vm6 = vmmov %vm18937_vm9  ;;  %v3893_v54 = vmax.f32 %v3719_v47, 0.0  ;;  %v16486_v14 = vsel %vm34_vm0, %v330_v38, %v12834_v2  ;;  %v12828_v58 = vunpack.i.l.bf16 %v16461_v62 }
 0x320   :  { %v16467_v30 = vsel %vm18938_vm6, %v3278_v51, %v12824_v4  ;;  %vm18939_vm7 = vmmov %vm18938_vm6  ;;  %v16491_v7 = vadd.f32 %v16472_v52, %v16105_v37  ;;  %v4436_v11 = vcombine.high %v3892_v12, %v3892_v12  ;;  %v4443_v50 = vrot.slane %v3892_v12, %v14922_v36 }
 0x321   :  { %v3340_v31 = vsel %vm18939_vm7, %v3275_v39, %v12818_v10  ;;  %vm18940_vm3 = vmmov %vm18938_vm6  ;;  %v4402_v3 = vcombine.high %v3890_v20, %v3890_v20  ;;  %v4409_v57 = vrot.slane %v3890_v20, %v14922_v36  ;;  %v4453_v42 = vcombine.high %v3893_v54, %v3893_v54 }
 0x322   :  { %v16480_v24 = vsel %vm18940_vm3, %v3276_v25, %v12819_v13  ;;  %v16496_v9 = vrot.slane %v3893_v54, %v14922_v36  ;;  %v16499_v43 = vsel %vm34_vm0, %v329_v33, %v12833_v59  ;;  %v16502_v53 = vsel %vm3352_vm2, %v3340_v31, %v12828_v58 }
 0x323   :  { %v4450_v21 = vrot.slane %v4436_v11, %v14922_v36  ;;  %v4451_v37 = vcombine.high %v4443_v50, %v4443_v50  ;;  %v6067_v8 = vsel %vm5338_vm11, %v4443_v50, -inf  ;;  %v4416_v44 = vrot.slane %v4402_v3, %v14922_v36  ;;  %v16517_v50 = vpop.f32.mrb[33].mxu0 }
 0x324   :  { %v6068_v23 = vrot.slane %v6067_v8, 4  ;;  %v4417_v27 = vcombine.high %v4409_v57, %v4409_v57  ;;  %v6011_v46 = vsel %vm5338_vm11, %v4409_v57, -inf  ;;  %v16509_v49 = vrot.slane %v4453_v42, %v14922_v36 }
 0x325   :  { %v4452_v55 = vcombine.high %v4450_v21, %v4450_v21  ;;  %v6074_v63 = vsel %vm5338_vm11, %v4451_v37, -inf  ;;  %v6081_v48 = vsel %vm5338_vm11, %v4450_v21, -inf  ;;  %v4418_v34 = vcombine.high %v4416_v44, %v4416_v44  ;;  %v16519_v37 = vpop.permute.xlu1 %12841 }
 0x326   :  { %v6069_v45 = vmax.f32 %v6067_v8, %v6068_v23  ;;  %v6075_v32 = vrot.slane %v6074_v63, 4  ;;  %v6082_v26 = vrot.slane %v6081_v48, 4  ;;  %v6012_v5 = vrot.slane %v6011_v46, 4 }
 0x327   :  { %v6088_v28 = vsel %vm5338_vm11, %v4452_v55, -inf  ;;  %v6018_v15 = vsel %vm5338_vm11, %v4417_v27, -inf  ;;  %v6025_v6 = vsel %vm5338_vm11, %v4416_v44, -inf  ;;  %v6032_v51 = vsel %vm5338_vm11, %v4418_v34, -inf }
 0x328   :  { %v6070_v4 = vrot.slane %v6069_v45, 2  ;;  %v6076_v16 = vmax.f32 %v6074_v63, %v6075_v32  ;;  %v6083_v61 = vmax.f32 %v6081_v48, %v6082_v26  ;;  %v6089_v39 = vrot.slane %v6088_v28, 4 }
 0x329   :  { %v6013_v25 = vmax.f32 %v6011_v46, %v6012_v5  ;;  %v6019_v13 = vrot.slane %v6018_v15, 4  ;;  %v6026_v10 = vrot.slane %v6025_v6, 4  ;;  %v6033_v18 = vrot.slane %v6032_v51, 4  ;;  %v16521_v46 = vpop.permute.xlu0 %12836 }
 0x32a   :  { %v6071_v41 = vmax.f32 %v6069_v45, %v6070_v4  ;;  %v6077_v38 = vrot.slane %v6076_v16, 2  ;;  %v6084_v31 = vrot.slane %v6083_v61, 2  ;;  %v6090_v47 = vmax.f32 %v6088_v28, %v6089_v39  ;;  %v16524_v4 = vpop.f32.mrb[34].mxu0 }
 0x32b   :  { %v6014_v2 = vrot.slane %v6013_v25, 2  ;;  %v6020_v12 = vmax.f32 %v6018_v15, %v6019_v13  ;;  %v6027_v20 = vmax.f32 %v6025_v6, %v6026_v10  ;;  %v6034_v33 = vmax.f32 %v6032_v51, %v6033_v18  ;;  %v13244_v13 = vld [vmem:[%s18843_s3 + $0x58] sm:$0xff]  }
 0x32c   :  { %v6072_v59 = vrot.slane %v6071_v41, 1  ;;  %v6078_v54 = vmax.f32 %v6076_v16, %v6077_v38  ;;  %v6085_v58 = vmax.f32 %v6083_v61, %v6084_v31  ;;  %v6091_v11 = vrot.slane %v6090_v47, 2  ;;  %v16534_v31 = vpop.permute.xlu1 %12851  ;;  %11425 = vmatprep.subr.bf16.mxu1 %v13244_v13 }
 0x32d   :  { %v6015_v3 = vmax.f32 %v6013_v25, %v6014_v2  ;;  %v6021_v57 = vrot.slane %v6020_v12, 2  ;;  %v6028_v42 = vrot.slane %v6027_v20, 2  ;;  %v6035_v21 = vrot.slane %v6034_v33, 2 }
 0x32e   :  { %v6073_v8 = vmax.f32 %v6071_v41, %v6072_v59  ;;  %v6079_v44 = vrot.slane %v6078_v54, 1  ;;  %v6086_v23 = vrot.slane %v6085_v58, 1  ;;  %v6092_v27 = vmax.f32 %v6090_v47, %v6091_v11  ;;  %v13245_v47 = vld [vmem:[%s18843_s3 + $0x18] sm:$0xff]   ;;  %v16544_v59 = vpop.permute.xlu0 %12846 }
 0x32f   :  { %v6016_v55 = vrot.slane %v6015_v3, 1  ;;  %v6022_v63 = vmax.f32 %v6020_v12, %v6021_v57  ;;  %v6029_v48 = vmax.f32 %v6027_v20, %v6028_v42  ;;  %v6036_v34 = vmax.f32 %v6034_v33, %v6035_v21  ;;  %11426 = vmatpush3.bf16.msra.mxu1 %v13245_v47  ;;  %v16549_v57 = vpop.f32.mrb[35].mxu0 }
 0x330   :  { %v6080_v45 = vmax.f32 %v6078_v54, %v6079_v44  ;;  %v6087_v32 = vmax.f32 %v6085_v58, %v6086_v23  ;;  %v6093_v26 = vrot.slane %v6092_v27, 1  ;;  %v7276_v5 = vsel %vm3352_vm2, %v6073_v8, -inf }
 0x331   :  { %v6017_v28 = vmax.f32 %v6015_v3, %v6016_v55  ;;  %v6023_v15 = vrot.slane %v6022_v63, 1  ;;  %v6030_v6 = vrot.slane %v6029_v48, 1  ;;  %v6037_v51 = vrot.slane %v6036_v34, 1 }
 0x332   :  { %v6094_v16 = vmax.f32 %v6092_v27, %v6093_v26  ;;  %v7279_v61 = vsel %vm3352_vm2, %v6080_v45, -inf  ;;  %v7282_v39 = vsel %vm3352_vm2, %v6087_v32, -inf  ;;  %v4468_v25 = vcombine.high %v16496_v9, %v16496_v9 }
 0x333   :  { %v6024_v10 = vmax.f32 %v6022_v63, %v6023_v15  ;;  %v6031_v18 = vmax.f32 %v6029_v48, %v6030_v6  ;;  %v6038_v41 = vmax.f32 %v6036_v34, %v6037_v51  ;;  %v7275_v38 = vsel %vm3352_vm2, %v6017_v28, -inf  ;;  %v13247_v48 = vld [vmem:[%s18843_s3 + $0x20] sm:$0xff]   ;;  %v332_v6 = vld [vmem:[#allocation2 + $0x2f0] sm:$0xff]  ;;  %v16570_v51 = vpop.permute.xlu1 %12861 }
 0x334   :  { %v7285_v2 = vsel %vm3352_vm2, %v6094_v16, -inf  ;;  %v7277_v12 = vmax.f32 %v7275_v38, %v7276_v5  ;;  %v4469_v20 = vcombine.high %v16509_v49, %v16509_v49  ;;  %v6095_v33 = vsel %vm5338_vm11, %v16496_v9, -inf  ;;  %v13246_v9 = vld [vmem:[%s18843_s3 + $0x60] sm:$0xff]  }
 0x335   :  { %v7278_v54 = vsel %vm3352_vm2, %v6024_v10, -inf  ;;  %v7281_v58 = vsel %vm3352_vm2, %v6031_v18, -inf  ;;  %v7284_v11 = vsel %vm3352_vm2, %v6038_v41, -inf  ;;  %v6096_v3 = vrot.slane %v6095_v33, 4  ;;  %11427 = vmatprep.subr.bf16.mxu1 %v13246_v9  ;;  %v331_v18 = vld [vmem:[#allocation2 + $0x2e8] sm:$0xff] }
 0x336   :  { %v7280_v42 = vmax.f32 %v7278_v54, %v7279_v61  ;;  %v7283_v21 = vmax.f32 %v7281_v58, %v7282_v39  ;;  %v7286_v8 = vmax.f32 %v7284_v11, %v7285_v2  ;;  %v6102_v44 = vsel %vm5338_vm11, %v4468_v25, -inf  ;;  %11428 = vmatpush3.bf16.msra.mxu1 %v13247_v48  ;;  %v13249_v41 = vld [vmem:[%s18843_s3 + $0x28] sm:$0xff]  }
 0x337   :  { %v6097_v23 = vmax.f32 %v6095_v33, %v6096_v3  ;;  %v6103_v27 = vrot.slane %v6102_v44, 4  ;;  %v6109_v55 = vsel %vm5338_vm11, %v16509_v49, -inf  ;;  %v6116_v63 = vsel %vm5338_vm11, %v4469_v20, -inf }
 0x338   :  { %v7732_v34 = vsel %vm7683_vm12, %v7280_v42, %v7277_v12  ;;  %v6110_v45 = vrot.slane %v6109_v55, 4  ;;  %v6117_v32 = vrot.slane %v6116_v63, 4  ;;  %v16566_v26 = vsel %vm3352_vm2, %v16480_v24, %v12829_v40  ;;  %v16576_v24 = vpop.permute.xlu0 %12856  ;;  %v13248_v40 = vld [vmem:[%s18843_s3 + $0x68] sm:$0xff]  }
 0x339   :  { %v7733_v5 = vsel %vm7685_vm13, %v7283_v21, %v7732_v34  ;;  %v6098_v49 = vrot.slane %v6097_v23, 2  ;;  %v6104_v28 = vmax.f32 %v6102_v44, %v6103_v27  ;;  %v3891_v15 = vmax.f32 %v16491_v7, 0.0  ;;  %11429 = vmatprep.subr.bf16.mxu1 %v13248_v40  ;;  %v16590_v27 = vpop.permute.xlu1 %12871 }
 0x33a   :  { %v6111_v16 = vmax.f32 %v6109_v55, %v6110_v45  ;;  %v6118_v61 = vmax.f32 %v6116_v63, %v6117_v32  ;;  %vm18941_vm14 = vcmask 1043459   ;;  %v12844_v62 = vunpack.i.h.bf16 %v16519_v37  ;;  %11430 = vmatpush3.bf16.msra.mxu1 %v13249_v41 }
 0x33b   :  { %v16573_v39 = vsel %vm18941_vm14, %v7286_v8, %v7733_v5  ;;  %v6099_v25 = vmax.f32 %v6097_v23, %v6098_v49  ;;  %v6105_v13 = vrot.slane %v6104_v28, 2  ;;  %v4419_v7 = vcombine.high %v3891_v15, %v3891_v15 }
 0x33c   :  { %v4426_v10 = vrot.slane %v3891_v15, %v14922_v36  ;;  %v6112_v38 = vrot.slane %v6111_v16, 2  ;;  %v6119_v47 = vrot.slane %v6118_v61, 2  ;;  %v2957_v2 = vsel %vm34_vm0, %v332_v6, %v12844_v62  ;;  %v16594_v34 = vpop.permute.xlu0 %12866  ;;  %v13251_v62 = vld [vmem:[%s18843_s3 + $0x30] sm:$0xff]  }
 0x33d   :  { %v12843_v12 = vunpack.i.l.bf16 %v16519_v37  ;;  %v6100_v20 = vrot.slane %v6099_v25, 1  ;;  %v6106_v33 = vmax.f32 %v6104_v28, %v6105_v13  ;;  %v4433_v54 = vrot.slane %v4419_v7, %v14922_v36  ;;  %v13250_v28 = vld [vmem:[%s18843_s3 + $0x70] sm:$0xff]  }
 0x33e   :  { %v4434_v58 = vcombine.high %v4426_v10, %v4426_v10  ;;  %v6113_v11 = vmax.f32 %v6111_v16, %v6112_v38  ;;  %v6120_v3 = vmax.f32 %v6118_v61, %v6119_v47  ;;  %v6039_v42 = vsel %vm5338_vm11, %v4426_v10, -inf  ;;  %11431 = vmatprep.subr.bf16.mxu1 %v13250_v28  ;;  %v16641_v28 = vld [vmem:[#allocation3 + $0x60] sm:$0xff] }
 0x33f   :  { %v2956_v21 = vsel %vm34_vm0, %v331_v18, %v12843_v12  ;;  %v6101_v8 = vmax.f32 %v6099_v25, %v6100_v20  ;;  %v6107_v44 = vrot.slane %v6106_v33, 1  ;;  %v4435_v9 = vcombine.high %v4433_v54, %v4433_v54  ;;  %11432 = vmatpush3.bf16.msra.mxu1 %v13251_v62 }
 0x340   :  { %v6040_v23 = vrot.slane %v6039_v42, 4  ;;  %v6114_v37 = vrot.slane %v6113_v11, 1  ;;  %v6121_v55 = vrot.slane %v6120_v3, 1  ;;  %v6046_v63 = vsel %vm5338_vm11, %v4434_v58, -inf }
 0x341   :  { %v6053_v48 = vsel %vm5338_vm11, %v4433_v54, -inf  ;;  %v6108_v45 = vmax.f32 %v6106_v33, %v6107_v44  ;;  %v16597_v32 = vsel %vm3352_vm2, %v6101_v8, -inf  ;;  %v6047_v49 = vrot.slane %v6046_v63, 4  ;;  %v16617_v54 = vpop.permute.xlu1 %12881  ;;  %v16624_v8 = vpop.permute.xlu0 %12876 }
 0x342   :  { %v6041_v5 = vmax.f32 %v6039_v42, %v6040_v23  ;;  %v6115_v15 = vmax.f32 %v6113_v11, %v6114_v37  ;;  %v6122_v6 = vmax.f32 %v6120_v3, %v6121_v55  ;;  %v6054_v16 = vrot.slane %v6053_v48, 4  ;;  %v13252_v55 = vld [vmem:[%s18843_s3 + $0x78] sm:$0xff]  }
 0x343   :  { %v6060_v61 = vsel %vm5338_vm11, %v4435_v9, -inf  ;;  %v16607_v40 = vsel %vm3352_vm2, %v6108_v45, -inf  ;;  %v6048_v13 = vmax.f32 %v6046_v63, %v6047_v49  ;;  %v12839_v38 = vunpack.i.h.bf16 %v16521_v46  ;;  %11433 = vmatprep.subr.bf16.mxu1 %v13252_v55 }
 0x344   :  { %v6042_v25 = vrot.slane %v6041_v5, 2  ;;  %v6061_v7 = vrot.slane %v6060_v61, 4  ;;  %v16610_v10 = vsel %vm3352_vm2, %v6115_v15, -inf  ;;  %v16613_v18 = vsel %vm3352_vm2, %v6122_v6, -inf }
 0x345   :  { %v6055_v41 = vmax.f32 %v6053_v48, %v6054_v16  ;;  %v6049_v12 = vrot.slane %v6048_v13, 2  ;;  %v12838_v33 = vunpack.i.l.bf16 %v16521_v46  ;;  %v3408_v11 = vsel %vm3352_vm2, %v16467_v30, %v12839_v38  ;;  %v16628_v46 = vld [vmem:[#allocation3 + $0x62] sm:$0xff]  ;;  %v13253_v48 = vld [vmem:[%s18843_s3 + $0x38] sm:$0xff]  }
 0x346   :  { %v6043_v47 = vmax.f32 %v6041_v5, %v6042_v25  ;;  %v6062_v20 = vmax.f32 %v6060_v61, %v6061_v7  ;;  %v3443_v3 = vpack.c.bf16 %v16566_v26, %v16502_v53  ;;  %v12854_v42 = vunpack.i.h.bf16 %v16534_v31  ;;  %11434 = vmatpush3.bf16.msra.mxu1 %v13253_v48  ;;  %v12892_v25 = vpop.permute.xlu1 %12891 }
 0x347   :  { %v6056_v58 = vrot.slane %v6055_v41, 2  ;;  %v6050_v9 = vmax.f32 %v6048_v13, %v6049_v12  ;;  %v3407_v37 = vsel %vm3352_vm2, %v16464_v22, %v12838_v33  ;;  %v12853_v53 = vunpack.i.l.bf16 %v16534_v31 }
 0x348   :  { %v6044_v44 = vrot.slane %v6043_v47, 1  ;;  %v6063_v23 = vrot.slane %v6062_v20, 2  ;;  %11657 = vmatprep.mubr.msk.bf16.mxu0 %vm3476_vm10, %v3443_v3  ;;  %v3022_v26 = vsel %vm2962_vm4, %v2957_v2, %v12854_v42  ;;  %v12849_v63 = vunpack.i.h.bf16 %v16544_v59 }
 0x349   :  { %v6057_v30 = vmax.f32 %v6055_v41, %v6056_v58  ;;  %v6051_v45 = vrot.slane %v6050_v9, 1  ;;  %v12848_v49 = vunpack.i.l.bf16 %v16544_v59  ;;  %v3021_v6 = vsel %vm2962_vm4, %v2956_v21, %v12853_v53  ;;  %v12887_v41 = vpop.permute.xlu0 %12886 }
 0x34a   :  { %v6045_v22 = vmax.f32 %v6043_v47, %v6044_v44  ;;  %v6064_v5 = vmax.f32 %v6062_v20, %v6063_v23  ;;  %v3020_v31 = vsel %vm2962_vm4, %v16486_v14, %v12849_v63  ;;  %v13055_v2 = vpack.i.bf16 %v16628_v46, %v16392_v35 }
 0x34b   :  { %v6058_v15 = vrot.slane %v6057_v30, 1  ;;  %v6052_v16 = vmax.f32 %v6050_v9, %v6051_v45  ;;  %v3019_v59 = vsel %vm2962_vm4, %v16499_v43, %v12848_v49  ;;  %v13080_v14 = vpack.i.bf16 %v16641_v28, %v16370_v60 }
 0x34c   :  { %v6065_v61 = vrot.slane %v6064_v5, 1  ;;  %v7287_v62 = vsel %vm3352_vm2, %v6045_v22, -inf  ;;  %13056 = vrot.lane.b32.xlu0 %v13055_v2, %s13379_s1  ;;  %v3444_v21 = vpack.c.bf16 %v3408_v11, %v3407_v37  ;;  %v12864_v47 = vunpack.i.h.bf16 %v16570_v51  ;;  %v12902_v37 = vpop.permute.xlu1 %12901 }
 0x34d   :  { %v6059_v13 = vmax.f32 %v6057_v30, %v6058_v15  ;;  %v7289_v7 = vmax.f32 %v7287_v62, %v16597_v32  ;;  %v7290_v38 = vsel %vm3352_vm2, %v6052_v16, -inf  ;;  %v12863_v12 = vunpack.i.l.bf16 %v16570_v51  ;;  %13081 = vrot.lane.b32.xlu1 %v13080_v14, %s13382_s26 }
 0x34e   :  { %v6066_v35 = vmax.f32 %v6064_v5, %v6065_v61  ;;  %v7292_v43 = vmax.f32 %v7290_v38, %v16607_v40  ;;  %11658 = vmatmul.mubr.msk.bf16.gmra.mrb[52].mxu0 %vm3476_vm10, %v3444_v21  ;;  %v12859_v60 = vunpack.i.h.bf16 %v16576_v24  ;;  %v3087_v51 = vsel %vm3027_vm5, %v3022_v26, %v12864_v47  ;;  %v16681_v26 = vpop.f32.mrb[36].mxu0 }
 0x34f   :  { %v7293_v20 = vsel %vm3352_vm2, %v6059_v13, -inf  ;;  %v7735_v32 = vsel %vm7689_vm15, %v7289_v7, %v16573_v39  ;;  %v3086_v11 = vsel %vm3027_vm5, %v3021_v6, %v12863_v12  ;;  %vm18942_vm1 = vcmask 1045509  }
 0x350   :  { %v7295_v33 = vmax.f32 %v7293_v20, %v16610_v10  ;;  %v7296_v58 = vsel %vm3352_vm2, %v6066_v35, -inf  ;;  %v7736_v3 = vsel %vm18942_vm1, %v7292_v43, %v7735_v32  ;;  %v12858_v39 = vunpack.i.l.bf16 %v16576_v24  ;;  %v12897_v24 = vpop.permute.xlu0 %12896  ;;  %v12912_v21 = vpop.permute.xlu1 %12911  ;;  %v333_v32 = vld [vmem:[#allocation2 + $0x300] sm:$0xff] }
 0x351   :  { %v7298_v40 = vmax.f32 %v7296_v58, %v16613_v18  ;;  %v3085_v42 = vsel %vm3027_vm5, %v3020_v31, %v12859_v60  ;;  %vm18943_vm8 = vcmask 1046534   ;;  %v12874_v9 = vunpack.i.h.bf16 %v16590_v27  ;;  %v334_v60 = vld [vmem:[#allocation2 + $0x308] sm:$0xff] }
 0x352   :  { %v7737_v44 = vsel %vm18943_vm8, %v7295_v33, %v7736_v3  ;;  %v12873_v10 = vunpack.i.l.bf16 %v16590_v27  ;;  %v12869_v23 = vunpack.i.h.bf16 %v16594_v34  ;;  %vm18944_vm9 = vcmask 1047559  }
 0x353   :  { %v7738_v55 = vsel %vm18944_vm9, %v7298_v40, %v7737_v44  ;;  %v3084_v30 = vsel %vm3027_vm5, %v3019_v59, %v12858_v39  ;;  %v12868_v18 = vunpack.i.l.bf16 %v16594_v34  ;;  %v12884_v53 = vunpack.i.h.bf16 %v16617_v54 }
 0x354   :  { %7825 = vst.msk [vmem:[#allocation3 + $0x71] sm:$0xff] %vm3352_vm2, %v7738_v55  ;;  %vm18945_vm6 = vcmask 130048   ;;  %v12883_v22 = vunpack.i.l.bf16 %v16617_v54  ;;  %vm18949_vm1 = vcmask 162816   ;;  %v12879_v34 = vunpack.i.h.bf16 %v16624_v8  ;;  %v12907_v47 = vpop.permute.xlu0 %12906 }
 0x355   :  { %v3151_v63 = vsel %vm18945_vm6, %v3086_v11, %v12873_v10  ;;  %vm18946_vm7 = vmmov %vm18945_vm6  ;;  %v12878_v49 = vunpack.i.l.bf16 %v16624_v8  ;;  %v12894_v6 = vunpack.i.h.bf16 %v12892_v25  ;;  %v12893_v31 = vunpack.i.l.bf16 %v12892_v25 }
 0x356   :  { %v3152_v27 = vsel %vm18946_vm7, %v3087_v51, %v12874_v9  ;;  %vm18947_vm3 = vmmov %vm18945_vm6  ;;  %v12889_v2 = vunpack.i.h.bf16 %v12887_v41  ;;  %v12888_v62 = vunpack.i.l.bf16 %v12887_v41  ;;  %v12904_v59 = vunpack.i.h.bf16 %v12902_v37 }
 0x357   :  { %v3150_v48 = vsel %vm18947_vm3, %v3085_v42, %v12869_v23  ;;  %vm18948_vm14 = vmmov %vm18947_vm3  ;;  %v3217_v5 = vsel %vm18949_vm1, %v3152_v27, %v12884_v53  ;;  %vm18953_vm7 = vcmask 195584   ;;  %v12903_v14 = vunpack.i.l.bf16 %v12902_v37 }
 0x358   :  { %v3149_v45 = vsel %vm18948_vm14, %v3084_v30, %v12868_v18  ;;  %vm18950_vm8 = vmmov %vm18949_vm1  ;;  %v12899_v25 = vunpack.i.h.bf16 %v12897_v24  ;;  %v12898_v38 = vunpack.i.l.bf16 %v12897_v24  ;;  %v3732_v41 = vadd.f32 %v16472_v52, %v16192_v17 }
 0x359   :  { %v3216_v15 = vsel %vm18950_vm8, %v3151_v63, %v12883_v22  ;;  %vm18951_vm9 = vmmov %vm18949_vm1  ;;  %vm18957_vm8 = vcmask 228352   ;;  %v3724_v43 = vadd.f32 %v16472_v52, %v16267_v29  ;;  %v3735_v20 = vadd.f32 %v16472_v52, %v16278_v0 }
 0x35a   :  { %v3214_v16 = vsel %vm18951_vm9, %v3149_v45, %v12878_v49  ;;  %vm18952_vm6 = vmmov %vm18949_vm1  ;;  %v3281_v54 = vsel %vm18953_vm7, %v3216_v15, %v12893_v31  ;;  %v12914_v11 = vunpack.i.h.bf16 %v12912_v21  ;;  %v12913_v51 = vunpack.i.l.bf16 %v12912_v21 }
 0x35b   :  { %v3215_v61 = vsel %vm18952_vm6, %v3150_v48, %v12879_v34  ;;  %vm18954_vm3 = vmmov %vm18953_vm7  ;;  %v3896_v40 = vmax.f32 %v3732_v41, 0.0  ;;  %v3894_v3 = vmax.f32 %v3724_v43, 0.0  ;;  %v3897_v39 = vmax.f32 %v3735_v20, 0.0 }
 0x35c   :  { %v3282_v13 = vsel %vm18954_vm3, %v3217_v5, %v12894_v6  ;;  %vm18955_vm14 = vmmov %vm18954_vm3  ;;  %v12909_v42 = vunpack.i.h.bf16 %v12907_v47  ;;  %v16714_v17 = vsel %vm34_vm0, %v334_v60, %v12914_v11  ;;  %v16717_v29 = vsel %vm34_vm0, %v333_v32, %v12913_v51  ;;  %v16743_v6 = vpop.f32.mrb[37].mxu0 }
 0x35d   :  { %v3280_v7 = vsel %vm18955_vm14, %v3215_v61, %v12889_v2  ;;  %vm18956_vm1 = vmmov %vm18954_vm3  ;;  %v16700_v35 = vsel %vm18957_vm8, %v3282_v13, %v12904_v59  ;;  %v12908_v44 = vunpack.i.l.bf16 %v12907_v47  ;;  %v16721_v0 = vadd.f32 %v16472_v52, %v16327_v56 }
 0x35e   :  { %v3279_v8 = vsel %vm18956_vm1, %v3214_v16, %v12888_v62  ;;  %vm18958_vm9 = vmmov %vm18957_vm8  ;;  %v4504_v9 = vcombine.high %v3896_v40, %v3896_v40  ;;  %v4511_v10 = vrot.slane %v3896_v40, %v14922_v36  ;;  %v4470_v23 = vcombine.high %v3894_v3, %v3894_v3  ;;  %v16745_v62 = vpop.f32.mrb[38].mxu0 }
 0x35f   :  { %v16703_v12 = vsel %vm18958_vm9, %v3281_v54, %v12903_v14  ;;  %vm18959_vm6 = vmmov %vm18957_vm8  ;;  %v4477_v37 = vrot.slane %v3894_v3, %v14922_v36  ;;  %v4521_v55 = vcombine.high %v3897_v39, %v3897_v39  ;;  %v16726_v30 = vrot.slane %v3897_v39, %v14922_v36  ;;  %v16751_v14 = vpop.f32.mrb[39].mxu0 }
 0x360   :  { %v3344_v33 = vsel %vm18959_vm6, %v3279_v8, %v12898_v38  ;;  %vm18960_vm7 = vmmov %vm18959_vm6  ;;  %v4518_v24 = vrot.slane %v4504_v9, %v14922_v36  ;;  %v4519_v56 = vcombine.high %v4511_v10, %v4511_v10  ;;  %v6179_v52 = vsel %vm5338_vm11, %v4511_v10, -inf }
 0x361   :  { %v3345_v58 = vsel %vm18960_vm7, %v3280_v7, %v12899_v25  ;;  %v16729_v18 = vsel %vm3352_vm2, %v3344_v33, %v12908_v44  ;;  %v4484_v63 = vrot.slane %v4470_v23, %v14922_v36  ;;  %v6180_v27 = vrot.slane %v6179_v52, 4 }
 0x362   :  { %v16732_v53 = vsel %vm3352_vm2, %v3345_v58, %v12909_v42  ;;  %v4485_v48 = vcombine.high %v4477_v37, %v4477_v37  ;;  %v6123_v22 = vsel %vm5338_vm11, %v4477_v37, -inf  ;;  %v16739_v45 = vrot.slane %v4521_v55, %v14922_v36 }
 0x363   :  { %v4520_v5 = vcombine.high %v4518_v24, %v4518_v24  ;;  %v6186_v34 = vsel %vm5338_vm11, %v4519_v56, -inf  ;;  %v6193_v49 = vsel %vm5338_vm11, %v4518_v24, -inf  ;;  %v4486_v15 = vcombine.high %v4484_v63, %v4484_v63  ;;  %v16753_v24 = vpop.permute.xlu1 %12921 }
 0x364   :  { %v6181_v31 = vmax.f32 %v6179_v52, %v6180_v27  ;;  %v6187_v2 = vrot.slane %v6186_v34, 4  ;;  %v6194_v16 = vrot.slane %v6193_v49, 4  ;;  %v6124_v61 = vrot.slane %v6123_v22, 4 }
 0x365   :  { %v6200_v59 = vsel %vm5338_vm11, %v4520_v5, -inf  ;;  %v6130_v54 = vsel %vm5338_vm11, %v4485_v48, -inf  ;;  %v6137_v13 = vsel %vm5338_vm11, %v4484_v63, -inf  ;;  %v6144_v7 = vsel %vm5338_vm11, %v4486_v15, -inf  ;;  %v16755_v48 = vpop.permute.xlu0 %12916 }
 0x366   :  { %v6182_v21 = vrot.slane %v6181_v31, 2  ;;  %v6188_v8 = vmax.f32 %v6186_v34, %v6187_v2  ;;  %v6195_v25 = vmax.f32 %v6193_v49, %v6194_v16  ;;  %v6201_v38 = vrot.slane %v6200_v59, 4 }
 0x367   :  { %v6125_v47 = vmax.f32 %v6123_v22, %v6124_v61  ;;  %v6131_v41 = vrot.slane %v6130_v54, 4  ;;  %v6138_v43 = vrot.slane %v6137_v13, 4  ;;  %v6145_v20 = vrot.slane %v6144_v7, 4 }
 0x368   :  { %v6183_v32 = vmax.f32 %v6181_v31, %v6182_v21  ;;  %v6189_v60 = vrot.slane %v6188_v8, 2  ;;  %v6196_v33 = vrot.slane %v6195_v25, 2  ;;  %v6202_v58 = vmax.f32 %v6200_v59, %v6201_v38 }
 0x369   :  { %v6126_v11 = vrot.slane %v6125_v47, 2  ;;  %v6132_v51 = vmax.f32 %v6130_v54, %v6131_v41  ;;  %v6139_v40 = vmax.f32 %v6137_v13, %v6138_v43  ;;  %v6146_v3 = vmax.f32 %v6144_v7, %v6145_v20  ;;  %v16763_v20 = vpop.permute.xlu1 %12931 }
 0x36a   :  { %v6184_v39 = vrot.slane %v6183_v32, 1  ;;  %v6190_v42 = vmax.f32 %v6188_v8, %v6189_v60  ;;  %v6197_v44 = vmax.f32 %v6195_v25, %v6196_v33  ;;  %v6203_v9 = vrot.slane %v6202_v58, 2 }
 0x36b   :  { %v6127_v10 = vmax.f32 %v6125_v47, %v6126_v11  ;;  %v6133_v23 = vrot.slane %v6132_v51, 2  ;;  %v6140_v37 = vrot.slane %v6139_v40, 2  ;;  %v6147_v55 = vrot.slane %v6146_v3, 2  ;;  %v16770_v11 = vpop.permute.xlu0 %12926 }
 0x36c   :  { %v6185_v56 = vmax.f32 %v6183_v32, %v6184_v39  ;;  %v6191_v52 = vrot.slane %v6190_v42, 1  ;;  %v6198_v63 = vrot.slane %v6197_v44, 1  ;;  %v6204_v27 = vmax.f32 %v6202_v58, %v6203_v9 }
 0x36d   :  { %v6128_v22 = vrot.slane %v6127_v10, 1  ;;  %v6134_v5 = vmax.f32 %v6132_v51, %v6133_v23  ;;  %v6141_v34 = vmax.f32 %v6139_v40, %v6140_v37  ;;  %v6148_v49 = vmax.f32 %v6146_v3, %v6147_v55 }
 0x36e   :  { %v6192_v15 = vmax.f32 %v6190_v42, %v6191_v52  ;;  %v6199_v31 = vmax.f32 %v6197_v44, %v6198_v63  ;;  %v6205_v2 = vrot.slane %v6204_v27, 1  ;;  %v7300_v16 = vsel %vm3352_vm2, %v6185_v56, -inf }
 0x36f   :  { %v6129_v61 = vmax.f32 %v6127_v10, %v6128_v22  ;;  %v6135_v59 = vrot.slane %v6134_v5, 1  ;;  %v6142_v54 = vrot.slane %v6141_v34, 1  ;;  %v6149_v13 = vrot.slane %v6148_v49, 1 }
 0x370   :  { %v6206_v7 = vmax.f32 %v6204_v27, %v6205_v2  ;;  %v7303_v21 = vsel %vm3352_vm2, %v6192_v15, -inf  ;;  %v7306_v8 = vsel %vm3352_vm2, %v6199_v31, -inf  ;;  %v4536_v25 = vcombine.high %v16726_v30, %v16726_v30  ;;  %v336_v15 = vld [vmem:[#allocation2 + $0x320] sm:$0xff]  ;;  %v16784_v31 = vpop.permute.xlu1 %12941 }
 0x371   :  { %v6136_v38 = vmax.f32 %v6134_v5, %v6135_v59  ;;  %v6143_v47 = vmax.f32 %v6141_v34, %v6142_v54  ;;  %v6150_v41 = vmax.f32 %v6148_v49, %v6149_v13  ;;  %v7299_v43 = vsel %vm3352_vm2, %v6129_v61, -inf  ;;  %v16791_v59 = vpop.permute.xlu0 %12936 }
 0x372   :  { %v7309_v32 = vsel %vm3352_vm2, %v6206_v7, -inf  ;;  %v7301_v60 = vmax.f32 %v7299_v43, %v7300_v16  ;;  %v4537_v33 = vcombine.high %v16739_v45, %v16739_v45  ;;  %v6207_v58 = vsel %vm5338_vm11, %v16726_v30, -inf }
 0x373   :  { %v7302_v51 = vsel %vm3352_vm2, %v6136_v38, -inf  ;;  %v7305_v40 = vsel %vm3352_vm2, %v6143_v47, -inf  ;;  %v7308_v3 = vsel %vm3352_vm2, %v6150_v41, -inf  ;;  %v6208_v39 = vrot.slane %v6207_v58, 4 }
 0x374   :  { %v7304_v42 = vmax.f32 %v7302_v51, %v7303_v21  ;;  %v7307_v44 = vmax.f32 %v7305_v40, %v7306_v8  ;;  %v7310_v9 = vmax.f32 %v7308_v3, %v7309_v32  ;;  %v6214_v10 = vsel %vm5338_vm11, %v4536_v25, -inf }
 0x375   :  { %v6209_v23 = vmax.f32 %v6207_v58, %v6208_v39  ;;  %v6215_v37 = vrot.slane %v6214_v10, 4  ;;  %v6221_v55 = vsel %vm5338_vm11, %v16739_v45, -inf  ;;  %v6228_v30 = vsel %vm5338_vm11, %v4537_v33, -inf }
 0x376   :  { %v7739_v56 = vsel %vm7683_vm12, %v7304_v42, %v7301_v60  ;;  %v6222_v52 = vrot.slane %v6221_v55, 4  ;;  %v6229_v63 = vrot.slane %v6228_v30, 4  ;;  %v3445_v27 = vpack.c.bf16 %v16732_v53, %v16729_v18  ;;  %v16799_v42 = vpop.permute.xlu1 %12951 }
 0x377   :  { %v7740_v22 = vsel %vm7685_vm13, %v7307_v44, %v7739_v56  ;;  %v6210_v5 = vrot.slane %v6209_v23, 2  ;;  %v6216_v34 = vmax.f32 %v6214_v10, %v6215_v37  ;;  %v3895_v49 = vmax.f32 %v16721_v0, 0.0  ;;  %v335_v0 = vld [vmem:[#allocation2 + $0x318] sm:$0xff] }
 0x378   :  { %v6223_v2 = vmax.f32 %v6221_v55, %v6222_v52  ;;  %v6230_v45 = vmax.f32 %v6228_v30, %v6229_v63  ;;  %vm18961_vm3 = vcmask 1043459   ;;  %v12924_v61 = vunpack.i.h.bf16 %v16753_v24  ;;  %11661 = vmatprep.mubr.msk.bf16.mxu0 %vm3476_vm10, %v3445_v27 }
 0x379   :  { %v16787_v16 = vsel %vm18961_vm3, %v7310_v9, %v7740_v22  ;;  %v6211_v18 = vmax.f32 %v6209_v23, %v6210_v5  ;;  %v6217_v53 = vrot.slane %v6216_v34, 2  ;;  %v4487_v54 = vcombine.high %v3895_v49, %v3895_v49  ;;  %v16803_v23 = vpop.permute.xlu0 %12946 }
 0x37a   :  { %v4494_v13 = vrot.slane %v3895_v49, %v14922_v36  ;;  %v6224_v7 = vrot.slane %v6223_v2, 2  ;;  %v6231_v21 = vrot.slane %v6230_v45, 2  ;;  %v2961_v8 = vsel %vm34_vm0, %v336_v15, %v12924_v61 }
 0x37b   :  { %v12923_v25 = vunpack.i.l.bf16 %v16753_v24  ;;  %v6212_v38 = vrot.slane %v6211_v18, 1  ;;  %v6218_v47 = vmax.f32 %v6216_v34, %v6217_v53  ;;  %v4501_v41 = vrot.slane %v4487_v54, %v14922_v36 }
 0x37c   :  { %v4502_v43 = vcombine.high %v4494_v13, %v4494_v13  ;;  %v6225_v32 = vmax.f32 %v6223_v2, %v6224_v7  ;;  %v6232_v60 = vmax.f32 %v6230_v45, %v6231_v21  ;;  %v6151_v33 = vsel %vm5338_vm11, %v4494_v13, -inf  ;;  %v16820_v7 = vpop.permute.xlu1 %12961 }
 0x37d   :  { %v2960_v58 = vsel %vm34_vm0, %v335_v0, %v12923_v25  ;;  %v6213_v51 = vmax.f32 %v6211_v18, %v6212_v38  ;;  %v6219_v40 = vrot.slane %v6218_v47, 1  ;;  %v4503_v3 = vcombine.high %v4501_v41, %v4501_v41 }
 0x37e   :  { %v6152_v39 = vrot.slane %v6151_v33, 4  ;;  %v6226_v44 = vrot.slane %v6225_v32, 1  ;;  %v6233_v9 = vrot.slane %v6232_v60, 1  ;;  %v6158_v24 = vsel %vm5338_vm11, %v4502_v43, -inf }
 0x37f   :  { %v6165_v10 = vsel %vm5338_vm11, %v4501_v41, -inf  ;;  %v6220_v37 = vmax.f32 %v6218_v47, %v6219_v40  ;;  %v16806_v55 = vsel %vm3352_vm2, %v6213_v51, -inf  ;;  %v6159_v56 = vrot.slane %v6158_v24, 4  ;;  %v16826_v41 = vpop.permute.xlu0 %12956  ;;  %v16830_v51 = vld [vmem:[#allocation3 + $0x70] sm:$0xff]  ;;  %v16832_v40 = vpop.f32.mrb[40].mxu0 }
 0x380   :  { %v6153_v30 = vmax.f32 %v6151_v33, %v6152_v39  ;;  %v6227_v52 = vmax.f32 %v6225_v32, %v6226_v44  ;;  %v6234_v63 = vmax.f32 %v6232_v60, %v6233_v9  ;;  %v6166_v27 = vrot.slane %v6165_v10, 4 }
 0x381   :  { %v6172_v22 = vsel %vm5338_vm11, %v4503_v3, -inf  ;;  %v16810_v5 = vsel %vm3352_vm2, %v6220_v37, -inf  ;;  %v6160_v49 = vmax.f32 %v6158_v24, %v6159_v56  ;;  %v12919_v18 = vunpack.i.h.bf16 %v16755_v48  ;;  %v7857_v37 = vld [vmem:[#allocation3 + $0x61] sm:$0xff] }
 0x382   :  { %v6154_v34 = vrot.slane %v6153_v30, 2  ;;  %v6173_v15 = vrot.slane %v6172_v22, 4  ;;  %v16813_v2 = vsel %vm3352_vm2, %v6227_v52, -inf  ;;  %v16816_v45 = vsel %vm3352_vm2, %v6234_v63, -inf }
 0x383   :  { %v6167_v61 = vmax.f32 %v6165_v10, %v6166_v27  ;;  %v6161_v54 = vrot.slane %v6160_v49, 2  ;;  %v12918_v0 = vunpack.i.l.bf16 %v16755_v48  ;;  %v3412_v25 = vsel %vm3352_vm2, %v16700_v35, %v12919_v18  ;;  %v7858_v48 = vld [vmem:[#allocation3 + $0x71] sm:$0xff] }
 0x384   :  { %v6155_v53 = vmax.f32 %v6153_v30, %v6154_v34  ;;  %v6174_v13 = vmax.f32 %v6172_v22, %v6173_v15  ;;  %v12934_v38 = vunpack.i.h.bf16 %v16763_v20  ;;  %v12933_v47 = vunpack.i.l.bf16 %v16763_v20  ;;  %v12972_v22 = vpop.permute.xlu1 %12971  ;;  %v12967_v15 = vpop.permute.xlu0 %12966 }
 0x385   :  { %v6168_v21 = vrot.slane %v6167_v61, 2  ;;  %v6162_v32 = vmax.f32 %v6160_v49, %v6161_v54  ;;  %v3411_v33 = vsel %vm3352_vm2, %v16703_v12, %v12918_v0  ;;  %v12929_v10 = vunpack.i.h.bf16 %v16770_v11  ;;  %v16853_v54 = vld [vmem:[#allocation3 + $0x72] sm:$0xff] }
 0x386   :  { %v6156_v43 = vrot.slane %v6155_v53, 1  ;;  %v6175_v60 = vrot.slane %v6174_v13, 2  ;;  %v3446_v39 = vpack.c.bf16 %v3412_v25, %v3411_v33  ;;  %v3025_v35 = vsel %vm2962_vm4, %v2960_v58, %v12933_v47 }
 0x387   :  { %v6169_v3 = vmax.f32 %v6167_v61, %v6168_v21  ;;  %v3026_v44 = vsel %vm2962_vm4, %v2961_v8, %v12934_v38  ;;  %v6163_v9 = vrot.slane %v6162_v32, 1  ;;  %v12928_v12 = vunpack.i.l.bf16 %v16770_v11 }
 0x388   :  { %v6157_v20 = vmax.f32 %v6155_v53, %v6156_v43  ;;  %v6176_v24 = vmax.f32 %v6174_v13, %v6175_v60  ;;  %v13065_v56 = vpack.i.bf16 %v16830_v51, %v16641_v28  ;;  %v13090_v52 = vpack.i.bf16 %v7858_v48, %v7857_v37  ;;  %11662 = vmatmul.mubr.msk.bf16.gmra.mrb[56].mxu0 %vm3476_vm10, %v3446_v39 }
 0x389   :  { %v6170_v30 = vrot.slane %v6169_v3, 1  ;;  %v6164_v63 = vmax.f32 %v6162_v32, %v6163_v9  ;;  %v3024_v8 = vsel %vm2962_vm4, %v16714_v17, %v12929_v10  ;;  %v3023_v11 = vsel %vm2962_vm4, %v16717_v29, %v12928_v12 }
 0x38a   :  { %v6177_v27 = vrot.slane %v6176_v24, 1  ;;  %v7311_v58 = vsel %vm3352_vm2, %v6157_v20, -inf  ;;  %13066 = vrot.lane.b32.xlu0 %v13065_v56, %s13381_s24  ;;  %13091 = vrot.lane.b32.xlu1 %v13090_v52, %s13379_s1  ;;  %v12944_v28 = vunpack.i.h.bf16 %v16784_v31  ;;  %v12943_v53 = vunpack.i.l.bf16 %v16784_v31 }
 0x38b   :  { %v6171_v34 = vmax.f32 %v6169_v3, %v6170_v30  ;;  %v7313_v49 = vmax.f32 %v7311_v58, %v16806_v55  ;;  %v7314_v18 = vsel %vm3352_vm2, %v6164_v63, -inf  ;;  %v12939_v17 = vunpack.i.h.bf16 %v16791_v59 }
 0x38c   :  { %v6178_v61 = vmax.f32 %v6176_v24, %v6177_v27  ;;  %v7316_v55 = vmax.f32 %v7314_v18, %v16810_v5  ;;  %v3091_v0 = vsel %vm3027_vm5, %v3026_v44, %v12944_v28  ;;  %v3090_v38 = vsel %vm3027_vm5, %v3025_v35, %v12943_v53 }
 0x38d   :  { %v7317_v29 = vsel %vm3352_vm2, %v6171_v34, -inf  ;;  %v7742_v13 = vsel %vm7689_vm15, %v7313_v49, %v16787_v16  ;;  %v12938_v31 = vunpack.i.l.bf16 %v16791_v59  ;;  %vm18962_vm0 = vcmask 1045509   ;;  %v12982_v59 = vpop.permute.xlu1 %12981 }
 0x38e   :  { %v7319_v21 = vmax.f32 %v7317_v29, %v16813_v2  ;;  %v7320_v25 = vsel %vm3352_vm2, %v6178_v61, -inf  ;;  %v7743_v43 = vsel %vm18962_vm0, %v7316_v55, %v7742_v13  ;;  %v3089_v5 = vsel %vm3027_vm5, %v3024_v8, %v12939_v17  ;;  %13076 = vrot.lane.b32.xlu0 %v13090_v52, %s13382_s26  ;;  %v16905_v17 = vld [vmem:[%s18842_s2] ss:$0 sm:$0xff] }
 0x38f   :  { %v7322_v47 = vmax.f32 %v7320_v25, %v16816_v45  ;;  %v13100_v16 = vpack.i.bf16 %v16853_v54, %v16628_v46  ;;  %vm18963_vm4 = vcmask 1046534   ;;  %v3088_v2 = vsel %vm3027_vm5, %v3023_v11, %v12938_v31  ;;  %v12977_v46 = vpop.permute.xlu0 %12976 }
 0x390   :  { %v7744_v32 = vsel %vm18963_vm4, %v7319_v21, %v7743_v43  ;;  %v12954_v60 = vunpack.i.h.bf16 %v16799_v42  ;;  %v12953_v33 = vunpack.i.l.bf16 %v16799_v42  ;;  %vm18964_vm14 = vcmask 1047559  }
 0x391   :  { %v7745_v45 = vsel %vm18964_vm14, %v7322_v47, %v7744_v32  ;;  %13101 = vrot.lane.b32.xlu1 %v13100_v16, %s13381_s24  ;;  %v12949_v48 = vunpack.i.h.bf16 %v16803_v23  ;;  %v12948_v3 = vunpack.i.l.bf16 %v16803_v23  ;;  %v12964_v39 = vunpack.i.h.bf16 %v16820_v7  ;;  %v12992_v11 = vpop.permute.xlu1 %12991 }
 0x392   :  { %7826 = vst.msk [vmem:[#allocation3 + $0x81] sm:$0xff] %vm3352_vm2, %v7745_v45  ;;  %vm18965_vm1 = vcmask 130048   ;;  %v12963_v42 = vunpack.i.l.bf16 %v16820_v7  ;;  %v12959_v20 = vunpack.i.h.bf16 %v16826_v41  ;;  %vm18969_vm6 = vcmask 162816  }
 0x393   :  { %v3155_v35 = vsel %vm18965_vm1, %v3090_v38, %v12953_v33  ;;  %vm18966_vm5 = vmmov %vm18965_vm1  ;;  %v12958_v23 = vunpack.i.l.bf16 %v16826_v41  ;;  %v12974_v12 = vunpack.i.h.bf16 %v12972_v22  ;;  %v12973_v56 = vunpack.i.l.bf16 %v12972_v22  ;;  %v16896_v22 = vpop.permute.xlu0 %12986  ;;  %v16914_v38 = vpop.f32.mrb[41].mxu0 }
 0x394   :  { %v3156_v44 = vsel %vm18966_vm5, %v3091_v0, %v12954_v60  ;;  %vm18967_vm8 = vmmov %vm18965_vm1  ;;  %v12969_v63 = vunpack.i.h.bf16 %v12967_v15  ;;  %v12968_v7 = vunpack.i.l.bf16 %v12967_v15  ;;  %v12984_v27 = vunpack.i.h.bf16 %v12982_v59 }
 0x395   :  { %v3153_v9 = vsel %vm18967_vm8, %v3088_v2, %v12948_v3  ;;  %vm18968_vm9 = vmmov %vm18965_vm1  ;;  %v3221_v10 = vsel %vm18969_vm6, %v3156_v44, %v12964_v39  ;;  %vm18973_vm4 = vcmask 195584   ;;  %v12983_v34 = vunpack.i.l.bf16 %v12982_v59  ;;  %v16941_v44 = vpop.f32.mrb[42].mxu0 }
 0x396   :  { %v3154_v24 = vsel %vm18968_vm9, %v3089_v5, %v12949_v48  ;;  %vm18970_vm7 = vmmov %vm18969_vm6  ;;  %v12979_v49 = vunpack.i.h.bf16 %v12977_v46  ;;  %vm18977_vm8 = vcmask 228352   ;;  %v12978_v18 = vunpack.i.l.bf16 %v12977_v46 }
 0x397   :  { %v3220_v37 = vsel %vm18970_vm7, %v3155_v35, %v12963_v42  ;;  %vm18971_vm3 = vmmov %vm18969_vm6  ;;  %v3748_v55 = vadd.f32 %v16905_v17, %v16435_v19  ;;  %v3740_v29 = vadd.f32 %v16905_v17, %v16517_v50  ;;  %v3751_v0 = vadd.f32 %v16905_v17, %v16524_v4 }
 0x398   :  { %v3219_v30 = vsel %vm18971_vm3, %v3154_v24, %v12959_v20  ;;  %vm18972_vm0 = vmmov %vm18971_vm3  ;;  %v3285_v58 = vsel %vm18973_vm4, %v3220_v37, %v12973_v56  ;;  %v12994_v21 = vunpack.i.h.bf16 %v12992_v11  ;;  %v12993_v25 = vunpack.i.l.bf16 %v12992_v11 }
 0x399   :  { %v3218_v52 = vsel %vm18972_vm0, %v3153_v9, %v12958_v23  ;;  %vm18974_vm14 = vmmov %vm18973_vm4  ;;  %v3900_v31 = vmax.f32 %v3748_v55, 0.0  ;;  %v3898_v47 = vmax.f32 %v3740_v29, 0.0  ;;  %v12989_v43 = vunpack.i.h.bf16 %v16896_v22 }
 0x39a   :  { %v3286_v8 = vsel %vm18974_vm14, %v3221_v10, %v12974_v12  ;;  %vm18975_vm1 = vmmov %vm18973_vm4  ;;  %v12988_v5 = vunpack.i.l.bf16 %v16896_v22  ;;  %v3901_v16 = vmax.f32 %v3751_v0, 0.0  ;;  %v16926_v4 = vadd.f32 %v16905_v17, %v16549_v57 }
 0x39b   :  { %v3283_v41 = vsel %vm18975_vm1, %v3218_v52, %v12968_v7  ;;  %vm18976_vm5 = vmmov %vm18975_vm1  ;;  %v3351_v61 = vsel %vm18977_vm8, %v3286_v8, %v12984_v27  ;;  %v4572_v32 = vcombine.high %v3900_v31, %v3900_v31  ;;  %v4579_v2 = vrot.slane %v3900_v31, %v14922_v36  ;;  %v16949_v7 = vpop.f32.mrb[43].mxu0 }
 0x39c   :  { %v3284_v28 = vsel %vm18976_vm5, %v3219_v30, %v12969_v63  ;;  %vm18978_vm9 = vmmov %vm18977_vm8  ;;  %v16922_v50 = vsel %vm3352_vm2, %v3351_v61, %v12994_v21  ;;  %v4538_v60 = vcombine.high %v3898_v47, %v3898_v47  ;;  %v4545_v33 = vrot.slane %v3898_v47, %v14922_v36 }
 0x39d   :  { %v3350_v53 = vsel %vm18978_vm9, %v3285_v58, %v12983_v34  ;;  %vm18979_vm6 = vmmov %vm18977_vm8  ;;  %v4589_v59 = vcombine.high %v3901_v16, %v3901_v16  ;;  %v16931_v45 = vrot.slane %v3901_v16, %v14922_v36  ;;  %v4586_v39 = vrot.slane %v4572_v32, %v14922_v36 }
 0x39e   :  { %v16900_v15 = vsel %vm18979_vm6, %v3284_v28, %v12979_v49  ;;  %vm18980_vm7 = vmmov %vm18979_vm6  ;;  %v16919_v19 = vsel %vm3352_vm2, %v3350_v53, %v12993_v25  ;;  %v4587_v57 = vcombine.high %v4579_v2, %v4579_v2  ;;  %v6291_v46 = vsel %vm5338_vm11, %v4579_v2, -inf }
 0x39f   :  { %v3348_v13 = vsel %vm18980_vm7, %v3283_v41, %v12978_v18  ;;  %v3448_v48 = vpack.c.bf16 %v16922_v50, %v16919_v19  ;;  %v4552_v35 = vrot.slane %v4538_v60, %v14922_v36  ;;  %v6292_v42 = vrot.slane %v6291_v46, 4 }
 0x3a0   :  { %v16936_v3 = vsel %vm3352_vm2, %v3348_v13, %v12988_v5  ;;  %v4553_v20 = vcombine.high %v4545_v33, %v4545_v33  ;;  %v6235_v9 = vsel %vm5338_vm11, %v4545_v33, -inf  ;;  %v16945_v24 = vrot.slane %v4589_v59, %v14922_v36 }
 0x3a1   :  { %v4588_v10 = vcombine.high %v4586_v39, %v4586_v39  ;;  %v6298_v23 = vsel %vm5338_vm11, %v4587_v57, -inf  ;;  %v6305_v37 = vsel %vm5338_vm11, %v4586_v39, -inf  ;;  %v4554_v30 = vcombine.high %v4552_v35, %v4552_v35 }
 0x3a2   :  { %v6293_v12 = vmax.f32 %v6291_v46, %v6292_v42  ;;  %v6299_v56 = vrot.slane %v6298_v23, 4  ;;  %v6306_v52 = vrot.slane %v6305_v37, 4  ;;  %v6236_v63 = vrot.slane %v6235_v9, 4  ;;  %v16955_v46 = vpop.permute.xlu1 %13001 }
 0x3a3   :  { %v6312_v27 = vsel %vm5338_vm11, %v4588_v10, -inf  ;;  %v6242_v58 = vsel %vm5338_vm11, %v4553_v20, -inf  ;;  %v6249_v8 = vsel %vm5338_vm11, %v4552_v35, -inf  ;;  %v6256_v34 = vsel %vm5338_vm11, %v4554_v30, -inf }
 0x3a4   :  { %v6294_v49 = vrot.slane %v6293_v12, 2  ;;  %v6300_v11 = vmax.f32 %v6298_v23, %v6299_v56  ;;  %v6307_v41 = vmax.f32 %v6305_v37, %v6306_v52  ;;  %v6313_v28 = vrot.slane %v6312_v27, 4 }
 0x3a5   :  { %v6237_v61 = vmax.f32 %v6235_v9, %v6236_v63  ;;  %v6243_v18 = vrot.slane %v6242_v58, 4  ;;  %v6250_v53 = vrot.slane %v6249_v8, 4  ;;  %v6257_v55 = vrot.slane %v6256_v34, 4 }
 0x3a6   :  { %v6295_v29 = vmax.f32 %v6293_v12, %v6294_v49  ;;  %v6301_v13 = vrot.slane %v6300_v11, 2  ;;  %v6308_v0 = vrot.slane %v6307_v41, 2  ;;  %v6314_v21 = vmax.f32 %v6312_v27, %v6313_v28 }
 0x3a7   :  { %v6238_v25 = vrot.slane %v6237_v61, 2  ;;  %v6244_v31 = vmax.f32 %v6242_v58, %v6243_v18  ;;  %v6251_v47 = vmax.f32 %v6249_v8, %v6250_v53  ;;  %v6258_v5 = vmax.f32 %v6256_v34, %v6257_v55 }
 0x3a8   :  { %v6296_v16 = vrot.slane %v6295_v29, 1  ;;  %v6302_v32 = vmax.f32 %v6300_v11, %v6301_v13  ;;  %v6309_v2 = vmax.f32 %v6307_v41, %v6308_v0  ;;  %v6315_v60 = vrot.slane %v6314_v21, 2 }
 0x3a9   :  { %v6239_v33 = vmax.f32 %v6237_v61, %v6238_v25  ;;  %v6245_v59 = vrot.slane %v6244_v31, 2  ;;  %v6252_v39 = vrot.slane %v6251_v47, 2  ;;  %v6259_v57 = vrot.slane %v6258_v5, 2 }
 0x3aa   :  { %v6297_v35 = vmax.f32 %v6295_v29, %v6296_v16  ;;  %v6303_v42 = vrot.slane %v6302_v32, 1  ;;  %v6310_v20 = vrot.slane %v6309_v2, 1  ;;  %v6316_v9 = vmax.f32 %v6314_v21, %v6315_v60  ;;  %v16963_v29 = vpop.permute.xlu1 %13011 }
 0x3ab   :  { %v6240_v10 = vrot.slane %v6239_v33, 1  ;;  %v6246_v23 = vmax.f32 %v6244_v31, %v6245_v59  ;;  %v6253_v37 = vmax.f32 %v6251_v47, %v6252_v39  ;;  %v6260_v30 = vmax.f32 %v6258_v5, %v6259_v57 }
 0x3ac   :  { %v6304_v12 = vmax.f32 %v6302_v32, %v6303_v42  ;;  %v6311_v56 = vmax.f32 %v6309_v2, %v6310_v20  ;;  %v6317_v52 = vrot.slane %v6316_v9, 1  ;;  %v7324_v63 = vsel %vm3352_vm2, %v6297_v35, -inf }
 0x3ad   :  { %v6241_v27 = vmax.f32 %v6239_v33, %v6240_v10  ;;  %v6247_v58 = vrot.slane %v6246_v23, 1  ;;  %v6254_v8 = vrot.slane %v6253_v37, 1  ;;  %v6261_v34 = vrot.slane %v6260_v30, 1 }
 0x3ae   :  { %v6318_v49 = vmax.f32 %v6316_v9, %v6317_v52  ;;  %v7327_v11 = vsel %vm3352_vm2, %v6304_v12, -inf  ;;  %v7330_v41 = vsel %vm3352_vm2, %v6311_v56, -inf  ;;  %v4604_v28 = vcombine.high %v16931_v45, %v16931_v45 }
 0x3af   :  { %v6248_v61 = vmax.f32 %v6246_v23, %v6247_v58  ;;  %v6255_v18 = vmax.f32 %v6253_v37, %v6254_v8  ;;  %v6262_v53 = vmax.f32 %v6260_v30, %v6261_v34  ;;  %v7323_v55 = vsel %vm3352_vm2, %v6241_v27, -inf  ;;  %v16992_v58 = vpop.f32.mrb[44].mxu0 }
 0x3b0   :  { %v7333_v13 = vsel %vm3352_vm2, %v6318_v49, -inf  ;;  %v7325_v0 = vmax.f32 %v7323_v55, %v7324_v63  ;;  %v4605_v21 = vcombine.high %v16945_v24, %v16945_v24  ;;  %v6319_v25 = vsel %vm5338_vm11, %v16931_v45, -inf  ;;  %v16977_v45 = vpop.permute.xlu0 %12996 }
 0x3b1   :  { %v7326_v31 = vsel %vm3352_vm2, %v6248_v61, -inf  ;;  %v7329_v47 = vsel %vm3352_vm2, %v6255_v18, -inf  ;;  %v7332_v5 = vsel %vm3352_vm2, %v6262_v53, -inf  ;;  %v6320_v16 = vrot.slane %v6319_v25, 4 }
 0x3b2   :  { %v7328_v32 = vmax.f32 %v7326_v31, %v7327_v11  ;;  %v7331_v2 = vmax.f32 %v7329_v47, %v7330_v41  ;;  %v7334_v60 = vmax.f32 %v7332_v5, %v7333_v13  ;;  %v6326_v33 = vsel %vm5338_vm11, %v4604_v28, -inf  ;;  %v7835_v41 = vld [vmem:[#allocation3] sm:$0xff] }
 0x3b3   :  { %v6321_v59 = vmax.f32 %v6319_v25, %v6320_v16  ;;  %v6327_v39 = vrot.slane %v6326_v33, 4  ;;  %v6333_v57 = vsel %vm5338_vm11, %v16945_v24, -inf  ;;  %v6340_v35 = vsel %vm5338_vm11, %v4605_v21, -inf  ;;  %v16986_v24 = vpop.permute.xlu1 %13021 }
 0x3b4   :  { %v7746_v42 = vsel %vm7683_vm12, %v7328_v32, %v7325_v0  ;;  %v6334_v20 = vrot.slane %v6333_v57, 4  ;;  %v6341_v9 = vrot.slane %v6340_v35, 4  ;;  %v3414_v10 = vsel %vm3352_vm2, %v16900_v15, %v12989_v43  ;;  %v17004_v53 = vpop.permute.xlu0 %13006 }
 0x3b5   :  { %v7747_v23 = vsel %vm7685_vm13, %v7331_v2, %v7746_v42  ;;  %v6322_v37 = vrot.slane %v6321_v59, 2  ;;  %v6328_v30 = vmax.f32 %v6326_v33, %v6327_v39  ;;  %v3447_v12 = vpack.c.bf16 %v3414_v10, %v16936_v3  ;;  %v7836_v42 = vld [vmem:[#allocation3 + $0x10] sm:$0xff] }
 0x3b6   :  { %v6335_v56 = vmax.f32 %v6333_v57, %v6334_v20  ;;  %v6342_v52 = vmax.f32 %v6340_v35, %v6341_v9  ;;  %v3899_v63 = vmax.f32 %v16926_v4, 0.0  ;;  %vm18981_vm3 = vcmask 1043459   ;;  %v7922_v20 = vld [vmem:[#allocation3 + $0x82] sm:$0xff] }
 0x3b7   :  { %v16990_v27 = vsel %vm18981_vm3, %v7334_v60, %v7747_v23  ;;  %v6323_v22 = vmax.f32 %v6321_v59, %v6322_v37  ;;  %v6329_v8 = vrot.slane %v6328_v30, 2  ;;  %v12999_v15 = vunpack.i.h.bf16 %v16977_v45  ;;  %11665 = vmatprep.mubr.msk.bf16.mxu0 %vm3476_vm10, %v3447_v12  ;;  %v17009_v50 = vpop.permute.xlu1 %13031  ;;  %vm18985_vm5 = vmmov %vm18981_vm3 }
 0x3b8   :  { %v12998_v43 = vunpack.i.l.bf16 %v16977_v45  ;;  %v6336_v3 = vrot.slane %v6335_v56, 2  ;;  %v6343_v34 = vrot.slane %v6342_v52, 2  ;;  %v4555_v49 = vcombine.high %v3899_v63, %v3899_v63  ;;  %11666 = vmatmul.mubr.msk.bf16.gmra.mrb[60].mxu0 %vm3476_vm10, %v3448_v48  ;;  %v17021_v12 = vpop.permute.xlu0 %13016  ;;  %vm18989_vm7 = vmmov %vm18981_vm3 }
 0x3b9   :  { %v4562_v11 = vrot.slane %v3899_v63, %v14922_v36  ;;  %v6324_v4 = vrot.slane %v6323_v22, 1  ;;  %v6330_v28 = vmax.f32 %v6328_v30, %v6329_v8  ;;  %v13004_v61 = vunpack.i.h.bf16 %v16955_v46  ;;  %v7890_v30 = vld [vmem:[#allocation3 + $0x80] sm:$0xff] }
 0x3ba   :  { %v13003_v18 = vunpack.i.l.bf16 %v16955_v46  ;;  %v6337_v55 = vmax.f32 %v6335_v56, %v6336_v3  ;;  %v6344_v13 = vmax.f32 %v6342_v52, %v6343_v34  ;;  %v4569_v0 = vrot.slane %v4555_v49, %v14922_v36 }
 0x3bb   :  { %v4570_v21 = vcombine.high %v4562_v11, %v4562_v11  ;;  %v6325_v25 = vmax.f32 %v6323_v22, %v6324_v4  ;;  %v6331_v31 = vrot.slane %v6330_v28, 1  ;;  %v6263_v47 = vsel %vm5338_vm11, %v4562_v11, -inf  ;;  %v7939_v11 = vld [vmem:[#allocation3 + $0x90] sm:$0xff] }
 0x3bc   :  { %v8364_v19 = vsel %vm3352_vm2, %v7835_v41, %v13003_v18  ;;  %v6338_v48 = vrot.slane %v6337_v55, 1  ;;  %v6345_v5 = vrot.slane %v6344_v13, 1  ;;  %v4571_v16 = vcombine.high %v4569_v0, %v4569_v0  ;;  %v17031_v41 = vpop.permute.xlu1 %13041 }
 0x3bd   :  { %v6264_v32 = vrot.slane %v6263_v47, 4  ;;  %v6332_v46 = vmax.f32 %v6330_v28, %v6331_v31  ;;  %v17012_v2 = vsel %vm3352_vm2, %v6325_v25, -inf  ;;  %v6270_v60 = vsel %vm5338_vm11, %v4570_v21, -inf  ;;  %v17037_v21 = vpop.f32.mrb[45].mxu0 }
 0x3be   :  { %v6277_v33 = vsel %vm5338_vm11, %v4569_v0, -inf  ;;  %v6339_v59 = vmax.f32 %v6337_v55, %v6338_v48  ;;  %v6346_v39 = vmax.f32 %v6344_v13, %v6345_v5  ;;  %v6271_v35 = vrot.slane %v6270_v60, 4  ;;  %v17041_v48 = vpop.f32.mrb[46].mxu0 }
 0x3bf   :  { %v6265_v57 = vmax.f32 %v6263_v47, %v6264_v32  ;;  %v17017_v9 = vsel %vm3352_vm2, %v6332_v46, -inf  ;;  %v6278_v10 = vrot.slane %v6277_v33, 4  ;;  %v6284_v23 = vsel %vm5338_vm11, %v4571_v16, -inf  ;;  %v7954_v46 = vld [vmem:[#allocation3 + $0x81] sm:$0xff] }
 0x3c0   :  { %v8365_v37 = vsel %vm3352_vm2, %v7836_v42, %v13004_v61  ;;  %v17024_v56 = vsel %vm3352_vm2, %v6339_v59, -inf  ;;  %v17027_v52 = vsel %vm3352_vm2, %v6346_v39, -inf  ;;  %v6272_v22 = vmax.f32 %v6270_v60, %v6271_v35  ;;  %v7955_v60 = vld [vmem:[#allocation3 + $0x91] sm:$0xff]  ;;  %v17045_v59 = vpop.f32.mrb[47].mxu0 }
 0x3c1   :  { %v6266_v63 = vrot.slane %v6265_v57, 2  ;;  %v6279_v8 = vmax.f32 %v6277_v33, %v6278_v10  ;;  %v6285_v3 = vrot.slane %v6284_v23, 4  ;;  %v13085_v34 = vpack.i.bf16 %v7922_v20, %v16853_v54  ;;  %v13027_v33 = vpop.permute.xlu0 %13026 }
 0x3c2   :  { %v13009_v49 = vunpack.i.h.bf16 %v17004_v53  ;;  %v6273_v28 = vrot.slane %v6272_v22, 2  ;;  %v13008_v61 = vunpack.i.l.bf16 %v17004_v53  ;;  %v13110_v18 = vpack.i.bf16 %v7890_v30, %v16830_v51 }
 0x3c3   :  { %v6267_v4 = vmax.f32 %v6265_v57, %v6266_v63  ;;  %v6280_v55 = vrot.slane %v6279_v8, 2  ;;  %v6286_v13 = vmax.f32 %v6284_v23, %v6285_v3  ;;  %13086 = vrot.lane.b32.xlu0 %v13085_v34, %s13379_s1  ;;  %vm8380_vm10 = vcmask 523264  }
 0x3c4   :  { %v13014_v0 = vunpack.i.h.bf16 %v16963_v29  ;;  %v6274_v25 = vmax.f32 %v6272_v22, %v6273_v28  ;;  %13111 = vrot.lane.b32.xlu1 %v13110_v18, %s13382_s26  ;;  %v13013_v31 = vunpack.i.l.bf16 %v16963_v29  ;;  %v13095_v47 = vpack.i.bf16 %v7939_v11, %v7890_v30 }
 0x3c5   :  { %v6268_v54 = vrot.slane %v6267_v4, 1  ;;  %v6281_v5 = vmax.f32 %v6279_v8, %v6280_v55  ;;  %v6287_v51 = vrot.slane %v6286_v13, 2  ;;  %v13019_v32 = vunpack.i.h.bf16 %v17021_v12 }
 0x3c6   :  { %v8382_v16 = vsel %vm8380_vm10, %v8365_v37, %v13014_v0  ;;  %v6275_v57 = vrot.slane %v6274_v25, 1  ;;  %v8381_v35 = vsel %vm8380_vm10, %v8364_v19, %v13013_v31  ;;  %v13018_v29 = vunpack.i.l.bf16 %v17021_v12  ;;  %v17052_v37 = vpop.permute.xlu1 %13051  ;;  %v7902_v12 = vld [vmem:[#allocation3 + $0x41] sm:$0xff]  ;;  %v7838_v31 = vld [vmem:[#allocation3 + $0x30] sm:$0xff] }
 0x3c7   :  { %v6269_v39 = vmax.f32 %v6267_v4, %v6268_v54  ;;  %v6282_v42 = vrot.slane %v6281_v5, 1  ;;  %v6288_v20 = vmax.f32 %v6286_v13, %v6287_v51  ;;  %13096 = vrot.lane.b32.xlu0 %v13095_v47, %s13381_s24  ;;  %v13024_v10 = vunpack.i.h.bf16 %v16986_v24  ;;  %v13037_v47 = vpop.permute.xlu0 %13036 }
 0x3c8   :  { %v13023_v23 = vunpack.i.l.bf16 %v16986_v24  ;;  %v6276_v30 = vmax.f32 %v6274_v25, %v6275_v57  ;;  %v13105_v22 = vpack.i.bf16 %v7955_v60, %v7954_v46  ;;  %v13029_v8 = vunpack.i.h.bf16 %v13027_v33  ;;  %v7837_v25 = vld [vmem:[#allocation3 + $0x20] sm:$0xff] }
 0x3c9   :  { %v7335_v63 = vsel %vm3352_vm2, %v6269_v39, -inf  ;;  %v6283_v3 = vmax.f32 %v6281_v5, %v6282_v42  ;;  %v6289_v34 = vrot.slane %v6288_v20, 1  ;;  %v13028_v11 = vunpack.i.l.bf16 %v13027_v33 }
 0x3ca   :  { %v7337_v19 = vmax.f32 %v7335_v63, %v17012_v2  ;;  %v7338_v4 = vsel %vm3352_vm2, %v6276_v30, -inf  ;;  %v8417_v28 = vsel %vm3352_vm2, %v7902_v12, %v13029_v8  ;;  %v13034_v18 = vunpack.i.h.bf16 %v17009_v50  ;;  %v7901_v2 = vld [vmem:[#allocation3 + $0x31] sm:$0xff]  ;;  %v13062_v57 = vpop.permute.xlu1 %13061 }
 0x3cb   :  { %v13033_v24 = vunpack.i.l.bf16 %v17009_v50  ;;  %v6290_v55 = vmax.f32 %v6288_v20, %v6289_v34  ;;  %v7340_v13 = vmax.f32 %v7338_v4, %v17017_v9  ;;  %v7341_v0 = vsel %vm3352_vm2, %v6283_v3, -inf  ;;  %13106 = vrot.lane.b32.xlu0 %v13105_v22, %s13382_s26  ;;  %v7899_v9 = vld [vmem:[#allocation3 + $0x11] sm:$0xff]  ;;  %v17095_v34 = vpop.permute.xlu0 %13046 }
 0x3cc   :  { %v7749_v54 = vsel %vm7689_vm15, %v7337_v19, %v16990_v27  ;;  %v7343_v5 = vmax.f32 %v7341_v0, %v17024_v56  ;;  %v8416_v51 = vsel %vm3352_vm2, %v7901_v2, %v13028_v11  ;;  %v8367_v50 = vsel %vm3352_vm2, %v7838_v31, %v13034_v18  ;;  %v7900_v27 = vld [vmem:[#allocation3 + $0x21] sm:$0xff]  ;;  %v7840_v19 = vld [vmem:[#allocation3 + $0x50] sm:$0xff] }
 0x3cd   :  { %v8366_v46 = vsel %vm3352_vm2, %v7837_v25, %v13033_v24  ;;  %v7344_v60 = vsel %vm3352_vm2, %v6290_v55, -inf  ;;  %vm18982_vm0 = vcmask 1045509   ;;  %vm8397_vm4 = vcmask 785408   ;;  %v7839_v55 = vld [vmem:[#allocation3 + $0x40] sm:$0xff] }
 0x3ce   :  { %v7750_v33 = vsel %vm18982_vm0, %v7340_v13, %v7749_v54  ;;  %v8414_v39 = vsel %vm3352_vm2, %v7899_v9, %v12998_v43  ;;  %v7346_v56 = vmax.f32 %v7344_v60, %v17027_v52  ;;  %vm18983_vm14 = vcmask 1046534   ;;  %v13072_v4 = vpop.permute.xlu1 %13071  ;;  %vm18986_vm8 = vmmov %vm18982_vm0 }
 0x3cf   :  { %v7751_v42 = vsel %vm18983_vm14, %v7343_v5, %v7750_v33  ;;  %v8415_v20 = vsel %vm3352_vm2, %v7900_v27, %v12999_v15  ;;  %v8430_v30 = vsel %vm8380_vm10, %v8414_v39, %v13008_v61  ;;  %v8398_v43 = vsel %vm8397_vm4, %v8381_v35, %v13023_v23  ;;  %vm18987_vm9 = vmmov %vm18983_vm14 }
 0x3d0   :  { %v8431_v63 = vsel %vm8380_vm10, %v8415_v20, %v13009_v49  ;;  %v8446_v22 = vsel %vm8397_vm4, %v8430_v30, %v13018_v29  ;;  %v8399_v52 = vsel %vm8397_vm4, %v8382_v16, %v13024_v10  ;;  %vm18984_vm1 = vcmask 1047559   ;;  %vm18990_vm3 = vmmov %vm18982_vm0 }
 0x3d1   :  { %v7752_v8 = vsel %vm18984_vm1, %v7346_v56, %v7751_v42  ;;  %v8447_v45 = vsel %vm8397_vm4, %v8431_v63, %v13019_v32  ;;  %v8462_v3 = vpack.c.bf16 %v8399_v52, %v8398_v43  ;;  %v13044_v15 = vunpack.i.h.bf16 %v17031_v41  ;;  %vm18988_vm6 = vmmov %vm18984_vm1 }
 0x3d2   :  { %7827 = vst.msk [vmem:[#allocation3 + $0xb1] sm:$0xff] %vm3352_vm2, %v7752_v8  ;;  %v8463_v61 = vpack.c.bf16 %v8447_v45, %v8446_v22  ;;  %v13043_v53 = vunpack.i.l.bf16 %v17031_v41  ;;  %v13054_v49 = vunpack.i.h.bf16 %v17052_v37  ;;  %v13053_v29 = vunpack.i.l.bf16 %v17052_v37  ;;  %vm18991_vm0 = vmmov %vm18987_vm9 }
 0x3d3   :  { %v17098_v16 = vsel %vm8380_vm10, %v8367_v50, %v13044_v15  ;;  %v13039_v35 = vunpack.i.h.bf16 %v13037_v47  ;;  %v13038_v10 = vunpack.i.l.bf16 %v13037_v47  ;;  %v13064_v32 = vunpack.i.h.bf16 %v13062_v57  ;;  %vm18992_vm14 = vmmov %vm18984_vm1 }
 0x3d4   :  { %8693 = vmatprep.mubr.bf16.mxu1 %v8463_v61  ;;  %v17101_v23 = vsel %vm8380_vm10, %v8366_v46, %v13043_v53  ;;  %v13063_v12 = vunpack.i.l.bf16 %v13062_v57  ;;  %v3764_v41 = vadd.f32 %v16905_v17, %v16681_v26  ;;  %v3756_v11 = vadd.f32 %v16905_v17, %v16743_v6  ;;  %vm18993_vm1 = vmmov %vm18985_vm5 }
 0x3d5   :  { %8694 = vmatmul.mubr.bf16.vlgmr.msra.gmra.mrb[0].mxu1 %v8462_v3  ;;  %v17108_v18 = vsel %vm8380_vm10, %v8416_v51, %v13038_v10  ;;  %v17111_v24 = vsel %vm8380_vm10, %v8417_v28, %v13039_v35  ;;  %v8369_v13 = vsel %vm3352_vm2, %v7840_v19, %v13064_v32  ;;  %v13049_v0 = vunpack.i.h.bf16 %v17095_v34 }
 0x3d6   :  { %v8368_v54 = vsel %vm3352_vm2, %v7839_v55, %v13063_v12  ;;  %v3904_v2 = vmax.f32 %v3764_v41, 0.0  ;;  %v3902_v26 = vmax.f32 %v3756_v11, 0.0  ;;  %v13048_v25 = vunpack.i.l.bf16 %v17095_v34 }
 0x3d7   :  { %v3767_v6 = vadd.f32 %v16905_v17, %v16745_v62  ;;  %v3759_v31 = vadd.f32 %v16905_v17, %v16751_v14  ;;  %v13074_v47 = vunpack.i.h.bf16 %v13072_v4  ;;  %v13073_v28 = vunpack.i.l.bf16 %v13072_v4 }
 0x3d8   :  { %v4640_v5 = vcombine.high %v3904_v2, %v3904_v2  ;;  %v4647_v51 = vrot.slane %v3904_v2, %v14922_v36  ;;  %v4606_v50 = vcombine.high %v3902_v26, %v3902_v26  ;;  %v4613_v46 = vrot.slane %v3902_v26, %v14922_v36 }
 0x3d9   :  { %v17123_v9 = vmax.f32 %v3767_v6, 0.0  ;;  %v17125_v60 = vmax.f32 %v3759_v31, 0.0  ;;  %v17128_v33 = vsel %vm8380_vm10, %v8368_v54, %v13073_v28  ;;  %v17131_v62 = vsel %vm8380_vm10, %v8369_v13, %v13074_v47 }
 0x3da   :  { %v4654_v14 = vrot.slane %v4640_v5, %v14922_v36  ;;  %v4655_v27 = vcombine.high %v4647_v51, %v4647_v51  ;;  %v6403_v39 = vsel %vm5338_vm11, %v4647_v51, -inf  ;;  %v4620_v57 = vrot.slane %v4606_v50, %v14922_v36 }
 0x3db   :  { %v6404_v56 = vrot.slane %v6403_v39, 4  ;;  %v4621_v42 = vcombine.high %v4613_v46, %v4613_v46  ;;  %v6347_v20 = vsel %vm5338_vm11, %v4613_v46, -inf  ;;  %v4657_v30 = vcombine.high %v17123_v9, %v17123_v9 }
 0x3dc   :  { %v4656_v63 = vcombine.high %v4654_v14, %v4654_v14  ;;  %v6410_v22 = vsel %vm5338_vm11, %v4655_v27, -inf  ;;  %v6417_v43 = vsel %vm5338_vm11, %v4654_v14, -inf  ;;  %v4622_v52 = vcombine.high %v4620_v57, %v4620_v57 }
 0x3dd   :  { %v6405_v8 = vmax.f32 %v6403_v39, %v6404_v56  ;;  %v6411_v45 = vrot.slane %v6410_v22, 4  ;;  %v6418_v3 = vrot.slane %v6417_v43, 4  ;;  %v6348_v15 = vrot.slane %v6347_v20, 4 }
 0x3de   :  { %v6424_v61 = vsel %vm5338_vm11, %v4656_v63, -inf  ;;  %v6354_v53 = vsel %vm5338_vm11, %v4621_v42, -inf  ;;  %v6361_v35 = vsel %vm5338_vm11, %v4620_v57, -inf  ;;  %v6368_v10 = vsel %vm5338_vm11, %v4622_v52, -inf }
 0x3df   :  { %v6406_v32 = vrot.slane %v6405_v8, 2  ;;  %v6412_v19 = vmax.f32 %v6410_v22, %v6411_v45  ;;  %v6419_v12 = vmax.f32 %v6417_v43, %v6418_v3  ;;  %v6425_v41 = vrot.slane %v6424_v61, 4 }
 0x3e0   :  { %v6349_v11 = vmax.f32 %v6347_v20, %v6348_v15  ;;  %v6355_v4 = vrot.slane %v6354_v53, 4  ;;  %v6362_v55 = vrot.slane %v6361_v35, 4  ;;  %v6369_v13 = vrot.slane %v6368_v10, 4 }
 0x3e1   :  { %v6407_v54 = vmax.f32 %v6405_v8, %v6406_v32  ;;  %v6413_v2 = vrot.slane %v6412_v19, 2  ;;  %v6420_v26 = vrot.slane %v6419_v12, 2  ;;  %v6426_v6 = vmax.f32 %v6424_v61, %v6425_v41 }
 0x3e2   :  { %v6350_v31 = vrot.slane %v6349_v11, 2  ;;  %v6356_v47 = vmax.f32 %v6354_v53, %v6355_v4  ;;  %v6363_v28 = vmax.f32 %v6361_v35, %v6362_v55  ;;  %v6370_v5 = vmax.f32 %v6368_v10, %v6369_v13 }
 0x3e3   :  { %v6408_v51 = vrot.slane %v6407_v54, 1  ;;  %v6414_v50 = vmax.f32 %v6412_v19, %v6413_v2  ;;  %v6421_v46 = vmax.f32 %v6419_v12, %v6420_v26  ;;  %v6427_v14 = vrot.slane %v6426_v6, 2  ;;  %v17146_v12 = vpop.f32.mrb[48].mxu0 }
 0x3e4   :  { %v6351_v27 = vmax.f32 %v6349_v11, %v6350_v31  ;;  %v6357_v39 = vrot.slane %v6356_v47, 2  ;;  %v6364_v57 = vrot.slane %v6363_v28, 2  ;;  %v6371_v56 = vrot.slane %v6370_v5, 2 }
 0x3e5   :  { %v6409_v42 = vmax.f32 %v6407_v54, %v6408_v51  ;;  %v6415_v20 = vrot.slane %v6414_v50, 1  ;;  %v6422_v63 = vrot.slane %v6421_v46, 1  ;;  %v6428_v22 = vmax.f32 %v6426_v6, %v6427_v14 }
 0x3e6   :  { %v6352_v43 = vrot.slane %v6351_v27, 1  ;;  %v6358_v52 = vmax.f32 %v6356_v47, %v6357_v39  ;;  %v6365_v8 = vmax.f32 %v6363_v28, %v6364_v57  ;;  %v6372_v45 = vmax.f32 %v6370_v5, %v6371_v56 }
 0x3e7   :  { %v6416_v3 = vmax.f32 %v6414_v50, %v6415_v20  ;;  %v6423_v15 = vmax.f32 %v6421_v46, %v6422_v63  ;;  %v6429_v61 = vrot.slane %v6428_v22, 1  ;;  %v7348_v53 = vsel %vm3352_vm2, %v6409_v42, -inf }
 0x3e8   :  { %v6353_v35 = vmax.f32 %v6351_v27, %v6352_v43  ;;  %v6359_v10 = vrot.slane %v6358_v52, 1  ;;  %v6366_v32 = vrot.slane %v6365_v8, 1  ;;  %v6373_v19 = vrot.slane %v6372_v45, 1 }
 0x3e9   :  { %v6430_v41 = vmax.f32 %v6428_v22, %v6429_v61  ;;  %v7351_v11 = vsel %vm3352_vm2, %v6416_v3, -inf  ;;  %v7354_v4 = vsel %vm3352_vm2, %v6423_v15, -inf  ;;  %v4664_v55 = vrot.slane %v17123_v9, %v14922_v36 }
 0x3ea   :  { %v6360_v13 = vmax.f32 %v6358_v52, %v6359_v10  ;;  %v6367_v54 = vmax.f32 %v6365_v8, %v6366_v32  ;;  %v6374_v2 = vmax.f32 %v6372_v45, %v6373_v19  ;;  %v7347_v26 = vsel %vm3352_vm2, %v6353_v35, -inf }
 0x3eb   :  { %v7357_v6 = vsel %vm3352_vm2, %v6430_v41, -inf  ;;  %v7349_v31 = vmax.f32 %v7347_v26, %v7348_v53  ;;  %v4671_v47 = vrot.slane %v4657_v30, %v14922_v36  ;;  %v4672_v28 = vcombine.high %v4664_v55, %v4664_v55 }
 0x3ec   :  { %v7350_v5 = vsel %vm3352_vm2, %v6360_v13, -inf  ;;  %v7353_v51 = vsel %vm3352_vm2, %v6367_v54, -inf  ;;  %v7356_v50 = vsel %vm3352_vm2, %v6374_v2, -inf  ;;  %v6431_v46 = vsel %vm5338_vm11, %v4664_v55, -inf }
 0x3ed   :  { %v7352_v14 = vmax.f32 %v7350_v5, %v7351_v11  ;;  %v7355_v27 = vmax.f32 %v7353_v51, %v7354_v4  ;;  %v7358_v39 = vmax.f32 %v7356_v50, %v7357_v6  ;;  %v4673_v57 = vcombine.high %v4671_v47, %v4671_v47 }
 0x3ee   :  { %v6432_v56 = vrot.slane %v6431_v46, 4  ;;  %v6438_v42 = vsel %vm5338_vm11, %v4672_v28, -inf  ;;  %v6445_v20 = vsel %vm5338_vm11, %v4671_v47, -inf  ;;  %v4623_v9 = vcombine.high %v17125_v60, %v17125_v60 }
 0x3ef   :  { %v7753_v30 = vsel %vm7683_vm12, %v7352_v14, %v7349_v31  ;;  %v6439_v63 = vrot.slane %v6438_v42, 4  ;;  %v6446_v22 = vrot.slane %v6445_v20, 4  ;;  %v6452_v43 = vsel %vm5338_vm11, %v4673_v57, -inf }
 0x3f0   :  { %v7754_v52 = vsel %vm7685_vm13, %v7355_v27, %v7753_v30  ;;  %v6433_v8 = vmax.f32 %v6431_v46, %v6432_v56  ;;  %v6453_v45 = vrot.slane %v6452_v43, 4  ;;  %v4630_v3 = vrot.slane %v17125_v60, %v14922_v36  ;;  %v17179_v30 = vpop.f32.mrb[49].mxu0 }
 0x3f1   :  { %v6440_v15 = vmax.f32 %v6438_v42, %v6439_v63  ;;  %v6447_v61 = vmax.f32 %v6445_v20, %v6446_v22  ;;  %v4637_v53 = vrot.slane %v4623_v9, %v14922_v36  ;;  %v17173_v35 = vsel %vm18985_vm5, %v7358_v39, %v7754_v52  ;;  %vm18994_vm5 = vmmov %vm18990_vm3 }
 0x3f2   :  { %v6434_v10 = vrot.slane %v6433_v8, 2  ;;  %v6454_v32 = vmax.f32 %v6452_v43, %v6453_v45  ;;  %v4638_v19 = vcombine.high %v4630_v3, %v4630_v3  ;;  %v6375_v41 = vsel %vm5338_vm11, %v4630_v3, -inf }
 0x3f3   :  { %v6441_v11 = vrot.slane %v6440_v15, 2  ;;  %v6448_v4 = vrot.slane %v6447_v61, 2  ;;  %v4639_v55 = vcombine.high %v4637_v53, %v4637_v53  ;;  %v6376_v13 = vrot.slane %v6375_v41, 4 }
 0x3f4   :  { %v6435_v54 = vmax.f32 %v6433_v8, %v6434_v10  ;;  %v6455_v2 = vrot.slane %v6454_v32, 2  ;;  %v6382_v60 = vsel %vm5338_vm11, %v4638_v19, -inf  ;;  %v6389_v26 = vsel %vm5338_vm11, %v4637_v53, -inf }
 0x3f5   :  { %v6442_v6 = vmax.f32 %v6440_v15, %v6441_v11  ;;  %v6449_v31 = vmax.f32 %v6447_v61, %v6448_v4  ;;  %v6377_v47 = vmax.f32 %v6375_v41, %v6376_v13  ;;  %v6383_v28 = vrot.slane %v6382_v60, 4  ;;  %v7860_v13 = vld [vmem:[#allocation3 + $0xb1] sm:$0xff] }
 0x3f6   :  { %v6436_v5 = vrot.slane %v6435_v54, 1  ;;  %v6456_v51 = vmax.f32 %v6454_v32, %v6455_v2  ;;  %v6390_v50 = vrot.slane %v6389_v26, 4  ;;  %v6396_v46 = vsel %vm5338_vm11, %v4639_v55, -inf  ;;  %v7859_v55 = vld [vmem:[#allocation3 + $0xa1] sm:$0xff] }
 0x3f7   :  { %v6443_v14 = vrot.slane %v6442_v6, 1  ;;  %v6450_v27 = vrot.slane %v6449_v31, 1  ;;  %v6378_v39 = vrot.slane %v6377_v47, 2  ;;  %v6384_v57 = vmax.f32 %v6382_v60, %v6383_v28 }
 0x3f8   :  { %v6437_v56 = vmax.f32 %v6435_v54, %v6436_v5  ;;  %v6457_v42 = vrot.slane %v6456_v51, 1  ;;  %v6391_v20 = vmax.f32 %v6389_v26, %v6390_v50  ;;  %v6397_v9 = vrot.slane %v6396_v46, 4  ;;  %v13057_v5 = vpop.permute.xlu0 %13056 }
 0x3f9   :  { %v6444_v63 = vmax.f32 %v6442_v6, %v6443_v14  ;;  %v6451_v22 = vmax.f32 %v6449_v31, %v6450_v27  ;;  %v6379_v43 = vmax.f32 %v6377_v47, %v6378_v39  ;;  %v6385_v52 = vrot.slane %v6384_v57, 2  ;;  %v7875_v6 = vld [vmem:[#allocation3 + $0xa2] sm:$0xff]  ;;  %v17197_v31 = vld [vmem:[#allocation3 + $0xb2] sm:$0xff]  ;;  %v17199_v47 = vpop.f32.mrb[50].mxu0 }
 0x3fa   :  { %v6458_v8 = vmax.f32 %v6456_v51, %v6457_v42  ;;  %v7360_v45 = vsel %vm3352_vm2, %v6437_v56, -inf  ;;  %v6392_v3 = vrot.slane %v6391_v20, 2  ;;  %v6398_v15 = vmax.f32 %v6396_v46, %v6397_v9  ;;  %v7903_v9 = vld [vmem:[#allocation3 + $0x51] sm:$0xff] }
 0x3fb   :  { %v7363_v61 = vsel %vm3352_vm2, %v6444_v63, -inf  ;;  %v7366_v53 = vsel %vm3352_vm2, %v6451_v22, -inf  ;;  %v6380_v10 = vrot.slane %v6379_v43, 1  ;;  %v6386_v32 = vmax.f32 %v6384_v57, %v6385_v52  ;;  %v7904_v63 = vld [vmem:[#allocation3 + $0x61] sm:$0xff] }
 0x3fc   :  { %v7369_v19 = vsel %vm3352_vm2, %v6458_v8, -inf  ;;  %v6393_v41 = vmax.f32 %v6391_v20, %v6392_v3  ;;  %v6399_v11 = vrot.slane %v6398_v15, 2  ;;  %v8448_v4 = vsel %vm8397_vm4, %v17108_v18, %v13048_v25 }
 0x3fd   :  { %v6381_v54 = vmax.f32 %v6379_v43, %v6380_v10  ;;  %v6387_v2 = vrot.slane %v6386_v32, 1  ;;  %v8449_v60 = vsel %vm8397_vm4, %v17111_v24, %v13049_v0  ;;  %v8400_v26 = vsel %vm8397_vm4, %v17101_v23, %v13053_v29  ;;  %v17205_v24 = vpop.permute.xlu1 %13081 }
 0x3fe   :  { %v6394_v18 = vrot.slane %v6393_v41, 1  ;;  %v6400_v25 = vmax.f32 %v6398_v15, %v6399_v11  ;;  %v8466_v28 = vpack.c.bf16 %v8449_v60, %v8448_v4  ;;  %v8401_v34 = vsel %vm8397_vm4, %v17098_v16, %v13054_v49 }
 0x3ff   :  { %v6388_v0 = vmax.f32 %v6386_v32, %v6387_v2  ;;  %v7359_v51 = vsel %vm3352_vm2, %v6381_v54, -inf  ;;  %v8465_v29 = vpack.c.bf16 %v8401_v34, %v8400_v26  ;;  %v13120_v23 = vpack.i.bf16 %v7860_v13, %v7859_v55 }
 0x400   :  { %v6395_v50 = vmax.f32 %v6393_v41, %v6394_v18  ;;  %v6401_v46 = vrot.slane %v6400_v25, 1  ;;  %v7361_v14 = vmax.f32 %v7359_v51, %v7360_v45  ;;  %8701 = vmatprep.mubr.bf16.mxu1 %v8466_v28  ;;  %v13130_v27 = vpack.i.bf16 %v17197_v31, %v7875_v6  ;;  %v17222_v45 = vpop.permute.xlu0 %13066  ;;  %v17259_v51 = vpop.f32.mrb[51].mxu0 }
 0x401   :  { %v7362_v39 = vsel %vm3352_vm2, %v6388_v0, -inf  ;;  %8702 = vmatmul.mubr.bf16.gmra.mrb[4].mxu1 %v8465_v29  ;;  %13121 = vrot.lane.b32.xlu1 %v13120_v23, %s13379_s1  ;;  %v13059_v37 = vunpack.i.h.bf16 %v13057_v5  ;;  %v13058_v49 = vunpack.i.l.bf16 %v13057_v5  ;;  %v13084_v16 = vunpack.i.h.bf16 %v17205_v24 }
 0x402   :  { %v6402_v57 = vmax.f32 %v6400_v25, %v6401_v46  ;;  %v7364_v56 = vmax.f32 %v7362_v39, %v7363_v61  ;;  %v7365_v42 = vsel %vm3352_vm2, %v6395_v50, -inf  ;;  %v7756_v20 = vsel %vm7689_vm15, %v7361_v14, %v17173_v35 }
 0x403   :  { %v7367_v22 = vmax.f32 %v7365_v42, %v7366_v53  ;;  %v17216_v43 = vsel %vm3352_vm2, %v7904_v63, %v13059_v37  ;;  %v17219_v52 = vsel %vm3352_vm2, %v7903_v9, %v13058_v49  ;;  %v13083_v8 = vunpack.i.l.bf16 %v17205_v24  ;;  %v17230_v53 = vpop.permute.xlu1 %13091 }
 0x404   :  { %v7368_v3 = vsel %vm3352_vm2, %v6402_v57, -inf  ;;  %v7757_v15 = vsel %vm18986_vm8, %v7364_v56, %v7756_v20  ;;  %v3780_v35 = vadd.f32 %v16905_v17, %v16832_v40  ;;  %v3772_v61 = vadd.f32 %v16905_v17, %v16914_v38  ;;  %vm18995_vm8 = vmmov %vm18991_vm0 }
 0x405   :  { %v7370_v10 = vmax.f32 %v7368_v3, %v7369_v19  ;;  %v7758_v32 = vsel %vm18987_vm9, %v7367_v22, %v7757_v15  ;;  %13131 = vrot.lane.b32.xlu1 %v13130_v27, %s13381_s24  ;;  %v3783_v41 = vadd.f32 %v16905_v17, %v16941_v44  ;;  %v3775_v11 = vadd.f32 %v16905_v17, %v16949_v7  ;;  %vm18996_vm9 = vmmov %vm18988_vm6 }
 0x406   :  { %v3908_v4 = vmax.f32 %v3780_v35, 0.0  ;;  %v3906_v55 = vmax.f32 %v3772_v61, 0.0  ;;  %v13069_v40 = vunpack.i.h.bf16 %v17222_v45  ;;  %v13068_v13 = vunpack.i.l.bf16 %v17222_v45 }
 0x407   :  { %v7759_v38 = vsel %vm18988_vm6, %v7370_v10, %v7758_v32  ;;  %v3909_v54 = vmax.f32 %v3783_v41, 0.0  ;;  %v17241_v19 = vmax.f32 %v3775_v11, 0.0  ;;  %v13094_v2 = vunpack.i.h.bf16 %v17230_v53  ;;  %vm18997_vm6 = vmmov %vm18993_vm1 }
 0x408   :  { %7828 = vst.msk [vmem:[#allocation3 + $0xc1] sm:$0xff] %vm3352_vm2, %v7759_v38  ;;  %v4708_v60 = vcombine.high %v3908_v4, %v3908_v4  ;;  %v4715_v44 = vrot.slane %v3908_v4, %v14922_v36  ;;  %v4674_v26 = vcombine.high %v3906_v55, %v3906_v55  ;;  %v4681_v17 = vrot.slane %v3906_v55, %v14922_v36 }
 0x409   :  { %v4725_v7 = vcombine.high %v3909_v54, %v3909_v54  ;;  %v17248_v6 = vrot.slane %v3909_v54, %v14922_v36  ;;  %v4691_v18 = vcombine.high %v17241_v19, %v17241_v19  ;;  %v17254_v25 = vrot.slane %v17241_v19, %v14922_v36 }
 0x40a   :  { %v4722_v28 = vrot.slane %v4708_v60, %v14922_v36  ;;  %v4723_v34 = vcombine.high %v4715_v44, %v4715_v44  ;;  %v6515_v5 = vsel %vm5338_vm11, %v4715_v44, -inf  ;;  %v4688_v0 = vrot.slane %v4674_v26, %v14922_v36 }
 0x40b   :  { %v6516_v29 = vrot.slane %v6515_v5, 4  ;;  %v4689_v23 = vcombine.high %v4681_v17, %v4681_v17  ;;  %v6459_v50 = vsel %vm5338_vm11, %v4681_v17, -inf  ;;  %v17263_v46 = vrot.slane %v4725_v7, %v14922_v36 }
 0x40c   :  { %v4724_v14 = vcombine.high %v4722_v28, %v4722_v28  ;;  %v6522_v27 = vsel %vm5338_vm11, %v4723_v34, -inf  ;;  %v6529_v39 = vsel %vm5338_vm11, %v4722_v28, -inf  ;;  %v4690_v37 = vcombine.high %v4688_v0, %v4688_v0 }
 0x40d   :  { %v6517_v49 = vmax.f32 %v6515_v5, %v6516_v29  ;;  %v6523_v57 = vrot.slane %v6522_v27, 4  ;;  %v6530_v56 = vrot.slane %v6529_v39, 4  ;;  %v6460_v42 = vrot.slane %v6459_v50, 4 }
 0x40e   :  { %v6536_v20 = vsel %vm5338_vm11, %v4724_v14, -inf  ;;  %v6466_v9 = vsel %vm5338_vm11, %v4689_v23, -inf  ;;  %v6473_v63 = vsel %vm5338_vm11, %v4688_v0, -inf  ;;  %v6480_v22 = vsel %vm5338_vm11, %v4690_v37, -inf }
 0x40f   :  { %v6518_v3 = vrot.slane %v6517_v49, 2  ;;  %v6524_v15 = vmax.f32 %v6522_v27, %v6523_v57  ;;  %v6531_v35 = vmax.f32 %v6529_v39, %v6530_v56  ;;  %v6537_v61 = vrot.slane %v6536_v20, 4 }
 0x410   :  { %v6461_v10 = vmax.f32 %v6459_v50, %v6460_v42  ;;  %v6467_v32 = vrot.slane %v6466_v9, 4  ;;  %v6474_v41 = vrot.slane %v6473_v63, 4  ;;  %v6481_v11 = vrot.slane %v6480_v22, 4 }
 0x411   :  { %v6519_v4 = vmax.f32 %v6517_v49, %v6518_v3  ;;  %v6525_v55 = vrot.slane %v6524_v15, 2  ;;  %v6532_v38 = vrot.slane %v6531_v35, 2  ;;  %v6538_v54 = vmax.f32 %v6536_v20, %v6537_v61 }
 0x412   :  { %v6462_v60 = vrot.slane %v6461_v10, 2  ;;  %v6468_v44 = vmax.f32 %v6466_v9, %v6467_v32  ;;  %v6475_v26 = vmax.f32 %v6473_v63, %v6474_v41  ;;  %v6482_v17 = vmax.f32 %v6480_v22, %v6481_v11 }
 0x413   :  { %v6520_v7 = vrot.slane %v6519_v4, 1  ;;  %v6526_v28 = vmax.f32 %v6524_v15, %v6525_v55  ;;  %v6533_v34 = vmax.f32 %v6531_v35, %v6532_v38  ;;  %v6539_v5 = vrot.slane %v6538_v54, 2 }
 0x414   :  { %v6463_v0 = vmax.f32 %v6461_v10, %v6462_v60  ;;  %v6469_v29 = vrot.slane %v6468_v44, 2  ;;  %v6476_v23 = vrot.slane %v6475_v26, 2  ;;  %v6483_v14 = vrot.slane %v6482_v17, 2 }
 0x415   :  { %v6521_v50 = vmax.f32 %v6519_v4, %v6520_v7  ;;  %v6527_v27 = vrot.slane %v6526_v28, 1  ;;  %v6534_v39 = vrot.slane %v6533_v34, 1  ;;  %v6540_v37 = vmax.f32 %v6538_v54, %v6539_v5 }
 0x416   :  { %v6464_v49 = vrot.slane %v6463_v0, 1  ;;  %v6470_v57 = vmax.f32 %v6468_v44, %v6469_v29  ;;  %v6477_v56 = vmax.f32 %v6475_v26, %v6476_v23  ;;  %v6484_v42 = vmax.f32 %v6482_v17, %v6483_v14 }
 0x417   :  { %v6528_v20 = vmax.f32 %v6526_v28, %v6527_v27  ;;  %v6535_v9 = vmax.f32 %v6533_v34, %v6534_v39  ;;  %v6541_v63 = vrot.slane %v6540_v37, 1  ;;  %v7372_v22 = vsel %vm3352_vm2, %v6521_v50, -inf }
 0x418   :  { %v6465_v3 = vmax.f32 %v6463_v0, %v6464_v49  ;;  %v6471_v15 = vrot.slane %v6470_v57, 1  ;;  %v6478_v35 = vrot.slane %v6477_v56, 1  ;;  %v6485_v61 = vrot.slane %v6484_v42, 1 }
 0x419   :  { %v6542_v10 = vmax.f32 %v6540_v37, %v6541_v63  ;;  %v7375_v32 = vsel %vm3352_vm2, %v6528_v20, -inf  ;;  %v7378_v41 = vsel %vm3352_vm2, %v6535_v9, -inf  ;;  %v4740_v11 = vcombine.high %v17248_v6, %v17248_v6 }
 0x41a   :  { %v6472_v4 = vmax.f32 %v6470_v57, %v6471_v15  ;;  %v6479_v55 = vmax.f32 %v6477_v56, %v6478_v35  ;;  %v6486_v38 = vmax.f32 %v6484_v42, %v6485_v61  ;;  %v7371_v54 = vsel %vm3352_vm2, %v6465_v3, -inf }
 0x41b   :  { %v17278_v60 = vsel %vm3352_vm2, %v6542_v10, -inf  ;;  %v7373_v44 = vmax.f32 %v7371_v54, %v7372_v22  ;;  %v4741_v26 = vcombine.high %v17263_v46, %v17263_v46  ;;  %v6543_v17 = vsel %vm5338_vm11, %v17248_v6, -inf }
 0x41c   :  { %v7374_v7 = vsel %vm3352_vm2, %v6472_v4, -inf  ;;  %v7377_v28 = vsel %vm3352_vm2, %v6479_v55, -inf  ;;  %v17287_v34 = vsel %vm3352_vm2, %v6486_v38, -inf  ;;  %v6544_v5 = vrot.slane %v6543_v17, 4 }
 0x41d   :  { %v7376_v0 = vmax.f32 %v7374_v7, %v7375_v32  ;;  %v7379_v29 = vmax.f32 %v7377_v28, %v7378_v41  ;;  %v7382_v23 = vmax.f32 %v17287_v34, %v17278_v60  ;;  %v6550_v14 = vsel %vm5338_vm11, %v4740_v11, -inf }
 0x41e   :  { %v6545_v50 = vmax.f32 %v6543_v17, %v6544_v5  ;;  %v6551_v27 = vrot.slane %v6550_v14, 4  ;;  %v6557_v6 = vsel %vm5338_vm11, %v17263_v46, -inf  ;;  %v6564_v39 = vsel %vm5338_vm11, %v4741_v26, -inf }
 0x41f   :  { %v7760_v37 = vsel %vm7683_vm12, %v7376_v0, %v7373_v44  ;;  %v6558_v49 = vrot.slane %v6557_v6, 4  ;;  %v6565_v57 = vrot.slane %v6564_v39, 4  ;;  %v4705_v56 = vrot.slane %v4691_v18, %v14922_v36 }
 0x420   :  { %v7761_v42 = vsel %vm7685_vm13, %v7379_v29, %v7760_v37  ;;  %v6546_v20 = vrot.slane %v6545_v50, 2  ;;  %v6552_v9 = vmax.f32 %v6550_v14, %v6551_v27  ;;  %v4706_v63 = vcombine.high %v17254_v25, %v17254_v25 }
 0x421   :  { %v6559_v22 = vmax.f32 %v6557_v6, %v6558_v49  ;;  %v6566_v46 = vmax.f32 %v6564_v39, %v6565_v57  ;;  %v4707_v3 = vcombine.high %v4705_v56, %v4705_v56  ;;  %v6487_v15 = vsel %vm5338_vm11, %v17254_v25, -inf  ;;  %v17308_v5 = vpop.f32.mrb[52].mxu0 }
 0x422   :  { %v6547_v35 = vmax.f32 %v6545_v50, %v6546_v20  ;;  %v6553_v61 = vrot.slane %v6552_v9, 2  ;;  %v6488_v10 = vrot.slane %v6487_v15, 4  ;;  %v6494_v32 = vsel %vm5338_vm11, %v4706_v63, -inf  ;;  %v17310_v27 = vpop.f32.mrb[53].mxu0  ;;  %v17313_v63 = vld [vmem:[#allocation3 + $0xc2] sm:$0xff] }
 0x423   :  { %v6560_v19 = vrot.slane %v6559_v22, 2  ;;  %v6567_v18 = vrot.slane %v6566_v46, 2  ;;  %v6495_v41 = vrot.slane %v6494_v32, 4  ;;  %v6501_v11 = vsel %vm5338_vm11, %v4705_v56, -inf }
 0x424   :  { %v6548_v4 = vrot.slane %v6547_v35, 1  ;;  %v6554_v55 = vmax.f32 %v6552_v9, %v6553_v61  ;;  %v6489_v38 = vmax.f32 %v6487_v15, %v6488_v10  ;;  %v6502_v54 = vrot.slane %v6501_v11, 4 }
 0x425   :  { %v6561_v60 = vmax.f32 %v6559_v22, %v6560_v19  ;;  %v6568_v44 = vmax.f32 %v6566_v46, %v6567_v18  ;;  %v6496_v26 = vmax.f32 %v6494_v32, %v6495_v41  ;;  %v6508_v17 = vsel %vm5338_vm11, %v4707_v3, -inf  ;;  %v17315_v22 = vld [vmem:[#allocation3 + $0xc0] sm:$0xff]  ;;  %v7891_v18 = vld [vmem:[#allocation3 + $0xb0] sm:$0xff] }
 0x426   :  { %v6549_v25 = vmax.f32 %v6547_v35, %v6548_v4  ;;  %v6555_v7 = vrot.slane %v6554_v55, 1  ;;  %v6490_v28 = vrot.slane %v6489_v38, 2  ;;  %v6503_v34 = vmax.f32 %v6501_v11, %v6502_v54 }
 0x427   :  { %v6562_v0 = vrot.slane %v6561_v60, 1  ;;  %v6569_v29 = vrot.slane %v6568_v44, 1  ;;  %v6497_v14 = vrot.slane %v6496_v26, 2  ;;  %v6509_v50 = vrot.slane %v6508_v17, 4 }
 0x428   :  { %v6556_v6 = vmax.f32 %v6554_v55, %v6555_v7  ;;  %v7384_v39 = vsel %vm3352_vm2, %v6549_v25, -inf  ;;  %v6491_v37 = vmax.f32 %v6489_v38, %v6490_v28  ;;  %v6504_v49 = vrot.slane %v6503_v34, 2  ;;  %v17324_v38 = vpop.f32.mrb[54].mxu0  ;;  %v17351_v25 = vld [vmem:[%s18842_s2] ss:$0 sm:$0xff]  ;;  %v17355_v28 = vpop.permute.xlu0 %13076 }
 0x429   :  { %v6563_v57 = vmax.f32 %v6561_v60, %v6562_v0  ;;  %v6570_v56 = vmax.f32 %v6568_v44, %v6569_v29  ;;  %v6498_v20 = vmax.f32 %v6496_v26, %v6497_v14  ;;  %v6510_v9 = vmax.f32 %v6508_v17, %v6509_v50  ;;  %v7842_v44 = vld [vmem:[#allocation3 + $0x70] sm:$0xff] }
 0x42a   :  { %v7387_v46 = vsel %vm3352_vm2, %v6556_v6, -inf  ;;  %v6492_v3 = vrot.slane %v6491_v37, 1  ;;  %v6505_v15 = vmax.f32 %v6503_v34, %v6504_v49  ;;  %v7762_v35 = vsel %vm18989_vm7, %v7382_v23, %v7761_v42  ;;  %vm18998_vm7 = vmmov %vm18990_vm3 }
 0x42b   :  { %v7390_v61 = vsel %vm3352_vm2, %v6563_v57, -inf  ;;  %v7393_v10 = vsel %vm3352_vm2, %v6570_v56, -inf  ;;  %v6499_v32 = vrot.slane %v6498_v20, 1  ;;  %v6511_v19 = vrot.slane %v6510_v9, 2 }
 0x42c   :  { %v6493_v41 = vmax.f32 %v6491_v37, %v6492_v3  ;;  %v6506_v11 = vrot.slane %v6505_v15, 1  ;;  %v13115_v4 = vpack.i.bf16 %v17313_v63, %v17197_v31  ;;  %v13140_v55 = vpack.i.bf16 %v17315_v22, %v7891_v18 }
 0x42d   :  { %v6500_v54 = vmax.f32 %v6498_v20, %v6499_v32  ;;  %v6512_v60 = vmax.f32 %v6510_v9, %v6511_v19  ;;  %v17330_v23 = vsel %vm8380_vm10, %v17219_v52, %v13068_v13  ;;  %v17336_v42 = vsel %vm8380_vm10, %v17216_v43, %v13069_v40  ;;  %v7841_v40 = vld [vmem:[#allocation3 + $0x60] sm:$0xff] }
 0x42e   :  { %v6507_v31 = vmax.f32 %v6505_v15, %v6506_v11  ;;  %v7383_v26 = vsel %vm3352_vm2, %v6493_v41, -inf  ;;  %13116 = vrot.lane.b32.xlu0 %v13115_v4, %s13379_s1  ;;  %13141 = vrot.lane.b32.xlu1 %v13140_v55, %s13382_s26  ;;  %v17344_v17 = vsel %vm3352_vm2, %v7842_v44, %v13094_v2  ;;  %v13093_v52 = vunpack.i.l.bf16 %v17230_v53 }
 0x42f   :  { %v6513_v45 = vrot.slane %v6512_v60, 1  ;;  %v7385_v13 = vmax.f32 %v7383_v26, %v7384_v39  ;;  %v7386_v43 = vsel %vm3352_vm2, %v6500_v54, -inf  ;;  %v3796_v7 = vadd.f32 %v17351_v25, %v16992_v58  ;;  %v17364_v39 = vpop.permute.xlu1 %13101 }
 0x430   :  { %v7388_v34 = vmax.f32 %v7386_v43, %v7387_v46  ;;  %v7389_v2 = vsel %vm3352_vm2, %v6507_v31, -inf  ;;  %v17359_v53 = vsel %vm3352_vm2, %v7841_v40, %v13093_v52  ;;  %v3788_v0 = vadd.f32 %v17351_v25, %v17037_v21 }
 0x431   :  { %v6514_v29 = vmax.f32 %v6512_v60, %v6513_v45  ;;  %v7391_v14 = vmax.f32 %v7389_v2, %v7390_v61  ;;  %v7763_v50 = vsel %vm7689_vm15, %v7385_v13, %v7762_v35  ;;  %v3912_v6 = vmax.f32 %v3796_v7, 0.0 }
 0x432   :  { %v7764_v58 = vsel %vm18990_vm3, %v7388_v34, %v7763_v50  ;;  %v3910_v37 = vmax.f32 %v3788_v0, 0.0  ;;  %v13079_v49 = vunpack.i.h.bf16 %v17355_v28  ;;  %v13078_v57 = vunpack.i.l.bf16 %v17355_v28  ;;  %v17386_v34 = vpop.f32.mrb[55].mxu0  ;;  %vm18999_vm3 = vmmov %vm18991_vm0 }
 0x433   :  { %v7392_v56 = vsel %vm3352_vm2, %v6514_v29, -inf  ;;  %v7765_v20 = vsel %vm18991_vm0, %v7391_v14, %v7764_v58  ;;  %v4776_v9 = vcombine.high %v3912_v6, %v3912_v6  ;;  %v4783_v21 = vrot.slane %v3912_v6, %v14922_v36  ;;  %vm19000_vm0 = vmmov %vm18996_vm9 }
 0x434   :  { %v7394_v46 = vmax.f32 %v7392_v56, %v7393_v10  ;;  %v4742_v3 = vcombine.high %v3910_v37, %v3910_v37  ;;  %v4749_v15 = vrot.slane %v3910_v37, %v14922_v36  ;;  %v13104_v35 = vunpack.i.h.bf16 %v17364_v39 }
 0x435   :  { %v4790_v61 = vrot.slane %v4776_v9, %v14922_v36  ;;  %v4791_v32 = vcombine.high %v4783_v21, %v4783_v21  ;;  %v6627_v19 = vsel %vm5338_vm11, %v4783_v21, -inf  ;;  %v13103_v18 = vunpack.i.l.bf16 %v17364_v39 }
 0x436   :  { %v7766_v41 = vsel %vm18992_vm14, %v7394_v46, %v7765_v20  ;;  %v6628_v11 = vrot.slane %v6627_v19, 4  ;;  %v4756_v4 = vrot.slane %v4742_v3, %v14922_v36  ;;  %v4757_v55 = vcombine.high %v4749_v15, %v4749_v15  ;;  %vm19001_vm14 = vmmov %vm18993_vm1 }
 0x437   :  { %7829 = vst.msk [vmem:[#allocation3 + $0xd1] sm:$0xff] %vm3352_vm2, %v7766_v41  ;;  %v4792_v10 = vcombine.high %v4790_v61, %v4790_v61  ;;  %v6634_v54 = vsel %vm5338_vm11, %v4791_v32, -inf  ;;  %v6641_v60 = vsel %vm5338_vm11, %v4790_v61, -inf  ;;  %v6571_v44 = vsel %vm5338_vm11, %v4749_v15, -inf }
 0x438   :  { %v6629_v31 = vmax.f32 %v6627_v19, %v6628_v11  ;;  %v6635_v26 = vrot.slane %v6634_v54, 4  ;;  %v6642_v52 = vrot.slane %v6641_v60, 4  ;;  %v4758_v45 = vcombine.high %v4756_v4, %v4756_v4 }
 0x439   :  { %v6648_v13 = vsel %vm5338_vm11, %v4792_v10, -inf  ;;  %v6572_v43 = vrot.slane %v6571_v44, 4  ;;  %v6578_v40 = vsel %vm5338_vm11, %v4757_v55, -inf  ;;  %v6585_v7 = vsel %vm5338_vm11, %v4756_v4, -inf }
 0x43a   :  { %v6630_v2 = vrot.slane %v6629_v31, 2  ;;  %v6636_v0 = vmax.f32 %v6634_v54, %v6635_v26  ;;  %v6643_v29 = vmax.f32 %v6641_v60, %v6642_v52  ;;  %v6649_v14 = vrot.slane %v6648_v13, 4 }
 0x43b   :  { %v6573_v50 = vmax.f32 %v6571_v44, %v6572_v43  ;;  %v6579_v6 = vrot.slane %v6578_v40, 4  ;;  %v6586_v58 = vrot.slane %v6585_v7, 4  ;;  %v6592_v37 = vsel %vm5338_vm11, %v4758_v45, -inf }
 0x43c   :  { %v6631_v56 = vmax.f32 %v6629_v31, %v6630_v2  ;;  %v6637_v20 = vrot.slane %v6636_v0, 2  ;;  %v6644_v9 = vrot.slane %v6643_v29, 2  ;;  %v6650_v21 = vmax.f32 %v6648_v13, %v6649_v14 }
 0x43d   :  { %v6574_v46 = vrot.slane %v6573_v50, 2  ;;  %v6580_v3 = vmax.f32 %v6578_v40, %v6579_v6  ;;  %v6587_v15 = vmax.f32 %v6585_v7, %v6586_v58  ;;  %v6593_v61 = vrot.slane %v6592_v37, 4 }
 0x43e   :  { %v6632_v32 = vrot.slane %v6631_v56, 1  ;;  %v6638_v19 = vmax.f32 %v6636_v0, %v6637_v20  ;;  %v6645_v41 = vmax.f32 %v6643_v29, %v6644_v9  ;;  %v6651_v11 = vrot.slane %v6650_v21, 2 }
 0x43f   :  { %v6575_v4 = vmax.f32 %v6573_v50, %v6574_v46  ;;  %v6581_v55 = vrot.slane %v6580_v3, 2  ;;  %v6588_v10 = vrot.slane %v6587_v15, 2  ;;  %v6594_v54 = vmax.f32 %v6592_v37, %v6593_v61 }
 0x440   :  { %v6633_v60 = vmax.f32 %v6631_v56, %v6632_v32  ;;  %v6639_v44 = vrot.slane %v6638_v19, 1  ;;  %v6646_v26 = vrot.slane %v6645_v41, 1  ;;  %v6652_v52 = vmax.f32 %v6650_v21, %v6651_v11 }
 0x441   :  { %v6576_v31 = vrot.slane %v6575_v4, 1  ;;  %v6582_v45 = vmax.f32 %v6580_v3, %v6581_v55  ;;  %v6589_v43 = vmax.f32 %v6587_v15, %v6588_v10  ;;  %v6595_v13 = vrot.slane %v6594_v54, 2 }
 0x442   :  { %v6640_v2 = vmax.f32 %v6638_v19, %v6639_v44  ;;  %v6647_v40 = vmax.f32 %v6645_v41, %v6646_v26  ;;  %v6653_v7 = vrot.slane %v6652_v52, 1  ;;  %v7396_v14 = vsel %vm3352_vm2, %v6633_v60, -inf }
 0x443   :  { %v6577_v0 = vmax.f32 %v6575_v4, %v6576_v31  ;;  %v6583_v29 = vrot.slane %v6582_v45, 1  ;;  %v6590_v6 = vrot.slane %v6589_v43, 1  ;;  %v6596_v50 = vmax.f32 %v6594_v54, %v6595_v13 }
 0x444   :  { %v6654_v58 = vmax.f32 %v6652_v52, %v6653_v7  ;;  %v7399_v37 = vsel %vm3352_vm2, %v6640_v2, -inf  ;;  %v7402_v56 = vsel %vm3352_vm2, %v6647_v40, -inf  ;;  %v17396_v20 = vsel %vm8380_vm10, %v17359_v53, %v13103_v18 }
 0x445   :  { %v6584_v9 = vmax.f32 %v6582_v45, %v6583_v29  ;;  %v6591_v21 = vmax.f32 %v6589_v43, %v6590_v6  ;;  %v6597_v46 = vrot.slane %v6596_v50, 1  ;;  %v7395_v3 = vsel %vm3352_vm2, %v6577_v0, -inf }
 0x446   :  { %v7405_v15 = vsel %vm3352_vm2, %v6654_v58, -inf  ;;  %v7397_v61 = vmax.f32 %v7395_v3, %v7396_v14  ;;  %v17404_v32 = vsel %vm8380_vm10, %v17344_v17, %v13104_v35  ;;  %v3799_v19 = vadd.f32 %v17351_v25, %v17041_v48 }
 0x447   :  { %v6598_v41 = vmax.f32 %v6596_v50, %v6597_v46  ;;  %v7398_v53 = vsel %vm3352_vm2, %v6584_v9, -inf  ;;  %v7401_v18 = vsel %vm3352_vm2, %v6591_v21, -inf  ;;  %v3791_v11 = vadd.f32 %v17351_v25, %v17045_v59 }
 0x448   :  { %v7400_v4 = vmax.f32 %v7398_v53, %v7399_v37  ;;  %v7403_v55 = vmax.f32 %v7401_v18, %v7402_v56  ;;  %v3913_v10 = vmax.f32 %v3799_v19, 0.0  ;;  %v8450_v17 = vsel %vm8397_vm4, %v17330_v23, %v13078_v57 }
 0x449   :  { %v7404_v39 = vsel %vm3352_vm2, %v6598_v41, -inf  ;;  %v3911_v35 = vmax.f32 %v3791_v11, 0.0  ;;  %v8451_v48 = vsel %vm8397_vm4, %v17336_v42, %v13079_v49  ;;  %v17425_v59 = vsel %vm8397_vm4, %v17128_v33, %v13083_v8 }
 0x44a   :  { %v7406_v54 = vmax.f32 %v7404_v39, %v7405_v15  ;;  %v7767_v60 = vsel %vm7683_vm12, %v7400_v4, %v7397_v61  ;;  %v4793_v44 = vcombine.high %v3913_v10, %v3913_v10  ;;  %v4800_v23 = vrot.slane %v3913_v10, %v14922_v36 }
 0x44b   :  { %v7768_v57 = vsel %vm7685_vm13, %v7403_v55, %v7767_v60  ;;  %v4759_v26 = vcombine.high %v3911_v35, %v3911_v35  ;;  %v4766_v28 = vrot.slane %v3911_v35, %v14922_v36  ;;  %v8469_v52 = vpack.c.bf16 %v8451_v48, %v8450_v17 }
 0x44c   :  { %v4807_v42 = vrot.slane %v4793_v44, %v14922_v36  ;;  %v4808_v49 = vcombine.high %v4800_v23, %v4800_v23  ;;  %v6655_v31 = vsel %vm5338_vm11, %v4800_v23, -inf  ;;  %v17434_v33 = vsel %vm18993_vm1, %v7406_v54, %v7768_v57  ;;  %v17444_v23 = vpop.permute.xlu0 %13086  ;;  %vm19002_vm1 = vmmov %vm18994_vm5 }
 0x44d   :  { %v6656_v8 = vrot.slane %v6655_v31, 4  ;;  %v4773_v45 = vrot.slane %v4759_v26, %v14922_v36  ;;  %v4774_v43 = vcombine.high %v4766_v28, %v4766_v28  ;;  %v6599_v13 = vsel %vm5338_vm11, %v4766_v28, -inf  ;;  %8709 = vmatprep.mubr.bf16.mxu1 %v8469_v52 }
 0x44e   :  { %v4809_v2 = vcombine.high %v4807_v42, %v4807_v42  ;;  %v6662_v40 = vsel %vm5338_vm11, %v4808_v49, -inf  ;;  %v6669_v7 = vsel %vm5338_vm11, %v4807_v42, -inf  ;;  %v6600_v14 = vrot.slane %v6599_v13, 4 }
 0x44f   :  { %v6657_v0 = vmax.f32 %v6655_v31, %v6656_v8  ;;  %v6663_v29 = vrot.slane %v6662_v40, 4  ;;  %v6670_v6 = vrot.slane %v6669_v7, 4  ;;  %v4775_v50 = vcombine.high %v4773_v45, %v4773_v45 }
 0x450   :  { %v6676_v58 = vsel %vm5338_vm11, %v4809_v2, -inf  ;;  %v6601_v37 = vmax.f32 %v6599_v13, %v6600_v14  ;;  %v6606_v56 = vsel %vm5338_vm11, %v4774_v43, -inf  ;;  %v6613_v9 = vsel %vm5338_vm11, %v4773_v45, -inf }
 0x451   :  { %v6658_v21 = vrot.slane %v6657_v0, 2  ;;  %v6664_v46 = vmax.f32 %v6662_v40, %v6663_v29  ;;  %v6671_v3 = vmax.f32 %v6669_v7, %v6670_v6  ;;  %v6677_v15 = vrot.slane %v6676_v58, 4 }
 0x452   :  { %v6602_v61 = vrot.slane %v6601_v37, 2  ;;  %v6607_v19 = vrot.slane %v6606_v56, 4  ;;  %v6614_v41 = vrot.slane %v6613_v9, 4  ;;  %v6620_v53 = vsel %vm5338_vm11, %v4775_v50, -inf }
 0x453   :  { %v6659_v18 = vmax.f32 %v6657_v0, %v6658_v21  ;;  %v6665_v11 = vrot.slane %v6664_v46, 2  ;;  %v6672_v4 = vrot.slane %v6671_v3, 2  ;;  %v6678_v55 = vmax.f32 %v6676_v58, %v6677_v15  ;;  %v13097_v15 = vpop.permute.xlu0 %13096 }
 0x454   :  { %v6603_v10 = vmax.f32 %v6601_v37, %v6602_v61  ;;  %v6608_v17 = vmax.f32 %v6606_v56, %v6607_v19  ;;  %v6615_v39 = vmax.f32 %v6613_v9, %v6614_v41  ;;  %v6621_v35 = vrot.slane %v6620_v53, 4  ;;  %v17448_v37 = vld [vmem:[#allocation3 + $0xd0] sm:$0xff] }
 0x455   :  { %v6660_v48 = vrot.slane %v6659_v18, 1  ;;  %v6666_v54 = vmax.f32 %v6664_v46, %v6665_v11  ;;  %v6673_v60 = vmax.f32 %v6671_v3, %v6672_v4  ;;  %v6679_v44 = vrot.slane %v6678_v55, 2  ;;  %v7862_v3 = vld [vmem:[#allocation3 + $0xd1] sm:$0xff] }
 0x456   :  { %v6604_v57 = vrot.slane %v6603_v10, 1  ;;  %v6609_v26 = vrot.slane %v6608_v17, 2  ;;  %v6616_v28 = vrot.slane %v6615_v39, 2  ;;  %v6622_v52 = vmax.f32 %v6620_v53, %v6621_v35 }
 0x457   :  { %v6661_v42 = vmax.f32 %v6659_v18, %v6660_v48  ;;  %v6667_v49 = vrot.slane %v6666_v54, 1  ;;  %v6674_v31 = vrot.slane %v6673_v60, 1  ;;  %v6680_v8 = vmax.f32 %v6678_v55, %v6679_v44  ;;  %v17456_v18 = vld [vmem:[#allocation3 + $0xd2] sm:$0xff] }
 0x458   :  { %v6605_v45 = vmax.f32 %v6603_v10, %v6604_v57  ;;  %v6610_v43 = vmax.f32 %v6608_v17, %v6609_v26  ;;  %v6617_v13 = vmax.f32 %v6615_v39, %v6616_v28  ;;  %v6623_v2 = vrot.slane %v6622_v52, 2  ;;  %v7861_v17 = vld [vmem:[#allocation3 + $0xc1] sm:$0xff]  ;;  %v17464_v39 = vpop.permute.xlu1 %13111 }
 0x459   :  { %v6668_v40 = vmax.f32 %v6666_v54, %v6667_v49  ;;  %v6675_v7 = vmax.f32 %v6673_v60, %v6674_v31  ;;  %v6681_v14 = vrot.slane %v6680_v8, 1  ;;  %v7408_v0 = vsel %vm3352_vm2, %v6661_v42, -inf  ;;  %v7906_v57 = vld [vmem:[#allocation3 + $0x81] sm:$0xff]  ;;  %v7905_v31 = vld [vmem:[#allocation3 + $0x71] sm:$0xff] }
 0x45a   :  { %v6611_v29 = vrot.slane %v6610_v43, 1  ;;  %v6618_v6 = vrot.slane %v6617_v13, 1  ;;  %v6624_v50 = vmax.f32 %v6622_v52, %v6623_v2  ;;  %v7407_v58 = vsel %vm3352_vm2, %v6605_v45, -inf }
 0x45b   :  { %v6682_v56 = vmax.f32 %v6680_v8, %v6681_v14  ;;  %v7411_v9 = vsel %vm3352_vm2, %v6668_v40, -inf  ;;  %v7414_v21 = vsel %vm3352_vm2, %v6675_v7, -inf  ;;  %v7409_v46 = vmax.f32 %v7407_v58, %v7408_v0  ;;  %v17468_v48 = vpop.f32.mrb[56].mxu0 }
 0x45c   :  { %v6612_v61 = vmax.f32 %v6610_v43, %v6611_v29  ;;  %v6619_v19 = vmax.f32 %v6617_v13, %v6618_v6  ;;  %v6625_v41 = vrot.slane %v6624_v50, 1  ;;  %v8403_v53 = vsel %vm8397_vm4, %v17131_v62, %v13084_v16  ;;  %v17487_v43 = vpop.permute.xlu0 %13106 }
 0x45d   :  { %v7417_v11 = vsel %vm3352_vm2, %v6682_v56, -inf  ;;  %v7770_v4 = vsel %vm7689_vm15, %v7409_v46, %v17434_v33  ;;  %v8468_v55 = vpack.c.bf16 %v8403_v53, %v17425_v59  ;;  %v13125_v10 = vpack.i.bf16 %v17448_v37, %v17315_v22  ;;  %v17474_v33 = vpop.f32.mrb[57].mxu0 }
 0x45e   :  { %v6626_v35 = vmax.f32 %v6624_v50, %v6625_v41  ;;  %v7410_v24 = vsel %vm3352_vm2, %v6612_v61, -inf  ;;  %v7413_v62 = vsel %vm3352_vm2, %v6619_v19, -inf  ;;  %v13150_v16 = vpack.i.bf16 %v7862_v3, %v7861_v17  ;;  %v17481_v42 = vpop.f32.mrb[58].mxu0 }
 0x45f   :  { %v7412_v54 = vmax.f32 %v7410_v24, %v7411_v9  ;;  %v7415_v60 = vmax.f32 %v7413_v62, %v7414_v21  ;;  %8710 = vmatmul.mubr.bf16.gmra.mrb[8].mxu1 %v8468_v55  ;;  %13126 = vrot.lane.b32.xlu0 %v13125_v10, %s13381_s24  ;;  %v13160_v59 = vpack.i.bf16 %v17456_v18, %v17313_v63  ;;  %v13089_v22 = vunpack.i.h.bf16 %v17444_v23  ;;  %v17489_v13 = vpop.f32.mrb[59].mxu0 }
 0x460   :  { %v7416_v44 = vsel %vm3352_vm2, %v6626_v35, -inf  ;;  %13151 = vrot.lane.b32.xlu1 %v13150_v16, %s13379_s1  ;;  %v13088_v26 = vunpack.i.l.bf16 %v17444_v23  ;;  %v13114_v28 = vunpack.i.h.bf16 %v17464_v39  ;;  %v13113_v52 = vunpack.i.l.bf16 %v17464_v39 }
 0x461   :  { %v7418_v49 = vmax.f32 %v7416_v44, %v7417_v11  ;;  %v7771_v63 = vsel %vm18994_vm5, %v7412_v54, %v7770_v4  ;;  %v8421_v8 = vsel %vm3352_vm2, %v7906_v57, %v13089_v22  ;;  %v3812_v45 = vadd.f32 %v17351_v25, %v17146_v12  ;;  %vm19003_vm5 = vmmov %vm18999_vm3 }
 0x462   :  { %v7772_v23 = vsel %vm18995_vm8, %v7415_v60, %v7771_v63  ;;  %v8420_v2 = vsel %vm3352_vm2, %v7905_v31, %v13088_v26  ;;  %v3804_v40 = vadd.f32 %v17351_v25, %v17179_v30  ;;  %v13099_v7 = vunpack.i.h.bf16 %v13097_v15  ;;  %vm19004_vm8 = vmmov %vm19000_vm0 }
 0x463   :  { %v7773_v14 = vsel %vm18996_vm9, %v7418_v49, %v7772_v23  ;;  %13136 = vrot.lane.b32.xlu0 %v13150_v16, %s13382_s26  ;;  %v3916_v0 = vmax.f32 %v3812_v45, 0.0  ;;  %v13098_v29 = vunpack.i.l.bf16 %v13097_v15  ;;  %v3815_v12 = vadd.f32 %v17351_v25, %v17199_v47  ;;  %vm19005_vm9 = vmmov %vm18997_vm6 }
 0x464   :  { %7830 = vst.msk [vmem:[#allocation3 + $0xe1] sm:$0xff] %vm3352_vm2, %v7773_v14  ;;  %13161 = vrot.lane.b32.xlu1 %v13160_v59, %s13381_s24  ;;  %v3914_v6 = vmax.f32 %v3804_v40, 0.0  ;;  %v17502_v50 = vsel %vm8380_vm10, %v8421_v8, %v13099_v7  ;;  %v3807_v30 = vadd.f32 %v17351_v25, %v17259_v51  ;;  %v13109_v58 = vunpack.i.h.bf16 %v17487_v43 }
 0x465   :  { %v4844_v56 = vcombine.high %v3916_v0, %v3916_v0  ;;  %v4851_v9 = vrot.slane %v3916_v0, %v14922_v36  ;;  %v17509_v21 = vsel %vm8380_vm10, %v8420_v2, %v13098_v29  ;;  %v17511_v47 = vmax.f32 %v3815_v12, 0.0 }
 0x466   :  { %v4810_v46 = vcombine.high %v3914_v6, %v3914_v6  ;;  %v4817_v3 = vrot.slane %v3914_v6, %v14922_v36  ;;  %v17514_v15 = vmax.f32 %v3807_v30, 0.0  ;;  %v13108_v61 = vunpack.i.l.bf16 %v17487_v43 }
 0x467   :  { %v4858_v19 = vrot.slane %v4844_v56, %v14922_v36  ;;  %v4859_v51 = vcombine.high %v4851_v9, %v4851_v9  ;;  %v6739_v41 = vsel %vm5338_vm11, %v4851_v9, -inf  ;;  %v4861_v53 = vcombine.high %v17511_v47, %v17511_v47 }
 0x468   :  { %v6740_v11 = vrot.slane %v6739_v41, 4  ;;  %v4824_v4 = vrot.slane %v4810_v46, %v14922_v36  ;;  %v4825_v55 = vcombine.high %v4817_v3, %v4817_v3  ;;  %v6683_v10 = vsel %vm5338_vm11, %v4817_v3, -inf }
 0x469   :  { %v4860_v17 = vcombine.high %v4858_v19, %v4858_v19  ;;  %v6746_v35 = vsel %vm5338_vm11, %v4859_v51, -inf  ;;  %v6753_v24 = vsel %vm5338_vm11, %v4858_v19, -inf  ;;  %v6684_v62 = vrot.slane %v6683_v10, 4 }
 0x46a   :  { %v6741_v16 = vmax.f32 %v6739_v41, %v6740_v11  ;;  %v6747_v54 = vrot.slane %v6746_v35, 4  ;;  %v6754_v60 = vrot.slane %v6753_v24, 4  ;;  %v4826_v59 = vcombine.high %v4824_v4, %v4824_v4 }
 0x46b   :  { %v6760_v22 = vsel %vm5338_vm11, %v4860_v17, -inf  ;;  %v6685_v44 = vmax.f32 %v6683_v10, %v6684_v62  ;;  %v6690_v57 = vsel %vm5338_vm11, %v4825_v55, -inf  ;;  %v6697_v26 = vsel %vm5338_vm11, %v4824_v4, -inf }
 0x46c   :  { %v6742_v49 = vrot.slane %v6741_v16, 2  ;;  %v6748_v63 = vmax.f32 %v6746_v35, %v6747_v54  ;;  %v6755_v31 = vmax.f32 %v6753_v24, %v6754_v60  ;;  %v6761_v8 = vrot.slane %v6760_v22, 4 }
 0x46d   :  { %v6686_v45 = vrot.slane %v6685_v44, 2  ;;  %v6691_v23 = vrot.slane %v6690_v57, 4  ;;  %v6698_v2 = vrot.slane %v6697_v26, 4  ;;  %v6704_v40 = vsel %vm5338_vm11, %v4826_v59, -inf }
 0x46e   :  { %v6743_v7 = vmax.f32 %v6741_v16, %v6742_v49  ;;  %v6749_v14 = vrot.slane %v6748_v63, 2  ;;  %v6756_v0 = vrot.slane %v6755_v31, 2  ;;  %v6762_v29 = vmax.f32 %v6760_v22, %v6761_v8 }
 0x46f   :  { %v6687_v12 = vmax.f32 %v6685_v44, %v6686_v45  ;;  %v6692_v6 = vmax.f32 %v6690_v57, %v6691_v23  ;;  %v6699_v30 = vmax.f32 %v6697_v26, %v6698_v2  ;;  %v6705_v56 = vrot.slane %v6704_v40, 4 }
 0x470   :  { %v6744_v9 = vrot.slane %v6743_v7, 1  ;;  %v6750_v46 = vmax.f32 %v6748_v63, %v6749_v14  ;;  %v6757_v3 = vmax.f32 %v6755_v31, %v6756_v0  ;;  %v6763_v19 = vrot.slane %v6762_v29, 2 }
 0x471   :  { %v6688_v51 = vrot.slane %v6687_v12, 1  ;;  %v6693_v41 = vrot.slane %v6692_v6, 2  ;;  %v6700_v11 = vrot.slane %v6699_v30, 2  ;;  %v6706_v4 = vmax.f32 %v6704_v40, %v6705_v56 }
 0x472   :  { %v6745_v55 = vmax.f32 %v6743_v7, %v6744_v9  ;;  %v6751_v10 = vrot.slane %v6750_v46, 1  ;;  %v6758_v17 = vrot.slane %v6757_v3, 1  ;;  %v6764_v35 = vmax.f32 %v6762_v29, %v6763_v19 }
 0x473   :  { %v6689_v24 = vmax.f32 %v6687_v12, %v6688_v51  ;;  %v6694_v62 = vmax.f32 %v6692_v6, %v6693_v41  ;;  %v6701_v16 = vmax.f32 %v6699_v30, %v6700_v11  ;;  %v6707_v54 = vrot.slane %v6706_v4, 2 }
 0x474   :  { %v6752_v60 = vmax.f32 %v6750_v46, %v6751_v10  ;;  %v6759_v59 = vmax.f32 %v6757_v3, %v6758_v17  ;;  %v6765_v22 = vrot.slane %v6764_v35, 1  ;;  %v7420_v44 = vsel %vm3352_vm2, %v6745_v55, -inf }
 0x475   :  { %v6695_v57 = vrot.slane %v6694_v62, 1  ;;  %v6702_v26 = vrot.slane %v6701_v16, 1  ;;  %v6708_v49 = vmax.f32 %v6706_v4, %v6707_v54  ;;  %v7419_v63 = vsel %vm3352_vm2, %v6689_v24, -inf }
 0x476   :  { %v6766_v31 = vmax.f32 %v6764_v35, %v6765_v22  ;;  %v7423_v8 = vsel %vm3352_vm2, %v6752_v60, -inf  ;;  %v7426_v45 = vsel %vm3352_vm2, %v6759_v59, -inf  ;;  %v7421_v23 = vmax.f32 %v7419_v63, %v7420_v44 }
 0x477   :  { %v6696_v2 = vmax.f32 %v6694_v62, %v6695_v57  ;;  %v6703_v40 = vmax.f32 %v6701_v16, %v6702_v26  ;;  %v6709_v7 = vrot.slane %v6708_v49, 1  ;;  %v4868_v14 = vrot.slane %v17511_v47, %v14922_v36 }
 0x478   :  { %v17536_v0 = vsel %vm3352_vm2, %v6766_v31, -inf  ;;  %v4875_v29 = vrot.slane %v4861_v53, %v14922_v36  ;;  %v4827_v12 = vcombine.high %v17514_v15, %v17514_v15  ;;  %v4834_v6 = vrot.slane %v17514_v15, %v14922_v36 }
 0x479   :  { %v6710_v30 = vmax.f32 %v6708_v49, %v6709_v7  ;;  %v7422_v56 = vsel %vm3352_vm2, %v6696_v2, -inf  ;;  %v7425_v9 = vsel %vm3352_vm2, %v6703_v40, -inf  ;;  %v4876_v46 = vcombine.high %v4868_v14, %v4868_v14 }
 0x47a   :  { %v7424_v3 = vmax.f32 %v7422_v56, %v7423_v8  ;;  %v7427_v19 = vmax.f32 %v7425_v9, %v7426_v45  ;;  %v4877_v51 = vcombine.high %v4875_v29, %v4875_v29  ;;  %v6767_v41 = vsel %vm5338_vm11, %v4868_v14, -inf }
 0x47b   :  { %v17550_v47 = vsel %vm3352_vm2, %v6710_v30, -inf  ;;  %v6768_v53 = vrot.slane %v6767_v41, 4  ;;  %v6774_v11 = vsel %vm5338_vm11, %v4876_v46, -inf  ;;  %v6781_v4 = vsel %vm5338_vm11, %v4875_v29, -inf }
 0x47c   :  { %v7430_v15 = vmax.f32 %v17550_v47, %v17536_v0  ;;  %v7774_v55 = vsel %vm7683_vm12, %v7424_v3, %v7421_v23  ;;  %v6775_v10 = vrot.slane %v6774_v11, 4  ;;  %v6782_v17 = vrot.slane %v6781_v4, 4 }
 0x47d   :  { %v7775_v35 = vsel %vm7685_vm13, %v7427_v19, %v7774_v55  ;;  %v6769_v24 = vmax.f32 %v6767_v41, %v6768_v53  ;;  %v6788_v62 = vsel %vm5338_vm11, %v4877_v51, -inf  ;;  %v4841_v16 = vrot.slane %v4827_v12, %v14922_v36 }
 0x47e   :  { %v6776_v54 = vmax.f32 %v6774_v11, %v6775_v10  ;;  %v6783_v60 = vmax.f32 %v6781_v4, %v6782_v17  ;;  %v6789_v59 = vrot.slane %v6788_v62, 4  ;;  %v4842_v22 = vcombine.high %v4834_v6, %v4834_v6 }
 0x47f   :  { %v6770_v44 = vrot.slane %v6769_v24, 2  ;;  %v4843_v57 = vcombine.high %v4841_v16, %v4841_v16  ;;  %v6711_v26 = vsel %vm5338_vm11, %v4834_v6, -inf  ;;  %v6725_v49 = vsel %vm5338_vm11, %v4841_v16, -inf }
 0x480   :  { %v6777_v63 = vrot.slane %v6776_v54, 2  ;;  %v6784_v31 = vrot.slane %v6783_v60, 2  ;;  %v6790_v8 = vmax.f32 %v6788_v62, %v6789_v59  ;;  %v6712_v45 = vrot.slane %v6711_v26, 4  ;;  %v17567_v59 = vld [vmem:[#allocation3 + $0xe0] sm:$0xff] }
 0x481   :  { %v6771_v23 = vmax.f32 %v6769_v24, %v6770_v44  ;;  %v6718_v2 = vsel %vm5338_vm11, %v4842_v22, -inf  ;;  %v6726_v40 = vrot.slane %v6725_v49, 4  ;;  %v6732_v7 = vsel %vm5338_vm11, %v4843_v57, -inf }
 0x482   :  { %v6778_v14 = vmax.f32 %v6776_v54, %v6777_v63  ;;  %v6785_v0 = vmax.f32 %v6783_v60, %v6784_v31  ;;  %v6791_v29 = vrot.slane %v6790_v8, 2  ;;  %v6713_v12 = vmax.f32 %v6711_v26, %v6712_v45  ;;  %v17565_v60 = vld [vmem:[#allocation3 + $0xe2] sm:$0xff] }
 0x483   :  { %v6772_v30 = vrot.slane %v6771_v23, 1  ;;  %v6719_v56 = vrot.slane %v6718_v2, 4  ;;  %v6727_v9 = vmax.f32 %v6725_v49, %v6726_v40  ;;  %v6733_v6 = vrot.slane %v6732_v7, 4 }
 0x484   :  { %v6779_v46 = vrot.slane %v6778_v14, 1  ;;  %v6786_v3 = vrot.slane %v6785_v0, 1  ;;  %v6792_v19 = vmax.f32 %v6790_v8, %v6791_v29  ;;  %v6714_v51 = vrot.slane %v6713_v12, 2 }
 0x485   :  { %v6773_v41 = vmax.f32 %v6771_v23, %v6772_v30  ;;  %v6720_v47 = vmax.f32 %v6718_v2, %v6719_v56  ;;  %v6728_v53 = vrot.slane %v6727_v9, 2  ;;  %v6734_v11 = vmax.f32 %v6732_v7, %v6733_v6 }
 0x486   :  { %v6780_v4 = vmax.f32 %v6778_v14, %v6779_v46  ;;  %v6787_v55 = vmax.f32 %v6785_v0, %v6786_v3  ;;  %v6793_v10 = vrot.slane %v6792_v19, 1  ;;  %v6715_v17 = vmax.f32 %v6713_v12, %v6714_v51 }
 0x487   :  { %v7432_v24 = vsel %vm3352_vm2, %v6773_v41, -inf  ;;  %v6721_v62 = vrot.slane %v6720_v47, 2  ;;  %v6729_v16 = vmax.f32 %v6727_v9, %v6728_v53  ;;  %v6735_v54 = vrot.slane %v6734_v11, 2 }
 0x488   :  { %v6794_v22 = vmax.f32 %v6792_v19, %v6793_v10  ;;  %v7435_v44 = vsel %vm3352_vm2, %v6780_v4, -inf  ;;  %v7438_v57 = vsel %vm3352_vm2, %v6787_v55, -inf  ;;  %v6716_v26 = vrot.slane %v6715_v17, 1 }
 0x489   :  { %v6722_v49 = vmax.f32 %v6720_v47, %v6721_v62  ;;  %v6730_v63 = vrot.slane %v6729_v16, 1  ;;  %v6736_v31 = vmax.f32 %v6734_v11, %v6735_v54  ;;  %v7776_v8 = vsel %vm18997_vm6, %v7430_v15, %v7775_v35  ;;  %vm19006_vm6 = vmmov %vm19002_vm1 }
 0x48a   :  { %v7441_v45 = vsel %vm3352_vm2, %v6794_v22, -inf  ;;  %v6717_v23 = vmax.f32 %v6715_v17, %v6716_v26  ;;  %v13145_v2 = vpack.i.bf16 %v17565_v60, %v17456_v18  ;;  %v13170_v40 = vpack.i.bf16 %v17567_v59, %v17448_v37 }
 0x48b   :  { %v6723_v7 = vrot.slane %v6722_v49, 1  ;;  %v6731_v14 = vmax.f32 %v6729_v16, %v6730_v63  ;;  %v6737_v0 = vrot.slane %v6736_v31, 1  ;;  %v8452_v29 = vsel %vm8397_vm4, %v17509_v21, %v13108_v61  ;;  %v17596_v61 = vpop.f32.mrb[60].mxu0 }
 0x48c   :  { %v7431_v12 = vsel %vm3352_vm2, %v6717_v23, -inf  ;;  %13146 = vrot.lane.b32.xlu0 %v13145_v2, %s13379_s1  ;;  %13171 = vrot.lane.b32.xlu1 %v13170_v40, %s13382_s26  ;;  %v8453_v18 = vsel %vm8397_vm4, %v17502_v50, %v13109_v58  ;;  %v8404_v37 = vsel %vm8397_vm4, %v17396_v20, %v13113_v52  ;;  %v8405_v21 = vsel %vm8397_vm4, %v17404_v32, %v13114_v28  ;;  %v17599_v56 = vpop.f32.mrb[61].mxu0 }
 0x48d   :  { %v6724_v15 = vmax.f32 %v6722_v49, %v6723_v7  ;;  %v6738_v35 = vmax.f32 %v6736_v31, %v6737_v0  ;;  %v7433_v30 = vmax.f32 %v7431_v12, %v7432_v24  ;;  %v7437_v43 = vsel %vm3352_vm2, %v6731_v14, -inf  ;;  %v17601_v9 = vpop.f32.mrb[62].mxu0 }
 0x48e   :  { %v7439_v50 = vmax.f32 %v7437_v43, %v7438_v57  ;;  %v8472_v58 = vpack.c.bf16 %v8453_v18, %v8452_v29  ;;  %v8471_v32 = vpack.c.bf16 %v8405_v21, %v8404_v37  ;;  %v17606_v28 = vpop.f32.mrb[63].mxu0  ;;  %v3828_v3 = vadd.f32 %v17351_v25, %v17308_v5 }
 0x48f   :  { %v7434_v20 = vsel %vm3352_vm2, %v6724_v15, -inf  ;;  %v7440_v39 = vsel %vm3352_vm2, %v6738_v35, -inf  ;;  %v7777_v52 = vsel %vm7689_vm15, %v7433_v30, %v7776_v8  ;;  %v3820_v19 = vadd.f32 %v17351_v25, %v17310_v27 }
 0x490   :  { %v7436_v6 = vmax.f32 %v7434_v20, %v7435_v44  ;;  %v7442_v46 = vmax.f32 %v7440_v39, %v7441_v45  ;;  %8717 = vmatprep.mubr.bf16.mxu1 %v8472_v58  ;;  %v3920_v41 = vmax.f32 %v3828_v3, 0.0  ;;  %v3831_v47 = vadd.f32 %v17351_v25, %v17324_v38 }
 0x491   :  { %8718 = vmatmul.mubr.bf16.gmra.mrb[12].mxu1 %v8471_v32  ;;  %v3823_v53 = vadd.f32 %v17351_v25, %v17386_v34  ;;  %v3918_v4 = vmax.f32 %v3820_v19, 0.0 }
 0x492   :  { %v7778_v51 = vsel %vm18998_vm7, %v7436_v6, %v7777_v52  ;;  %v4912_v10 = vcombine.high %v3920_v41, %v3920_v41  ;;  %v4919_v5 = vrot.slane %v3920_v41, %v14922_v36  ;;  %v17620_v17 = vmax.f32 %v3831_v47, 0.0  ;;  %vm19007_vm7 = vmmov %vm18999_vm3 }
 0x493   :  { %v7779_v11 = vsel %vm18999_vm3, %v7439_v50, %v7778_v51  ;;  %v4878_v27 = vcombine.high %v3918_v4, %v3918_v4  ;;  %v4885_v24 = vrot.slane %v3918_v4, %v14922_v36  ;;  %v17624_v62 = vmax.f32 %v3823_v53, 0.0  ;;  %vm19008_vm3 = vmmov %vm19000_vm0 }
 0x494   :  { %v7780_v55 = vsel %vm19000_vm0, %v7442_v46, %v7779_v11  ;;  %v4926_v38 = vrot.slane %v4912_v10, %v14922_v36  ;;  %v4927_v25 = vcombine.high %v4919_v5, %v4919_v5  ;;  %v6851_v34 = vsel %vm5338_vm11, %v4919_v5, -inf  ;;  %vm19009_vm0 = vmmov %vm19005_vm9 }
 0x495   :  { %7831 = vst.msk [vmem:[#allocation3 + $0xf1] sm:$0xff] %vm3352_vm2, %v7780_v55  ;;  %v4929_v16 = vcombine.high %v17620_v17, %v17620_v17  ;;  %v6852_v54 = vrot.slane %v6851_v34, 4  ;;  %v4892_v22 = vrot.slane %v4878_v27, %v14922_v36  ;;  %v4893_v44 = vcombine.high %v4885_v24, %v4885_v24 }
 0x496   :  { %v6795_v57 = vsel %vm5338_vm11, %v4885_v24, -inf  ;;  %v4928_v26 = vcombine.high %v4926_v38, %v4926_v38  ;;  %v6858_v49 = vsel %vm5338_vm11, %v4927_v25, -inf  ;;  %v6865_v63 = vsel %vm5338_vm11, %v4926_v38, -inf }
 0x497   :  { %v6796_v31 = vrot.slane %v6795_v57, 4  ;;  %v6853_v8 = vmax.f32 %v6851_v34, %v6852_v54  ;;  %v6859_v45 = vrot.slane %v6858_v49, 4  ;;  %v6866_v23 = vrot.slane %v6865_v63, 4 }
 0x498   :  { %v4894_v2 = vcombine.high %v4892_v22, %v4892_v22  ;;  %v6872_v40 = vsel %vm5338_vm11, %v4928_v26, -inf  ;;  %v6802_v14 = vsel %vm5338_vm11, %v4893_v44, -inf  ;;  %v6809_v0 = vsel %vm5338_vm11, %v4892_v22, -inf }
 0x499   :  { %v6797_v7 = vmax.f32 %v6795_v57, %v6796_v31  ;;  %v6854_v29 = vrot.slane %v6853_v8, 2  ;;  %v6860_v12 = vmax.f32 %v6858_v49, %v6859_v45  ;;  %v6867_v18 = vmax.f32 %v6865_v63, %v6866_v23 }
 0x49a   :  { %v6873_v37 = vrot.slane %v6872_v40, 4  ;;  %v6803_v15 = vrot.slane %v6802_v14, 4  ;;  %v6810_v35 = vrot.slane %v6809_v0, 4  ;;  %v6816_v30 = vsel %vm5338_vm11, %v4894_v2, -inf }
 0x49b   :  { %v6798_v21 = vrot.slane %v6797_v7, 2  ;;  %v6855_v43 = vmax.f32 %v6853_v8, %v6854_v29  ;;  %v6861_v50 = vrot.slane %v6860_v12, 2  ;;  %v6868_v58 = vrot.slane %v6867_v18, 2 }
 0x49c   :  { %v6874_v20 = vmax.f32 %v6872_v40, %v6873_v37  ;;  %v6804_v52 = vmax.f32 %v6802_v14, %v6803_v15  ;;  %v6811_v32 = vmax.f32 %v6809_v0, %v6810_v35  ;;  %v6817_v6 = vrot.slane %v6816_v30, 4 }
 0x49d   :  { %v6799_v39 = vmax.f32 %v6797_v7, %v6798_v21  ;;  %v6856_v46 = vrot.slane %v6855_v43, 1  ;;  %v6862_v3 = vmax.f32 %v6860_v12, %v6861_v50  ;;  %v6869_v19 = vmax.f32 %v6867_v18, %v6868_v58 }
 0x49e   :  { %v6875_v51 = vrot.slane %v6874_v20, 2  ;;  %v6805_v47 = vrot.slane %v6804_v52, 2  ;;  %v6812_v53 = vrot.slane %v6811_v32, 2  ;;  %v6818_v11 = vmax.f32 %v6816_v30, %v6817_v6 }
 0x49f   :  { %v6800_v41 = vrot.slane %v6799_v39, 1  ;;  %v6857_v4 = vmax.f32 %v6855_v43, %v6856_v46  ;;  %v6863_v55 = vrot.slane %v6862_v3, 1  ;;  %v6870_v10 = vrot.slane %v6869_v19, 1 }
 0x4a0   :  { %v6876_v5 = vmax.f32 %v6874_v20, %v6875_v51  ;;  %v6806_v24 = vmax.f32 %v6804_v52, %v6805_v47  ;;  %v6813_v38 = vmax.f32 %v6811_v32, %v6812_v53  ;;  %v6819_v25 = vrot.slane %v6818_v11, 2 }
 0x4a1   :  { %v6801_v27 = vmax.f32 %v6799_v39, %v6800_v41  ;;  %v6864_v34 = vmax.f32 %v6862_v3, %v6863_v55  ;;  %v6871_v54 = vmax.f32 %v6869_v19, %v6870_v10  ;;  %v7444_v44 = vsel %vm3352_vm2, %v6857_v4, -inf }
 0x4a2   :  { %v6877_v22 = vrot.slane %v6876_v5, 1  ;;  %v6807_v57 = vrot.slane %v6806_v24, 1  ;;  %v6814_v26 = vrot.slane %v6813_v38, 1  ;;  %v6820_v49 = vmax.f32 %v6818_v11, %v6819_v25 }
 0x4a3   :  { %v7443_v63 = vsel %vm3352_vm2, %v6801_v27, -inf  ;;  %v7447_v8 = vsel %vm3352_vm2, %v6864_v34, -inf  ;;  %v7450_v45 = vsel %vm3352_vm2, %v6871_v54, -inf  ;;  %v4936_v14 = vrot.slane %v17620_v17, %v14922_v36 }
 0x4a4   :  { %v6878_v31 = vmax.f32 %v6876_v5, %v6877_v22  ;;  %v7445_v23 = vmax.f32 %v7443_v63, %v7444_v44  ;;  %v6808_v2 = vmax.f32 %v6806_v24, %v6807_v57  ;;  %v6815_v40 = vmax.f32 %v6813_v38, %v6814_v26 }
 0x4a5   :  { %v6821_v7 = vrot.slane %v6820_v49, 1  ;;  %v4943_v29 = vrot.slane %v4929_v16, %v14922_v36  ;;  %v4895_v12 = vcombine.high %v17624_v62, %v17624_v62  ;;  %v4902_v18 = vrot.slane %v17624_v62, %v14922_v36 }
 0x4a6   :  { %v17645_v0 = vsel %vm3352_vm2, %v6878_v31, -inf  ;;  %v7446_v21 = vsel %vm3352_vm2, %v6808_v2, -inf  ;;  %v7449_v15 = vsel %vm3352_vm2, %v6815_v40, -inf  ;;  %v4944_v35 = vcombine.high %v4936_v14, %v4936_v14 }
 0x4a7   :  { %v6822_v37 = vmax.f32 %v6820_v49, %v6821_v7  ;;  %v7448_v43 = vmax.f32 %v7446_v21, %v7447_v8  ;;  %v7451_v50 = vmax.f32 %v7449_v15, %v7450_v45  ;;  %v4945_v58 = vcombine.high %v4943_v29, %v4943_v29 }
 0x4a8   :  { %v17657_v30 = vpop.f32.mrb[0].mxu1  ;;  %v6879_v17 = vsel %vm5338_vm11, %v4936_v14, -inf  ;;  %v6886_v62 = vsel %vm5338_vm11, %v4944_v35, -inf  ;;  %v6893_v52 = vsel %vm5338_vm11, %v4943_v29, -inf  ;;  %v4909_v11 = vrot.slane %v4895_v12, %v14922_v36 }
 0x4a9   :  { %v17660_v16 = vpop.f32.mrb[1].mxu1  ;;  %v17663_v20 = vsel %vm3352_vm2, %v6822_v37, -inf  ;;  %v6880_v39 = vrot.slane %v6879_v17, 4  ;;  %v7781_v46 = vsel %vm7683_vm12, %v7448_v43, %v7445_v23  ;;  %v6887_v3 = vrot.slane %v6886_v62, 4 }
 0x4aa   :  { %v17667_v32 = vpop.f32.mrb[2].mxu1  ;;  %v7454_v6 = vmax.f32 %v17663_v20, %v17645_v0  ;;  %v6894_v19 = vrot.slane %v6893_v52, 4  ;;  %v7782_v41 = vsel %vm7685_vm13, %v7451_v50, %v7781_v46  ;;  %v6900_v53 = vsel %vm5338_vm11, %v4945_v58, -inf  ;;  %v17681_v58 = vpop.permute.xlu1 %13121  ;;  %v7864_v46 = vld [vmem:[#allocation3 + $0xf1] sm:$0xff] }
 0x4ab   :  { %v17672_v51 = vpop.f32.mrb[3].mxu1  ;;  %v6881_v47 = vmax.f32 %v6879_v17, %v6880_v39  ;;  %v6888_v4 = vmax.f32 %v6886_v62, %v6887_v3  ;;  %v6901_v10 = vrot.slane %v6900_v53, 4  ;;  %v4910_v5 = vcombine.high %v4902_v18, %v4902_v18 }
 0x4ac   :  { %v6895_v55 = vmax.f32 %v6893_v52, %v6894_v19  ;;  %v4911_v24 = vcombine.high %v4909_v11, %v4909_v11  ;;  %v6823_v38 = vsel %vm5338_vm11, %v4902_v18, -inf  ;;  %v6837_v25 = vsel %vm5338_vm11, %v4909_v11, -inf  ;;  %v17683_v52 = vld [vmem:[#allocation3 + $0xf0] sm:$0xff] }
 0x4ad   :  { %v6882_v27 = vrot.slane %v6881_v47, 2  ;;  %v6889_v34 = vrot.slane %v6888_v4, 2  ;;  %v6902_v22 = vmax.f32 %v6900_v53, %v6901_v10  ;;  %v6824_v44 = vrot.slane %v6823_v38, 4  ;;  %v17688_v53 = vld [vmem:[%s18842_s2] ss:$0 sm:$0xff] }
 0x4ae   :  { %v6896_v54 = vrot.slane %v6895_v55, 2  ;;  %v6830_v26 = vsel %vm5338_vm11, %v4910_v5, -inf  ;;  %v6838_v49 = vrot.slane %v6837_v25, 4  ;;  %v6844_v63 = vsel %vm5338_vm11, %v4911_v24, -inf }
 0x4af   :  { %v6883_v57 = vmax.f32 %v6881_v47, %v6882_v27  ;;  %v6890_v31 = vmax.f32 %v6888_v4, %v6889_v34  ;;  %v6903_v45 = vrot.slane %v6902_v22, 2  ;;  %v6825_v23 = vmax.f32 %v6823_v38, %v6824_v44  ;;  %v17693_v27 = vld [vmem:[#allocation3 + $0xe1] sm:$0xff] }
 0x4b0   :  { %v6897_v8 = vmax.f32 %v6895_v55, %v6896_v54  ;;  %v6831_v40 = vrot.slane %v6830_v26, 4  ;;  %v6839_v7 = vmax.f32 %v6837_v25, %v6838_v49  ;;  %v6845_v14 = vrot.slane %v6844_v63, 4 }
 0x4b1   :  { %v6884_v2 = vrot.slane %v6883_v57, 1  ;;  %v6891_v0 = vrot.slane %v6890_v31, 1  ;;  %v6904_v12 = vmax.f32 %v6902_v22, %v6903_v45  ;;  %v6826_v18 = vrot.slane %v6825_v23, 2 }
 0x4b2   :  { %v6898_v29 = vrot.slane %v6897_v8, 1  ;;  %v6832_v37 = vmax.f32 %v6830_v26, %v6831_v40  ;;  %v6840_v21 = vrot.slane %v6839_v7, 2  ;;  %v6846_v15 = vmax.f32 %v6844_v63, %v6845_v14 }
 0x4b3   :  { %v6885_v35 = vmax.f32 %v6883_v57, %v6884_v2  ;;  %v6905_v43 = vrot.slane %v6904_v12, 1  ;;  %v6827_v50 = vmax.f32 %v6825_v23, %v6826_v18  ;;  %v6892_v3 = vmax.f32 %v6890_v31, %v6891_v0  ;;  %v17700_v57 = vld [vmem:[#allocation3 + $0xf2] sm:$0xff] }
 0x4b4   :  { %v6899_v17 = vmax.f32 %v6897_v8, %v6898_v29  ;;  %v6833_v20 = vrot.slane %v6832_v37, 2  ;;  %v6841_v39 = vmax.f32 %v6839_v7, %v6840_v21  ;;  %v6847_v62 = vrot.slane %v6846_v15, 2 }
 0x4b5   :  { %v6906_v19 = vmax.f32 %v6904_v12, %v6905_v43  ;;  %v6828_v47 = vrot.slane %v6827_v50, 1  ;;  %v3844_v11 = vadd.f32 %v17688_v53, %v17468_v48  ;;  %v7783_v5 = vsel %vm19001_vm14, %v7454_v6, %v7782_v41  ;;  %vm19011_vm14 = vmmov %vm19003_vm5 }
 0x4b6   :  { %v6834_v4 = vmax.f32 %v6832_v37, %v6833_v20  ;;  %v6842_v55 = vrot.slane %v6841_v39, 1  ;;  %v6848_v10 = vmax.f32 %v6846_v15, %v6847_v62  ;;  %v7456_v24 = vsel %vm3352_vm2, %v6885_v35, -inf }
 0x4b7   :  { %v6829_v38 = vmax.f32 %v6827_v50, %v6828_v47  ;;  %v13155_v25 = vpack.i.bf16 %v17683_v52, %v17567_v59  ;;  %v13180_v34 = vpack.i.bf16 %v7864_v46, %v17693_v27  ;;  %v7462_v54 = vsel %vm3352_vm2, %v6899_v17, -inf  ;;  %v17707_v59 = vpop.permute.xlu1 %13131 }
 0x4b8   :  { %v6835_v22 = vrot.slane %v6834_v4, 1  ;;  %v6843_v44 = vmax.f32 %v6841_v39, %v6842_v55  ;;  %v6849_v48 = vrot.slane %v6848_v10, 1  ;;  %v7459_v26 = vsel %vm3352_vm2, %v6892_v3, -inf }
 0x4b9   :  { %v7465_v6 = vsel %vm3352_vm2, %v6906_v19, -inf  ;;  %v7455_v41 = vsel %vm3352_vm2, %v6829_v38, -inf  ;;  %13156 = vrot.lane.b32.xlu0 %v13155_v25, %s13381_s24  ;;  %13181 = vrot.lane.b32.xlu1 %v13180_v34, %s13379_s1  ;;  %v13124_v45 = vunpack.i.h.bf16 %v17681_v58  ;;  %v13123_v23 = vunpack.i.l.bf16 %v17681_v58 }
 0x4ba   :  { %v6836_v49 = vmax.f32 %v6834_v4, %v6835_v22  ;;  %v6850_v63 = vmax.f32 %v6848_v10, %v6849_v48  ;;  %v7457_v31 = vmax.f32 %v7455_v41, %v7456_v24  ;;  %v7461_v8 = vsel %vm3352_vm2, %v6843_v44, -inf }
 0x4bb   :  { %v7463_v2 = vmax.f32 %v7461_v8, %v7462_v54  ;;  %v13190_v40 = vpack.i.bf16 %v17700_v57, %v17565_v60  ;;  %v3924_v29 = vmax.f32 %v3844_v11, 0.0  ;;  %v13134_v12 = vunpack.i.h.bf16 %v17707_v59 }
 0x4bc   :  { %v7458_v7 = vsel %vm3352_vm2, %v6836_v49, -inf  ;;  %v7464_v14 = vsel %vm3352_vm2, %v6850_v63, -inf  ;;  %v7784_v0 = vsel %vm7689_vm15, %v7457_v31, %v7783_v5  ;;  %v3836_v21 = vadd.f32 %v17688_v53, %v17474_v33 }
 0x4bd   :  { %v7460_v18 = vmax.f32 %v7458_v7, %v7459_v26  ;;  %v7466_v37 = vmax.f32 %v7464_v14, %v7465_v6  ;;  %13166 = vrot.lane.b32.xlu0 %v13180_v34, %s13382_s26  ;;  %13191 = vrot.lane.b32.xlu1 %v13190_v40, %s13381_s24  ;;  %v13133_v60 = vunpack.i.l.bf16 %v17707_v59  ;;  %v4980_v15 = vcombine.high %v3924_v29, %v3924_v29 }
 0x4be   :  { %v4987_v35 = vrot.slane %v3924_v29, %v14922_v36  ;;  %v3847_v43 = vadd.f32 %v17688_v53, %v17481_v42  ;;  %v3922_v17 = vmax.f32 %v3836_v21, 0.0  ;;  %v17729_v20 = vadd.f32 %v17688_v53, %v17489_v13 }
 0x4bf   :  { %v7785_v50 = vsel %vm19002_vm1, %v7460_v18, %v7784_v0  ;;  %v17733_v39 = vadd.f32 %v17688_v53, %v17596_v61  ;;  %v4994_v62 = vrot.slane %v4980_v15, %v14922_v36 }
 0x4c0   :  { %v7786_v33 = vsel %vm19003_vm5, %v7463_v2, %v7785_v50  ;;  %v4995_v46 = vcombine.high %v4987_v35, %v4987_v35  ;;  %v6963_v3 = vsel %vm5338_vm11, %v4987_v35, -inf  ;;  %v4946_v47 = vcombine.high %v3922_v17, %v3922_v17  ;;  %vm19013_vm5 = vmmov %vm19009_vm0 }
 0x4c1   :  { %v7787_v42 = vsel %vm19004_vm8, %v7466_v37, %v7786_v33  ;;  %v6964_v19 = vrot.slane %v6963_v3, 4  ;;  %v4953_v11 = vrot.slane %v3922_v17, %v14922_v36  ;;  %v4996_v13 = vcombine.high %v4994_v62, %v4994_v62  ;;  %vm19014_vm8 = vmmov %vm19009_vm0 }
 0x4c2   :  { %7832 = vst.msk [vmem:[#allocation3 + $0x101] sm:$0xff] %vm3352_vm2, %v7787_v42  ;;  %v6970_v4 = vsel %vm5338_vm11, %v4995_v46, -inf  ;;  %v6977_v61 = vsel %vm5338_vm11, %v4994_v62, -inf  ;;  %v3925_v55 = vmax.f32 %v3847_v43, 0.0  ;;  %v4960_v38 = vrot.slane %v4946_v47, %v14922_v36 }
 0x4c3   :  { %v6965_v10 = vmax.f32 %v6963_v3, %v6964_v19  ;;  %v6971_v5 = vrot.slane %v6970_v4, 4  ;;  %v6978_v24 = vrot.slane %v6977_v61, 4  ;;  %v6984_v25 = vsel %vm5338_vm11, %v4996_v13, -inf }
 0x4c4   :  { %v4961_v34 = vcombine.high %v4953_v11, %v4953_v11  ;;  %v6907_v54 = vsel %vm5338_vm11, %v4953_v11, -inf  ;;  %v4997_v22 = vcombine.high %v3925_v55, %v3925_v55  ;;  %v6985_v6 = vrot.slane %v6984_v25, 4 }
 0x4c5   :  { %v6966_v44 = vrot.slane %v6965_v10, 2  ;;  %v6972_v48 = vmax.f32 %v6970_v4, %v6971_v5  ;;  %v6979_v26 = vmax.f32 %v6977_v61, %v6978_v24  ;;  %v4962_v41 = vcombine.high %v4960_v38, %v4960_v38 }
 0x4c6   :  { %v6908_v49 = vrot.slane %v6907_v54, 4  ;;  %v6914_v63 = vsel %vm5338_vm11, %v4961_v34, -inf  ;;  %v6921_v31 = vsel %vm5338_vm11, %v4960_v38, -inf  ;;  %v6986_v7 = vmax.f32 %v6984_v25, %v6985_v6 }
 0x4c7   :  { %v6967_v8 = vmax.f32 %v6965_v10, %v6966_v44  ;;  %v6973_v2 = vrot.slane %v6972_v48, 2  ;;  %v6980_v40 = vrot.slane %v6979_v26, 2  ;;  %v6915_v0 = vrot.slane %v6914_v63, 4 }
 0x4c8   :  { %v6909_v14 = vmax.f32 %v6907_v54, %v6908_v49  ;;  %v6922_v29 = vrot.slane %v6921_v31, 4  ;;  %v6928_v18 = vsel %vm5338_vm11, %v4962_v41, -inf  ;;  %v6987_v35 = vrot.slane %v6986_v7, 2 }
 0x4c9   :  { %v6968_v37 = vrot.slane %v6967_v8, 1  ;;  %v6974_v21 = vmax.f32 %v6972_v48, %v6973_v2  ;;  %v6981_v15 = vmax.f32 %v6979_v26, %v6980_v40  ;;  %v6916_v50 = vmax.f32 %v6914_v63, %v6915_v0 }
 0x4ca   :  { %v6910_v43 = vrot.slane %v6909_v14, 2  ;;  %v6923_v17 = vmax.f32 %v6921_v31, %v6922_v29  ;;  %v6929_v33 = vrot.slane %v6928_v18, 4  ;;  %v6988_v42 = vmax.f32 %v6986_v7, %v6987_v35  ;;  %v13254_v31 = vld [vmem:[%s18843_s3 + $0x80] sm:$0xff]  }
 0x4cb   :  { %v6969_v62 = vmax.f32 %v6967_v8, %v6968_v37  ;;  %v6975_v46 = vrot.slane %v6974_v21, 1  ;;  %v6982_v3 = vrot.slane %v6981_v15, 1  ;;  %v6917_v47 = vrot.slane %v6916_v50, 2  ;;  %11669 = vmatprep.subr.bf16.mxu1 %v13254_v31 }
 0x4cc   :  { %v6911_v19 = vmax.f32 %v6909_v14, %v6910_v43  ;;  %v6924_v11 = vrot.slane %v6923_v17, 2  ;;  %v6930_v13 = vmax.f32 %v6928_v18, %v6929_v33  ;;  %v6989_v10 = vrot.slane %v6988_v42, 1  ;;  %11670 = vmatpush3.bf16.msra.mxu1 %v13254_v31 }
 0x4cd   :  { %v6976_v4 = vmax.f32 %v6974_v21, %v6975_v46  ;;  %v6983_v61 = vmax.f32 %v6981_v15, %v6982_v3  ;;  %v7468_v5 = vsel %vm3352_vm2, %v6969_v62, -inf  ;;  %v6918_v38 = vmax.f32 %v6916_v50, %v6917_v47 }
 0x4ce   :  { %v6912_v24 = vrot.slane %v6911_v19, 1  ;;  %v6925_v25 = vmax.f32 %v6923_v17, %v6924_v11  ;;  %v6931_v34 = vrot.slane %v6930_v13, 2  ;;  %v6990_v54 = vmax.f32 %v6988_v42, %v6989_v10  ;;  %v17774_v10 = vld [vmem:[#allocation3 + $0x102] sm:$0xff] }
 0x4cf   :  { %v7471_v44 = vsel %vm3352_vm2, %v6976_v4, -inf  ;;  %v7474_v48 = vsel %vm3352_vm2, %v6983_v61, -inf  ;;  %v5004_v26 = vrot.slane %v3925_v55, %v14922_v36  ;;  %v6919_v41 = vrot.slane %v6918_v38, 1 }
 0x4d0   :  { %v6913_v6 = vmax.f32 %v6911_v19, %v6912_v24  ;;  %v6926_v49 = vrot.slane %v6925_v25, 1  ;;  %v6932_v63 = vmax.f32 %v6930_v13, %v6931_v34  ;;  %v7477_v8 = vsel %vm3352_vm2, %v6990_v54, -inf }
 0x4d1   :  { %v5011_v2 = vrot.slane %v4997_v22, %v14922_v36  ;;  %v5012_v40 = vcombine.high %v5004_v26, %v5004_v26  ;;  %v6991_v7 = vsel %vm5338_vm11, %v5004_v26, -inf  ;;  %v6920_v14 = vmax.f32 %v6918_v38, %v6919_v41  ;;  %v17779_v26 = vld [vmem:[#allocation3 + $0x100] sm:$0xff] }
 0x4d2   :  { %v6927_v0 = vmax.f32 %v6925_v25, %v6926_v49  ;;  %v6933_v29 = vrot.slane %v6932_v63, 1  ;;  %v7467_v55 = vsel %vm3352_vm2, %v6913_v6, -inf  ;;  %v6992_v15 = vrot.slane %v6991_v7, 4 }
 0x4d3   :  { %v7469_v37 = vmax.f32 %v7467_v55, %v7468_v5  ;;  %v5013_v21 = vcombine.high %v5011_v2, %v5011_v2  ;;  %v6998_v35 = vsel %vm5338_vm11, %v5012_v40, -inf  ;;  %v7470_v50 = vsel %vm3352_vm2, %v6920_v14, -inf }
 0x4d4   :  { %v17760_v18 = vpop.f32.mrb[4].mxu1  ;;  %v6934_v22 = vmax.f32 %v6932_v63, %v6933_v29  ;;  %v7473_v17 = vsel %vm3352_vm2, %v6927_v0, -inf  ;;  %v6999_v33 = vrot.slane %v6998_v35, 4  ;;  %v7472_v46 = vmax.f32 %v7470_v50, %v7471_v44 }
 0x4d5   :  { %v17763_v43 = vpop.f32.mrb[5].mxu1  ;;  %v7475_v3 = vmax.f32 %v7473_v17, %v7474_v48  ;;  %v6993_v42 = vmax.f32 %v6991_v7, %v6992_v15  ;;  %v7005_v19 = vsel %vm5338_vm11, %v5011_v2, -inf  ;;  %v7012_v61 = vsel %vm5338_vm11, %v5013_v21, -inf }
 0x4d6   :  { %v17767_v62 = vpop.f32.mrb[6].mxu1  ;;  %v7476_v11 = vsel %vm3352_vm2, %v6934_v22, -inf  ;;  %v7000_v13 = vmax.f32 %v6998_v35, %v6999_v33  ;;  %v7006_v4 = vrot.slane %v7005_v19, 4  ;;  %v7788_v24 = vsel %vm7683_vm12, %v7472_v46, %v7469_v37 }
 0x4d7   :  { %v17770_v47 = vpop.f32.mrb[7].mxu1  ;;  %v7478_v5 = vmax.f32 %v7476_v11, %v7477_v8  ;;  %v6994_v38 = vrot.slane %v6993_v42, 2  ;;  %v7013_v25 = vrot.slane %v7012_v61, 4  ;;  %v7789_v34 = vsel %vm7685_vm13, %v7475_v3, %v7788_v24 }
 0x4d8   :  { %v7001_v54 = vrot.slane %v7000_v13, 2  ;;  %v7007_v44 = vmax.f32 %v7005_v19, %v7006_v4  ;;  %v3923_v48 = vmax.f32 %v17729_v20, 0.0  ;;  %v13175_v63 = vpack.i.bf16 %v17774_v10, %v17700_v57 }
 0x4d9   :  { %v6995_v6 = vmax.f32 %v6993_v42, %v6994_v38  ;;  %v7014_v41 = vmax.f32 %v7012_v61, %v7013_v25  ;;  %v17782_v49 = vsel %vm19005_vm9, %v7478_v5, %v7789_v34  ;;  %v13200_v20 = vpack.i.bf16 %v17779_v26, %v17683_v52  ;;  %vm19015_vm9 = vmmov %vm19009_vm0 }
 0x4da   :  { %v7002_v31 = vmax.f32 %v7000_v13, %v7001_v54  ;;  %v7008_v8 = vrot.slane %v7007_v44, 2  ;;  %v4963_v2 = vcombine.high %v3923_v48, %v3923_v48  ;;  %v4970_v40 = vrot.slane %v3923_v48, %v14922_v36  ;;  %13176 = vrot.lane.b32.xlu0 %v13175_v63, %s13379_s1 }
 0x4db   :  { %v6996_v7 = vrot.slane %v6995_v6, 1  ;;  %v7015_v14 = vrot.slane %v7014_v41, 2  ;;  %v3928_v0 = vmax.f32 %v17733_v39, 0.0  ;;  %13201 = vrot.lane.b32.xlu1 %v13200_v20, %s13382_s26 }
 0x4dc   :  { %v7003_v29 = vrot.slane %v7002_v31, 1  ;;  %v7009_v55 = vmax.f32 %v7007_v44, %v7008_v8  ;;  %v4977_v37 = vrot.slane %v4963_v2, %v14922_v36  ;;  %v4978_v21 = vcombine.high %v4970_v40, %v4970_v40 }
 0x4dd   :  { %v6997_v57 = vmax.f32 %v6995_v6, %v6996_v7  ;;  %v7016_v15 = vmax.f32 %v7014_v41, %v7015_v14  ;;  %v6935_v35 = vsel %vm5338_vm11, %v4970_v40, -inf  ;;  %v5048_v22 = vcombine.high %v3928_v0, %v3928_v0 }
 0x4de   :  { %v7004_v50 = vmax.f32 %v7002_v31, %v7003_v29  ;;  %v7010_v17 = vrot.slane %v7009_v55, 1  ;;  %v4979_v33 = vcombine.high %v4977_v37, %v4977_v37  ;;  %v6936_v46 = vrot.slane %v6935_v35, 4 }
 0x4df   :  { %v7017_v3 = vrot.slane %v7016_v15, 1  ;;  %v7480_v52 = vsel %vm3352_vm2, %v6997_v57, -inf  ;;  %v6942_v39 = vsel %vm5338_vm11, %v4978_v21, -inf  ;;  %v6949_v42 = vsel %vm5338_vm11, %v4977_v37, -inf }
 0x4e0   :  { %v7011_v19 = vmax.f32 %v7009_v55, %v7010_v17  ;;  %v17798_v11 = vsel %vm3352_vm2, %v7004_v50, -inf  ;;  %v6937_v13 = vmax.f32 %v6935_v35, %v6936_v46  ;;  %v6943_v4 = vrot.slane %v6942_v39, 4 }
 0x4e1   :  { %v7018_v61 = vmax.f32 %v7016_v15, %v7017_v3  ;;  %v6950_v5 = vrot.slane %v6949_v42, 4  ;;  %v6956_v24 = vsel %vm5338_vm11, %v4979_v33, -inf  ;;  %v5055_v38 = vrot.slane %v3928_v0, %v14922_v36 }
 0x4e2   :  { %v17803_v25 = vsel %vm3352_vm2, %v7011_v19, -inf  ;;  %v6938_v34 = vrot.slane %v6937_v13, 2  ;;  %v6944_v54 = vmax.f32 %v6942_v39, %v6943_v4  ;;  %v6957_v44 = vrot.slane %v6956_v24, 4 }
 0x4e3   :  { %v17806_v48 = vsel %vm3352_vm2, %v7018_v61, -inf  ;;  %v6951_v6 = vmax.f32 %v6949_v42, %v6950_v5  ;;  %v5062_v41 = vrot.slane %v5048_v22, %v14922_v36  ;;  %v5063_v63 = vcombine.high %v5055_v38, %v5055_v38 }
 0x4e4   :  { %v6939_v31 = vmax.f32 %v6937_v13, %v6938_v34  ;;  %v6945_v8 = vrot.slane %v6944_v54, 2  ;;  %v6958_v2 = vmax.f32 %v6956_v24, %v6957_v44  ;;  %v7075_v40 = vsel %vm5338_vm11, %v5055_v38, -inf }
 0x4e5   :  { %v6952_v7 = vrot.slane %v6951_v6, 2  ;;  %v5064_v14 = vcombine.high %v5062_v41, %v5062_v41  ;;  %v7076_v20 = vrot.slane %v7075_v40, 4  ;;  %v7082_v0 = vsel %vm5338_vm11, %v5063_v63, -inf }
 0x4e6   :  { %v6940_v29 = vrot.slane %v6939_v31, 1  ;;  %v6946_v55 = vmax.f32 %v6944_v54, %v6945_v8  ;;  %v6959_v37 = vrot.slane %v6958_v2, 2  ;;  %v7083_v21 = vrot.slane %v7082_v0, 4 }
 0x4e7   :  { %v6953_v57 = vmax.f32 %v6951_v6, %v6952_v7  ;;  %v7077_v15 = vmax.f32 %v7075_v40, %v7076_v20  ;;  %v7089_v35 = vsel %vm5338_vm11, %v5062_v41, -inf  ;;  %v7096_v22 = vsel %vm5338_vm11, %v5064_v14, -inf  ;;  %v7843_v14 = vld [vmem:[#allocation3 + $0xa0] sm:$0xff] }
 0x4e8   :  { %v6941_v50 = vmax.f32 %v6939_v31, %v6940_v29  ;;  %v6947_v17 = vrot.slane %v6946_v55, 1  ;;  %v6960_v33 = vmax.f32 %v6958_v2, %v6959_v37  ;;  %v7084_v46 = vmax.f32 %v7082_v0, %v7083_v21  ;;  %v13117_v31 = vpop.permute.xlu0 %13116 }
 0x4e9   :  { %v6954_v3 = vrot.slane %v6953_v57, 1  ;;  %v7078_v39 = vrot.slane %v7077_v15, 2  ;;  %v7090_v42 = vrot.slane %v7089_v35, 4  ;;  %v7097_v19 = vrot.slane %v7096_v22, 4 }
 0x4ea   :  { %v6948_v13 = vmax.f32 %v6946_v55, %v6947_v17  ;;  %v6961_v4 = vrot.slane %v6960_v33, 1  ;;  %v7479_v61 = vsel %vm3352_vm2, %v6941_v50, -inf  ;;  %v7085_v5 = vrot.slane %v7084_v46, 2 }
 0x4eb   :  { %v6955_v24 = vmax.f32 %v6953_v57, %v6954_v3  ;;  %v7481_v38 = vmax.f32 %v7479_v61, %v7480_v52  ;;  %v7079_v34 = vmax.f32 %v7077_v15, %v7078_v39  ;;  %v7091_v54 = vmax.f32 %v7089_v35, %v7090_v42  ;;  %v13342_v57 = vld [vmem:[#allocation3 + $0xb0] sm:$0xff]  ;;  %v17828_v35 = vpop.permute.xlu1 %13141 }
 0x4ec   :  { %v6962_v44 = vmax.f32 %v6960_v33, %v6961_v4  ;;  %v7482_v6 = vsel %vm3352_vm2, %v6948_v13, -inf  ;;  %v7086_v41 = vmax.f32 %v7084_v46, %v7085_v5  ;;  %v7098_v63 = vmax.f32 %v7096_v22, %v7097_v19  ;;  %v17841_v39 = vpop.permute.xlu0 %13126  ;;  %v7907_v13 = vld [vmem:[#allocation3 + $0xb1] sm:$0xff]  ;;  %v13343_v4 = vld [vmem:[#allocation3 + $0xc1] sm:$0xff] }
 0x4ed   :  { %v7484_v8 = vmax.f32 %v7482_v6, %v17798_v11  ;;  %v7485_v2 = vsel %vm3352_vm2, %v6955_v24, -inf  ;;  %v7791_v40 = vsel %vm7689_vm15, %v7481_v38, %v17782_v49  ;;  %v7080_v7 = vrot.slane %v7079_v34, 1 }
 0x4ee   :  { %v7487_v20 = vmax.f32 %v7485_v2, %v17803_v25  ;;  %v7488_v52 = vsel %vm3352_vm2, %v6962_v44, -inf  ;;  %v7087_v0 = vrot.slane %v7086_v41, 1  ;;  %v7092_v29 = vrot.slane %v7091_v54, 2 }
 0x4ef   :  { %v7490_v55 = vmax.f32 %v7488_v52, %v17806_v48  ;;  %v7792_v37 = vsel %vm19006_vm6, %v7484_v8, %v7791_v40  ;;  %v7099_v21 = vrot.slane %v7098_v63, 2  ;;  %v3852_v11 = vadd.f32 %v17688_v53, %v17599_v56  ;;  %vm19016_vm6 = vmmov %vm19009_vm0 }
 0x4f0   :  { %v8373_v49 = vsel %vm3352_vm2, %v13342_v57, %v13124_v45  ;;  %v13119_v15 = vunpack.i.h.bf16 %v13117_v31  ;;  %v7793_v25 = vsel %vm19007_vm7, %v7487_v20, %v7792_v37  ;;  %v7093_v22 = vmax.f32 %v7091_v54, %v7092_v29  ;;  %vm19017_vm7 = vmmov %vm19009_vm0 }
 0x4f1   :  { %v8372_v48 = vsel %vm3352_vm2, %v7843_v14, %v13123_v23  ;;  %v13118_v50 = vunpack.i.l.bf16 %v13117_v31  ;;  %v7794_v17 = vsel %vm19008_vm3, %v7490_v55, %v7793_v25  ;;  %v7100_v33 = vmax.f32 %v7098_v63, %v7099_v21 }
 0x4f2   :  { %v17838_v56 = vsel %vm8380_vm10, %v8372_v48, %v13133_v60  ;;  %7833 = vst.msk [vmem:[#allocation3 + $0x111] sm:$0xff] %vm3352_vm2, %v7794_v17  ;;  %v7081_v45 = vmax.f32 %v7079_v34, %v7080_v7  ;;  %v7088_v46 = vmax.f32 %v7086_v41, %v7087_v0  ;;  %v7094_v3 = vrot.slane %v7093_v22, 1 }
 0x4f3   :  { %v17846_v58 = vsel %vm8380_vm10, %v8373_v49, %v13134_v12  ;;  %v13144_v23 = vunpack.i.h.bf16 %v17828_v35  ;;  %v7101_v42 = vrot.slane %v7100_v33, 1  ;;  %v3926_v19 = vmax.f32 %v3852_v11, 0.0 }
 0x4f4   :  { %v17850_v60 = vsel %vm3352_vm2, %v13343_v4, %v13119_v15  ;;  %v7095_v61 = vmax.f32 %v7093_v22, %v7094_v3  ;;  %v3863_v5 = vadd.f32 %v17688_v53, %v17601_v9  ;;  %v3855_v24 = vadd.f32 %v17688_v53, %v17606_v28 }
 0x4f5   :  { %v17857_v59 = vsel %vm3352_vm2, %v7907_v13, %v13118_v50  ;;  %v13129_v12 = vunpack.i.h.bf16 %v17841_v39  ;;  %v5014_v38 = vcombine.high %v3926_v19, %v3926_v19  ;;  %v5021_v34 = vrot.slane %v3926_v19, %v14922_v36 }
 0x4f6   :  { %v17862_v54 = vsel %vm3352_vm2, %v7081_v45, -inf  ;;  %v17865_v44 = vsel %vm3352_vm2, %v7088_v46, -inf  ;;  %v3929_v6 = vmax.f32 %v3863_v5, 0.0  ;;  %v3927_v41 = vmax.f32 %v3855_v24, 0.0 }
 0x4f7   :  { %v7102_v9 = vmax.f32 %v7100_v33, %v7101_v42  ;;  %v5028_v63 = vrot.slane %v5014_v38, %v14922_v36  ;;  %v5029_v28 = vcombine.high %v5021_v34, %v5021_v34  ;;  %v7019_v53 = vsel %vm5338_vm11, %v5021_v34, -inf }
 0x4f8   :  { %v17870_v31 = vsel %vm3352_vm2, %v7095_v61, -inf  ;;  %v7020_v8 = vrot.slane %v7019_v53, 4  ;;  %v5065_v2 = vcombine.high %v3929_v6, %v3929_v6  ;;  %v5072_v40 = vrot.slane %v3929_v6, %v14922_v36 }
 0x4f9   :  { %v5030_v7 = vcombine.high %v5028_v63, %v5028_v63  ;;  %v7026_v14 = vsel %vm5338_vm11, %v5029_v28, -inf  ;;  %v7033_v20 = vsel %vm5338_vm11, %v5028_v63, -inf  ;;  %v5031_v52 = vcombine.high %v3927_v41, %v3927_v41 }
 0x4fa   :  { %v7021_v0 = vmax.f32 %v7019_v53, %v7020_v8  ;;  %v7027_v29 = vrot.slane %v7026_v14, 4  ;;  %v7034_v55 = vrot.slane %v7033_v20, 4  ;;  %v5079_v37 = vrot.slane %v5065_v2, %v14922_v36 }
 0x4fb   :  { %v7040_v21 = vsel %vm5338_vm11, %v5030_v7, -inf  ;;  %v5080_v11 = vcombine.high %v5072_v40, %v5072_v40  ;;  %v7103_v57 = vsel %vm5338_vm11, %v5072_v40, -inf  ;;  %v17879_v49 = vrot.slane %v3927_v41, %v14922_v36 }
 0x4fc   :  { %v7022_v15 = vrot.slane %v7021_v0, 2  ;;  %v7028_v25 = vmax.f32 %v7026_v14, %v7027_v29  ;;  %v7035_v22 = vmax.f32 %v7033_v20, %v7034_v55  ;;  %v7041_v48 = vrot.slane %v7040_v21, 4 }
 0x4fd   :  { %v5081_v50 = vcombine.high %v5079_v37, %v5079_v37  ;;  %v7104_v17 = vrot.slane %v7103_v57, 4  ;;  %v7110_v33 = vsel %vm5338_vm11, %v5080_v11, -inf  ;;  %v7117_v45 = vsel %vm5338_vm11, %v5079_v37, -inf }
 0x4fe   :  { %v7023_v46 = vmax.f32 %v7021_v0, %v7022_v15  ;;  %v7029_v3 = vrot.slane %v7028_v25, 2  ;;  %v7036_v42 = vrot.slane %v7035_v22, 2  ;;  %v7042_v19 = vmax.f32 %v7040_v21, %v7041_v48 }
 0x4ff   :  { %v7105_v13 = vmax.f32 %v7103_v57, %v7104_v17  ;;  %v7111_v4 = vrot.slane %v7110_v33, 4  ;;  %v7118_v61 = vrot.slane %v7117_v45, 4  ;;  %v7124_v5 = vsel %vm5338_vm11, %v5081_v50, -inf }
 0x500   :  { %v7024_v24 = vrot.slane %v7023_v46, 1  ;;  %v7030_v38 = vmax.f32 %v7028_v25, %v7029_v3  ;;  %v7037_v34 = vmax.f32 %v7035_v22, %v7036_v42  ;;  %v7043_v6 = vrot.slane %v7042_v19, 2 }
 0x501   :  { %v7106_v41 = vrot.slane %v7105_v13, 2  ;;  %v7112_v63 = vmax.f32 %v7110_v33, %v7111_v4  ;;  %v7119_v28 = vmax.f32 %v7117_v45, %v7118_v61  ;;  %v7125_v53 = vrot.slane %v7124_v5, 4 }
 0x502   :  { %v7025_v8 = vmax.f32 %v7023_v46, %v7024_v24  ;;  %v7031_v2 = vrot.slane %v7030_v38, 1  ;;  %v7038_v40 = vrot.slane %v7037_v34, 1  ;;  %v7044_v7 = vmax.f32 %v7042_v19, %v7043_v6  ;;  %v13137_v19 = vpop.permute.xlu0 %13136 }
 0x503   :  { %v7107_v14 = vmax.f32 %v7105_v13, %v7106_v41  ;;  %v7113_v20 = vrot.slane %v7112_v63, 2  ;;  %v7120_v0 = vrot.slane %v7119_v28, 2  ;;  %v7126_v29 = vmax.f32 %v7124_v5, %v7125_v53 }
 0x504   :  { %v7032_v55 = vmax.f32 %v7030_v38, %v7031_v2  ;;  %v7039_v37 = vmax.f32 %v7037_v34, %v7038_v40  ;;  %v7045_v21 = vrot.slane %v7044_v7, 1  ;;  %v7491_v11 = vsel %vm3352_vm2, %v7025_v8, -inf }
 0x505   :  { %v7501_v57 = vsel %vm3352_vm2, %v7102_v9, -inf  ;;  %v7493_v15 = vmax.f32 %v7491_v11, %v17862_v54  ;;  %v7108_v25 = vrot.slane %v7107_v14, 1  ;;  %v5045_v22 = vrot.slane %v5031_v52, %v14922_v36 }
 0x506   :  { %v7046_v48 = vmax.f32 %v7044_v7, %v7045_v21  ;;  %v7494_v50 = vsel %vm3352_vm2, %v7032_v55, -inf  ;;  %v7497_v17 = vsel %vm3352_vm2, %v7039_v37, -inf  ;;  %v7127_v33 = vrot.slane %v7126_v29, 2 }
 0x507   :  { %v13143_v45 = vunpack.i.l.bf16 %v17828_v35  ;;  %v7496_v46 = vmax.f32 %v7494_v50, %v17865_v44  ;;  %v7499_v3 = vmax.f32 %v7497_v17, %v17870_v31  ;;  %v7114_v42 = vmax.f32 %v7112_v63, %v7113_v20 }
 0x508   :  { %v7500_v9 = vsel %vm3352_vm2, %v7046_v48, -inf  ;;  %v7121_v54 = vmax.f32 %v7119_v28, %v7120_v0  ;;  %v7128_v13 = vmax.f32 %v7126_v29, %v7127_v33  ;;  %v5046_v52 = vcombine.high %v17879_v49, %v17879_v49 }
 0x509   :  { %v13128_v4 = vunpack.i.l.bf16 %v17841_v39  ;;  %v8439_v61 = vsel %vm8380_vm10, %v17850_v60, %v13129_v12  ;;  %v7502_v5 = vmax.f32 %v7500_v9, %v7501_v57  ;;  %v7795_v44 = vsel %vm7683_vm12, %v7496_v46, %v7493_v15  ;;  %v13255_v9 = vld [vmem:[%s18843_s3 + $0x88] sm:$0xff]  }
 0x50a   :  { %v7796_v31 = vsel %vm7685_vm13, %v7499_v3, %v7795_v44  ;;  %v7109_v24 = vmax.f32 %v7107_v14, %v7108_v25  ;;  %v5047_v38 = vcombine.high %v5045_v22, %v5045_v22  ;;  %v13139_v34 = vunpack.i.h.bf16 %v13137_v19  ;;  %v17935_v44 = vld [vmem:[#allocation3 + $0x101] sm:$0xff]  ;;  %11671 = vmatprep.subr.bf16.mxu1 %v13255_v9 }
 0x50b   :  { %v7115_v6 = vrot.slane %v7114_v42, 1  ;;  %v7047_v41 = vsel %vm5338_vm11, %v17879_v49, -inf  ;;  %v7054_v63 = vsel %vm5338_vm11, %v5046_v52, -inf  ;;  %v7061_v28 = vsel %vm5338_vm11, %v5045_v22, -inf  ;;  %v17916_v22 = vld [vmem:[#allocation3 + $0x110] sm:$0xff]  ;;  %11672 = vmatpush3.bf16.msra.mxu1 %v13255_v9 }
 0x50c   :  { %v7122_v39 = vrot.slane %v7121_v54, 1  ;;  %v7129_v53 = vrot.slane %v7128_v13, 1  ;;  %v7048_v8 = vrot.slane %v7047_v41, 4  ;;  %v7055_v60 = vrot.slane %v7054_v63, 4  ;;  %v7846_v9 = vld [vmem:[#allocation3 + $0xd0] sm:$0xff] }
 0x50d   :  { %v7062_v12 = vrot.slane %v7061_v28, 4  ;;  %v7068_v2 = vsel %vm5338_vm11, %v5047_v38, -inf  ;;  %v17909_v40 = vsel %vm19009_vm0, %v7502_v5, %v7796_v31  ;;  %v13138_v7 = vunpack.i.l.bf16 %v13137_v19  ;;  %v17920_v19 = vld [vmem:[#allocation3 + $0x111] sm:$0xff]  ;;  %vm19010_vm11 = vmmov %vm19002_vm1 }
 0x50e   :  { %v8438_v14 = vsel %vm8380_vm10, %v17857_v59, %v13128_v4  ;;  %v7049_v20 = vmax.f32 %v7047_v41, %v7048_v8  ;;  %v7056_v49 = vmax.f32 %v7054_v63, %v7055_v60  ;;  %v7069_v0 = vrot.slane %v7068_v2, 4  ;;  %v17945_v38 = vld [vmem:[#allocation3 + $0x112] sm:$0xff]  ;;  %vm19012_vm1 = vmmov %vm19008_vm3 }
 0x50f   :  { %v7116_v29 = vmax.f32 %v7114_v42, %v7115_v6  ;;  %v7504_v55 = vsel %vm3352_vm2, %v7109_v24, -inf  ;;  %v7063_v37 = vmax.f32 %v7061_v28, %v7062_v12  ;;  %v8454_v21 = vsel %vm8397_vm4, %v8438_v14, %v13138_v7  ;;  %vm19018_vm3 = vmmov %vm19009_vm0 }
 0x510   :  { %v7050_v11 = vrot.slane %v7049_v20, 2  ;;  %v7057_v57 = vrot.slane %v7056_v49, 2  ;;  %v7070_v15 = vmax.f32 %v7068_v2, %v7069_v0  ;;  %v8455_v25 = vsel %vm8397_vm4, %v8439_v61, %v13139_v34  ;;  %v13152_v0 = vpop.permute.xlu1 %13151 }
 0x511   :  { %v7123_v48 = vmax.f32 %v7121_v54, %v7122_v39  ;;  %v7130_v50 = vmax.f32 %v7128_v13, %v7129_v53  ;;  %v7064_v17 = vrot.slane %v7063_v37, 2  ;;  %v8475_v59 = vpack.c.bf16 %v8455_v25, %v8454_v21  ;;  %v7947_v21 = vld [vmem:[#allocation3 + $0x130] sm:$0xff] }
 0x512   :  { %v7051_v33 = vmax.f32 %v7049_v20, %v7050_v11  ;;  %v7058_v46 = vmax.f32 %v7056_v49, %v7057_v57  ;;  %v7071_v3 = vrot.slane %v7070_v15, 2  ;;  %v8406_v42 = vsel %vm8397_vm4, %v17838_v56, %v13143_v45 }
 0x513   :  { %v7065_v52 = vmax.f32 %v7063_v37, %v7064_v17  ;;  %8725 = vmatprep.mubr.bf16.mxu1 %v8475_v59  ;;  %v8407_v54 = vsel %vm8397_vm4, %v17846_v58, %v13144_v23  ;;  %v17931_v13 = vadd.f32 %v17660_v16, %v17657_v30  ;;  %v13185_v56 = vpack.i.bf16 %v17916_v22, %v17779_v26 }
 0x514   :  { %v7052_v45 = vrot.slane %v7051_v33, 1  ;;  %v7059_v4 = vrot.slane %v7058_v46, 1  ;;  %v7072_v61 = vmax.f32 %v7070_v15, %v7071_v3  ;;  %v8474_v5 = vpack.c.bf16 %v8407_v54, %v8406_v42  ;;  %v7963_v3 = vld [vmem:[#allocation3 + $0x131] sm:$0xff]  ;;  %v7845_v42 = vld [vmem:[#allocation3 + $0xc0] sm:$0xff] }
 0x515   :  { %v7507_v31 = vsel %vm3352_vm2, %v7116_v29, -inf  ;;  %v7066_v35 = vrot.slane %v7065_v52, 1  ;;  %13186 = vrot.lane.b32.xlu0 %v13185_v56, %s13381_s24  ;;  %v13210_v58 = vpack.i.bf16 %v17920_v19, %v17935_v44  ;;  %v17943_v30 = vadd.f32 %v17672_v51, %v17667_v32  ;;  %v13162_v29 = vpop.permute.xlu1 %13161 }
 0x516   :  { %v7053_v16 = vmax.f32 %v7051_v33, %v7052_v45  ;;  %v7060_v23 = vmax.f32 %v7058_v46, %v7059_v4  ;;  %v7073_v24 = vrot.slane %v7072_v61, 1  ;;  %8726 = vmatmul.mubr.bf16.gmra.mrb[16].mxu1 %v8474_v5  ;;  %v17949_v34 = vadd.f32 %v17763_v43, %v17760_v18 }
 0x517   :  { %v7510_v6 = vsel %vm3352_vm2, %v7123_v48, -inf  ;;  %v7067_v41 = vmax.f32 %v7065_v52, %v7066_v35  ;;  %13211 = vrot.lane.b32.xlu1 %v13210_v58, %s13379_s1  ;;  %v7513_v63 = vsel %vm3352_vm2, %v7130_v50, -inf  ;;  %v13220_v18 = vpack.i.bf16 %v17945_v38, %v17774_v10  ;;  %v7909_v35 = vld [vmem:[#allocation3 + $0xd1] sm:$0xff] }
 0x518   :  { %v7074_v32 = vmax.f32 %v7072_v61, %v7073_v24  ;;  %v7503_v51 = vsel %vm3352_vm2, %v7053_v16, -inf  ;;  %v7506_v28 = vsel %vm3352_vm2, %v7060_v23, -inf  ;;  %v17963_v12 = vadd.f32 %v17770_v47, %v17767_v62  ;;  %v13147_v47 = vpop.permute.xlu0 %13146 }
 0x519   :  { %v7505_v39 = vmax.f32 %v7503_v51, %v7504_v55  ;;  %v7508_v53 = vmax.f32 %v7506_v28, %v7507_v31  ;;  %v7509_v8 = vsel %vm3352_vm2, %v7067_v41, -inf  ;;  %13196 = vrot.lane.b32.xlu0 %v13210_v58, %s13382_s26  ;;  %v13154_v11 = vunpack.i.h.bf16 %v13152_v0  ;;  %v13172_v15 = vpop.permute.xlu1 %13171 }
 0x51a   :  { %v7511_v43 = vmax.f32 %v7509_v8, %v7510_v6  ;;  %v7512_v60 = vsel %vm3352_vm2, %v7074_v32, -inf  ;;  %v13153_v57 = vunpack.i.l.bf16 %v13152_v0  ;;  %v13164_v25 = vunpack.i.h.bf16 %v13162_v29 }
 0x51b   :  { %v7514_v2 = vmax.f32 %v7512_v60, %v7513_v63  ;;  %v7798_v7 = vsel %vm7689_vm15, %v7505_v39, %v17909_v40  ;;  %13221 = vrot.lane.b32.xlu1 %v13220_v18, %s13381_s24  ;;  %v13163_v48 = vunpack.i.l.bf16 %v13162_v29  ;;  %v13149_v59 = vunpack.i.h.bf16 %v13147_v47 }
 0x51c   :  { %v7799_v14 = vsel %vm19010_vm11, %v7508_v53, %v7798_v7  ;;  %v13148_v33 = vunpack.i.l.bf16 %v13147_v47  ;;  %v13174_v52 = vunpack.i.h.bf16 %v13172_v15  ;;  %v13173_v54 = vunpack.i.l.bf16 %v13172_v15  ;;  %vm19019_vm11 = vmmov %vm19009_vm0 }
 0x51d   :  { %v7800_v20 = vsel %vm19011_vm14, %v7511_v43, %v7799_v14  ;;  %v8375_v4 = vsel %vm3352_vm2, %v7846_v9, %v13154_v11  ;;  %v8374_v61 = vsel %vm3352_vm2, %v7845_v42, %v13153_v57  ;;  %v8425_v23 = vsel %vm3352_vm2, %v17693_v27, %v13149_v59 }
 0x51e   :  { %v7801_v49 = vsel %vm19012_vm1, %v7514_v2, %v7800_v20  ;;  %v8391_v5 = vsel %vm8380_vm10, %v8374_v61, %v13163_v48  ;;  %v8392_v31 = vsel %vm8380_vm10, %v8375_v4, %v13164_v25  ;;  %v8424_v24 = vsel %vm3352_vm2, %v7909_v35, %v13148_v33  ;;  %v7847_v33 = vld [vmem:[#allocation3 + $0xe0] sm:$0xff]  ;;  %v13345_v35 = vld [vmem:[#allocation3 + $0xf1] sm:$0xff] }
 0x51f   :  { %7834 = vst.msk [vmem:[#allocation3 + $0x121] sm:$0xff] %vm3352_vm2, %v7801_v49  ;;  %v8408_v28 = vsel %vm8397_vm4, %v8391_v5, %v13173_v54  ;;  %v8409_v39 = vsel %vm8397_vm4, %v8392_v31, %v13174_v52  ;;  %v13344_v54 = vld [vmem:[#allocation3 + $0xf0] sm:$0xff]  ;;  %vm9768_vm15 = vcmask 521216  }
 0x520   :  { %v8477_v7 = vpack.c.bf16 %v8409_v39, %v8408_v28  ;;  %9771 = vst.msk [vmem:[#allocation4 + $0x10] sm:$0x3f] %vm9768_vm15, %v13371_v1  ;;  %9769 = vst.msk [vmem:[#allocation4] sm:$0x3f] %vm9768_vm15, %v13371_v1 }
 0x521   :  { %9770 = vst.msk [vmem:[#allocation4 + $0x8] sm:$0x3f] %vm9768_vm15, %v13371_v1  ;;  %9772 = vst.msk [vmem:[#allocation4 + $0x18] sm:$0x3f] %vm9768_vm15, %v13371_v1 }
 0x522   :  { %9773 = vst.msk [vmem:[#allocation4 + $0x20] sm:$0x3f] %vm9768_vm15, %v13371_v1  ;;  %9774 = vst.msk [vmem:[#allocation4 + $0x28] sm:$0x3f] %vm9768_vm15, %v13371_v1 }
 0x523   :  { %9775 = vst.msk [vmem:[#allocation4 + $0x30] sm:$0x3f] %vm9768_vm15, %v13371_v1  ;;  %9776 = vst.msk [vmem:[#allocation4 + $0x38] sm:$0x3f] %vm9768_vm15, %v13371_v1 }
 0x524   :  { %9777 = vst.msk [vmem:[#allocation4 + $0x40] sm:$0x3f] %vm9768_vm15, %v13371_v1  ;;  %9778 = vst.msk [vmem:[#allocation4 + $0x48] sm:$0x3f] %vm9768_vm15, %v13371_v1 }
 0x525   :  { %9779 = vst.msk [vmem:[#allocation4 + $0x50] sm:$0x3f] %vm9768_vm15, %v13371_v1  ;;  %9780 = vst.msk [vmem:[#allocation4 + $0x58] sm:$0x3f] %vm9768_vm15, %v13371_v1  ;;  %v11269_v1 = vld [vmem:[%s18844_s4] ss:$0 sm:$0xff] }
 0x526   :  { %v17972_v55 = vld [vmem:[#allocation3 + $0x122] sm:$0xff] }
 0x527   :  { %v7898_v62 = vld [vmem:[#allocation3 + $0x120] sm:$0xff]  ;;  %v13205_v37 = vpack.i.bf16 %v17972_v55, %v17945_v38 }
 0x528   :  { %v13230_v40 = vpack.i.bf16 %v7898_v62, %v17916_v22  ;;  %v13215_v50 = vpack.i.bf16 %v7947_v21, %v7898_v62  ;;  %v17979_v46 = vld [vmem:[#allocation3 + $0x121] sm:$0xff] }
 0x529   :  { %13206 = vrot.lane.b32.xlu0 %v13205_v37, %s13379_s1  ;;  %v13225_v58 = vpack.i.bf16 %v7963_v3, %v17979_v46 }
 0x52a   :  { %13231 = vrot.lane.b32.xlu1 %v13230_v40, %s13382_s26 }
 0x52b   :  { %v13157_v17 = vpop.permute.xlu0 %13156  ;;  %v13182_v37 = vpop.permute.xlu1 %13181 }
 0x52c   :  { %v13159_v56 = vunpack.i.h.bf16 %v13157_v17  ;;  %v13158_v45 = vunpack.i.l.bf16 %v13157_v17  ;;  %v13184_v11 = vunpack.i.h.bf16 %v13182_v37  ;;  %v13183_v57 = vunpack.i.l.bf16 %v13182_v37 }
 0x52d   :  { %13216 = vrot.lane.b32.xlu0 %v13215_v50, %s13381_s24 }
 0x52e   :  { %v8440_v32 = vsel %vm8380_vm10, %v8424_v24, %v13158_v45  ;;  %v8441_v51 = vsel %vm8380_vm10, %v8425_v23, %v13159_v56  ;;  %v8377_v56 = vsel %vm3352_vm2, %v13344_v54, %v13184_v11  ;;  %v8376_v45 = vsel %vm3352_vm2, %v7847_v33, %v13183_v57  ;;  %v7965_v54 = vld [vmem:[#allocation3 + $0x32] sm:$0xff] }
 0x52f   :  { %v13167_v16 = vpop.permute.xlu0 %13166  ;;  %v13192_v40 = vpop.permute.xlu1 %13191 }
 0x530   :  { %v13169_v6 = vunpack.i.h.bf16 %v13167_v16  ;;  %v13168_v41 = vunpack.i.l.bf16 %v13167_v16  ;;  %v13194_v25 = vunpack.i.h.bf16 %v13192_v40  ;;  %v13193_v48 = vunpack.i.l.bf16 %v13192_v40 }
 0x531   :  { %13226 = vrot.lane.b32.xlu0 %v13225_v58, %s13382_s26 }
 0x532   :  { %v11447_v63 = vpop.f32.mrb[8].mxu1  ;;  %v8456_v8 = vsel %vm8397_vm4, %v8440_v32, %v13168_v41  ;;  %v8457_v27 = vsel %vm8397_vm4, %v8441_v51, %v13169_v6  ;;  %v8393_v4 = vsel %vm8380_vm10, %v8376_v45, %v13193_v48  ;;  %v8394_v61 = vsel %vm8380_vm10, %v8377_v56, %v13194_v25  ;;  %v7964_v45 = vld [vmem:[#allocation3 + $0x22] sm:$0xff] }
 0x533   :  { %v11448_v53 = vpop.f32.mrb[9].mxu1  ;;  %v8478_v43 = vpack.c.bf16 %v8457_v27, %v8456_v8 }
 0x534   :  { %v11450_v18 = vpop.f32.mrb[10].mxu1  ;;  %v17997_v60 = vadd.f32 %v11448_v53, %v11447_v63 }
 0x535   :  { %v11451_v2 = vpop.f32.mrb[11].mxu1  ;;  %8733 = vmatprep.mubr.bf16.mxu1 %v8478_v43 }
 0x536   :  { %v17999_v14 = vadd.f32 %v11451_v2, %v11450_v18  ;;  %8734 = vmatmul.mubr.bf16.gmra.mrb[20].mxu1 %v8477_v7 }
 0x54c   :  { %v13177_v21 = vpop.permute.xlu0 %13176 }
 0x54d   :  { %v13202_v15 = vpop.permute.xlu1 %13201  ;;  %v13179_v17 = vunpack.i.h.bf16 %v13177_v21  ;;  %v13178_v59 = vunpack.i.l.bf16 %v13177_v21 }
 0x54e   :  { %v13204_v3 = vunpack.i.h.bf16 %v13202_v15  ;;  %v13203_v42 = vunpack.i.l.bf16 %v13202_v15 }
 0x54f   :  { %v8427_v31 = vsel %vm3352_vm2, %v17935_v44, %v13179_v17  ;;  %v8426_v58 = vsel %vm3352_vm2, %v13345_v35, %v13178_v59  ;;  %v7968_v35 = vld [vmem:[#allocation3 + $0x62] sm:$0xff] }
 0x550   :  { %v8410_v41 = vsel %vm8397_vm4, %v8393_v4, %v13203_v42  ;;  %v8411_v63 = vsel %vm8397_vm4, %v8394_v61, %v13204_v3  ;;  %v7967_v4 = vld [vmem:[#allocation3 + $0x52] sm:$0xff] }
 0x551   :  { %v8480_v39 = vpack.c.bf16 %v8411_v63, %v8410_v41  ;;  %v7969_v61 = vld [vmem:[#allocation3 + $0x72] sm:$0xff]  ;;  %v7972_v41 = vld [vmem:[#allocation3 + $0xc2] sm:$0xff] }
 0x564   :  { %v11453_v20 = vpop.f32.mrb[12].mxu1 }
 0x565   :  { %v11454_v49 = vpop.f32.mrb[13].mxu1 }
 0x566   :  { %v18001_v0 = vadd.f32 %v11454_v49, %v11453_v20  ;;  %v11456_v29 = vpop.f32.mrb[14].mxu1 }
 0x567   :  { %v11457_v62 = vpop.f32.mrb[15].mxu1 }
 0x568   :  { %v18003_v47 = vadd.f32 %v11457_v62, %v11456_v29 }
 0x587   :  { %v13187_v50 = vpop.permute.xlu0 %13186 }
 0x588   :  { %v13189_v9 = vunpack.i.h.bf16 %v13187_v50  ;;  %v13188_v52 = vunpack.i.l.bf16 %v13187_v50 }
 0x589   :  { %v13212_v44 = vpop.permute.xlu1 %13211 }
 0x58a   :  { %v8442_v24 = vsel %vm8380_vm10, %v8426_v58, %v13188_v52  ;;  %v8443_v6 = vsel %vm8380_vm10, %v8427_v31, %v13189_v9  ;;  %v13214_v27 = vunpack.i.h.bf16 %v13212_v44  ;;  %v13213_v18 = vunpack.i.l.bf16 %v13212_v44  ;;  %v7979_v44 = vld [vmem:[#allocation3 + $0x132] sm:$0xff] }
 0x58b   :  { %v13197_v5 = vpop.permute.xlu0 %13196  ;;  %v8470_v58 = vpack.c.bf16 %v7969_v61, %v7968_v35 }
 0x58c   :  { %v13199_v16 = vunpack.i.h.bf16 %v13197_v5  ;;  %v13198_v23 = vunpack.i.l.bf16 %v13197_v5  ;;  %v8379_v11 = vsel %vm3352_vm2, %v17916_v22, %v13214_v27  ;;  %v8378_v57 = vsel %vm3352_vm2, %v17779_v26, %v13213_v18  ;;  %v7966_v5 = vld [vmem:[#allocation3 + $0x42] sm:$0xff] }
 0x58d   :  { %v13222_v53 = vpop.permute.xlu1 %13221  ;;  %v8467_v31 = vpack.c.bf16 %v7967_v4, %v7966_v5 }
 0x58e   :  { %v8458_v32 = vsel %vm8397_vm4, %v8442_v24, %v13198_v23  ;;  %v8459_v51 = vsel %vm8397_vm4, %v8443_v6, %v13199_v16  ;;  %v13224_v2 = vunpack.i.h.bf16 %v13222_v53  ;;  %v13223_v7 = vunpack.i.l.bf16 %v13222_v53  ;;  %v7970_v16 = vld [vmem:[#allocation3 + $0x82] sm:$0xff]  ;;  %v7971_v23 = vld [vmem:[#allocation3 + $0x92] sm:$0xff] }
 0x58f   :  { %v8481_v28 = vpack.c.bf16 %v8459_v51, %v8458_v32  ;;  %v7973_v24 = vld [vmem:[#allocation3 + $0xd2] sm:$0xff]  ;;  %v8473_v6 = vpack.c.bf16 %v7971_v23, %v7970_v16  ;;  %v7974_v51 = vld [vmem:[#allocation3 + $0xe2] sm:$0xff]  ;;  %v8485_v53 = vpack.c.bf16 %v7979_v44, %v17972_v55 }
 0x590   :  { %v8395_v15 = vsel %vm8380_vm10, %v8378_v57, %v13223_v7  ;;  %v8396_v25 = vsel %vm8380_vm10, %v8379_v11, %v13224_v2  ;;  %v8476_v63 = vpack.c.bf16 %v7973_v24, %v7972_v41  ;;  %v7975_v32 = vld [vmem:[#allocation3 + $0xf2] sm:$0xff] }
 0x591   :  { %8741 = vmatprep.mubr.bf16.mxu1 %v8481_v28  ;;  %v8479_v28 = vpack.c.bf16 %v7975_v32, %v7974_v51 }
 0x592   :  { %8742 = vmatmul.mubr.bf16.gmra.mrb[24].mxu1 %v8480_v39  ;;  %v8482_v39 = vpack.c.bf16 %v17945_v38, %v17774_v10 }
 0x59b   :  { %v13207_v8 = vpop.permute.xlu0 %13206 }
 0x59c   :  { %v13232_v43 = vpop.permute.xlu1 %13231  ;;  %v13209_v49 = vunpack.i.h.bf16 %v13207_v8  ;;  %v13208_v29 = vunpack.i.l.bf16 %v13207_v8 }
 0x59d   :  { %v13234_v62 = vunpack.i.h.bf16 %v13232_v43  ;;  %v13233_v37 = vunpack.i.l.bf16 %v13232_v43 }
 0x59e   :  { %v8429_v50 = vsel %vm3352_vm2, %v17979_v46, %v13209_v49  ;;  %v8428_v17 = vsel %vm3352_vm2, %v17920_v19, %v13208_v29  ;;  %v8464_v19 = vpack.c.bf16 %v7965_v54, %v7964_v45 }
 0x59f   :  { %v13217_v20 = vpop.permute.xlu0 %13216  ;;  %v8412_v42 = vsel %vm8397_vm4, %v8395_v15, %v13233_v37  ;;  %v8413_v26 = vsel %vm8397_vm4, %v8396_v25, %v13234_v62 }
 0x5a0   :  { %v13219_v40 = vunpack.i.h.bf16 %v13217_v20  ;;  %v13218_v21 = vunpack.i.l.bf16 %v13217_v20  ;;  %v8483_v46 = vpack.c.bf16 %v8413_v26, %v8412_v42 }
 0x5a2   :  { %v8444_v3 = vsel %vm8380_vm10, %v8428_v17, %v13218_v21  ;;  %v8445_v22 = vsel %vm8380_vm10, %v8429_v50, %v13219_v40 }
 0x5a3   :  { %v13227_v48 = vpop.permute.xlu0 %13226 }
 0x5a4   :  { %v13229_v59 = vunpack.i.h.bf16 %v13227_v48  ;;  %v13228_v33 = vunpack.i.l.bf16 %v13227_v48 }
 0x5a6   :  { %v8460_v9 = vsel %vm8397_vm4, %v8444_v3, %v13228_v33  ;;  %v8461_v52 = vsel %vm8397_vm4, %v8445_v22, %v13229_v59  ;;  %v8704_v33 = vadd.f32 %v17949_v34, %v11269_v1  ;;  %v8696_v22 = vadd.f32 %v17931_v13, %v11269_v1 }
 0x5a7   :  { %v8484_v56 = vpack.c.bf16 %v8461_v52, %v8460_v9  ;;  %v8707_v9 = vadd.f32 %v17963_v12, %v11269_v1  ;;  %v18078_v34 = vadd.f32 %v17997_v60, %v11269_v1  ;;  %v18081_v13 = vadd.f32 %v18003_v47, %v11269_v1 }
 0x5a8   :  { %v18084_v12 = vadd.f32 %v17999_v14, %v11269_v1  ;;  %vm9846_vm4 = vcmask 519168  }
 0x5a9   :  { %8749 = vmatprep.mubr.bf16.mxu1 %v8484_v56  ;;  %v8699_v56 = vadd.f32 %v17943_v30, %v11269_v1 }
 0x5aa   :  { %8750 = vmatmul.mubr.bf16.gmra.mrb[28].mxu1 %v8483_v46  ;;  %v18075_v46 = vadd.f32 %v18001_v0, %v11269_v1 }
 0x5ab   :  { %11673 = vmatprep.mubr.msk.bf16.mxu1 %vm3352_vm2, %v8464_v19 }
 0x5b2   :  { %11674 = vmatmul.mubr.msk.bf16.vlgmr.msra.gmra.mrb[32].mxu1 %vm3352_vm2, %v8467_v31 }
 0x5b3   :  { %11677 = vmatprep.mubr.msk.bf16.mxu1 %vm3352_vm2, %v8470_v58 }
 0x5ba   :  { %11678 = vmatmul.mubr.msk.bf16.gmra.mrb[36].mxu1 %vm3352_vm2, %v8473_v6 }
 0x5bb   :  { %11681 = vmatprep.mubr.msk.bf16.mxu1 %vm3352_vm2, %v8476_v63 }
 0x5c2   :  { %11682 = vmatmul.mubr.msk.bf16.gmra.mrb[40].mxu1 %vm3352_vm2, %v8479_v28 }
 0x5c3   :  { %11685 = vmatprep.mubr.msk.bf16.mxu1 %vm3352_vm2, %v8482_v39 }
 0x5ca   :  { %11686 = vmatmul.mubr.msk.bf16.gmra.mrb[44].mxu1 %vm3352_vm2, %v8485_v53  ;;  %vm9223_vm2 = vcmask 517120  }
 0x5e9   :  { %v11459_v8 = vpop.f32.mrb[16].mxu1 }
 0x5ea   :  { %v11460_v27 = vpop.f32.mrb[17].mxu1 }
 0x5eb   :  { %v11461_v18 = vadd.f32 %v11460_v27, %v11459_v8  ;;  %v11462_v43 = vpop.f32.mrb[18].mxu1 }
 0x5ec   :  { %v11463_v2 = vpop.f32.mrb[19].mxu1 }
 0x5ed   :  { %v18045_v7 = vadd.f32 %v11463_v2, %v11462_v43  ;;  %v18091_v58 = vadd.f32 %v11461_v18, %v11269_v1 }
 0x609   :  { %v11465_v20 = vpop.f32.mrb[20].mxu1 }
 0x60a   :  { %v11466_v49 = vpop.f32.mrb[21].mxu1 }
 0x60b   :  { %v11467_v29 = vadd.f32 %v11466_v49, %v11465_v20  ;;  %v11468_v10 = vpop.f32.mrb[22].mxu1 }
 0x60c   :  { %v11469_v38 = vpop.f32.mrb[23].mxu1 }
 0x60d   :  { %v11470_v62 = vadd.f32 %v11469_v38, %v11468_v10  ;;  %v18086_v31 = vadd.f32 %v11467_v29, %v11269_v1 }
 0x60f   :  { %v18096_v47 = vadd.f32 %v11470_v62, %v11269_v1 }
 0x665   :  { %v11471_v55 = vpop.f32.mrb[24].mxu1 }
 0x666   :  { %v11472_v37 = vpop.f32.mrb[25].mxu1 }
 0x667   :  { %v18059_v40 = vadd.f32 %v11472_v37, %v11471_v55  ;;  %v11474_v21 = vpop.f32.mrb[26].mxu1 }
 0x668   :  { %v11475_v11 = vpop.f32.mrb[27].mxu1 }
 0x669   :  { %v18061_v57 = vadd.f32 %v11475_v11, %v11474_v21 }
 0x67d   :  { %v11477_v15 = vpop.f32.mrb[28].mxu1 }
 0x67e   :  { %v11478_v25 = vpop.f32.mrb[29].mxu1 }
 0x67f   :  { %v18063_v48 = vadd.f32 %v11478_v25, %v11477_v15  ;;  %v11480_v50 = vpop.f32.mrb[30].mxu1 }
 0x680   :  { %v11481_v17 = vpop.f32.mrb[31].mxu1 }
 0x681   :  { %v18065_v59 = vadd.f32 %v11481_v17, %v11480_v50 }
 0x685   :  { %v11675_v3 = vpop.f32.mrb[32].mxu1 }
 0x686   :  { %v8801_v42 = vadd.f32 %v11675_v3, %v8704_v33  ;;  %v8792_v26 = vpop.f32.mrb[33].mxu1 }
 0x687   :  { %v8793_v52 = vadd.f32 %v8792_v26, %v8696_v22  ;;  %v11676_v54 = vpop.f32.mrb[34].mxu1 }
 0x688   :  { %v8857_v45 = vmax.f32 %v8801_v42, 0.0  ;;  %v8804_v19 = vadd.f32 %v11676_v54, %v8707_v9  ;;  %v8795_v4 = vpop.f32.mrb[35].mxu1 }
 0x689   :  { %v8855_v61 = vmax.f32 %v8793_v52, 0.0  ;;  %v8796_v5 = vadd.f32 %v8795_v4, %v8699_v56 }
 0x68a   :  { %v8921_v30 = vcombine.high %v8857_v45, %v8857_v45  ;;  %v8928_v0 = vrot.slane %v8857_v45, %v14922_v36  ;;  %v18089_v35 = vmax.f32 %v8804_v19, 0.0 }
 0x68b   :  { %v8887_v16 = vcombine.high %v8855_v61, %v8855_v61  ;;  %v8894_v60 = vrot.slane %v8855_v61, %v14922_v36  ;;  %v18094_v23 = vmax.f32 %v8796_v5, 0.0 }
 0x68c   :  { %v8935_v24 = vrot.slane %v8921_v30, %v14922_v36  ;;  %v8936_v14 = vcombine.high %v8928_v0, %v8928_v0  ;;  %v9280_v6 = vsel %vm9223_vm2, %v8928_v0, -inf  ;;  %v8938_v41 = vcombine.high %v18089_v35, %v18089_v35 }
 0x68d   :  { %v9281_v63 = vrot.slane %v9280_v6, 4  ;;  %v8901_v32 = vrot.slane %v8887_v16, %v14922_v36  ;;  %v8902_v51 = vcombine.high %v8894_v60, %v8894_v60  ;;  %v9224_v28 = vsel %vm9223_vm2, %v8894_v60, -inf  ;;  %v18104_v39 = vpop.f32.mrb[36].mxu1 }
 0x68e   :  { %v8937_v44 = vcombine.high %v8935_v24, %v8935_v24  ;;  %v9287_v53 = vsel %vm9223_vm2, %v8936_v14, -inf  ;;  %v9294_v8 = vsel %vm9223_vm2, %v8935_v24, -inf  ;;  %v9225_v27 = vrot.slane %v9224_v28, 4  ;;  %v18108_v18 = vpop.f32.mrb[37].mxu1 }
 0x68f   :  { %v9282_v43 = vmax.f32 %v9280_v6, %v9281_v63  ;;  %v9288_v2 = vrot.slane %v9287_v53, 4  ;;  %v9295_v20 = vrot.slane %v9294_v8, 4  ;;  %v8903_v49 = vcombine.high %v8901_v32, %v8901_v32  ;;  %v18110_v29 = vpop.f32.mrb[38].mxu1 }
 0x690   :  { %v9301_v10 = vsel %vm9223_vm2, %v8937_v44, -inf  ;;  %v9226_v38 = vmax.f32 %v9224_v28, %v9225_v27  ;;  %v9231_v62 = vsel %vm9223_vm2, %v8902_v51, -inf  ;;  %v9238_v55 = vsel %vm9223_vm2, %v8901_v32, -inf  ;;  %v18115_v37 = vpop.f32.mrb[39].mxu1 }
 0x691   :  { %v9283_v21 = vrot.slane %v9282_v43, 2  ;;  %v9289_v11 = vmax.f32 %v9287_v53, %v9288_v2  ;;  %v9296_v15 = vmax.f32 %v9294_v8, %v9295_v20  ;;  %v9302_v25 = vrot.slane %v9301_v10, 4 }
 0x692   :  { %v9227_v50 = vrot.slane %v9226_v38, 2  ;;  %v9232_v17 = vrot.slane %v9231_v62, 4  ;;  %v9239_v1 = vrot.slane %v9238_v55, 4  ;;  %v9245_v33 = vsel %vm9223_vm2, %v8903_v49, -inf }
 0x693   :  { %v9284_v3 = vmax.f32 %v9282_v43, %v9283_v21  ;;  %v9290_v22 = vrot.slane %v9289_v11, 2  ;;  %v9297_v42 = vrot.slane %v9296_v15, 2  ;;  %v9303_v26 = vmax.f32 %v9301_v10, %v9302_v25 }
 0x694   :  { %v9228_v9 = vmax.f32 %v9226_v38, %v9227_v50  ;;  %v9233_v52 = vmax.f32 %v9231_v62, %v9232_v17  ;;  %v9240_v54 = vmax.f32 %v9238_v55, %v9239_v1  ;;  %v9246_v56 = vrot.slane %v9245_v33, 4 }
 0x695   :  { %v9285_v45 = vrot.slane %v9284_v3, 1  ;;  %v9291_v19 = vmax.f32 %v9289_v11, %v9290_v22  ;;  %v9298_v4 = vmax.f32 %v9296_v15, %v9297_v42  ;;  %v9304_v61 = vrot.slane %v9303_v26, 2  ;;  %v18118_v5 = vpop.f32.mrb[40].mxu1 }
 0x696   :  { %v9229_v30 = vrot.slane %v9228_v9, 1  ;;  %v9234_v0 = vrot.slane %v9233_v52, 2  ;;  %v9241_v16 = vrot.slane %v9240_v54, 2  ;;  %v9247_v60 = vmax.f32 %v9245_v33, %v9246_v56  ;;  %v18120_v24 = vpop.f32.mrb[41].mxu1 }
 0x697   :  { %v9286_v14 = vmax.f32 %v9284_v3, %v9285_v45  ;;  %v9292_v6 = vrot.slane %v9291_v19, 1  ;;  %v9299_v63 = vrot.slane %v9298_v4, 1  ;;  %v9305_v32 = vmax.f32 %v9303_v26, %v9304_v61  ;;  %v18122_v51 = vpop.f32.mrb[42].mxu1 }
 0x698   :  { %v9230_v28 = vmax.f32 %v9228_v9, %v9229_v30  ;;  %v9235_v44 = vmax.f32 %v9233_v52, %v9234_v0  ;;  %v9242_v53 = vmax.f32 %v9240_v54, %v9241_v16  ;;  %v9248_v8 = vrot.slane %v9247_v60, 2  ;;  %v18124_v27 = vpop.f32.mrb[43].mxu1 }
 0x699   :  { %v9293_v43 = vmax.f32 %v9291_v19, %v9292_v6  ;;  %v9300_v2 = vmax.f32 %v9298_v4, %v9299_v63  ;;  %v9306_v20 = vrot.slane %v9305_v32, 1  ;;  %v18127_v49 = vsel %vm8380_vm10, %v9286_v14, -inf }
 0x69a   :  { %v9236_v10 = vrot.slane %v9235_v44, 1  ;;  %v9243_v38 = vrot.slane %v9242_v53, 1  ;;  %v9249_v62 = vmax.f32 %v9247_v60, %v9248_v8  ;;  %v18130_v55 = vsel %vm8380_vm10, %v9230_v28, -inf }
 0x69b   :  { %v9307_v21 = vmax.f32 %v9305_v32, %v9306_v20  ;;  %v18133_v11 = vsel %vm8380_vm10, %v9293_v43, -inf  ;;  %v18136_v15 = vsel %vm8380_vm10, %v9300_v2, -inf  ;;  %v8945_v25 = vrot.slane %v18089_v35, %v14922_v36 }
 0x69c   :  { %v9237_v50 = vmax.f32 %v9235_v44, %v9236_v10  ;;  %v9244_v17 = vmax.f32 %v9242_v53, %v9243_v38  ;;  %v9250_v1 = vrot.slane %v9249_v62, 1  ;;  %v8952_v33 = vrot.slane %v8938_v41, %v14922_v36 }
 0x69d   :  { %v18145_v3 = vsel %vm8380_vm10, %v9307_v21, -inf  ;;  %v8953_v22 = vcombine.high %v8945_v25, %v8945_v25  ;;  %v9308_v42 = vsel %vm9223_vm2, %v8945_v25, -inf  ;;  %v8904_v26 = vcombine.high %v18094_v23, %v18094_v23  ;;  %v18150_v9 = vpop.f32.mrb[44].mxu1 }
 0x69e   :  { %v9251_v52 = vmax.f32 %v9249_v62, %v9250_v1  ;;  %v18153_v54 = vsel %vm8380_vm10, %v9237_v50, -inf  ;;  %v18156_v56 = vsel %vm8380_vm10, %v9244_v17, -inf  ;;  %v8954_v35 = vcombine.high %v8952_v33, %v8952_v33  ;;  %v18158_v41 = vpop.f32.mrb[45].mxu1 }
 0x69f   :  { %v9309_v45 = vrot.slane %v9308_v42, 4  ;;  %v9315_v19 = vsel %vm9223_vm2, %v8953_v22, -inf  ;;  %v9322_v4 = vsel %vm9223_vm2, %v8952_v33, -inf  ;;  %v8911_v61 = vrot.slane %v18094_v23, %v14922_v36  ;;  %v18172_v23 = vpop.f32.mrb[46].mxu1 }
 0x6a0   :  { %v18165_v30 = vsel %vm8380_vm10, %v9251_v52, -inf  ;;  %v9316_v0 = vrot.slane %v9315_v19, 4  ;;  %v9323_v16 = vrot.slane %v9322_v4, 4  ;;  %v9329_v60 = vsel %vm9223_vm2, %v8954_v35, -inf }
 0x6a1   :  { %v9310_v14 = vmax.f32 %v9308_v42, %v9309_v45  ;;  %v9330_v6 = vrot.slane %v9329_v60, 4  ;;  %v8918_v63 = vrot.slane %v8904_v26, %v14922_v36  ;;  %v8919_v32 = vcombine.high %v8911_v61, %v8911_v61 }
 0x6a2   :  { %v9317_v28 = vmax.f32 %v9315_v19, %v9316_v0  ;;  %v9324_v44 = vmax.f32 %v9322_v4, %v9323_v16  ;;  %v9252_v53 = vsel %vm9223_vm2, %v8911_v61, -inf  ;;  %v8817_v8 = vadd.f32 %v18104_v39, %v18075_v46 }
 0x6a3   :  { %v9311_v43 = vrot.slane %v9310_v14, 2  ;;  %v9331_v2 = vmax.f32 %v9329_v60, %v9330_v6  ;;  %v8920_v20 = vcombine.high %v8918_v63, %v8918_v63  ;;  %v9253_v10 = vrot.slane %v9252_v53, 4 }
 0x6a4   :  { %v9318_v38 = vrot.slane %v9317_v28, 2  ;;  %v9325_v62 = vrot.slane %v9324_v44, 2  ;;  %v9259_v21 = vsel %vm9223_vm2, %v8919_v32, -inf  ;;  %v9266_v25 = vsel %vm9223_vm2, %v8918_v63, -inf }
 0x6a5   :  { %v9312_v50 = vmax.f32 %v9310_v14, %v9311_v43  ;;  %v9332_v17 = vrot.slane %v9331_v2, 2  ;;  %v9254_v1 = vmax.f32 %v9252_v53, %v9253_v10  ;;  %v9260_v33 = vrot.slane %v9259_v21, 4 }
 0x6a6   :  { %v9319_v22 = vmax.f32 %v9317_v28, %v9318_v38  ;;  %v9326_v42 = vmax.f32 %v9324_v44, %v9325_v62  ;;  %v9267_v26 = vrot.slane %v9266_v25, 4  ;;  %v9273_v46 = vsel %vm9223_vm2, %v8920_v20, -inf }
 0x6a7   :  { %v9313_v39 = vrot.slane %v9312_v50, 1  ;;  %v9333_v52 = vmax.f32 %v9331_v2, %v9332_v17  ;;  %v9255_v35 = vrot.slane %v9254_v1, 2  ;;  %v9261_v45 = vmax.f32 %v9259_v21, %v9260_v33 }
 0x6a8   :  { %v9320_v19 = vrot.slane %v9319_v22, 1  ;;  %v9327_v4 = vrot.slane %v9326_v42, 1  ;;  %v9268_v61 = vmax.f32 %v9266_v25, %v9267_v26  ;;  %v9274_v0 = vrot.slane %v9273_v46, 4 }
 0x6a9   :  { %v9314_v16 = vmax.f32 %v9312_v50, %v9313_v39  ;;  %v9334_v60 = vrot.slane %v9333_v52, 1  ;;  %v9256_v14 = vmax.f32 %v9254_v1, %v9255_v35  ;;  %v9262_v6 = vrot.slane %v9261_v45, 2 }
 0x6aa   :  { %v9321_v63 = vmax.f32 %v9319_v22, %v9320_v19  ;;  %v9328_v32 = vmax.f32 %v9326_v42, %v9327_v4  ;;  %v9269_v28 = vrot.slane %v9268_v61, 2  ;;  %v9275_v44 = vmax.f32 %v9273_v46, %v9274_v0 }
 0x6ab   :  { %v9335_v53 = vmax.f32 %v9333_v52, %v9334_v60  ;;  %v9685_v43 = vsel %vm8380_vm10, %v9314_v16, -inf  ;;  %v9257_v20 = vrot.slane %v9256_v14, 1  ;;  %v9263_v2 = vmax.f32 %v9261_v45, %v9262_v6 }
 0x6ac   :  { %v9686_v10 = vmax.f32 %v18127_v49, %v9685_v43  ;;  %v9688_v38 = vsel %vm8380_vm10, %v9321_v63, -inf  ;;  %v9691_v62 = vsel %vm8380_vm10, %v9328_v32, -inf  ;;  %v9270_v21 = vmax.f32 %v9268_v61, %v9269_v28 }
 0x6ad   :  { %v9689_v25 = vmax.f32 %v18133_v11, %v9688_v38  ;;  %v9692_v50 = vmax.f32 %v18136_v15, %v9691_v62  ;;  %v9694_v17 = vsel %vm8380_vm10, %v9335_v53, -inf  ;;  %v9258_v1 = vmax.f32 %v9256_v14, %v9257_v20 }
 0x6ae   :  { %v9695_v33 = vmax.f32 %v18145_v3, %v9694_v17  ;;  %v9264_v22 = vrot.slane %v9263_v2, 1  ;;  %v9271_v42 = vrot.slane %v9270_v21, 1  ;;  %v9276_v26 = vrot.slane %v9275_v44, 2 }
 0x6af   :  { %v9816_v46 = vsel %vm7683_vm12, %v9689_v25, %v9686_v10  ;;  %v9673_v49 = vsel %vm8380_vm10, %v9258_v1, -inf  ;;  %v8861_v39 = vmax.f32 %v8817_v8, 0.0  ;;  %v8809_v52 = vadd.f32 %v18108_v18, %v18078_v34  ;;  %v18196_v18 = vpop.f32.mrb[47].mxu1 }
 0x6b0   :  { %v9817_v11 = vsel %vm7685_vm13, %v9692_v50, %v9816_v46  ;;  %v9265_v35 = vmax.f32 %v9263_v2, %v9264_v22  ;;  %v9272_v15 = vmax.f32 %v9270_v21, %v9271_v42  ;;  %v9277_v45 = vmax.f32 %v9275_v44, %v9276_v26 }
 0x6b1   :  { %v9818_v19 = vsel %vm19013_vm5, %v9695_v33, %v9817_v11  ;;  %v9674_v3 = vmax.f32 %v18130_v55, %v9673_v49  ;;  %v8989_v4 = vcombine.high %v8861_v39, %v8861_v39  ;;  %v8996_v61 = vrot.slane %v8861_v39, %v14922_v36 }
 0x6b2   :  { %9848 = vst.msk [vmem:[#allocation4 + $0x11] sm:$0xf] %vm9846_vm4, %v9818_v19  ;;  %v9278_v0 = vrot.slane %v9277_v45, 1  ;;  %v9676_v8 = vsel %vm8380_vm10, %v9265_v35, -inf  ;;  %v9679_v16 = vsel %vm8380_vm10, %v9272_v15, -inf  ;;  %v8859_v34 = vmax.f32 %v8809_v52, 0.0 }
 0x6b3   :  { %v9677_v60 = vmax.f32 %v18153_v54, %v9676_v8  ;;  %v9680_v14 = vmax.f32 %v18156_v56, %v9679_v16  ;;  %v9003_v6 = vrot.slane %v8989_v4, %v14922_v36  ;;  %v9004_v55 = vcombine.high %v8996_v61, %v8996_v61 }
 0x6b4   :  { %v9279_v63 = vmax.f32 %v9277_v45, %v9278_v0  ;;  %v9392_v32 = vsel %vm9223_vm2, %v8996_v61, -inf  ;;  %v8955_v28 = vcombine.high %v8859_v34, %v8859_v34  ;;  %v8962_v44 = vrot.slane %v8859_v34, %v14922_v36 }
 0x6b5   :  { %v9813_v53 = vsel %vm7683_vm12, %v9677_v60, %v9674_v3  ;;  %v9005_v43 = vcombine.high %v9003_v6, %v9003_v6  ;;  %v9393_v20 = vrot.slane %v9392_v32, 4  ;;  %v9399_v2 = vsel %vm9223_vm2, %v9004_v55, -inf }
 0x6b6   :  { %v9682_v10 = vsel %vm8380_vm10, %v9279_v63, -inf  ;;  %v9814_v54 = vsel %vm7685_vm13, %v9680_v14, %v9813_v53  ;;  %v9400_v56 = vrot.slane %v9399_v2, 4  ;;  %v9406_v38 = vsel %vm9223_vm2, %v9003_v6, -inf  ;;  %v9863_v14 = vld [vmem:[#allocation4 + $0x1] sm:$0xf] }
 0x6b7   :  { %v9683_v62 = vmax.f32 %v18165_v30, %v9682_v10  ;;  %v9394_v21 = vmax.f32 %v9392_v32, %v9393_v20  ;;  %v9407_v25 = vrot.slane %v9406_v38, 4  ;;  %v9413_v50 = vsel %vm9223_vm2, %v9005_v43, -inf  ;;  %v13256_v6 = vld [vmem:[%s18845_s5 + $0xc0] sm:$0xff]   ;;  %9936 = vrot.lane.b32.xlu0 %v9863_v14, %s13381_s24  ;;  %v9867_v10 = vld [vmem:[#allocation4 + $0x31] sm:$0xf] }
 0x6b8   :  { %v9401_v17 = vmax.f32 %v9399_v2, %v9400_v56  ;;  %v9414_v1 = vrot.slane %v9413_v50, 4  ;;  %v8969_v33 = vrot.slane %v8955_v28, %v14922_v36  ;;  %v8970_v22 = vcombine.high %v8962_v44, %v8962_v44  ;;  %11521 = vmatprep.subr.bf16.mxu0 %v13256_v6 }
 0x6b9   :  { %v9815_v42 = vsel %vm19014_vm8, %v9683_v62, %v9814_v54  ;;  %v9395_v26 = vrot.slane %v9394_v21, 2  ;;  %v9408_v46 = vmax.f32 %v9406_v38, %v9407_v25  ;;  %v9336_v49 = vsel %vm9223_vm2, %v8962_v44, -inf  ;;  %v9915_v44 = vld [vmem:[#allocation4 + $0x29] sm:$0xf] }
 0x6ba   :  { %9847 = vst.msk [vmem:[#allocation4 + $0x9] sm:$0xf] %vm9846_vm4, %v9815_v42  ;;  %v9402_v39 = vrot.slane %v9401_v17, 2  ;;  %v9415_v52 = vmax.f32 %v9413_v50, %v9414_v1  ;;  %v8971_v30 = vcombine.high %v8969_v33, %v8969_v33  ;;  %v9337_v11 = vrot.slane %v9336_v49, 4  ;;  %10038 = vrot.lane.b32.xlu1 %v9915_v44, %s13381_s24  ;;  %v13258_v44 = vld [vmem:[%s18845_s5 + $0xc8] sm:$0xff]  }
 0x6bb   :  { %v9396_v35 = vmax.f32 %v9394_v21, %v9395_v26  ;;  %v9409_v15 = vrot.slane %v9408_v46, 2  ;;  %v9343_v45 = vsel %vm9223_vm2, %v8970_v22, -inf  ;;  %v9350_v19 = vsel %vm9223_vm2, %v8969_v33, -inf  ;;  %v9919_v21 = vld [vmem:[#allocation4 + $0x59] sm:$0xf]  ;;  %9944 = vrot.lane.b32.xlu0 %v9867_v10, %s13381_s24 }
 0x6bc   :  { %v9403_v3 = vmax.f32 %v9401_v17, %v9402_v39  ;;  %v9416_v4 = vrot.slane %v9415_v52, 2  ;;  %v9338_v61 = vmax.f32 %v9336_v49, %v9337_v11  ;;  %v9344_v0 = vrot.slane %v9343_v45, 4  ;;  %v13257_v11 = vld [vmem:[%s18845_s5 + $0x80] sm:$0xff]  }
 0x6bd   :  { %v9397_v8 = vrot.slane %v9396_v35, 1  ;;  %v9410_v16 = vmax.f32 %v9408_v46, %v9409_v15  ;;  %v9351_v34 = vrot.slane %v9350_v19, 4  ;;  %v9357_v60 = vsel %vm9223_vm2, %v8971_v30, -inf  ;;  %v9865_v30 = vld [vmem:[#allocation4 + $0x11] sm:$0xf]  ;;  %11522 = vmatpush3.bf16.msra.mxu0 %v13257_v11 }
 0x6be   :  { %v9404_v55 = vrot.slane %v9403_v3, 1  ;;  %v9417_v63 = vmax.f32 %v9415_v52, %v9416_v4  ;;  %v9339_v32 = vrot.slane %v9338_v61, 2  ;;  %v9345_v28 = vmax.f32 %v9343_v45, %v9344_v0  ;;  %10046 = vrot.lane.b32.xlu1 %v9919_v21, %s13381_s24  ;;  %11523 = vmatprep.subr.bf16.mxu0 %v13258_v44  ;;  %v13261_v11 = vld [vmem:[%s18845_s5 + $0x90] sm:$0xff]  }
 0x6bf   :  { %v9398_v53 = vmax.f32 %v9396_v35, %v9397_v8  ;;  %v9411_v43 = vrot.slane %v9410_v16, 1  ;;  %v9352_v20 = vmax.f32 %v9350_v19, %v9351_v34  ;;  %v9358_v2 = vrot.slane %v9357_v60, 4  ;;  %9940 = vrot.lane.b32.xlu0 %v9865_v30, %s13381_s24  ;;  %v13260_v30 = vld [vmem:[%s18845_s5 + $0xd0] sm:$0xff]  }
 0x6c0   :  { %v9405_v54 = vmax.f32 %v9403_v3, %v9404_v55  ;;  %v9418_v56 = vrot.slane %v9417_v63, 1  ;;  %v9340_v38 = vmax.f32 %v9338_v61, %v9339_v32  ;;  %v9346_v62 = vrot.slane %v9345_v28, 2  ;;  %v9880_v3 = vld [vmem:[#allocation4 + $0x10] sm:$0xf] }
 0x6c1   :  { %v9412_v25 = vmax.f32 %v9410_v16, %v9411_v43  ;;  %v18223_v50 = vsel %vm8380_vm10, %v9398_v53, -inf  ;;  %v9353_v17 = vrot.slane %v9352_v20, 2  ;;  %v9359_v1 = vmax.f32 %v9357_v60, %v9358_v2  ;;  %v13259_v53 = vld [vmem:[%s18845_s5 + $0x88] sm:$0xff]  }
 0x6c2   :  { %v9419_v33 = vmax.f32 %v9417_v63, %v9418_v56  ;;  %v18226_v22 = vsel %vm8380_vm10, %v9405_v54, -inf  ;;  %v9341_v42 = vrot.slane %v9340_v38, 1  ;;  %v9347_v26 = vmax.f32 %v9345_v28, %v9346_v62  ;;  %9970 = vrot.lane.b32.xlu1 %v9880_v3, %s13381_s24  ;;  %v9912_v28 = vld [vmem:[#allocation4 + $0x11] sm:$0xf]  ;;  %11524 = vmatpush3.bf16.msra.mxu0 %v13259_v53  ;;  %v13264_v53 = vld [vmem:[%s18845_s5 + $0xe0] sm:$0xff]  }
 0x6c3   :  { %v18230_v46 = vsel %vm8380_vm10, %v9412_v25, -inf  ;;  %v9354_v49 = vmax.f32 %v9352_v20, %v9353_v17  ;;  %v9360_v39 = vrot.slane %v9359_v1, 2  ;;  %v8820_v52 = vadd.f32 %v18110_v29, %v18081_v13  ;;  %v9896_v54 = vld [vmem:[#allocation4 + $0x12] sm:$0xf]  ;;  %10032 = vrot.lane.b32.xlu0 %v9912_v28, %s13381_s24  ;;  %11525 = vmatprep.subr.bf16.mxu0 %v13260_v30 }
 0x6c4   :  { %v18239_v35 = vsel %vm8380_vm10, %v9419_v33, -inf  ;;  %v9342_v15 = vmax.f32 %v9340_v38, %v9341_v42  ;;  %v9348_v45 = vrot.slane %v9347_v26, 1  ;;  %v8812_v19 = vadd.f32 %v18115_v37, %v18084_v12  ;;  %v9879_v42 = vld [vmem:[#allocation4 + $0x8] sm:$0xf] }
 0x6c5   :  { %v9355_v4 = vrot.slane %v9354_v49, 1  ;;  %v9361_v61 = vmax.f32 %v9359_v1, %v9360_v39  ;;  %v8862_v0 = vmax.f32 %v8820_v52, 0.0  ;;  %v8833_v13 = vadd.f32 %v18118_v5, %v18086_v31 }
 0x6c6   :  { %v9349_v29 = vmax.f32 %v9347_v26, %v9348_v45  ;;  %v18246_v8 = vsel %vm8380_vm10, %v9342_v15, -inf  ;;  %v8860_v16 = vmax.f32 %v8812_v19, 0.0  ;;  %v18250_v34 = vadd.f32 %v18120_v24, %v18091_v58  ;;  %10002 = vrot.lane.b32.xlu1 %v9896_v54, %s13381_s24  ;;  %v13262_v15 = vld [vmem:[%s18845_s5 + $0xd8] sm:$0xff]   ;;  %11526 = vmatpush3.bf16.msra.mxu0 %v13261_v11 }
 0x6c7   :  { %v9356_v12 = vmax.f32 %v9354_v49, %v9355_v4  ;;  %v9362_v37 = vrot.slane %v9361_v61, 1  ;;  %v9006_v60 = vcombine.high %v8862_v0, %v8862_v0  ;;  %v9013_v14 = vrot.slane %v8862_v0, %v14922_v36  ;;  %9968 = vrot.lane.b32.xlu0 %v9879_v42, %s13381_s24  ;;  %11527 = vmatprep.subr.bf16.mxu0 %v13262_v15 }
 0x6c8   :  { %v18256_v31 = vsel %vm8380_vm10, %v9349_v29, -inf  ;;  %v8972_v5 = vcombine.high %v8860_v16, %v8860_v16  ;;  %v8979_v6 = vrot.slane %v8860_v16, %v14922_v36  ;;  %v18259_v55 = vmax.f32 %v8833_v13, 0.0 }
 0x6c9   :  { %v9363_v63 = vmax.f32 %v9361_v61, %v9362_v37  ;;  %v18262_v58 = vsel %vm8380_vm10, %v9356_v12, -inf  ;;  %v9020_v24 = vrot.slane %v9006_v60, %v14922_v36  ;;  %v9021_v32 = vcombine.high %v9013_v14, %v9013_v14  ;;  %v9864_v61 = vld [vmem:[#allocation4 + $0x9] sm:$0xf]  ;;  %v13266_v12 = vld [vmem:[%s18845_s5 + $0x40] sm:$0xff]  }
 0x6ca   :  { %v9420_v43 = vsel %vm9223_vm2, %v9013_v14, -inf  ;;  %v8986_v20 = vrot.slane %v8972_v5, %v14922_v36  ;;  %v8987_v2 = vcombine.high %v8979_v6, %v8979_v6  ;;  %v9364_v10 = vsel %vm9223_vm2, %v8979_v6, -inf  ;;  %9938 = vrot.lane.b32.xlu1 %v9864_v61, %s13381_s24  ;;  %v9895_v6 = vld [vmem:[#allocation4 + $0xa] sm:$0xf]  ;;  %11493 = vmatprep.subr.bf16.mxu1 %v13266_v12 }
 0x6cb   :  { %v18276_v56 = vsel %vm8380_vm10, %v9363_v63, -inf  ;;  %v9022_v38 = vcombine.high %v9020_v24, %v9020_v24  ;;  %v9421_v62 = vrot.slane %v9420_v43, 4  ;;  %v9427_v21 = vsel %vm9223_vm2, %v9021_v32, -inf  ;;  %v13263_v63 = vld [vmem:[%s18845_s5 + $0x98] sm:$0xff]   ;;  %10000 = vrot.lane.b32.xlu0 %v9895_v6, %s13381_s24 }
 0x6cc   :  { %v9428_v25 = vrot.slane %v9427_v21, 4  ;;  %v9434_v17 = vsel %vm9223_vm2, %v9020_v24, -inf  ;;  %v8988_v1 = vcombine.high %v8986_v20, %v8986_v20  ;;  %v9365_v33 = vrot.slane %v9364_v10, 4  ;;  %11528 = vmatpush3.bf16.msra.mxu0 %v13263_v63  ;;  %v13271_v63 = vld [vmem:[%s18845_s5 + $0xa8] sm:$0xff]  }
 0x6cd   :  { %v9422_v26 = vmax.f32 %v9420_v43, %v9421_v62  ;;  %v9435_v49 = vrot.slane %v9434_v17, 4  ;;  %v9441_v39 = vsel %vm9223_vm2, %v9022_v38, -inf  ;;  %v9371_v52 = vsel %vm9223_vm2, %v8987_v2, -inf  ;;  %v13267_v43 = vld [vmem:[%s18845_s5] sm:$0xff]   ;;  %v13268_v38 = vld [vmem:[%s18845_s5 + $0x48] sm:$0xff]   ;;  %11529 = vmatprep.subr.bf16.mxu0 %v13264_v53 }
 0x6ce   :  { %v9429_v45 = vmax.f32 %v9427_v21, %v9428_v25  ;;  %v9442_v19 = vrot.slane %v9441_v39, 4  ;;  %v9366_v3 = vmax.f32 %v9364_v10, %v9365_v33  ;;  %v9372_v4 = vrot.slane %v9371_v52, 4  ;;  %11494 = vmatpush3.bf16.msra.mxu1 %v13267_v43 }
 0x6cf   :  { %v9423_v0 = vrot.slane %v9422_v26, 2  ;;  %v9436_v13 = vmax.f32 %v9434_v17, %v9435_v49  ;;  %v9378_v29 = vsel %vm9223_vm2, %v8986_v20, -inf  ;;  %v9385_v16 = vsel %vm9223_vm2, %v8988_v1, -inf  ;;  %v13269_v1 = vld [vmem:[%s18845_s5 + $0x8] sm:$0xff]   ;;  %11495 = vmatprep.subr.bf16.mxu1 %v13268_v38 }
 0x6d0   :  { %v9430_v37 = vrot.slane %v9429_v45, 2  ;;  %v9443_v60 = vmax.f32 %v9441_v39, %v9442_v19  ;;  %v9367_v14 = vrot.slane %v9366_v3, 2  ;;  %v9373_v5 = vmax.f32 %v9371_v52, %v9372_v4  ;;  %v13265_v39 = vld [vmem:[%s18845_s5 + $0xa0] sm:$0xff]   ;;  %v13272_v52 = vld [vmem:[%s18845_s5 + $0x50] sm:$0xff]   ;;  %v13270_v19 = vld [vmem:[%s18845_s5 + $0xe8] sm:$0xff]  }
 0x6d1   :  { %v9424_v24 = vmax.f32 %v9422_v26, %v9423_v0  ;;  %v9437_v32 = vrot.slane %v9436_v13, 2  ;;  %v9379_v28 = vrot.slane %v9378_v29, 4  ;;  %v9386_v44 = vrot.slane %v9385_v16, 4  ;;  %11530 = vmatpush3.bf16.msra.mxu0 %v13265_v39 }
 0x6d2   :  { %v9431_v20 = vmax.f32 %v9429_v45, %v9430_v37  ;;  %v9444_v2 = vrot.slane %v9443_v60, 2  ;;  %v9368_v10 = vmax.f32 %v9366_v3, %v9367_v14  ;;  %v9374_v54 = vrot.slane %v9373_v5, 2  ;;  %11496 = vmatpush3.bf16.msra.mxu1 %v13269_v1  ;;  %v13273_v37 = vld [vmem:[%s18845_s5 + $0x10] sm:$0xff]   ;;  %11531 = vmatprep.subr.bf16.mxu0 %v13270_v19  ;;  %v13277_v19 = vld [vmem:[%s18845_s5 + $0x20] sm:$0xff]  }
 0x6d3   :  { %v9425_v62 = vrot.slane %v9424_v24, 1  ;;  %v9438_v21 = vmax.f32 %v9436_v13, %v9437_v32  ;;  %v9380_v25 = vmax.f32 %v9378_v29, %v9379_v28  ;;  %v9387_v17 = vmax.f32 %v9385_v16, %v9386_v44  ;;  %11497 = vmatprep.subr.bf16.mxu1 %v13272_v52 }
 0x6d4   :  { %v9432_v33 = vrot.slane %v9431_v20, 1  ;;  %v9445_v42 = vmax.f32 %v9443_v60, %v9444_v2  ;;  %v9369_v26 = vrot.slane %v9368_v10, 1  ;;  %v9375_v49 = vmax.f32 %v9373_v5, %v9374_v54 }
 0x6d5   :  { %v9426_v30 = vmax.f32 %v9424_v24, %v9425_v62  ;;  %v9439_v11 = vrot.slane %v9438_v21, 1  ;;  %v9381_v15 = vrot.slane %v9380_v25, 2  ;;  %v9388_v45 = vrot.slane %v9387_v17, 2  ;;  %v13275_v62 = vld [vmem:[%s18845_s5 + $0x18] sm:$0xff]   ;;  %11532 = vmatpush3.bf16.msra.mxu0 %v13271_v63 }
 0x6d6   :  { %v9433_v3 = vmax.f32 %v9431_v20, %v9432_v33  ;;  %v9446_v4 = vrot.slane %v9445_v42, 1  ;;  %v9370_v61 = vmax.f32 %v9368_v10, %v9369_v26  ;;  %v9376_v0 = vrot.slane %v9375_v49, 1  ;;  %11498 = vmatpush3.bf16.msra.mxu1 %v13273_v37 }
 0x6d7   :  { %v9440_v13 = vmax.f32 %v9438_v21, %v9439_v11  ;;  %v9709_v29 = vsel %vm8380_vm10, %v9426_v30, -inf  ;;  %v9382_v16 = vmax.f32 %v9380_v25, %v9381_v15  ;;  %v9389_v12 = vmax.f32 %v9387_v17, %v9388_v45 }
 0x6d8   :  { %v9447_v60 = vmax.f32 %v9445_v42, %v9446_v4  ;;  %v9710_v14 = vmax.f32 %v18223_v50, %v9709_v29  ;;  %v9712_v5 = vsel %vm8380_vm10, %v9433_v3, -inf  ;;  %v9377_v6 = vmax.f32 %v9375_v49, %v9376_v0  ;;  %v13274_v50 = vld [vmem:[%s18845_s5 + $0x58] sm:$0xff]  }
 0x6d9   :  { %v9713_v24 = vmax.f32 %v18226_v22, %v9712_v5  ;;  %v9715_v32 = vsel %vm8380_vm10, %v9440_v13, -inf  ;;  %v9383_v28 = vrot.slane %v9382_v16, 1  ;;  %v9390_v44 = vrot.slane %v9389_v12, 1  ;;  %11499 = vmatprep.subr.bf16.mxu1 %v13274_v50 }
 0x6da   :  { %v9716_v53 = vmax.f32 %v18230_v46, %v9715_v32  ;;  %v9718_v43 = vsel %vm8380_vm10, %v9447_v60, -inf  ;;  %v9697_v20 = vsel %vm8380_vm10, %v9370_v61, -inf  ;;  %v9700_v2 = vsel %vm8380_vm10, %v9377_v6, -inf  ;;  %11500 = vmatpush3.bf16.msra.mxu1 %v13275_v62  ;;  %v13279_v6 = vld [vmem:[%s18845_s5 + $0x28] sm:$0xff]  }
 0x6db   :  { %v9719_v10 = vmax.f32 %v18239_v35, %v9718_v43  ;;  %v9822_v22 = vsel %vm7683_vm12, %v9713_v24, %v9710_v14  ;;  %v9384_v54 = vmax.f32 %v9382_v16, %v9383_v28  ;;  %v9391_v38 = vmax.f32 %v9389_v12, %v9390_v44  ;;  %v13276_v35 = vld [vmem:[%s18845_s5 + $0x60] sm:$0xff]   ;;  %v13282_v44 = vld [vmem:[%s18845_s5 + $0x70] sm:$0xff]  }
 0x6dc   :  { %v9823_v21 = vsel %vm7685_vm13, %v9716_v53, %v9822_v22  ;;  %v9698_v46 = vmax.f32 %v18246_v8, %v9697_v20  ;;  %v9701_v25 = vmax.f32 %v18256_v31, %v9700_v2  ;;  %v9057_v17 = vcombine.high %v18259_v55, %v18259_v55  ;;  %v13280_v8 = vld [vmem:[%s18845_s5 + $0xf0] sm:$0xff]   ;;  %11501 = vmatprep.subr.bf16.mxu1 %v13276_v35 }
 0x6dd   :  { %v9824_v1 = vsel %vm19015_vm9, %v9719_v10, %v9823_v21  ;;  %v9703_v33 = vsel %vm8380_vm10, %v9384_v54, -inf  ;;  %v9706_v42 = vsel %vm8380_vm10, %v9391_v38, -inf  ;;  %v9064_v26 = vrot.slane %v18259_v55, %v14922_v36  ;;  %v13281_v31 = vld [vmem:[%s18845_s5 + $0xb0] sm:$0xff]   ;;  %11533 = vmatprep.subr.bf16.mxu0 %v13280_v8  ;;  %v13286_v21 = vld [vmem:[%s18845_s5 + $0xf8] sm:$0xff]  }
 0x6de   :  { %9850 = vst.msk [vmem:[#allocation4 + $0x21] sm:$0xf] %vm9846_vm4, %v9824_v1  ;;  %v9704_v49 = vmax.f32 %v18262_v58, %v9703_v33  ;;  %v9707_v39 = vmax.f32 %v18276_v56, %v9706_v42  ;;  %v9819_v52 = vsel %vm7683_vm12, %v9701_v25, %v9698_v46  ;;  %v9071_v30 = vrot.slane %v9057_v17, %v14922_v36  ;;  %v13283_v1 = vld [vmem:[%s18845_s5 + $0x30] sm:$0xff]   ;;  %v13284_v33 = vld [vmem:[%s18845_s5 + $0x78] sm:$0xff]  }
 0x6df   :  { %v9072_v55 = vcombine.high %v9064_v26, %v9064_v26  ;;  %v9504_v11 = vsel %vm9223_vm2, %v9064_v26, -inf  ;;  %v8863_v15 = vmax.f32 %v18250_v34, 0.0  ;;  %v8836_v45 = vadd.f32 %v18122_v51, %v18096_v47  ;;  %v13278_v34 = vld [vmem:[%s18845_s5 + $0x68] sm:$0xff]   ;;  %11534 = vmatpush3.bf16.msra.mxu0 %v13281_v31  ;;  %11502 = vmatpush3.bf16.msra.mxu1 %v13277_v19 }
 0x6e0   :  { %v9820_v58 = vsel %vm7685_vm13, %v9704_v49, %v9819_v52  ;;  %v9073_v56 = vcombine.high %v9071_v30, %v9071_v30  ;;  %v9505_v3 = vrot.slane %v9504_v11, 4  ;;  %v9518_v4 = vsel %vm9223_vm2, %v9071_v30, -inf  ;;  %11503 = vmatprep.subr.bf16.mxu1 %v13278_v34  ;;  %11535 = vmatprep.subr.bf16.mxu0 %v13286_v21  ;;  %v13287_v49 = vld [vmem:[%s18845_s5 + $0xb8] sm:$0xff]  }
 0x6e1   :  { %v9821_v47 = vsel %vm19016_vm6, %v9707_v39, %v9820_v58  ;;  %v9511_v51 = vsel %vm9223_vm2, %v9072_v55, -inf  ;;  %v9519_v61 = vrot.slane %v9518_v4, 4  ;;  %v9023_v0 = vcombine.high %v8863_v15, %v8863_v15 }
 0x6e2   :  { %9849 = vst.msk [vmem:[#allocation4 + $0x19] sm:$0xf] %vm9846_vm4, %v9821_v47  ;;  %v9506_v13 = vmax.f32 %v9504_v11, %v9505_v3  ;;  %v9512_v29 = vrot.slane %v9511_v51, 4  ;;  %v9525_v16 = vsel %vm9223_vm2, %v9073_v56, -inf  ;;  %v9030_v12 = vrot.slane %v8863_v15, %v14922_v36 }
 0x6e3   :  { %v9520_v37 = vmax.f32 %v9518_v4, %v9519_v61  ;;  %v9526_v60 = vrot.slane %v9525_v16, 4  ;;  %v9037_v14 = vrot.slane %v9023_v0, %v14922_v36  ;;  %v18389_v5 = vmax.f32 %v8836_v45, 0.0  ;;  %11504 = vmatpush3.bf16.msra.mxu1 %v13279_v6  ;;  %11536 = vmatpush3.bf16.msra.mxu0 %v13287_v49 }
 0x6e4   :  { %v9507_v63 = vrot.slane %v9506_v13, 2  ;;  %v9513_v24 = vmax.f32 %v9511_v51, %v9512_v29  ;;  %v9038_v32 = vcombine.high %v9030_v12, %v9030_v12  ;;  %v9448_v28 = vsel %vm9223_vm2, %v9030_v12, -inf  ;;  %11505 = vmatprep.subr.bf16.mxu1 %v13282_v44  ;;  %v13285_v51 = vld [vmem:[%s18845_s5 + $0x38] sm:$0xff]  }
 0x6e5   :  { %v9521_v50 = vrot.slane %v9520_v37, 2  ;;  %v9527_v53 = vmax.f32 %v9525_v16, %v9526_v60  ;;  %v9039_v43 = vcombine.high %v9037_v14, %v9037_v14  ;;  %v9449_v20 = vrot.slane %v9448_v28, 4  ;;  %v9882_v2 = vld [vmem:[#allocation4 + $0x20] sm:$0xf] }
 0x6e6   :  { %v9914_v10 = vld [vmem:[#allocation4 + $0x21] sm:$0xf]  ;;  %v9508_v22 = vmax.f32 %v9506_v13, %v9507_v63  ;;  %v9514_v54 = vrot.slane %v9513_v24, 2  ;;  %v9455_v38 = vsel %vm9223_vm2, %v9038_v32, -inf  ;;  %v9462_v62 = vsel %vm9223_vm2, %v9037_v14, -inf  ;;  %9974 = vrot.lane.b32.xlu1 %v9882_v2, %s13381_s24 }
 0x6e7   :  { %10036 = vrot.lane.b32.xlu0 %v9914_v10, %s13381_s24  ;;  %v9522_v46 = vmax.f32 %v9520_v37, %v9521_v50  ;;  %v9528_v25 = vrot.slane %v9527_v53, 2  ;;  %v9450_v17 = vmax.f32 %v9448_v28, %v9449_v20  ;;  %v9456_v35 = vrot.slane %v9455_v38, 4  ;;  %v9898_v11 = vld [vmem:[#allocation4 + $0x22] sm:$0xf]  ;;  %11506 = vmatpush3.bf16.msra.mxu1 %v13283_v1  ;;  %v18423_v13 = vld [vmem:[%s18844_s4] ss:$0 sm:$0xff] }
 0x6e8   :  { %v9509_v42 = vrot.slane %v9508_v22, 1  ;;  %v9515_v26 = vmax.f32 %v9513_v24, %v9514_v54  ;;  %v9463_v8 = vrot.slane %v9462_v62, 4  ;;  %v9469_v31 = vsel %vm9223_vm2, %v9039_v43, -inf  ;;  %11507 = vmatprep.subr.bf16.mxu1 %v13284_v33 }
 0x6e9   :  { %v9523_v39 = vrot.slane %v9522_v46, 1  ;;  %v9529_v52 = vmax.f32 %v9527_v53, %v9528_v25  ;;  %v9451_v30 = vrot.slane %v9450_v17, 2  ;;  %v9457_v55 = vmax.f32 %v9455_v38, %v9456_v35  ;;  %v9881_v15 = vld [vmem:[#allocation4 + $0x18] sm:$0xf] }
 0x6ea   :  { %v9510_v45 = vmax.f32 %v9508_v22, %v9509_v42  ;;  %v9516_v19 = vrot.slane %v9515_v26, 1  ;;  %v9464_v58 = vmax.f32 %v9462_v62, %v9463_v8  ;;  %v9470_v56 = vrot.slane %v9469_v31, 4  ;;  %10006 = vrot.lane.b32.xlu1 %v9898_v11, %s13381_s24  ;;  %v9866_v16 = vld [vmem:[#allocation4 + $0x19] sm:$0xf] }
 0x6eb   :  { %9972 = vrot.lane.b32.xlu0 %v9881_v15, %s13381_s24  ;;  %v9524_v3 = vmax.f32 %v9522_v46, %v9523_v39  ;;  %v9530_v4 = vrot.slane %v9529_v52, 1  ;;  %v9452_v34 = vmax.f32 %v9450_v17, %v9451_v30  ;;  %v9458_v47 = vrot.slane %v9457_v55, 2  ;;  %v9897_v6 = vld [vmem:[#allocation4 + $0x1a] sm:$0xf]  ;;  %11508 = vmatpush3.bf16.msra.mxu1 %v13285_v51 }
 0x6ec   :  { %v9465_v61 = vrot.slane %v9464_v58, 2  ;;  %v9471_v0 = vmax.f32 %v9469_v31, %v9470_v56  ;;  %v8731_v29 = vadd.f32 %v18423_v13, %v18045_v7  ;;  %v9517_v12 = vmax.f32 %v9515_v26, %v9516_v19  ;;  %v9913_v21 = vld [vmem:[#allocation4 + $0x19] sm:$0xf] }
 0x6ed   :  { %v18428_v37 = vsel %vm8380_vm10, %v9510_v45, -inf  ;;  %v9453_v60 = vrot.slane %v9452_v34, 1  ;;  %v9459_v14 = vmax.f32 %v9457_v55, %v9458_v47  ;;  %v9531_v63 = vmax.f32 %v9529_v52, %v9530_v4 }
 0x6ee   :  { %v9466_v24 = vmax.f32 %v9464_v58, %v9465_v61  ;;  %v9472_v32 = vrot.slane %v9471_v0, 2  ;;  %v9074_v28 = vcombine.high %v18389_v5, %v18389_v5  ;;  %9942 = vrot.lane.b32.xlu1 %v9866_v16, %s13381_s24  ;;  %v18435_v7 = vsel %vm8380_vm10, %v9524_v3, -inf }
 0x6ef   :  { %10004 = vrot.lane.b32.xlu0 %v9897_v6, %s13381_s24  ;;  %v9454_v44 = vmax.f32 %v9452_v34, %v9453_v60  ;;  %v9460_v50 = vrot.slane %v9459_v14, 1  ;;  %v9081_v53 = vrot.slane %v18389_v5, %v14922_v36  ;;  %v8828_v10 = vadd.f32 %v18124_v27, %v8731_v29 }
 0x6f0   :  { %v9467_v43 = vrot.slane %v9466_v24, 1  ;;  %v9473_v20 = vmax.f32 %v9471_v0, %v9472_v32  ;;  %v9088_v2 = vrot.slane %v9074_v28, %v14922_v36  ;;  %v18442_v22 = vsel %vm8380_vm10, %v9517_v12, -inf }
 0x6f1   :  { %v9461_v54 = vmax.f32 %v9459_v14, %v9460_v50  ;;  %v9089_v38 = vcombine.high %v9081_v53, %v9081_v53  ;;  %v9532_v62 = vsel %vm9223_vm2, %v9081_v53, -inf  ;;  %v18446_v46 = vsel %vm8380_vm10, %v9531_v63, -inf }
 0x6f2   :  { %v9474_v25 = vrot.slane %v9473_v20, 1  ;;  %v9090_v5 = vcombine.high %v9088_v2, %v9088_v2  ;;  %v9533_v17 = vrot.slane %v9532_v62, 4  ;;  %10034 = vrot.lane.b32.xlu1 %v9913_v21, %s13381_s24  ;;  %v18450_v35 = vsel %vm8380_vm10, %v9454_v44, -inf }
 0x6f3   :  { %v9539_v27 = vsel %vm9223_vm2, %v9089_v38, -inf  ;;  %v9546_v1 = vsel %vm9223_vm2, %v9088_v2, -inf  ;;  %v8864_v33 = vmax.f32 %v8828_v10, 0.0  ;;  %v18454_v42 = vmax.f32 %v9466_v24, %v9467_v43 }
 0x6f4   :  { %v18457_v26 = vsel %vm8380_vm10, %v9461_v54, -inf  ;;  %v9534_v8 = vmax.f32 %v9532_v62, %v9533_v17  ;;  %v9540_v31 = vrot.slane %v9539_v27, 4  ;;  %v9547_v49 = vrot.slane %v9546_v1, 4 }
 0x6f5   :  { %v9553_v39 = vsel %vm9223_vm2, %v9090_v5, -inf  ;;  %v9040_v52 = vcombine.high %v8864_v33, %v8864_v33  ;;  %v9047_v30 = vrot.slane %v8864_v33, %v14922_v36  ;;  %v18461_v55 = vmax.f32 %v9473_v20, %v9474_v25 }
 0x6f6   :  { %v9535_v11 = vrot.slane %v9534_v8, 2  ;;  %v9541_v15 = vmax.f32 %v9539_v27, %v9540_v31  ;;  %v9554_v45 = vrot.slane %v9553_v39, 4  ;;  %v9548_v19 = vmax.f32 %v9546_v1, %v9547_v49 }
 0x6f7   :  { %v9054_v58 = vrot.slane %v9040_v52, %v14922_v36  ;;  %v9055_v56 = vcombine.high %v9047_v30, %v9047_v30  ;;  %v9476_v3 = vsel %vm9223_vm2, %v9047_v30, -inf }
 0x6f8   :  { %v9536_v4 = vmax.f32 %v9534_v8, %v9535_v11  ;;  %v9542_v34 = vrot.slane %v9541_v15, 2  ;;  %v9555_v47 = vmax.f32 %v9553_v39, %v9554_v45  ;;  %v9477_v51 = vrot.slane %v9476_v3, 4 }
 0x6f9   :  { %v9549_v61 = vrot.slane %v9548_v19, 2  ;;  %v9056_v0 = vcombine.high %v9054_v58, %v9054_v58  ;;  %v9483_v29 = vsel %vm9223_vm2, %v9055_v56, -inf  ;;  %v9490_v16 = vsel %vm9223_vm2, %v9054_v58, -inf }
 0x6fa   :  { %v9537_v12 = vrot.slane %v9536_v4, 1  ;;  %v9543_v60 = vmax.f32 %v9541_v15, %v9542_v34  ;;  %v9556_v14 = vrot.slane %v9555_v47, 2  ;;  %v9478_v6 = vmax.f32 %v9476_v3, %v9477_v51 }
 0x6fb   :  { %v9550_v63 = vmax.f32 %v9548_v19, %v9549_v61  ;;  %v9484_v24 = vrot.slane %v9483_v29, 4  ;;  %v9491_v32 = vrot.slane %v9490_v16, 4  ;;  %v9497_v28 = vsel %vm9223_vm2, %v9056_v0, -inf }
 0x6fc   :  { %v9538_v44 = vmax.f32 %v9536_v4, %v9537_v12  ;;  %v9544_v50 = vrot.slane %v9543_v60, 1  ;;  %v9557_v53 = vmax.f32 %v9555_v47, %v9556_v14  ;;  %v9479_v43 = vrot.slane %v9478_v6, 2 }
 0x6fd   :  { %v9551_v20 = vrot.slane %v9550_v63, 1  ;;  %v9485_v2 = vmax.f32 %v9483_v29, %v9484_v24  ;;  %v9492_v10 = vmax.f32 %v9490_v16, %v9491_v32  ;;  %v9498_v54 = vrot.slane %v9497_v28, 4 }
 0x6fe   :  { %v9545_v38 = vmax.f32 %v9543_v60, %v9544_v50  ;;  %v9558_v62 = vrot.slane %v9557_v53, 1  ;;  %v9733_v21 = vsel %vm8380_vm10, %v9538_v44, -inf  ;;  %v9480_v25 = vmax.f32 %v9478_v6, %v9479_v43 }
 0x6ff   :  { %v9552_v5 = vmax.f32 %v9550_v63, %v9551_v20  ;;  %v9734_v17 = vmax.f32 %v18428_v37, %v9733_v21  ;;  %v9486_v27 = vrot.slane %v9485_v2, 2  ;;  %v9493_v1 = vrot.slane %v9492_v10, 2 }
 0x700   :  { %v9559_v33 = vmax.f32 %v9557_v53, %v9558_v62  ;;  %v9736_v8 = vsel %vm8380_vm10, %v9545_v38, -inf  ;;  %v9481_v31 = vrot.slane %v9480_v25, 1  ;;  %v9499_v49 = vmax.f32 %v9497_v28, %v9498_v54 }
 0x701   :  { %v9737_v39 = vmax.f32 %v18442_v22, %v9736_v8  ;;  %v9739_v52 = vsel %vm8380_vm10, %v9552_v5, -inf  ;;  %v9487_v30 = vmax.f32 %v9485_v2, %v9486_v27  ;;  %v9494_v11 = vmax.f32 %v9492_v10, %v9493_v1 }
 0x702   :  { %v9740_v15 = vmax.f32 %v18435_v7, %v9739_v52  ;;  %v9742_v45 = vsel %vm8380_vm10, %v9559_v33, -inf  ;;  %v9482_v19 = vmax.f32 %v9480_v25, %v9481_v31  ;;  %v9500_v58 = vrot.slane %v9499_v49, 2 }
 0x703   :  { %v9743_v37 = vmax.f32 %v18446_v46, %v9742_v45  ;;  %v9828_v56 = vsel %vm7683_vm12, %v9737_v39, %v9734_v17  ;;  %v9488_v3 = vrot.slane %v9487_v30, 1  ;;  %v9495_v4 = vrot.slane %v9494_v11, 1 }
 0x704   :  { %v9829_v34 = vsel %vm7685_vm13, %v9740_v15, %v9828_v56  ;;  %v9501_v47 = vmax.f32 %v9499_v49, %v9500_v58  ;;  %v9721_v22 = vsel %vm8380_vm10, %v9482_v19, -inf  ;;  %v8752_v51 = vadd.f32 %v18423_v13, %v18063_v48 }
 0x705   :  { %v9830_v7 = vsel %vm19017_vm7, %v9743_v37, %v9829_v34  ;;  %v9489_v61 = vmax.f32 %v9487_v30, %v9488_v3  ;;  %v9496_v0 = vmax.f32 %v9494_v11, %v9495_v4  ;;  %v9722_v29 = vmax.f32 %v18450_v35, %v9721_v22 }
 0x706   :  { %v9726_v46 = vsel %vm8380_vm10, %v18454_v42, -inf  ;;  %9852 = vst.msk [vmem:[#allocation4 + $0x41] sm:$0xf] %vm9846_vm4, %v9830_v7  ;;  %v9502_v16 = vrot.slane %v9501_v47, 1  ;;  %v8849_v12 = vadd.f32 %v18150_v9, %v8752_v51  ;;  %v8744_v60 = vadd.f32 %v18423_v13, %v18059_v40 }
 0x707   :  { %v9724_v14 = vsel %vm8380_vm10, %v9489_v61, -inf  ;;  %v9727_v48 = vsel %vm8380_vm10, %v9496_v0, -inf  ;;  %v8755_v6 = vadd.f32 %v18423_v13, %v18065_v59  ;;  %v8747_v35 = vadd.f32 %v18423_v13, %v18061_v57 }
 0x708   :  { %v9503_v63 = vmax.f32 %v9501_v47, %v9502_v16  ;;  %v9725_v42 = vmax.f32 %v18457_v26, %v9724_v14  ;;  %v9728_v24 = vmax.f32 %v9726_v46, %v9727_v48  ;;  %v8869_v32 = vmax.f32 %v8849_v12, 0.0 }
 0x709   :  { %v9729_v9 = vsel %vm8380_vm10, %v18461_v55, -inf  ;;  %v8841_v40 = vadd.f32 %v18158_v41, %v8744_v60  ;;  %v8852_v28 = vadd.f32 %v18172_v23, %v8755_v6  ;;  %v18501_v44 = vadd.f32 %v18196_v18, %v8747_v35 }
 0x70a   :  { %v9730_v59 = vsel %vm8380_vm10, %v9503_v63, -inf  ;;  %v9825_v50 = vsel %vm7683_vm12, %v9725_v42, %v9722_v29  ;;  %v9125_v57 = vcombine.high %v8869_v32, %v8869_v32  ;;  %v9132_v13 = vrot.slane %v8869_v32, %v14922_v36 }
 0x70b   :  { %v9731_v26 = vmax.f32 %v9729_v9, %v9730_v59  ;;  %v9826_v53 = vsel %vm7685_vm13, %v9728_v24, %v9825_v50  ;;  %v8867_v43 = vmax.f32 %v8841_v40, 0.0  ;;  %v8870_v49 = vmax.f32 %v8852_v28, 0.0 }
 0x70c   :  { %v9139_v55 = vrot.slane %v9125_v57, %v14922_v36  ;;  %v9140_v20 = vcombine.high %v9132_v13, %v9132_v13  ;;  %v9616_v41 = vsel %vm9223_vm2, %v9132_v13, -inf }
 0x70d   :  { %v9827_v23 = vsel %vm19018_vm3, %v9731_v26, %v9826_v53  ;;  %v9617_v18 = vrot.slane %v9616_v41, 4  ;;  %v9091_v2 = vcombine.high %v8867_v43, %v8867_v43  ;;  %v9098_v10 = vrot.slane %v8867_v43, %v14922_v36  ;;  %v9869_v54 = vld [vmem:[#allocation4 + $0x41] sm:$0xf] }
 0x70e   :  { %v9884_v38 = vld [vmem:[#allocation4 + $0x40] sm:$0xf]  ;;  %9851 = vst.msk [vmem:[#allocation4 + $0x39] sm:$0xf] %vm9846_vm4, %v9827_v23  ;;  %v9141_v62 = vcombine.high %v9139_v55, %v9139_v55  ;;  %v9623_v21 = vsel %vm9223_vm2, %v9140_v20, -inf  ;;  %v9630_v25 = vsel %vm9223_vm2, %v9139_v55, -inf  ;;  %9948 = vrot.lane.b32.xlu0 %v9869_v54, %s13381_s24  ;;  %v9142_v42 = vcombine.high %v8870_v49, %v8870_v49 }
 0x70f   :  { %9978 = vrot.lane.b32.xlu1 %v9884_v38, %s13381_s24  ;;  %v9618_v5 = vmax.f32 %v9616_v41, %v9617_v18  ;;  %v9624_v17 = vrot.slane %v9623_v21, 4  ;;  %v9631_v27 = vrot.slane %v9630_v25, 4  ;;  %v9105_v1 = vrot.slane %v9091_v2, %v14922_v36  ;;  %v9916_v15 = vld [vmem:[#allocation4 + $0x41] sm:$0xf] }
 0x710   :  { %v9637_v33 = vsel %vm9223_vm2, %v9141_v62, -inf  ;;  %v9106_v8 = vcombine.high %v9098_v10, %v9098_v10  ;;  %v9560_v31 = vsel %vm9223_vm2, %v9098_v10, -inf  ;;  %v9149_v28 = vrot.slane %v8870_v49, %v14922_v36 }
 0x711   :  { %v9619_v39 = vrot.slane %v9618_v5, 2  ;;  %v9625_v52 = vmax.f32 %v9623_v21, %v9624_v17  ;;  %v9632_v30 = vmax.f32 %v9630_v25, %v9631_v27  ;;  %v9638_v11 = vrot.slane %v9637_v33, 4 }
 0x712   :  { %v9107_v45 = vcombine.high %v9105_v1, %v9105_v1  ;;  %v9561_v19 = vrot.slane %v9560_v31, 4  ;;  %v9567_v58 = vsel %vm9223_vm2, %v9106_v8, -inf  ;;  %v9574_v37 = vsel %vm9223_vm2, %v9105_v1, -inf  ;;  %10040 = vrot.lane.b32.xlu0 %v9916_v15, %s13381_s24 }
 0x713   :  { %v9620_v56 = vmax.f32 %v9618_v5, %v9619_v39  ;;  %v9626_v3 = vrot.slane %v9625_v52, 2  ;;  %v9633_v4 = vrot.slane %v9632_v30, 2  ;;  %v9639_v34 = vmax.f32 %v9637_v33, %v9638_v11 }
 0x714   :  { %v9562_v47 = vmax.f32 %v9560_v31, %v9561_v19  ;;  %v9568_v22 = vrot.slane %v9567_v58, 4  ;;  %v9575_v51 = vrot.slane %v9574_v37, 4  ;;  %v9581_v7 = vsel %vm9223_vm2, %v9107_v45, -inf }
 0x715   :  { %v9621_v61 = vrot.slane %v9620_v56, 1  ;;  %v9627_v0 = vmax.f32 %v9625_v52, %v9626_v3  ;;  %v9634_v29 = vmax.f32 %v9632_v30, %v9633_v4  ;;  %v9640_v46 = vrot.slane %v9639_v34, 2  ;;  %v9868_v16 = vld [vmem:[#allocation4 + $0x39] sm:$0xf] }
 0x716   :  { %v9883_v12 = vld [vmem:[#allocation4 + $0x38] sm:$0xf]  ;;  %v9563_v60 = vrot.slane %v9562_v47, 2  ;;  %v9569_v14 = vmax.f32 %v9567_v58, %v9568_v22  ;;  %v9576_v48 = vmax.f32 %v9574_v37, %v9575_v51  ;;  %v9582_v6 = vrot.slane %v9581_v7, 4  ;;  %9946 = vrot.lane.b32.xlu1 %v9868_v16, %s13381_s24 }
 0x717   :  { %9976 = vrot.lane.b32.xlu0 %v9883_v12, %s13381_s24  ;;  %v9628_v35 = vrot.slane %v9627_v0, 1  ;;  %v9641_v63 = vmax.f32 %v9639_v34, %v9640_v46  ;;  %v9635_v24 = vrot.slane %v9634_v29, 1  ;;  %v9622_v40 = vmax.f32 %v9620_v56, %v9621_v61 }
 0x718   :  { %v9564_v32 = vmax.f32 %v9562_v47, %v9563_v60  ;;  %v9570_v9 = vrot.slane %v9569_v14, 2  ;;  %v9577_v57 = vrot.slane %v9576_v48, 2  ;;  %v9583_v13 = vmax.f32 %v9581_v7, %v9582_v6 }
 0x719   :  { %v9629_v59 = vmax.f32 %v9627_v0, %v9628_v35  ;;  %v9642_v50 = vrot.slane %v9641_v63, 1  ;;  %v9156_v26 = vrot.slane %v9142_v42, %v14922_v36  ;;  %v9636_v53 = vmax.f32 %v9634_v29, %v9635_v24 }
 0x71a   :  { %v9565_v43 = vrot.slane %v9564_v32, 1  ;;  %v18527_v55 = vmax.f32 %v9569_v14, %v9570_v9  ;;  %v8868_v20 = vmax.f32 %v18501_v44, 0.0  ;;  %v18531_v41 = vsel %vm8380_vm10, %v9622_v40, -inf }
 0x71b   :  { %v9157_v23 = vcombine.high %v9149_v28, %v9149_v28  ;;  %v9158_v18 = vcombine.high %v9156_v26, %v9156_v26  ;;  %v9644_v2 = vsel %vm9223_vm2, %v9149_v28, -inf  ;;  %v9643_v10 = vmax.f32 %v9641_v63, %v9642_v50 }
 0x71c   :  { %v18535_v54 = vsel %vm8380_vm10, %v9629_v59, -inf  ;;  %v18537_v38 = vmax.f32 %v9576_v48, %v9577_v57  ;;  %v9584_v62 = vrot.slane %v9583_v13, 2  ;;  %v9645_v21 = vrot.slane %v9644_v2, 4 }
 0x71d   :  { %v9651_v25 = vsel %vm9223_vm2, %v9157_v23, -inf  ;;  %v9658_v5 = vsel %vm9223_vm2, %v9156_v26, -inf  ;;  %v9665_v44 = vsel %vm9223_vm2, %v9158_v18, -inf  ;;  %v18543_v17 = vsel %vm8380_vm10, %v9636_v53, -inf }
 0x71e   :  { %v18545_v27 = vmax.f32 %v9564_v32, %v9565_v43  ;;  %v9572_v1 = vrot.slane %v18527_v55, 1  ;;  %v9652_v33 = vrot.slane %v9651_v25, 4  ;;  %v9646_v8 = vmax.f32 %v9644_v2, %v9645_v21 }
 0x71f   :  { %v9659_v31 = vrot.slane %v9658_v5, 4  ;;  %v9666_v49 = vrot.slane %v9665_v44, 4  ;;  %v9108_v39 = vcombine.high %v8868_v20, %v8868_v20  ;;  %v9579_v52 = vrot.slane %v18537_v38, 1 }
 0x720   :  { %v18549_v30 = vmax.f32 %v9583_v13, %v9584_v62  ;;  %v9653_v11 = vmax.f32 %v9651_v25, %v9652_v33  ;;  %v9115_v15 = vrot.slane %v8868_v20, %v14922_v36  ;;  %v9647_v45 = vrot.slane %v9646_v8, 2 }
 0x721   :  { %v9660_v19 = vmax.f32 %v9658_v5, %v9659_v31  ;;  %v9667_v58 = vmax.f32 %v9665_v44, %v9666_v49  ;;  %v9122_v37 = vrot.slane %v9108_v39, %v14922_v36  ;;  %v9765_v56 = vsel %vm8380_vm10, %v9643_v10, -inf }
 0x722   :  { %v9654_v3 = vrot.slane %v9653_v11, 2  ;;  %v9123_v4 = vcombine.high %v9115_v15, %v9115_v15  ;;  %v9588_v34 = vsel %vm9223_vm2, %v9115_v15, -inf  ;;  %v9648_v47 = vmax.f32 %v9646_v8, %v9647_v45 }
 0x723   :  { %v9661_v22 = vrot.slane %v9660_v19, 2  ;;  %v9668_v51 = vrot.slane %v9667_v58, 2  ;;  %v9124_v7 = vcombine.high %v9122_v37, %v9122_v37  ;;  %v9589_v0 = vrot.slane %v9588_v34, 4 }
 0x724   :  { %v9655_v61 = vmax.f32 %v9653_v11, %v9654_v3  ;;  %v9595_v29 = vsel %vm9223_vm2, %v9123_v4, -inf  ;;  %v9602_v46 = vsel %vm9223_vm2, %v9122_v37, -inf  ;;  %v9649_v16 = vrot.slane %v9648_v47, 1 }
 0x725   :  { %v9662_v12 = vmax.f32 %v9660_v19, %v9661_v22  ;;  %v9669_v60 = vmax.f32 %v9667_v58, %v9668_v51  ;;  %v9596_v14 = vrot.slane %v9595_v29, 4  ;;  %v9590_v6 = vmax.f32 %v9588_v34, %v9589_v0 }
 0x726   :  { %v9656_v48 = vrot.slane %v9655_v61, 1  ;;  %v9603_v35 = vrot.slane %v9602_v46, 4  ;;  %v9609_v63 = vsel %vm9223_vm2, %v9124_v7, -inf  ;;  %v9650_v42 = vmax.f32 %v9648_v47, %v9649_v16 }
 0x727   :  { %v9663_v24 = vrot.slane %v9662_v12, 1  ;;  %v9670_v32 = vrot.slane %v9669_v60, 1  ;;  %v9597_v9 = vmax.f32 %v9595_v29, %v9596_v14  ;;  %v9591_v28 = vrot.slane %v9590_v6, 2 }
 0x728   :  { %v9657_v40 = vmax.f32 %v9655_v61, %v9656_v48  ;;  %v9604_v59 = vmax.f32 %v9602_v46, %v9603_v35  ;;  %v9610_v50 = vrot.slane %v9609_v63, 4  ;;  %v9757_v26 = vsel %vm8380_vm10, %v9650_v42, -inf }
 0x729   :  { %v9664_v57 = vmax.f32 %v9662_v12, %v9663_v24  ;;  %v9671_v13 = vmax.f32 %v9669_v60, %v9670_v32  ;;  %v9598_v53 = vrot.slane %v9597_v9, 2  ;;  %v9758_v43 = vmax.f32 %v18531_v41, %v9757_v26  ;;  %v18585_v51 = vpop.permute.xlu0 %9936 }
 0x72a   :  { %v9760_v20 = vsel %vm8380_vm10, %v9657_v40, -inf  ;;  %v9592_v23 = vmax.f32 %v9590_v6, %v9591_v28  ;;  %v9605_v18 = vrot.slane %v9604_v59, 2  ;;  %v9573_v8 = vmax.f32 %v18527_v55, %v9572_v1  ;;  %v18574_v55 = vld [vmem:[%s18845_s5 + $0x100] sm:$0xff]  }
 0x72b   :  { %v9761_v2 = vmax.f32 %v18535_v54, %v9760_v20  ;;  %v9763_v10 = vsel %vm8380_vm10, %v9664_v57, -inf  ;;  %v9766_v62 = vsel %vm8380_vm10, %v9671_v13, -inf  ;;  %v9599_v21 = vmax.f32 %v9597_v9, %v9598_v53  ;;  %11689 = vmatprep.subr.bf16.mxu1 %v18574_v55 }
 0x72c   :  { %v9764_v25 = vmax.f32 %v18543_v17, %v9763_v10  ;;  %v9767_v5 = vmax.f32 %v9765_v56, %v9766_v62  ;;  %v9593_v44 = vrot.slane %v9592_v23, 1  ;;  %v9606_v33 = vmax.f32 %v9604_v59, %v9605_v18  ;;  %v18594_v6 = vpop.permute.xlu1 %10038  ;;  %v9899_v59 = vld [vmem:[#allocation4 + $0x3a] sm:$0xf]  ;;  %v9872_v62 = vld [vmem:[#allocation4 + $0xa] sm:$0xf] }
 0x72d   :  { %v9834_v41 = vsel %vm7683_vm12, %v9761_v2, %v9758_v43  ;;  %v9600_v31 = vrot.slane %v9599_v21, 1  ;;  %v9611_v49 = vmax.f32 %v9609_v63, %v9610_v50  ;;  %v9580_v39 = vmax.f32 %v18537_v38, %v9579_v52  ;;  %v9900_v63 = vld [vmem:[#allocation4 + $0x42] sm:$0xf] }
 0x72e   :  { %v9835_v54 = vsel %vm7685_vm13, %v9764_v25, %v9834_v41  ;;  %v9594_v11 = vmax.f32 %v9592_v23, %v9593_v44  ;;  %v9607_v15 = vrot.slane %v9606_v33, 1  ;;  %v9586_v45 = vrot.slane %v18549_v30, 1  ;;  %v9871_v23 = vld [vmem:[#allocation4 + $0x2] sm:$0xf] }
 0x72f   :  { %v9836_v19 = vsel %vm19009_vm0, %v9767_v5, %v9835_v54  ;;  %v9601_v17 = vmax.f32 %v9599_v21, %v9600_v31  ;;  %v9612_v58 = vrot.slane %v9611_v49, 2  ;;  %v9744_v1 = vsel %vm8380_vm10, %v18545_v27, -inf  ;;  %v9874_v21 = vld [vmem:[#allocation4 + $0x1a] sm:$0xf]  ;;  %v9873_v5 = vld [vmem:[#allocation4 + $0x12] sm:$0xf] }
 0x730   :  { %9854 = vst.msk [vmem:[#allocation4 + $0x51] sm:$0xf] %vm9846_vm4, %v9836_v19  ;;  %v9608_v38 = vmax.f32 %v9606_v33, %v9607_v15  ;;  %v9745_v52 = vsel %vm8380_vm10, %v9594_v11, -inf  ;;  %v9747_v37 = vsel %vm8380_vm10, %v9573_v8, -inf  ;;  %v9750_v34 = vsel %vm8380_vm10, %v9580_v39, -inf  ;;  %v18601_v42 = vpop.permute.xlu1 %10046 }
 0x731   :  { %v9613_v56 = vmax.f32 %v9611_v49, %v9612_v58  ;;  %v9746_v3 = vmax.f32 %v9744_v1, %v9745_v52  ;;  %v9748_v4 = vsel %vm8380_vm10, %v9601_v17, -inf  ;;  %v9587_v27 = vmax.f32 %v18549_v30, %v9586_v45  ;;  %v18596_v30 = vpop.permute.xlu0 %9944  ;;  %v9855_v31 = vld [vmem:[#allocation4] sm:$0xf]  ;;  %v9856_v39 = vld [vmem:[#allocation4 + $0x8] sm:$0xf] }
 0x732   :  { %v9749_v47 = vmax.f32 %v9747_v37, %v9748_v4  ;;  %v9751_v22 = vsel %vm8380_vm10, %v9608_v38, -inf  ;;  %v9857_v15 = vld [vmem:[#allocation4 + $0x10] sm:$0xf]  ;;  %v9858_v45 = vld [vmem:[#allocation4 + $0x18] sm:$0xf]  ;;  %v10056_v38 = vsel %vm8380_vm10, %v9855_v31, %v18585_v51 }
 0x733   :  { %v9614_v7 = vrot.slane %v9613_v56, 1  ;;  %v9752_v61 = vmax.f32 %v9750_v34, %v9751_v22  ;;  %v9753_v16 = vsel %vm8380_vm10, %v9587_v27, -inf  ;;  %v9889_v17 = vld [vmem:[#allocation4 + $0x19] sm:$0xf]  ;;  %v9887_v37 = vld [vmem:[#allocation4 + $0x9] sm:$0xf] }
 0x734   :  { %v9831_v0 = vsel %vm7683_vm12, %v9749_v47, %v9746_v3  ;;  %v9971_v40 = vpop.permute.xlu1 %9970  ;;  %v9907_v34 = vld [vmem:[#allocation4 + $0x28] sm:$0xf]  ;;  %v9906_v27 = vld [vmem:[#allocation4 + $0x20] sm:$0xf] }
 0x735   :  { %v9615_v29 = vmax.f32 %v9613_v56, %v9614_v7  ;;  %v9832_v46 = vsel %vm7685_vm13, %v9752_v61, %v9831_v0  ;;  %v9941_v24 = vpop.permute.xlu0 %9940  ;;  %v10065_v33 = vsel %vm8380_vm10, %v9872_v62, %v9971_v40  ;;  %v9890_v56 = vld [vmem:[#allocation4 + $0x21] sm:$0xf]  ;;  %v9888_v0 = vld [vmem:[#allocation4 + $0x11] sm:$0xf]  ;;  %vm19020_vm13 = vcmask 1041408  }
 0x736   :  { %v10058_v52 = vsel %vm8380_vm10, %v9857_v15, %v9941_v24  ;;  %v9861_v62 = vld [vmem:[#allocation4 + $0x40] sm:$0xf] }
 0x737   :  { %v9754_v12 = vsel %vm8380_vm10, %v9615_v29, -inf  ;;  %v9886_v60 = vld [vmem:[#allocation4 + $0x50] sm:$0xf] }
 0x738   :  { %v9918_v14 = vld [vmem:[#allocation4 + $0x51] sm:$0xf]  ;;  %v9755_v48 = vmax.f32 %v9753_v16, %v9754_v12  ;;  %9982 = vrot.lane.b32.xlu1 %v9886_v60, %s13381_s24  ;;  %v10003_v26 = vpop.permute.xlu1 %10002  ;;  %v9905_v60 = vld [vmem:[#allocation4 + $0x18] sm:$0xf] }
 0x739   :  { %10044 = vrot.lane.b32.xlu0 %v9918_v14, %s13381_s24  ;;  %v10033_v28 = vpop.permute.xlu0 %10032  ;;  %v9902_v13 = vld [vmem:[#allocation4 + $0x52] sm:$0xf] }
 0x73a   :  { %v9833_v35 = vsel %vm19019_vm11, %v9755_v48, %v9832_v46  ;;  %v10073_v46 = vsel %vm8380_vm10, %v9888_v0, %v10003_v26  ;;  %v9904_v16 = vld [vmem:[#allocation4 + $0x10] sm:$0xf]  ;;  %v13289_v48 = vld [vmem:[%s18845_s5 + $0x108] sm:$0xff]  }
 0x73b   :  { %9853 = vst.msk [vmem:[#allocation4 + $0x49] sm:$0xf] %vm9846_vm4, %v9833_v35  ;;  %v10083_v35 = vsel %vm8380_vm10, %v9907_v34, %v18594_v6  ;;  %v13293_v6 = vld [vmem:[%s18845_s5 + $0x118] sm:$0xff]  }
 0x73c   :  { %10010 = vrot.lane.b32.xlu1 %v9900_v63, %s13381_s24  ;;  %v9939_v43 = vpop.permute.xlu1 %9938  ;;  %v10080_v63 = vsel %vm8380_vm10, %v9904_v16, %v10033_v28 }
 0x73d   :  { %v9969_v53 = vpop.permute.xlu0 %9968  ;;  %v10057_v11 = vsel %vm8380_vm10, %v9856_v39, %v9939_v43 }
 0x73e   :  { %v10064_v10 = vsel %vm8380_vm10, %v9871_v23, %v9969_v53  ;;  %v11296_v47 = vcombine.low %v10056_v38, %v10057_v11 }
 0x73f   :  { %v11297_v49 = vcombine.low %v10064_v10, %v10065_v33  ;;  %v9860_v10 = vld [vmem:[#allocation4 + $0x38] sm:$0xf] }
 0x741   :  { %v10001_v20 = vpop.permute.xlu0 %10000 }
 0x742   :  { %v9885_v32 = vld [vmem:[#allocation4 + $0x48] sm:$0xf]  ;;  %v10072_v22 = vsel %vm8380_vm10, %v9887_v37, %v10001_v20 }
 0x743   :  { %v9870_v9 = vld [vmem:[#allocation4 + $0x49] sm:$0xf]  ;;  %9980 = vrot.lane.b32.xlu0 %v9885_v32, %s13381_s24  ;;  %v11298_v24 = vcombine.low %v10072_v22, %v10073_v46 }
 0x744   :  { %9950 = vrot.lane.b32.xlu1 %v9870_v9, %s13381_s24  ;;  %v9917_v50 = vld [vmem:[#allocation4 + $0x49] sm:$0xf] }
 0x745   :  { %v9901_v57 = vld [vmem:[#allocation4 + $0x4a] sm:$0xf] }
 0x746   :  { %v13292_v37 = vld [vmem:[#allocation4 + $0x22] ss:$8 sps:$4 sm:$0xff]  }
 0x747   :  { %10008 = vrot.lane.b32.xlu0 %v9899_v59, %s13381_s24  ;;  %v9909_v34 = vld [vmem:[#allocation4 + $0x48] sm:$0xf] }
 0x748   :  { %10042 = vrot.lane.b32.xlu1 %v9917_v50, %s13381_s24 }
 0x74b   :  { %10012 = vrot.lane.b32.xlu0 %v9901_v57, %s13381_s24  ;;  %v13290_v57 = vld [vmem:[%s18845_s5 + $0x110] sm:$0xff]  }
 0x74c   :  { %10014 = vrot.lane.b32.xlu1 %v9902_v13, %s13381_s24 }
 0x758   :  { %v9975_v18 = vpop.permute.xlu1 %9974 }
 0x759   :  { %v10037_v2 = vpop.permute.xlu0 %10036  ;;  %v10067_v8 = vsel %vm8380_vm10, %v9874_v21, %v9975_v18  ;;  %v9875_v18 = vld [vmem:[#allocation4 + $0x32] sm:$0xf]  ;;  %v9876_v21 = vld [vmem:[#allocation4 + $0x3a] sm:$0xf] }
 0x75a   :  { %v10082_v51 = vsel %vm8380_vm10, %v9906_v27, %v10037_v2  ;;  %v9859_v2 = vld [vmem:[#allocation4 + $0x30] sm:$0xf] }
 0x75b   :  { %v11303_v9 = vcombine.low %v10082_v51, %v10083_v35  ;;  %v9894_v35 = vld [vmem:[#allocation4 + $0x51] sm:$0xf] }
 0x75c   :  { %v10007_v25 = vpop.permute.xlu1 %10006 }
 0x75d   :  { %v9973_v44 = vpop.permute.xlu0 %9972  ;;  %v10075_v7 = vsel %vm8380_vm10, %v9890_v56, %v10007_v25 }
 0x75e   :  { %v10066_v41 = vsel %vm8380_vm10, %v9873_v5, %v9973_v44  ;;  %v10060_v44 = vsel %vm8380_vm10, %v9859_v2, %v18596_v30 }
 0x75f   :  { %v11301_v54 = vcombine.low %v10066_v41, %v10067_v8  ;;  %v9878_v8 = vld [vmem:[#allocation4 + $0x4a] sm:$0xf]  ;;  %v9877_v41 = vld [vmem:[#allocation4 + $0x42] sm:$0xf] }
 0x760   :  { %v9943_v19 = vpop.permute.xlu1 %9942 }
 0x761   :  { %v10005_v58 = vpop.permute.xlu0 %10004  ;;  %v10185_v1 = vpack.c.bf16 %v11301_v54, %v11297_v49  ;;  %v10059_v3 = vsel %vm8380_vm10, %v9858_v45, %v9943_v19  ;;  %v9862_v49 = vld [vmem:[#allocation4 + $0x48] sm:$0xf]  ;;  %v9911_v54 = vld [vmem:[#allocation4 + $0x58] sm:$0xf] }
 0x762   :  { %v10074_v4 = vsel %vm8380_vm10, %v9889_v17, %v10005_v58  ;;  %v11300_v61 = vcombine.low %v10058_v52, %v10059_v3  ;;  %v13291_v52 = vld [vmem:[#allocation4 + $0x12] ss:$8 sps:$4 sm:$0xff]   ;;  %v9908_v3 = vld [vmem:[#allocation4 + $0x40] sm:$0xf] }
 0x763   :  { %10527 = vmatprep.mubr.bf16.mxu1 %v10185_v1  ;;  %v11302_v29 = vcombine.low %v10074_v4, %v10075_v7  ;;  %v9910_v1 = vld [vmem:[#allocation4 + $0x50] sm:$0xf]  ;;  %v10087_v7 = vsel %vm8380_vm10, %v9911_v54, %v18601_v42  ;;  %v10188_v16 = vpack.c.bf16 %v13292_v37, %v13291_v52  ;;  %v13300_v54 = vld [vmem:[%s18847_s7 + $0x48] sm:$0xff]   ;;  %v13309_v52 = vld [vmem:[%s18847_s7 + $0x18] sm:$0xff]  }
 0x764   :  { %v10184_v12 = vpack.c.bf16 %v11300_v61, %v11296_v47  ;;  %v10035_v14 = vpop.permute.xlu1 %10034  ;;  %v13311_v37 = vld [vmem:[%s18847_s7 + $0x98] sm:$0xff]  }
 0x765   :  { %v10081_v32 = vsel %vm8380_vm10, %v9905_v60, %v10035_v14  ;;  %v10186_v59 = vpack.c.bf16 %v11302_v29, %v11298_v24  ;;  %v9891_v29 = vld [vmem:[#allocation4 + $0x39] sm:$0xf]  ;;  %v9892_v60 = vld [vmem:[#allocation4 + $0x41] sm:$0xf]  ;;  %v9893_v14 = vld [vmem:[#allocation4 + $0x49] sm:$0xf] }
 0x766   :  { %v11299_v40 = vcombine.low %v10080_v63, %v10081_v32  ;;  %10528 = vmatmul.mubr.bf16.vlgmr.msra.gmra.mrb[48].mxu1 %v10184_v12 }
 0x767   :  { %11690 = vmatpush3.bf16.msra.mxu1 %v18574_v55 }
 0x768   :  { %v10187_v50 = vpack.c.bf16 %v11303_v9, %v11299_v40  ;;  %11691 = vmatprep.subr.bf16.mxu1 %v13289_v48  ;;  %v13294_v40 = vld [vmem:[#allocation4 + $0x42] ss:$8 sps:$4 sm:$0xff]  }
 0x76a   :  { %10576 = vmatprep.mubr.bf16.mxu0 %v10187_v50 }
 0x76b   :  { %10577 = vmatmul.mubr.bf16.vlgmr.msra.gmra.mrb[64].mxu0 %v10186_v59  ;;  %11692 = vmatpush3.bf16.msra.mxu1 %v13289_v48  ;;  %v13295_v59 = vld [vmem:[#allocation4 + $0x52] ss:$8 sps:$4 sm:$0xff]  }
 0x76c   :  { %11693 = vmatprep.subr.bf16.mxu1 %v13290_v57 }
 0x76f   :  { %11694 = vmatpush3.bf16.msra.mxu1 %v13290_v57 }
 0x770   :  { %11695 = vmatprep.subr.bf16.mxu1 %v13293_v6 }
 0x773   :  { %11696 = vmatpush3.bf16.msra.mxu1 %v13293_v6 }
 0x780   :  { %v9949_v28 = vpop.permute.xlu0 %9948 }
 0x781   :  { %v9979_v13 = vpop.permute.xlu1 %9978  ;;  %v10062_v33 = vsel %vm8380_vm10, %v9861_v62, %v9949_v28  ;;  %v10193_v28 = vpack.c.bf16 %v13295_v59, %v13294_v40 }
 0x782   :  { %v10069_v11 = vsel %vm8380_vm10, %v9876_v21, %v9979_v13 }
 0x784   :  { %v10041_v55 = vpop.permute.xlu0 %10040 }
 0x785   :  { %v10084_v61 = vsel %vm8380_vm10, %v9908_v3, %v10041_v55  ;;  %v13314_v3 = vld [vmem:[%s18847_s7 + $0xe0] sm:$0xff]  }
 0x788   :  { %v9947_v26 = vpop.permute.xlu1 %9946 }
 0x789   :  { %v9977_v53 = vpop.permute.xlu0 %9976  ;;  %v10061_v25 = vsel %vm8380_vm10, %v9860_v10, %v9947_v26 }
 0x78a   :  { %v10068_v5 = vsel %vm8380_vm10, %v9875_v18, %v9977_v53  ;;  %v11304_v17 = vcombine.low %v10060_v44, %v10061_v25  ;;  %v13296_v25 = vld [vmem:[%s18847_s7 + $0x40] sm:$0xff]  }
 0x78b   :  { %v11305_v58 = vcombine.low %v10068_v5, %v10069_v11  ;;  %11555 = vmatprep.subr.bf16.mxu0 %v13296_v25  ;;  %v13302_v11 = vld [vmem:[%s18847_s7 + $0xc8] sm:$0xff]  }
 0x7aa   :  { %v9983_v43 = vpop.permute.xlu1 %9982 }
 0x7ab   :  { %v10045_v20 = vpop.permute.xlu0 %10044  ;;  %v10071_v15 = vsel %vm8380_vm10, %v9878_v8, %v9983_v43 }
 0x7ac   :  { %v10086_v56 = vsel %vm8380_vm10, %v9910_v1, %v10045_v20  ;;  %v18660_v20 = vld [vmem:[%s18846_s6] ss:$0 sm:$0xff]  ;;  %v13307_v1 = vld [vmem:[%s18847_s7 + $0x90] sm:$0xff]  }
 0x7ad   :  { %v11311_v51 = vcombine.low %v10086_v56, %v10087_v7  ;;  %v13312_v56 = vld [vmem:[%s18847_s7 + $0x60] sm:$0xff]   ;;  %v13319_v7 = vld [vmem:[%s18847_s7 + $0xa8] sm:$0xff]  }
 0x7ae   :  { %v10011_v23 = vpop.permute.xlu1 %10010 }
 0x7af   :  { %v10077_v24 = vsel %vm8380_vm10, %v9892_v60, %v10011_v23  ;;  %v13327_v60 = vld [vmem:[%s18847_s7 + $0xb8] sm:$0xff]  }
 0x7b5   :  { %v9981_v31 = vpop.permute.xlu0 %9980 }
 0x7b6   :  { %v9951_v39 = vpop.permute.xlu1 %9950  ;;  %v10070_v45 = vsel %vm8380_vm10, %v9877_v41, %v9981_v31  ;;  %v13297_v41 = vld [vmem:[%s18847_s7] sm:$0xff]  }
 0x7b7   :  { %v10063_v19 = vsel %vm8380_vm10, %v9862_v49, %v9951_v39  ;;  %v11309_v30 = vcombine.low %v10070_v45, %v10071_v15  ;;  %v13298_v31 = vld [vmem:[%s18847_s7 + $0xc0] sm:$0xff]   ;;  %11556 = vmatpush3.bf16.msra.mxu0 %v13297_v41  ;;  %v13301_v15 = vld [vmem:[%s18847_s7 + $0x8] sm:$0xff]  }
 0x7b8   :  { %v11308_v38 = vcombine.low %v10062_v33, %v10063_v19  ;;  %v13299_v49 = vld [vmem:[%s18847_s7 + $0x80] sm:$0xff]   ;;  %11577 = vmatprep.subr.bf16.mxu1 %v13298_v31  ;;  %11557 = vmatprep.subr.bf16.mxu0 %v13300_v54  ;;  %v13303_v45 = vld [vmem:[%s18847_s7 + $0x88] sm:$0xff]   ;;  %v13304_v19 = vld [vmem:[%s18847_s7 + $0x50] sm:$0xff]  }
 0x7b9   :  { %v10009_v4 = vpop.permute.xlu0 %10008  ;;  %v10190_v22 = vpack.c.bf16 %v11309_v30, %v11305_v58  ;;  %v13305_v58 = vld [vmem:[%s18847_s7 + $0x10] sm:$0xff]   ;;  %v13308_v30 = vld [vmem:[%s18847_s7 + $0x58] sm:$0xff]  }
 0x7ba   :  { %v10043_v47 = vpop.permute.xlu1 %10042  ;;  %v10189_v27 = vpack.c.bf16 %v11308_v38, %v11304_v17  ;;  %v10076_v12 = vsel %vm8380_vm10, %v9891_v29, %v10009_v4  ;;  %v13306_v17 = vld [vmem:[%s18847_s7 + $0xd0] sm:$0xff]   ;;  %v13310_v38 = vld [vmem:[%s18847_s7 + $0xd8] sm:$0xff]   ;;  %v13313_v4 = vld [vmem:[%s18847_s7 + $0x20] sm:$0xff]  }
 0x7bb   :  { %v10085_v0 = vsel %vm8380_vm10, %v9909_v34, %v10043_v47  ;;  %10535 = vmatprep.mubr.bf16.mxu1 %v10190_v22  ;;  %v11306_v50 = vcombine.low %v10076_v12, %v10077_v24  ;;  %11558 = vmatpush3.bf16.msra.mxu0 %v13301_v15  ;;  %v13315_v34 = vld [vmem:[%s18847_s7 + $0xa0] sm:$0xff]   ;;  %v13316_v47 = vld [vmem:[%s18847_s7 + $0x68] sm:$0xff]   ;;  %v13323_v29 = vld [vmem:[%s18847_s7 + $0xb0] sm:$0xff]  }
 0x7bc   :  { %v11307_v46 = vcombine.low %v10084_v61, %v10085_v0  ;;  %10536 = vmatmul.mubr.bf16.gmra.mrb[52].mxu1 %v10189_v27  ;;  %11559 = vmatprep.subr.bf16.mxu0 %v13304_v19  ;;  %v13318_v22 = vld [vmem:[%s18847_s7 + $0xe8] sm:$0xff]   ;;  %v13320_v61 = vld [vmem:[%s18847_s7 + $0x70] sm:$0xff]   ;;  %v13325_v12 = vld [vmem:[%s18847_s7 + $0x38] sm:$0xff]  }
 0x7bd   :  { %v10013_v48 = vpop.permute.xlu0 %10012  ;;  %11697 = vmatprep.mubr.msk.bf16.mxu1 %vm8380_vm10, %v10188_v16  ;;  %v13317_v27 = vld [vmem:[%s18847_s7 + $0x28] sm:$0xff]   ;;  %v13322_v0 = vld [vmem:[%s18847_s7 + $0xf0] sm:$0xff]   ;;  %v13326_v16 = vld [vmem:[%s18847_s7 + $0xf8] sm:$0xff]  }
 0x7be   :  { %v10015_v63 = vpop.permute.xlu1 %10014  ;;  %v10192_v42 = vpack.c.bf16 %v11311_v51, %v11307_v46  ;;  %v10078_v32 = vsel %vm8380_vm10, %v9893_v14, %v10013_v48  ;;  %v13321_v51 = vld [vmem:[%s18847_s7 + $0x30] sm:$0xff]   ;;  %v13324_v46 = vld [vmem:[%s18847_s7 + $0x78] sm:$0xff]  }
 0x7bf   :  { %v10079_v9 = vsel %vm8380_vm10, %v9894_v35, %v10015_v63  ;;  %11560 = vmatpush3.bf16.msra.mxu0 %v13305_v58 }
 0x7c0   :  { %v11310_v57 = vcombine.low %v10078_v32, %v10079_v9  ;;  %10584 = vmatprep.mubr.bf16.mxu0 %v10192_v42  ;;  %11561 = vmatprep.subr.bf16.mxu0 %v13308_v30 }
 0x7c2   :  { %v10191_v6 = vpack.c.bf16 %v11310_v57, %v11306_v50 }
 0x7c3   :  { %11562 = vmatpush3.bf16.msra.mxu0 %v13309_v52 }
 0x7c4   :  { %10585 = vmatmul.mubr.bf16.gmra.mrb[68].mxu0 %v10191_v6  ;;  %11698 = vmatmul.mubr.msk.bf16.vlgmr.msra.gmra.mrb[56].mxu1 %vm8380_vm10, %v10193_v28  ;;  %vm19021_vm10 = vmmov %vm19020_vm13 }
 0x7c5   :  { %11578 = vmatpush3.bf16.msra.mxu1 %v13299_v49  ;;  %11563 = vmatprep.subr.bf16.mxu0 %v13312_v56  ;;  %vm19022_vm14 = vmmov %vm19021_vm10 }
 0x7c6   :  { %11579 = vmatprep.subr.bf16.mxu1 %v13302_v11  ;;  %vm19023_vm1 = vmmov %vm19021_vm10 }
 0x7c7   :  { %11564 = vmatpush3.bf16.msra.mxu0 %v13313_v4  ;;  %vm19024_vm15 = vmmov %vm19023_vm1 }
 0x7c8   :  { %11565 = vmatprep.subr.bf16.mxu0 %v13316_v47  ;;  %vm19025_vm2 = vmmov %vm19023_vm1 }
 0x7c9   :  { %11580 = vmatpush3.bf16.msra.mxu1 %v13303_v45  ;;  %vm19026_vm4 = vmmov %vm19023_vm1 }
 0x7ca   :  { %11581 = vmatprep.subr.bf16.mxu1 %v13306_v17  ;;  %vm19027_vm5 = vmmov %vm19023_vm1 }
 0x7cb   :  { %11566 = vmatpush3.bf16.msra.mxu0 %v13317_v27  ;;  %vm19028_vm8 = vmmov %vm19023_vm1 }
 0x7cc   :  { %11567 = vmatprep.subr.bf16.mxu0 %v13320_v61  ;;  %vm19029_vm9 = vmmov %vm19023_vm1 }
 0x7cd   :  { %11582 = vmatpush3.bf16.msra.mxu1 %v13307_v1  ;;  %vm19030_vm6 = vmmov %vm19023_vm1 }
 0x7ce   :  { %11583 = vmatprep.subr.bf16.mxu1 %v13310_v38  ;;  %vm19031_vm7 = vmmov %vm19023_vm1 }
 0x7cf   :  { %11568 = vmatpush3.bf16.msra.mxu0 %v13321_v51  ;;  %vm19032_vm3 = vmmov %vm19023_vm1 }
 0x7d0   :  { %11569 = vmatprep.subr.bf16.mxu0 %v13324_v46  ;;  %vm19033_vm0 = vmmov %vm19023_vm1 }
 0x7d1   :  { %11584 = vmatpush3.bf16.msra.mxu1 %v13311_v37  ;;  %vm19034_vm11 = vmmov %vm19033_vm0 }
 0x7d2   :  { %11585 = vmatprep.subr.bf16.mxu1 %v13314_v3 }
 0x7d3   :  { %11570 = vmatpush3.bf16.msra.mxu0 %v13325_v12 }
 0x7d5   :  { %11586 = vmatpush3.bf16.msra.mxu1 %v13315_v34 }
 0x7d6   :  { %11587 = vmatprep.subr.bf16.mxu1 %v13318_v22 }
 0x7d9   :  { %11588 = vmatpush3.bf16.msra.mxu1 %v13319_v7 }
 0x7da   :  { %11589 = vmatprep.subr.bf16.mxu1 %v13322_v0 }
 0x7dd   :  { %11590 = vmatpush3.bf16.msra.mxu1 %v13323_v29 }
 0x7de   :  { %11591 = vmatprep.subr.bf16.mxu1 %v13326_v16 }
 0x7e1   :  { %11592 = vmatpush3.bf16.msra.mxu1 %v13327_v60 }
 0x839   :  { %v11509_v13 = vpop.f32.mrb[48].mxu1 }
 0x83a   :  { %v11510_v55 = vpop.f32.mrb[49].mxu1 }
 0x83b   :  { %v11511_v26 = vadd.f32 %v11510_v55, %v11509_v13  ;;  %v11512_v53 = vpop.f32.mrb[50].mxu1 }
 0x83c   :  { %v11513_v43 = vpop.f32.mrb[51].mxu1 }
 0x83d   :  { %v11514_v23 = vadd.f32 %v11513_v43, %v11512_v53  ;;  %v10530_v10 = vadd.f32 %v11511_v26, %v18660_v20 }
 0x83e   :  { %v11537_v18 = vpop.f32.mrb[64].mxu0 }
 0x83f   :  { %v11538_v2 = vpop.f32.mrb[65].mxu0  ;;  %v10533_v44 = vadd.f32 %v11514_v23, %v18660_v20 }
 0x840   :  { %v11539_v62 = vadd.f32 %v11538_v2, %v11537_v18  ;;  %v11540_v21 = vpop.f32.mrb[66].mxu0 }
 0x841   :  { %v11541_v5 = vpop.f32.mrb[67].mxu0 }
 0x842   :  { %v11542_v33 = vadd.f32 %v11541_v5, %v11540_v21  ;;  %v18667_v8 = vadd.f32 %v11539_v62, %v10530_v10 }
 0x844   :  { %v18678_v39 = vadd.f32 %v11542_v33, %v10533_v44 }
 0x88f   :  { %v11515_v14 = vpop.f32.mrb[52].mxu1 }
 0x890   :  { %v11516_v48 = vpop.f32.mrb[53].mxu1 }
 0x891   :  { %v11517_v35 = vadd.f32 %v11516_v48, %v11515_v14  ;;  %v11518_v63 = vpop.f32.mrb[54].mxu1 }
 0x892   :  { %v11519_v42 = vpop.f32.mrb[55].mxu1 }
 0x893   :  { %v11520_v24 = vadd.f32 %v11519_v42, %v11518_v63  ;;  %v10538_v59 = vadd.f32 %v11517_v35, %v18660_v20 }
 0x895   :  { %v10541_v26 = vadd.f32 %v11520_v24, %v18660_v20 }
 0x897   :  { %v11543_v32 = vpop.f32.mrb[68].mxu0  ;;  %v11699_v40 = vpop.f32.mrb[56].mxu1 }
 0x898   :  { %v11544_v9 = vpop.f32.mrb[69].mxu0  ;;  %v10627_v6 = vpop.f32.mrb[57].mxu1 }
 0x899   :  { %v11545_v50 = vadd.f32 %v11544_v9, %v11543_v32  ;;  %v11546_v57 = vpop.f32.mrb[70].mxu0  ;;  %v10628_v28 = vadd.f32 %v10627_v6, %v18667_v8  ;;  %v11700_v55 = vpop.f32.mrb[58].mxu1 }
 0x89a   :  { %v11547_v13 = vpop.f32.mrb[71].mxu0  ;;  %v10630_v23 = vpop.f32.mrb[59].mxu1 }
 0x89b   :  { %v10587_v53 = vadd.f32 %v11545_v50, %v10538_v59  ;;  %v11548_v43 = vadd.f32 %v11547_v13, %v11546_v57  ;;  %v10642_v18 = vmax.f32 %v10628_v28, 0.0  ;;  %v10631_v2 = vadd.f32 %v10630_v23, %v18678_v39 }
 0x89d   :  { %v10636_v10 = vadd.f32 %v11699_v40, %v10587_v53  ;;  %v10590_v62 = vadd.f32 %v11548_v43, %v10541_v26  ;;  %v10650_v21 = vcombine.high %v10642_v18, %v10642_v18  ;;  %v10657_v25 = vrot.slane %v10642_v18, %v14922_v36 }
 0x89e   :  { %v18769_v5 = vmax.f32 %v10631_v2, 0.0 }
 0x89f   :  { %v10644_v44 = vmax.f32 %v10636_v10, 0.0  ;;  %v10639_v33 = vadd.f32 %v11700_v55, %v10590_v62  ;;  %v10664_v8 = vrot.slane %v10650_v21, %v14922_v36  ;;  %v10665_v41 = vcombine.high %v10657_v25, %v10657_v25 }
 0x8a0   :  { %v10734_v20 = vsel %vm19020_vm13, %v10657_v25, -inf  ;;  %v10667_v39 = vcombine.high %v18769_v5, %v18769_v5  ;;  %v10674_v6 = vrot.slane %v18769_v5, %v14922_v36  ;;  %vm19035_vm13 = vmmov %vm19033_vm0 }
 0x8a1   :  { %v10684_v31 = vcombine.high %v10644_v44, %v10644_v44  ;;  %v10691_v49 = vrot.slane %v10644_v44, %v14922_v36  ;;  %v10735_v54 = vrot.slane %v10734_v20, 4  ;;  %v10666_v11 = vcombine.high %v10664_v8, %v10664_v8 }
 0x8a2   :  { %v10741_v15 = vsel %vm19021_vm10, %v10665_v41, -inf  ;;  %v10748_v45 = vsel %vm19022_vm14, %v10664_v8, -inf  ;;  %v10645_v19 = vmax.f32 %v10639_v33, 0.0  ;;  %v10681_v5 = vrot.slane %v10667_v39, %v14922_v36 }
 0x8a3   :  { %v10698_v17 = vrot.slane %v10684_v31, %v14922_v36  ;;  %v10699_v58 = vcombine.high %v10691_v49, %v10691_v49  ;;  %v10790_v1 = vsel %vm19023_vm1, %v10691_v49, -inf  ;;  %v10736_v30 = vmax.f32 %v10734_v20, %v10735_v54 }
 0x8a4   :  { %v10791_v38 = vrot.slane %v10790_v1, 4  ;;  %v10742_v52 = vrot.slane %v10741_v15, 4  ;;  %v10749_v37 = vrot.slane %v10748_v45, 4  ;;  %v10755_v56 = vsel %vm19024_vm15, %v10666_v11, -inf }
 0x8a5   :  { %v10700_v3 = vcombine.high %v10698_v17, %v10698_v17  ;;  %v10797_v4 = vsel %vm19025_vm2, %v10699_v58, -inf  ;;  %v10804_v34 = vsel %vm19026_vm4, %v10698_v17, -inf  ;;  %v10737_v47 = vrot.slane %v10736_v30, 2 }
 0x8a6   :  { %v10792_v22 = vmax.f32 %v10790_v1, %v10791_v38  ;;  %v10798_v27 = vrot.slane %v10797_v4, 4  ;;  %v10805_v7 = vrot.slane %v10804_v34, 4  ;;  %v10743_v61 = vmax.f32 %v10741_v15, %v10742_v52 }
 0x8a7   :  { %v10811_v0 = vsel %vm19027_vm5, %v10700_v3, -inf  ;;  %v10738_v51 = vmax.f32 %v10736_v30, %v10737_v47  ;;  %v10750_v29 = vmax.f32 %v10748_v45, %v10749_v37  ;;  %v10756_v46 = vrot.slane %v10755_v56, 4 }
 0x8a8   :  { %v10793_v16 = vrot.slane %v10792_v22, 2  ;;  %v10799_v12 = vmax.f32 %v10797_v4, %v10798_v27  ;;  %v10806_v60 = vmax.f32 %v10804_v34, %v10805_v7  ;;  %v10812_v14 = vrot.slane %v10811_v0, 4 }
 0x8a9   :  { %v10739_v48 = vrot.slane %v10738_v51, 1  ;;  %v10744_v35 = vrot.slane %v10743_v61, 2  ;;  %v10751_v63 = vrot.slane %v10750_v29, 2  ;;  %v10757_v42 = vmax.f32 %v10755_v56, %v10756_v46 }
 0x8aa   :  { %v10794_v24 = vmax.f32 %v10792_v22, %v10793_v16  ;;  %v10800_v32 = vrot.slane %v10799_v12, 2  ;;  %v10807_v9 = vrot.slane %v10806_v60, 2  ;;  %v10813_v40 = vmax.f32 %v10811_v0, %v10812_v14 }
 0x8ab   :  { %v18784_v59 = vmax.f32 %v10743_v61, %v10744_v35  ;;  %v10752_v50 = vmax.f32 %v10750_v29, %v10751_v63  ;;  %v10758_v57 = vrot.slane %v10757_v42, 2  ;;  %v10701_v43 = vcombine.high %v10645_v19, %v10645_v19 }
 0x8ac   :  { %v10795_v28 = vrot.slane %v10794_v24, 1  ;;  %v18788_v13 = vmax.f32 %v10799_v12, %v10800_v32  ;;  %v10808_v55 = vmax.f32 %v10806_v60, %v10807_v9  ;;  %v10814_v26 = vrot.slane %v10813_v40, 2 }
 0x8ad   :  { %v10753_v53 = vrot.slane %v10752_v50, 1  ;;  %v18790_v18 = vmax.f32 %v10738_v51, %v10739_v48  ;;  %v10746_v2 = vrot.slane %v18784_v59, 1  ;;  %v18793_v10 = vmax.f32 %v10757_v42, %v10758_v57 }
 0x8ae   :  { %v10809_v23 = vrot.slane %v10808_v55, 1  ;;  %v18795_v62 = vmax.f32 %v10794_v24, %v10795_v28  ;;  %v10708_v21 = vrot.slane %v10645_v19, %v14922_v36  ;;  %v10715_v25 = vrot.slane %v10701_v43, %v14922_v36 }
 0x8af   :  { %v10802_v44 = vrot.slane %v18788_v13, 1  ;;  %v18801_v33 = vmax.f32 %v10813_v40, %v10814_v26  ;;  %v10682_v8 = vcombine.high %v10674_v6, %v10674_v6  ;;  %v10762_v41 = vsel %vm19028_vm8, %v10674_v6, -inf }
 0x8b0   :  { %v10754_v20 = vmax.f32 %v10752_v50, %v10753_v53  ;;  %v10716_v31 = vcombine.high %v10708_v21, %v10708_v21  ;;  %v10717_v49 = vcombine.high %v10715_v25, %v10715_v25  ;;  %v10818_v54 = vsel %vm19029_vm9, %v10708_v21, -inf }
 0x8b1   :  { %v10810_v11 = vmax.f32 %v10808_v55, %v10809_v23  ;;  %v10819_v15 = vrot.slane %v10818_v54, 4  ;;  %v10832_v45 = vsel %vm19030_vm6, %v10715_v25, -inf  ;;  %v10683_v19 = vcombine.high %v10681_v5, %v10681_v5 }
 0x8b2   :  { %v10825_v17 = vsel %vm19031_vm7, %v10716_v31, -inf  ;;  %v10833_v36 = vrot.slane %v10832_v45, 4  ;;  %v10839_v39 = vsel %vm19032_vm3, %v10717_v49, -inf  ;;  %v10763_v58 = vrot.slane %v10762_v41, 4 }
 0x8b3   :  { %v10820_v1 = vmax.f32 %v10818_v54, %v10819_v15  ;;  %v10826_v30 = vrot.slane %v10825_v17, 4  ;;  %v10840_v38 = vrot.slane %v10839_v39, 4  ;;  %v10769_v52 = vsel %vm19033_vm0, %v10682_v8, -inf }
 0x8b4   :  { %v10834_v37 = vmax.f32 %v10832_v45, %v10833_v36  ;;  %v10764_v56 = vmax.f32 %v10762_v41, %v10763_v58  ;;  %v10770_v3 = vrot.slane %v10769_v52, 4  ;;  %v10776_v4 = vsel %vm19034_vm11, %v10681_v5, -inf }
 0x8b5   :  { %v10821_v34 = vrot.slane %v10820_v1, 2  ;;  %v10827_v47 = vmax.f32 %v10825_v17, %v10826_v30  ;;  %v10841_v22 = vmax.f32 %v10839_v39, %v10840_v38  ;;  %v10777_v27 = vrot.slane %v10776_v4, 4 }
 0x8b6   :  { %v10835_v7 = vrot.slane %v10834_v37, 2  ;;  %v10765_v61 = vrot.slane %v10764_v56, 2  ;;  %v10771_v0 = vmax.f32 %v10769_v52, %v10770_v3  ;;  %v10783_v51 = vsel %vm19035_vm13, %v10683_v19, -inf }
 0x8b7   :  { %v10822_v29 = vmax.f32 %v10820_v1, %v10821_v34  ;;  %v10828_v46 = vrot.slane %v10827_v47, 2  ;;  %v10842_v16 = vrot.slane %v10841_v22, 2  ;;  %v10778_v12 = vmax.f32 %v10776_v4, %v10777_v27  ;;  %v11351_v4 = vld [vmem:[%s18848_s8] ss:$0 sm:$0xff] }
 0x8b8   :  { %v10836_v60 = vmax.f32 %v10834_v37, %v10835_v7  ;;  %v10766_v14 = vmax.f32 %v10764_v56, %v10765_v61  ;;  %v10772_v48 = vrot.slane %v10771_v0, 2  ;;  %v10784_v35 = vrot.slane %v10783_v51, 4 }
 0x8b9   :  { %v10850_v63 = vmax.f32 %v18795_v62, %v10810_v11  ;;  %v10823_v42 = vrot.slane %v10822_v29, 1  ;;  %v10829_v24 = vmax.f32 %v10827_v47, %v10828_v46  ;;  %v10779_v32 = vrot.slane %v10778_v12, 2 }
 0x8ba   :  { %v10837_v9 = vrot.slane %v10836_v60, 1  ;;  %v10767_v40 = vrot.slane %v10766_v14, 1  ;;  %v10773_v50 = vmax.f32 %v10771_v0, %v10772_v48  ;;  %v10785_v57 = vmax.f32 %v10783_v51, %v10784_v35 }
 0x8bb   :  { %v10846_v6 = vmax.f32 %v18790_v18, %v10754_v20  ;;  %v10780_v28 = vmax.f32 %v10778_v12, %v10779_v32  ;;  %v10747_v55 = vmax.f32 %v18784_v59, %v10746_v2  ;;  %v10760_v26 = vrot.slane %v18793_v10, 1 }
 0x8bc   :  { %v10824_v53 = vmax.f32 %v10822_v29, %v10823_v42  ;;  %v10838_v43 = vmax.f32 %v10836_v60, %v10837_v9  ;;  %v10843_v23 = vmax.f32 %v10841_v22, %v10842_v16  ;;  %v10786_v21 = vrot.slane %v10785_v57, 2 }
 0x8bd   :  { %v10830_v25 = vrot.slane %v10829_v24, 1  ;;  %v10781_v62 = vrot.slane %v10780_v28, 1  ;;  %v10761_v5 = vmax.f32 %v18793_v10, %v10760_v26  ;;  %v10816_v8 = vrot.slane %v18801_v33, 1 }
 0x8be   :  { %v10768_v41 = vmax.f32 %v10766_v14, %v10767_v40  ;;  %v10774_v31 = vrot.slane %v10773_v50, 1  ;;  %v10787_v49 = vmax.f32 %v10785_v57, %v10786_v21  ;;  %v10856_v18 = vsel %vm7683_vm12, %v10850_v63, %v10846_v6 }
 0x8bf   :  { %v10852_v20 = vmax.f32 %v10824_v53, %v10838_v43  ;;  %v10782_v54 = vmax.f32 %v10780_v28, %v10781_v62  ;;  %v10803_v59 = vmax.f32 %v18788_v13, %v10802_v44  ;;  %v10817_v2 = vmax.f32 %v18801_v33, %v10816_v8 }
 0x8c0   :  { %v10788_v11 = vrot.slane %v10787_v49, 1  ;;  %v10844_v15 = vrot.slane %v10843_v23, 1  ;;  %v10847_v19 = vmax.f32 %v10747_v55, %v10761_v5  ;;  %v10775_v17 = vmax.f32 %v10773_v50, %v10774_v31 }
 0x8c1   :  { %v10848_v45 = vmax.f32 %v10768_v41, %v10782_v54  ;;  %v10851_v10 = vmax.f32 %v10803_v59, %v10817_v2  ;;  %v10831_v39 = vmax.f32 %v10829_v24, %v10830_v25  ;;  %v10870_v56 = vpack.c.bf16 %v10856_v18, %v10856_v18 }
 0x8c2   :  { %v10789_v36 = vmax.f32 %v10787_v49, %v10788_v11  ;;  %v10845_v58 = vmax.f32 %v10843_v23, %v10844_v15 }
 0x8c3   :  { %v10860_v1 = vsel %vm7683_vm12, %v10851_v10, %v10847_v19  ;;  %v10864_v30 = vsel %vm7683_vm12, %v10852_v20, %v10848_v45 }
 0x8c4   :  { %v10871_v38 = vpack.c.bf16 %v10860_v1, %v10860_v1  ;;  %v10849_v52 = vmax.f32 %v10775_v17, %v10789_v36  ;;  %v10853_v37 = vmax.f32 %v10831_v39, %v10845_v58  ;;  %v10872_v33 = vpack.c.bf16 %v10864_v30, %v10864_v30 }
 0x8c6   :  { %11169 = vmatprep.mubr.bf16.mxu0 %v10871_v38  ;;  %v10868_v13 = vsel %vm7683_vm12, %v10853_v37, %v10849_v52  ;;  %vm11217_vm12 = vcmask 74752  }
 0x8c7   :  { %11170 = vmatmul.mubr.bf16.vlgmr.msra.gmra.mrb[72].mxu0 %v10870_v56  ;;  %v10873_v44 = vpack.c.bf16 %v10868_v13, %v10868_v13 }
 0x8c9   :  { %11209 = vmatprep.mubr.bf16.mxu1 %v10873_v44 }
 0x8ca   :  { %11210 = vmatmul.mubr.bf16.vlgmr.msra.gmra.mrb[60].mxu1 %v10872_v33 }
 0x99a   :  { %v11571_v3 = vpop.f32.mrb[72].mxu0 }
 0x99b   :  { %v11572_v34 = vpop.f32.mrb[73].mxu0 }
 0x99c   :  { %v11573_v47 = vadd.f32 %v11572_v34, %v11571_v3  ;;  %v11574_v22 = vpop.f32.mrb[74].mxu0 }
 0x99d   :  { %v11593_v27 = vpop.f32.mrb[60].mxu1  ;;  %v11575_v7 = vpop.f32.mrb[75].mxu0 }
 0x99e   :  { %v11172_v61 = vadd.f32 %v11573_v47, %v11351_v4  ;;  %v11594_v0 = vpop.f32.mrb[61].mxu1 }
 0x99f   :  { %v11595_v51 = vadd.f32 %v11594_v0, %v11593_v27  ;;  %v11596_v29 = vpop.f32.mrb[62].mxu1 }
 0x9a0   :  { %v11597_v46 = vpop.f32.mrb[63].mxu1 }
 0x9a1   :  { %v11212_v16 = vadd.f32 %v11595_v51, %v11172_v61 }
 0x9a3   :  { %11218 = vst.msk [vmem:[#allocation5] sm:$0x3] %vm11217_vm12, %v11212_v16 }
 0x9a4   :  { %13358 = shalt.err (!%p13355_p4)
}
 0x9a5   :  { %s13359_s30 = scalar_lea.hbm %s18849_s9, 32 }
 0x9a6   :  { %p13360_p5 = scmp.ne.s32.totalorder %s18849_s9, %s13359_s30  ;;  %p13363_p6 = scmp.lt.u32.totalorder %s13359_s30, %s18849_s9 }
 0x9a8   :  { %p13365_p7 = pnand %p13363_p6, %p13360_p5 }
 0x9aa   :  { %13368 = shalt.err (!%p13365_p7)
}
 0x9ab   :  { %11228 = dma.vmem_to_hbm [thread:$0]  %s11226_s20, 32, %s18849_s9, [#allocation6]  }
 0x9ac   :  { %13369 = dma.done.wait [#allocation6], 32  }
 0x9ad   :  { %13370 = vsyncadd [#allocation6], 4294967264 }
 0x9ae   :  { %11232 = vsyncpa [#allocation6], 1 }

</bundles_post_ra>
